<compile_context>
chip_gen: v7x
topology: tpu7x:2x2x1
jax: 0.10.0
libtpu: 0.0.40
codegen_flags: <defaults>
</compile_context>

<pallas_src>
import math
from functools import partial

import jax
import jax.numpy as jnp
from jax.experimental import pallas as pl
from jax.experimental.pallas import tpu as pltpu

# ----------------------------------------------------------------------------
# Scaled-down architecture hyper-parameters (structure preserved).
# TODO(synk): real resnext101_32x16d uses groups=32, width_per_group=16 and stage
#             channels (64, 256, 512, 1024, 2048); scaled down here so the
#             synthetic kernel runs at small shapes.  Block counts per stage are
#             kept at the real [3, 4, 23, 3].
# TODO(synk): 'swsl' pretrained weights cannot be loaded; parameters are
#             deterministic (PRNGKey(0)) and BatchNorm uses synthetic eval-mode
#             running statistics folded into the conv weights.
IN_CH = 3
STEM = 8
GROUPS = 4
WIDTH_MULT = 2            # bottleneck width = planes * WIDTH_MULT
EXPANSION = 4
LAYER_PLANES = [4, 8, 16, 32]
LAYER_BLOCKS = [3, 4, 23, 3]
LAYER_STRIDES = [1, 2, 2, 1]      # PAN: encoder_output_stride=16 -> layer4 dilated
LAYER_DILATIONS = [1, 1, 1, 2]
DEC_CH = 8                # PAN decoder_channels (real default 32)
NUM_CLASSES = 3
BN_EPS = 1e-5
VMEM_LIMIT = 32 << 20     # safe on v5e/v6e/v7x (<= physical on all three)


# ============================================================================
# Tiling helpers
# ============================================================================
def _pick_tile(n, row_bytes, budget=2 << 20, prefer_split=False):
    """Largest multiple-of-8 divisor of n with tile*row_bytes <= budget.

    prefer_split=True additionally caps the tile at n//2 so the 'parallel'
    row axis always has >= 2 tiles (feeds both v7x TensorCores)."""
    if n <= 8:
        return n
    cap = max(8, min(n, budget // max(row_bytes, 1)))
    if prefer_split and n >= 16:
        cap = min(cap, n // 2)
    best = None
    d = 8
    while d <= cap:
        if n % d == 0:
            best = d
        d += 8
    return best if best is not None else n


def _k_tile(k, tm):
    """Tile K only when the bf16 A tile would exceed ~4 MiB (VMEM safety)."""
    if tm * k * 2 > (4 << 20):
        for t in (512, 256, 128):
            if k % t == 0:
                return t
    return k


def _act(y, act):
    if act == "relu":
        return jnp.maximum(y, 0.0)
    if act == "sigmoid":
        # EUP-friendly sigmoid: exp + approximate reciprocal.
        return pl.reciprocal(1.0 + jnp.exp(-y), approx=True)
    return y


# ============================================================================
# Pallas kernels
# ============================================================================
def _mm_act_kernel(a_ref, b_ref, s_ref, y_ref, *, act):
    """One-shot matmul + folded-BN shift + activation (K fits in one block)."""
    y = jnp.dot(a_ref[...], b_ref[...], preferred_element_type=jnp.float32)
    y_ref[...] = _act(y + s_ref[...], act).astype(y_ref.dtype)


def _mm_act_acc_kernel(a_ref, b_ref, s_ref, y_ref, acc_ref, *, act):
    """K-tiled matmul with VMEM f32 accumulator; shift+act in the finalize."""
    k = pl.program_id(1)

    @pl.when(k == 0)
    def _init():
        acc_ref[...] = jnp.zeros_like(acc_ref)

    acc_ref[...] += jnp.dot(a_ref[...], b_ref[...],
                            preferred_element_type=jnp.float32)

    @pl.when(k == pl.num_programs(1) - 1)
    def _finalize():
        y_ref[...] = _act(acc_ref[...] + s_ref[...], act).astype(y_ref.dtype)


def _gmm_act_kernel(a_ref, b_ref, s_ref, y_ref, *, act):
    """Grouped conv matmul: one (group, row-tile) block per grid step."""
    y = jnp.dot(a_ref[0], b_ref[0], preferred_element_type=jnp.float32)
    y_ref[0] = _act(y + s_ref[0], act).astype(y_ref.dtype)


def _mm_groupk_res_kernel(a_ref, b_ref, s_ref, r_ref, y_ref, acc_ref, *, act):
    """1x1 conv reducing over the group-blocked input axis, with fused
    folded-BN shift + residual add + activation in the finalize."""
    g = pl.program_id(1)

    @pl.when(g == 0)
    def _init():
        acc_ref[...] = jnp.zeros_like(acc_ref)

    acc_ref[...] += jnp.dot(a_ref[0], b_ref[0],
                            preferred_element_type=jnp.float32)

    @pl.when(g == pl.num_programs(1) - 1)
    def _finalize():
        y = acc_ref[...] + s_ref[...] + r_ref[...].astype(jnp.float32)
        y_ref[...] = _act(y, act).astype(y_ref.dtype)


def _add_kernel(a_ref, b_ref, o_ref):
    y = a_ref[...].astype(jnp.float32) + b_ref[...].astype(jnp.float32)
    o_ref[...] = y.astype(o_ref.dtype)


def _gate_kernel(a_ref, g_ref, c_ref, o_ref):
    """o = a * g + c with in-kernel broadcasting (decoder attention fuse)."""
    y = (a_ref[0].astype(jnp.float32) * g_ref[0].astype(jnp.float32)
         + c_ref[0].astype(jnp.float32))
    o_ref[0] = y.astype(o_ref.dtype)


def _gap_kernel(x_ref, o_ref, acc_ref, *, inv_count):
    t = pl.program_id(1)

    @pl.when(t == 0)
    def _init():
        acc_ref[...] = jnp.zeros_like(acc_ref)

    acc_ref[...] += jnp.sum(x_ref[0].astype(jnp.float32), axis=0, keepdims=True)

    @pl.when(t == pl.num_programs(1) - 1)
    def _finalize():
        o_ref[0] = (acc_ref[...] * inv_count).astype(o_ref.dtype)


# ============================================================================
# Pallas wrappers
# ============================================================================
@partial(jax.jit, static_argnames=("act", "out_dtype"))
def matmul_fused(a, b, shift, *, act="none", out_dtype=jnp.bfloat16):
    """a:(M,K) -> act(a @ b + shift) with BN scale/shift folded into b/shift."""
    M, K = a.shape
    N = b.shape[1]
    a = a.astype(jnp.bfloat16)
    tm = _pick_tile(M, row_bytes=2 * K + 6 * N, prefer_split=True)
    tk = _k_tile(K, tm)
    mt, kt = M // tm, K // tk
    params = pltpu.CompilerParams(
        dimension_semantics=("parallel",) if kt == 1 else ("parallel", "arbitrary"),
        vmem_limit_bytes=VMEM_LIMIT)
    if kt == 1:
        return pl.pallas_call(
            partial(_mm_act_kernel, act=act),
            out_shape=jax.ShapeDtypeStruct((M, N), out_dtype),
            grid=(mt,),
            in_specs=[pl.BlockSpec((tm, K), lambda m: (m, 0)),
                      pl.BlockSpec((K, N), lambda m: (0, 0)),
                      pl.BlockSpec((1, N), lambda m: (0, 0))],
            out_specs=pl.BlockSpec((tm, N), lambda m: (m, 0)),
            compiler_params=params,
        )(a, b, shift)
    return pl.pallas_call(
        partial(_mm_act_acc_kernel, act=act),
        out_shape=jax.ShapeDtypeStruct((M, N), out_dtype),
        grid=(mt, kt),
        in_specs=[pl.BlockSpec((tm, tk), lambda m, k: (m, k)),
                  pl.BlockSpec((tk, N), lambda m, k: (k, 0)),
                  pl.BlockSpec((1, N), lambda m, k: (0, 0))],
        out_specs=pl.BlockSpec((tm, N), lambda m, k: (m, 0)),
        scratch_shapes=[pltpu.VMEM((tm, N), jnp.float32)],
        compiler_params=params,
    )(a, b, shift)


@partial(jax.jit, static_argnames=("act",))
def grouped_matmul_act(a3, b3, s3, *, act="relu"):
    """Grouped conv as one launch with a real group grid axis.

    a3:(G,M,Kg) group-blocked im2col, b3:(G,Kg,Og), s3:(G,1,Og) -> (G,M,Og)."""
    G, M, Kg = a3.shape
    Og = b3.shape[-1]
    tm = _pick_tile(M, row_bytes=2 * Kg + 2 * Og, prefer_split=True)
    mt = M // tm
    return pl.pallas_call(
        partial(_gmm_act_kernel, act=act),
        out_shape=jax.ShapeDtypeStruct((G, M, Og), jnp.bfloat16),
        grid=(mt, G),
        in_specs=[pl.BlockSpec((1, tm, Kg), lambda m, g: (g, m, 0)),
                  pl.BlockSpec((1, Kg, Og), lambda m, g: (g, 0, 0)),
                  pl.BlockSpec((1, 1, Og), lambda m, g: (g, 0, 0))],
        out_specs=pl.BlockSpec((1, tm, Og), lambda m, g: (g, m, 0)),
        compiler_params=pltpu.CompilerParams(
            dimension_semantics=("parallel", "parallel"),
            vmem_limit_bytes=VMEM_LIMIT),
    )(a3.astype(jnp.bfloat16), b3, s3)


@partial(jax.jit, static_argnames=("act",))
def groupk_matmul_res_act(a3, b3, shift, res, *, act="relu"):
    """1x1 conv over the group-blocked conv2 output + residual + act, fused.

    a3:(G,M,Og_in), b3:(G,Og_in,N), shift:(1,N), res:(M,N) -> (M,N)."""
    G, M, Og = a3.shape
    N = b3.shape[-1]
    tm = _pick_tile(M, row_bytes=2 * G * Og + 8 * N, prefer_split=True)
    mt = M // tm
    return pl.pallas_call(
        partial(_mm_groupk_res_kernel, act=act),
        out_shape=jax.ShapeDtypeStruct((M, N), jnp.bfloat16),
        grid=(mt, G),
        in_specs=[pl.BlockSpec((1, tm, Og), lambda m, g: (g, m, 0)),
                  pl.BlockSpec((1, Og, N), lambda m, g: (g, 0, 0)),
                  pl.BlockSpec((1, N), lambda m, g: (0, 0)),
                  pl.BlockSpec((tm, N), lambda m, g: (m, 0))],
        out_specs=pl.BlockSpec((tm, N), lambda m, g: (m, 0)),
        scratch_shapes=[pltpu.VMEM((tm, N), jnp.float32)],
        compiler_params=pltpu.CompilerParams(
            dimension_semantics=("parallel", "arbitrary"),
            vmem_limit_bytes=VMEM_LIMIT),
    )(a3, b3, shift, res.astype(jnp.bfloat16))


@jax.jit
def add2(a, b):
    """Elementwise a + b, flattened to a lane-dense 2-D slab where possible."""
    shape, total = a.shape, a.size
    if total % 128 == 0:
        a2, b2 = a.reshape(-1, 128), b.reshape(-1, 128)
    else:
        a2, b2 = a.reshape(1, total), b.reshape(1, total)
    M, C = a2.shape
    tm = _pick_tile(M, row_bytes=6 * C)
    row = pl.BlockSpec((tm, C), lambda m: (m, 0))
    y = pl.pallas_call(
        _add_kernel,
        out_shape=jax.ShapeDtypeStruct((M, C), a.dtype),
        grid=(M // tm,),
        in_specs=[row, row],
        out_specs=row,
        compiler_params=pltpu.CompilerParams(dimension_semantics=("parallel",)),
    )(a2, b2)
    return y.reshape(shape)


@jax.jit
def gate_add(a, g, c):
    """out = a * g + c; a:(N,S,C); g,c broadcast along S (dim=1) and/or C."""
    N, S, C = a.shape
    tr = _pick_tile(S, row_bytes=8 * C)
    rt = S // tr

    def spec(arr):
        s_full = arr.shape[1] == S
        c_full = arr.shape[2] == C
        blk = (1, tr if s_full else 1, C if c_full else 1)
        if s_full:
            return pl.BlockSpec(blk, lambda n, r: (n, r, 0))
        return pl.BlockSpec(blk, lambda n, r: (n, 0, 0))

    return pl.pallas_call(
        _gate_kernel,
        out_shape=jax.ShapeDtypeStruct((N, S, C), jnp.bfloat16),
        grid=(N, rt),
        in_specs=[spec(a), spec(g), spec(c)],
        out_specs=pl.BlockSpec((1, tr, C), lambda n, r: (n, r, 0)),
        compiler_params=pltpu.CompilerParams(
            dimension_semantics=("parallel", "parallel")),
    )(a, g, c)


@jax.jit
def global_avg_pool(x):
    """AdaptiveAvgPool2d(1): (N,H,W,C) -> (N,1,1,C), tiled reduction."""
    N, H, W, C = x.shape
    S = H * W
    x3 = x.reshape(N, S, C)
    ts = _pick_tile(S, row_bytes=2 * C)
    st = S // ts
    y = pl.pallas_call(
        partial(_gap_kernel, inv_count=1.0 / S),
        out_shape=jax.ShapeDtypeStruct((N, 1, C), x.dtype),
        grid=(N, st),
        in_specs=[pl.BlockSpec((1, ts, C), lambda n, t: (n, t, 0))],
        out_specs=pl.BlockSpec((1, 1, C), lambda n, t: (n, 0, 0)),
        scratch_shapes=[pltpu.VMEM((1, C), jnp.float32)],
        compiler_params=pltpu.CompilerParams(
            dimension_semantics=("parallel", "arbitrary")),
    )(x3)
    return y.reshape(N, 1, 1, C)


# ============================================================================
# Convolution = im2col (JAX glue, bf16) + single fused Pallas matmul
# ============================================================================
# TODO(synk): the kh*kw im2col taps are still materialized in HBM; folding them
#             into the matmul grid as an extra reduction axis (manual async
#             copies of shifted windows) would cut conv input traffic by the
#             tap factor.
def _im2col(x, kh, kw, stride, padding, dilation):
    N, H, W, C = x.shape
    Ho = (H + 2 * padding - dilation * (kh - 1) - 1) // stride + 1
    Wo = (W + 2 * padding - dilation * (kw - 1) - 1) // stride + 1
    xp = x if padding == 0 else jnp.pad(
        x, ((0, 0), (padding, padding), (padding, padding), (0, 0)))
    taps = []
    for i in range(kh):
        for j in range(kw):
            taps.append(
                xp[:, i * dilation:i * dilation + (Ho - 1) * stride + 1:stride,
                   j * dilation:j * dilation + (Wo - 1) * stride + 1:stride, :])
    A = taps[0] if len(taps) == 1 else jnp.concatenate(taps, axis=-1)
    return A.reshape(N * Ho * Wo, kh * kw * C), Ho, Wo


def _im2col_grouped(x, kh, kw, stride, padding, dilation, groups):
    """Group-blocked im2col: (G, N*Ho*Wo, kh*kw*C/G)."""
    N, H, W, C = x.shape
    Cg = C // groups
    Ho = (H + 2 * padding - dilation * (kh - 1) - 1) // stride + 1
    Wo = (W + 2 * padding - dilation * (kw - 1) - 1) // stride + 1
    xp = x if padding == 0 else jnp.pad(
        x, ((0, 0), (padding, padding), (padding, padding), (0, 0)))
    per_group = []
    for g in range(groups):
        taps = []
        for i in range(kh):
            for j in range(kw):
                taps.append(
                    xp[:, i * dilation:i * dilation + (Ho - 1) * stride + 1:stride,
                       j * dilation:j * dilation + (Wo - 1) * stride + 1:stride,
                       g * Cg:(g + 1) * Cg])
        per_group.append(
            jnp.concatenate(taps, axis=-1).reshape(N * Ho * Wo, kh * kw * Cg))
    return jnp.stack(per_group, axis=0), Ho, Wo


def conv_apply(x, prep, *, stride=1, padding=0, dilation=1, act="relu",
               out_dtype=jnp.bfloat16):
    """Conv -> folded eval BN -> activation, all in one pallas_call."""
    kh, kw = prep["k"]
    N = x.shape[0]
    if kh == 1 and kw == 1:
        xs = x if stride == 1 else x[:, ::stride, ::stride, :]
        A = xs.reshape(-1, xs.shape[-1])
        Ho, Wo = xs.shape[1], xs.shape[2]
    else:
        A, Ho, Wo = _im2col(x, kh, kw, stride, padding, dilation)
    O = prep["B"].shape[-1]
    y = matmul_fused(A, prep["B"], prep["shift"], act=act, out_dtype=out_dtype)
    return y.reshape(N, Ho, Wo, O)


# ============================================================================
# Glue ops (plain JAX)
# ============================================================================
def maxpool(x, kernel, stride, padding):
    return jax.lax.reduce_window(
        x, jnp.array(-jnp.inf, x.dtype), jax.lax.max,
        window_dimensions=(1, kernel, kernel, 1),
        window_strides=(1, stride, stride, 1),
        padding=((0, 0), (padding, padding), (padding, padding), (0, 0)))


def resize_bilinear_ac(x, out_h, out_w):
    """F.interpolate(mode='bilinear', align_corners=True) on NHWC (JAX gathers)."""
    N, H, W, C = x.shape
    if out_h == H and out_w == W:
        return x
    dtype = x.dtype
    xf = x.astype(jnp.float32)

    def coords(o, i):
        if o == 1 or i == 1:
            return jnp.zeros((o,), jnp.float32)
        return jnp.arange(o, dtype=jnp.float32) * ((i - 1) / (o - 1))

    ys, xs = coords(out_h, H), coords(out_w, W)
    y0 = jnp.floor(ys).astype(jnp.int32)
    y1 = jnp.minimum(y0 + 1, H - 1)
    x0 = jnp.floor(xs).astype(jnp.int32)
    x1 = jnp.minimum(x0 + 1, W - 1)
    wy = (ys - y0.astype(jnp.float32))[None, :, None, None]
    wx = (xs - x0.astype(jnp.float32))[None, None, :, None]
    yy0, yy1 = y0[:, None], y1[:, None]
    xx0, xx1 = x0[None, :], x1[None, :]
    c00 = xf[:, yy0, xx0, :]
    c01 = xf[:, yy0, xx1, :]
    c10 = xf[:, yy1, xx0, :]
    c11 = xf[:, yy1, xx1, :]
    top = c00 * (1.0 - wx) + c01 * wx
    bot = c10 * (1.0 - wx) + c11 * wx
    return (top * (1.0 - wy) + bot * wy).astype(dtype)


# ============================================================================
# Deterministic parameters with eval-mode BN folded at build time
# ============================================================================
_KEY = jax.random.PRNGKey(0)
_CNT = [0]


def _next_key():
    _CNT[0] += 1
    return jax.random.fold_in(_KEY, _CNT[0])


def init_conv_w(cout, cin_g, kh, kw):
    fan_in = cin_g * kh * kw
    return jax.random.normal(_next_key(), (cout, cin_g, kh, kw), jnp.float32) * (
        1.0 / math.sqrt(fan_in))


def init_bn(c):
    """Eval-mode BatchNorm: affine params + running statistics."""
    return {"gamma": 1.0 + 0.1 * jax.random.normal(_next_key(), (c,), jnp.float32),
            "beta": 0.05 * jax.random.normal(_next_key(), (c,), jnp.float32),
            "mean": 0.05 * jax.random.normal(_next_key(), (c,), jnp.float32),
            "var": 0.9 + 0.2 * jax.random.uniform(_next_key(), (c,), jnp.float32)}


def _bn_scale_shift(bn):
    scale = bn["gamma"] * jax.lax.rsqrt(bn["var"] + BN_EPS)
    shift = bn["beta"] - bn["mean"] * scale
    return scale, shift


def fold_conv_g1(w, bn, bias=None):
    """(O,Cin,kh,kw) conv (+optional eval BN, +optional bias) -> bf16 matrix."""
    O, cin, kh, kw = w.shape
    if bn is not None:
        scale, shift = _bn_scale_shift(bn)
    else:
        scale = jnp.ones((O,), jnp.float32)
        shift = jnp.zeros((O,), jnp.float32)
    if bias is not None:
        shift = shift + bias * scale
    wm = jnp.transpose(w * scale[:, None, None, None], (2, 3, 1, 0))
    return {"B": wm.reshape(kh * kw * cin, O).astype(jnp.bfloat16),
            "shift": shift.reshape(1, O).astype(jnp.float32),
            "k": (kh, kw)}


def fold_conv_grouped(w, bn, groups):
    """(O,Cin/G,kh,kw) grouped conv + eval BN -> (G, kh*kw*Cin/G, O/G) bf16."""
    O, cg, kh, kw = w.shape
    Og = O // groups
    scale, shift = _bn_scale_shift(bn)
    ws = w * scale[:, None, None, None]
    mats = [jnp.transpose(ws[g * Og:(g + 1) * Og], (2, 3, 1, 0)).reshape(kh * kw * cg, Og)
            for g in range(groups)]
    return {"B": jnp.stack(mats, 0).astype(jnp.bfloat16),
            "shift": shift.reshape(groups, 1, Og).astype(jnp.float32),
            "k": (kh, kw)}


def fold_conv1x1_groupk(w, bn, groups):
    """1x1 conv consuming a group-blocked input: (G, width/G, O) bf16."""
    O, width, _, _ = w.shape
    scale, shift = _bn_scale_shift(bn)
    wm = jnp.transpose(w[:, :, 0, 0] * scale[:, None], (1, 0))   # (width, O)
    return {"B": wm.reshape(groups, width // groups, O).astype(jnp.bfloat16),
            "shift": shift.reshape(1, O).astype(jnp.float32),
            "k": (1, 1)}


def build_params():
    params = {"stem": fold_conv_g1(init_conv_w(STEM, IN_CH, 7, 7), init_bn(STEM))}
    layers = []
    inplanes = STEM
    for planes, nblocks, stride, dil in zip(
            LAYER_PLANES, LAYER_BLOCKS, LAYER_STRIDES, LAYER_DILATIONS):
        width = planes * WIDTH_MULT
        cout = planes * EXPANSION
        blocks = []
        for bi in range(nblocks):
            s = stride if bi == 0 else 1
            blk = {
                "c1": fold_conv_g1(init_conv_w(width, inplanes, 1, 1), init_bn(width)),
                "c2": fold_conv_grouped(init_conv_w(width, width // GROUPS, 3, 3),
                                        init_bn(width), GROUPS),
                "c3": fold_conv1x1_groupk(init_conv_w(cout, width, 1, 1),
                                          init_bn(cout), GROUPS),
                "stride": s,
                "dilation": dil,
            }
            if bi == 0 and (s != 1 or inplanes != cout):
                blk["down"] = fold_conv_g1(init_conv_w(cout, inplanes, 1, 1),
                                           init_bn(cout))
            blocks.append(blk)
            inplanes = cout
        layers.append(blocks)
    params["layers"] = layers

    c2, c3, c4, c5 = [pp * EXPANSION for pp in LAYER_PLANES]

    def cbr(cin, cout_, k):
        return fold_conv_g1(init_conv_w(cout_, cin, k, k), init_bn(cout_))

    # TODO(synk): the Cin=Cout=1 pyramid convs still run on the MXU matmul path
    #             (N=1 masked stores); a VPU stencil would keep them off the MXU.
    params["fpa"] = {"branch1": cbr(c5, DEC_CH, 1), "mid": cbr(c5, DEC_CH, 1),
                     "down1": cbr(c5, 1, 7), "down2": cbr(1, 1, 5),
                     "down3a": cbr(1, 1, 3), "down3b": cbr(1, 1, 3),
                     "conv2": cbr(1, 1, 5), "conv1": cbr(1, 1, 7)}
    params["gau3"] = {"conv1": cbr(DEC_CH, DEC_CH, 1), "conv2": cbr(c4, DEC_CH, 3)}
    params["gau2"] = {"conv1": cbr(DEC_CH, DEC_CH, 1), "conv2": cbr(c3, DEC_CH, 3)}
    params["gau1"] = {"conv1": cbr(DEC_CH, DEC_CH, 1), "conv2": cbr(c2, DEC_CH, 3)}
    params["head"] = fold_conv_g1(
        init_conv_w(NUM_CLASSES, DEC_CH, 3, 3), None,
        bias=0.01 * jax.random.normal(_next_key(), (NUM_CLASSES,), jnp.float32))
    return params


# ============================================================================
# Model forward
# ============================================================================
def bottleneck_fwd(x, p):
    N, H, W, Cin = x.shape
    width = p["c1"]["B"].shape[-1]
    cout = p["c3"]["B"].shape[-1]
    # conv1 1x1 + bn + relu (one launch)
    h1 = matmul_fused(x.reshape(-1, Cin), p["c1"]["B"], p["c1"]["shift"], act="relu")
    h1 = h1.reshape(N, H, W, width)
    # grouped 3x3 conv2 + bn + relu (one launch, real group grid axis)
    A3, Ho, Wo = _im2col_grouped(h1, 3, 3, p["stride"], p["dilation"],
                                 p["dilation"], GROUPS)
    y2 = grouped_matmul_act(A3, p["c2"]["B"], p["c2"]["shift"], act="relu")
    # residual branch
    if "down" in p:
        xs = x if p["stride"] == 1 else x[:, ::p["stride"], ::p["stride"], :]
        res = matmul_fused(xs.reshape(-1, Cin), p["down"]["B"], p["down"]["shift"],
                           act="none")
    else:
        res = x.reshape(-1, Cin)
    # conv3 (1x1, reduces over groups) + bn3 + residual add + relu, fully fused
    out = groupk_matmul_res_act(y2, p["c3"]["B"], p["c3"]["shift"], res, act="relu")
    return out.reshape(N, Ho, Wo, cout)


def fpa_fwd(x, p):
    N, h, w, _ = x.shape
    dec = p["mid"]["B"].shape[-1]
    # global-pool branch
    b1 = global_avg_pool(x)
    b1 = conv_apply(b1, p["branch1"], act="relu")               # (N,1,1,dec)
    # mid branch
    mid = conv_apply(x, p["mid"], act="relu")                   # (N,h,w,dec)
    # pyramid attention branch
    x1 = conv_apply(maxpool(x, 2, 2, 0), p["down1"], padding=3, act="relu")
    x2 = conv_apply(maxpool(x1, 2, 2, 0), p["down2"], padding=2, act="relu")
    x3 = conv_apply(maxpool(x2, 2, 2, 0), p["down3a"], padding=1, act="relu")
    x3 = conv_apply(x3, p["down3b"], padding=1, act="relu")
    x3 = resize_bilinear_ac(x3, h // 4, w // 4)
    x2 = conv_apply(x2, p["conv2"], padding=2, act="relu")
    xx = add2(x2, x3)
    xx = resize_bilinear_ac(xx, h // 2, w // 2)
    x1 = conv_apply(x1, p["conv1"], padding=3, act="relu")
    xx = add2(xx, x1)
    attn = resize_bilinear_ac(xx, h, w)                         # (N,h,w,1)
    out = gate_add(mid.reshape(N, h * w, dec),
                   attn.reshape(N, h * w, 1),
                   b1.reshape(N, 1, dec))                       # mid*attn + b1
    return out.reshape(N, h, w, dec)


def gau_fwd(x_low, y_high, p):
    N, h, w, _ = x_low.shape
    dec = p["conv1"]["B"].shape[-1]
    y_up = resize_bilinear_ac(y_high, h, w)
    xc = conv_apply(x_low, p["conv2"], padding=1, act="relu")
    ya = conv_apply(global_avg_pool(y_high), p["conv1"], act="sigmoid")
    out = gate_add(xc.reshape(N, h * w, dec),
                   ya.reshape(N, 1, dec),
                   y_up.reshape(N, h * w, dec))                 # xc*gate + y_up
    return out.reshape(N, h, w, dec)


def pan_forward(params, x_nchw):
    x = jnp.transpose(x_nchw, (0, 2, 3, 1)).astype(jnp.bfloat16)  # NCHW -> NHWC

    # ---------------- encoder (ResNeXt-style, output_stride=16) ----------------
    s = conv_apply(x, params["stem"], stride=2, padding=3, act="relu")   # /2
    s = maxpool(s, 3, 2, 1)                                              # /4
    feats = []
    for layer in params["layers"]:
        for blk in layer:
            s = bottleneck_fwd(s, blk)
        feats.append(s)
    f2, f3, f4, f5 = feats        # /4, /8, /16, /16(dilated)

    # ---------------- PAN decoder ----------------
    x5 = fpa_fwd(f5, params["fpa"])
    x4 = gau_fwd(f4, x5, params["gau3"])
    x3 = gau_fwd(f3, x4, params["gau2"])
    x2 = gau_fwd(f2, x3, params["gau1"])

    # ---------------- segmentation head ----------------
    y = conv_apply(x2, params["head"], padding=1, act="none",
                   out_dtype=jnp.float32)
    N, h, w, _ = y.shape
    y = resize_bilinear_ac(y, h * 4, w * 4)   # nn.UpsamplingBilinear2d(scale=4)
    return jnp.transpose(y, (0, 3, 1, 2))     # back to NCHW


# ============================================================================
if __name__ == "__main__":
    # smallest spatial size compatible with PAN's FPA pyramid at output_stride 16
    # is 128 (bottleneck 8x8 -> 4 -> 2 -> 1).
    key = jax.random.PRNGKey(0)
    x = jax.random.normal(key, (2, IN_CH, 128, 128), jnp.float32)

    params = build_params()
    out = pan_forward(params, x)
    out = jax.block_until_ready(out)

    assert out.shape == (2, NUM_CLASSES, 128, 128), out.shape
    assert out.dtype == jnp.float32
    assert bool(jnp.all(jnp.isfinite(out)))
    print("KERNEL_OK")
</pallas_src>

<mosaic_0001>
module attributes {stable_mosaic.version = 11 : i64} {
  func.func @_mm_act_kernel(%arg0: i32, %arg1: memref<4096x147xbf16, #tpu.memory_space<vmem>>, %arg2: memref<147x8xbf16, #tpu.memory_space<vmem>>, %arg3: memref<1x8xf32, #tpu.memory_space<vmem>>, %arg4: memref<4096x8xbf16, #tpu.memory_space<vmem>>) attributes {dimension_semantics = [#tpu.dimension_semantics<parallel>], iteration_bounds = array<i64: 2>, scalar_prefetch = 0 : i64, scratch_operands = 0 : i64, tpu.core_type = #tpu.core_type<tc>, window_params = [{transform_indices = @transform_0, window_bounds = array<i64: 4096, 147>}, {pipeline_mode = #tpu.pipeline_mode<synchronous>, transform_indices = @transform_1, window_bounds = array<i64: 147, 8>}, {pipeline_mode = #tpu.pipeline_mode<synchronous>, transform_indices = @transform_2, window_bounds = array<i64: 1, 8>}, {transform_indices = @transform_3, window_bounds = array<i64: 4096, 8>}]} {
    %c0 = arith.constant 0 : index
    %c0_0 = arith.constant 0 : index
    %0 = vector.load %arg1[%c0, %c0_0] : memref<4096x147xbf16, #tpu.memory_space<vmem>>, vector<4096x147xbf16>
    %c0_1 = arith.constant 0 : index
    %c0_2 = arith.constant 0 : index
    %1 = vector.load %arg2[%c0_1, %c0_2] : memref<147x8xbf16, #tpu.memory_space<vmem>>, vector<147x8xbf16>
    %cst = arith.constant dense<0.000000e+00> : vector<4096x8xf32>
    %2 = tpu.matmul %0, %1, %cst {dimension_numbers = #tpu.dot_dimension_numbers<[1], [0], [0], [1], [0, 0, 1, 1], [], []>} : vector<4096x147xbf16>, vector<147x8xbf16>, vector<4096x8xf32> -> vector<4096x8xf32>
    %c0_3 = arith.constant 0 : index
    %c0_4 = arith.constant 0 : index
    %3 = vector.load %arg3[%c0_3, %c0_4] : memref<1x8xf32, #tpu.memory_space<vmem>>, vector<1x8xf32>
    %4 = vector.broadcast %3 : vector<1x8xf32> to vector<4096x8xf32>
    %5 = arith.addf %2, %4 : vector<4096x8xf32>
    %cst_5 = arith.constant 0.000000e+00 : f32
    %6 = vector.broadcast %cst_5 : f32 to vector<4096x8xf32>
    %7 = arith.maximumf %5, %6 : vector<4096x8xf32>
    %8 = arith.truncf %7 : vector<4096x8xf32> to vector<4096x8xbf16>
    %c0_6 = arith.constant 0 : index
    %c0_7 = arith.constant 0 : index
    %9 = vector.load %arg4[%c0_6, %c0_7] : memref<4096x8xbf16, #tpu.memory_space<vmem>>, vector<4096x8xbf16>
    tpu.vector_store %arg4[%c0_6, %c0_7], %8 {strides = array<i32>} : memref<4096x8xbf16, #tpu.memory_space<vmem>>, vector<4096x8xbf16>,
    return
  }
  func.func @transform_0(%arg0: i32) -> (i32, i32) {
    %c0_i32 = arith.constant 0 : i32
    %c0_i32_0 = arith.constant 0 : i32
    return %arg0, %c0_i32 : i32, i32
  }
  func.func @transform_1(%arg0: i32) -> (i32, i32) {
    %c0_i32 = arith.constant 0 : i32
    %c0_i32_0 = arith.constant 0 : i32
    %c0_i32_1 = arith.constant 0 : i32
    return %c0_i32, %c0_i32_0 : i32, i32
  }
  func.func @transform_2(%arg0: i32) -> (i32, i32) {
    %c0_i32 = arith.constant 0 : i32
    %c0_i32_0 = arith.constant 0 : i32
    %c0_i32_1 = arith.constant 0 : i32
    return %c0_i32, %c0_i32_0 : i32, i32
  }
  func.func @transform_3(%arg0: i32) -> (i32, i32) {
    %c0_i32 = arith.constant 0 : i32
    %c0_i32_0 = arith.constant 0 : i32
    return %arg0, %c0_i32 : i32, i32
  }
}

</mosaic_0001>

<bundles_post_ra>
// kernel: matmul_fused.1
= control target key start
LH: loop header
LB: loop body
LE: loop exit
PB: predicated region body
PF: predicated region fallthrough
CT: control target
= control target key end

     0   :  { %s11724_s12 = smov 0   ;;  %s14123_s0 = inlined_call_operand.vmem [shape: bf16[8192,147], index: 0, kind: input, shape index: {}]   ;;  %s14124_s1 = inlined_call_operand.vmem [shape: bf16[147,8], index: 1, kind: input, shape index: {}]   ;;  %s14125_s2 = inlined_call_operand.vmem [shape: f32[1,8], index: 2, kind: input, shape index: {}]   ;;  %s14126_s3 = inlined_call_operand.vmem [shape: bf16[8192,8], index: 3, kind: output, shape index: {}]  }
   0x1 LB: > { %s9063_s13 = sadd.s32 4294967295, %s11700_s12   ;;  %p9067_p0 = scmp.ge.s32.totalorder %s11700_s12, 1  ;;  %s11700_s12 = sphi %s11724_s12, %s13_s12  }
   0x2   : > { %p139_p1 = scmp.lt.s32.totalorder %s11700_s12, 3 }
   0x4   : > { %p140_p2 = pnand %p9067_p0, %p139_p1 }
   0x5   : > { %v10909_v0 = vld [vmem:[%s14124_s1] sm:$0xff] (!%p140_p2)   ;;  %v11702_v1 = vmov (!%p140_p2), 0   ;;  %v10910_v2 = vld [vmem:[%s14124_s1 + $0x8] sm:$0xff] (!%p140_p2)   ;;  %v10911_v3 = vld [vmem:[%s14124_s1 + $0x10] sm:$0xff] (!%p140_p2)   ;;  %s9068_s20 = sshll.u32 (!%p140_p2), %s9063_s13, 9  ;;  %vm3077_vm0 = vcmask (!%p140_p2), 154624  }
   0x6   : > { %143 = sbr.rel (%p140_p2) target bundleno = 1283 (0x503), region = 32  ;;  %3853 = vmatprep.subr.bf16.mxu0 (!%p140_p2), %v11702_v1  ;;  %10879 = vmatprep.subr.bf16.mxu1 (!%p140_p2), %v11702_v1  ;;  %p165_p3 = scmp.lt.s32.totalorder (!%p140_p2), %s9068_s20, 1023  ;;  %v10912_v4 = vld [vmem:[%s14124_s1 + $0x18] sm:$0xff] (!%p140_p2)   ;;  %v10913_v5 = vld [vmem:[%s14124_s1 + $0x20] sm:$0xff] (!%p140_p2)   ;;  %v10914_v8 = vld [vmem:[%s14124_s1 + $0x28] sm:$0xff] (!%p140_p2)   ;;  %vm3846_vm1 = vcmask (!%p140_p2), 1040384  }
   0x7   : > { %3854 = vmatpush1.bf16.msra.mxu0 (!%p140_p2), %v10909_v0  ;;  %10889 = vmatpush1.bf16.msra.mxu1 (!%p140_p2), %v10909_v0  ;;  %v10915_v9 = vld [vmem:[%s14124_s1 + $0x30] sm:$0xff] (!%p140_p2)   ;;  %v10916_v10 = vld [vmem:[%s14124_s1 + $0x38] sm:$0xff] (!%p140_p2)   ;;  %vm3847_vm2 = vcmask (!%p140_p2), 1041408   ;;  %v11703_v11 = vmov (!%p140_p2), 65535   ;;  %v10917_v13 = vld [vmem:[%s14124_s1 + $0x40] sm:$0xff] (!%p140_p2)   ;;  %vm8494_vm3 = vcmask (!%p140_p2), 60416  }
   0x8   : > { %3855 = vmatprep.subr.bf16.mxu0 (!%p140_p2), %v11702_v1  ;;  %10880 = vmatprep.subr.bf16.mxu1 (!%p140_p2), %v11702_v1  ;;  %v3848_v12 = vsel (!%p140_p2), %vm3846_vm1, 4294967295, %v11703_v11  ;;  %v10918_v14 = vld [vmem:[%s14124_s1 + $0x48] ss:$0 sps:$4 sm:$0x33] (!%p140_p2)  }
   0x9   : > { %v3849_v15 = vsel (!%p140_p2), %vm3847_vm2, %v3848_v12, 0 }
   0xa   : > { %v3851_v16 = vand.u32 (!%p140_p2), %v10918_v14, %v3849_v15 }
   0xb   : > { %3856 = vmatpush1.bf16.msra.mxu0 (!%p140_p2), %v10910_v2  ;;  %10890 = vmatpush1.bf16.msra.mxu1 (!%p140_p2), %v10910_v2 }
   0xc   : > { %3857 = vmatprep.subr.bf16.mxu0 (!%p140_p2), %v11702_v1  ;;  %10881 = vmatprep.subr.bf16.mxu1 (!%p140_p2), %v11702_v1 }
   0xd   : > { %s14128_s20 = smov (!%p165_p3, %s9068_s20), 1023 }
   0xe   : > { %s10366_s23 = sshll.u32 %s14128_s20, 3  ;;  %s9072_s15 = sshll.u32 %s14128_s20, 2 }
   0xf   : > { %3858 = vmatpush1.bf16.msra.mxu0 %v10911_v3  ;;  %10891 = vmatpush1.bf16.msra.mxu1 %v10911_v3  ;;  %s11750_s26 = scalar_lea.vmem %s14123_s0, %s10366_s23  ;;  %s11953_s18 = scalar_lea.vmem %s14126_s3, %s9072_s15 }
  0x10   : > { %3859 = vmatprep.subr.bf16.mxu0 %v11702_v1  ;;  %10882 = vmatprep.subr.bf16.mxu1 %v11702_v1  ;;  %v10921_v6 = vld [vmem:[%s11750_s26 + $0x4] ss:$8 sps:$4 sm:$0xff]   ;;  %v10919_v17 = vld [vmem:[%s11750_s26] ss:$8 sps:$4 sm:$0xff]   ;;  %v10925_v19 = vld [vmem:[%s11750_s26 + $0x14] ss:$8 sps:$4 sm:$0xff]  }
  0x11   : > { %v10924_v7 = vld [vmem:[%s11750_s26 + $0x804] ss:$8 sps:$4 sm:$0xff]   ;;  %9596 = vmatprep.mubr.msk.bf16.mxu0 %vm3077_vm0, %v10921_v6  ;;  %v10922_v18 = vld [vmem:[%s11750_s26 + $0x800] ss:$8 sps:$4 sm:$0xff]   ;;  %v10927_v20 = vld [vmem:[%s11750_s26 + $0x814] ss:$8 sps:$4 sm:$0xff]  }
  0x12   : > { %9724 = vmatprep.mubr.msk.bf16.mxu1 %vm3077_vm0, %v10924_v7  ;;  %v10929_v21 = vld [vmem:[%s11750_s26 + $0x10] ss:$8 sps:$4 sm:$0xff]   ;;  %v10931_v23 = vld [vmem:[%s11750_s26 + $0x24] ss:$8 sps:$4 sm:$0xff]   ;;  %v10935_v25 = vld [vmem:[%s11750_s26 + $0x20] ss:$8 sps:$4 sm:$0xff]  }
  0x13   : > { %3860 = vmatpush1.bf16.msra.mxu0 %v10912_v4  ;;  %10892 = vmatpush1.bf16.msra.mxu1 %v10912_v4  ;;  %v10930_v22 = vld [vmem:[%s11750_s26 + $0x810] ss:$8 sps:$4 sm:$0xff]   ;;  %v10933_v24 = vld [vmem:[%s11750_s26 + $0x824] ss:$8 sps:$4 sm:$0xff]   ;;  %v10936_v26 = vld [vmem:[%s11750_s26 + $0x820] ss:$8 sps:$4 sm:$0xff]  }
  0x14   : > { %3861 = vmatprep.subr.bf16.mxu0 %v11702_v1  ;;  %10883 = vmatprep.subr.bf16.mxu1 %v11702_v1  ;;  %v10937_v27 = vld [vmem:[%s11750_s26 + $0x34] ss:$8 sps:$4 sm:$0xff]   ;;  %v10941_v29 = vld [vmem:[%s11750_s26 + $0x30] ss:$8 sps:$4 sm:$0xff]   ;;  %v10943_v31 = vld [vmem:[%s11750_s26 + $0x44] ss:$8 sps:$4 sm:$0xff]  }
  0x15   : > { %v10939_v28 = vld [vmem:[%s11750_s26 + $0x834] ss:$8 sps:$4 sm:$0xff]   ;;  %v10942_v30 = vld [vmem:[%s11750_s26 + $0x830] ss:$8 sps:$4 sm:$0xff]   ;;  %v10945_v32 = vld [vmem:[%s11750_s26 + $0x844] ss:$8 sps:$4 sm:$0xff]  }
  0x16   : > { %v10947_v33 = vld [vmem:[%s11750_s26 + $0x40] ss:$8 sps:$4 sm:$0xff]   ;;  %v10949_v35 = vld [vmem:[%s11750_s26 + $0x54] ss:$8 sps:$4 sm:$0xff]   ;;  %v10953_v37 = vld [vmem:[%s11750_s26 + $0x50] ss:$8 sps:$4 sm:$0xff]  }
  0x17   : > { %3862 = vmatpush1.bf16.msra.mxu0 %v10913_v5  ;;  %10893 = vmatpush1.bf16.msra.mxu1 %v10913_v5  ;;  %v10948_v34 = vld [vmem:[%s11750_s26 + $0x840] ss:$8 sps:$4 sm:$0xff]   ;;  %v10951_v36 = vld [vmem:[%s11750_s26 + $0x854] ss:$8 sps:$4 sm:$0xff]   ;;  %v10954_v38 = vld [vmem:[%s11750_s26 + $0x850] ss:$8 sps:$4 sm:$0xff]  }
  0x18   : > { %3863 = vmatprep.subr.bf16.mxu0 %v11702_v1  ;;  %10884 = vmatprep.subr.bf16.mxu1 %v11702_v1  ;;  %v10955_v39 = vld [vmem:[%s11750_s26 + $0x64] ss:$8 sps:$4 sm:$0xff]   ;;  %v10959_v41 = vld [vmem:[%s11750_s26 + $0x60] ss:$8 sps:$4 sm:$0xff]   ;;  %v10961_v43 = vld [vmem:[%s11750_s26 + $0x74] ss:$8 sps:$4 sm:$0xff]  }
  0x19   : > { %v10957_v40 = vld [vmem:[%s11750_s26 + $0x864] ss:$8 sps:$4 sm:$0xff]   ;;  %v10960_v42 = vld [vmem:[%s11750_s26 + $0x860] ss:$8 sps:$4 sm:$0xff]   ;;  %v10963_v44 = vld [vmem:[%s11750_s26 + $0x874] ss:$8 sps:$4 sm:$0xff]  }
  0x1a   : > { %v10965_v45 = vld [vmem:[%s11750_s26 + $0x70] ss:$8 sps:$4 sm:$0xff]   ;;  %v10967_v47 = vld [vmem:[%s11750_s26 + $0x84] ss:$8 sps:$4 sm:$0xff]   ;;  %v10971_v49 = vld [vmem:[%s11750_s26 + $0x80] ss:$8 sps:$4 sm:$0xff]  }
  0x1b   : > { %3864 = vmatpush1.bf16.msra.mxu0 %v10914_v8  ;;  %10894 = vmatpush1.bf16.msra.mxu1 %v10914_v8  ;;  %v10966_v46 = vld [vmem:[%s11750_s26 + $0x870] ss:$8 sps:$4 sm:$0xff]   ;;  %v10969_v48 = vld [vmem:[%s11750_s26 + $0x884] ss:$8 sps:$4 sm:$0xff]   ;;  %v10972_v50 = vld [vmem:[%s11750_s26 + $0x880] ss:$8 sps:$4 sm:$0xff]  }
  0x1c   : > { %3865 = vmatprep.subr.bf16.mxu0 %v11702_v1  ;;  %10885 = vmatprep.subr.bf16.mxu1 %v11702_v1  ;;  %v10973_v51 = vld [vmem:[%s11750_s26 + $0x94] ss:$8 sps:$4 sm:$0xff]   ;;  %v10977_v53 = vld [vmem:[%s11750_s26 + $0x90] ss:$8 sps:$4 sm:$0xff]   ;;  %v10979_v55 = vld [vmem:[%s11750_s26 + $0xa4] ss:$8 sps:$4 sm:$0xff]  }
  0x1d   : > { %v10975_v52 = vld [vmem:[%s11750_s26 + $0x894] ss:$8 sps:$4 sm:$0xff]   ;;  %v10978_v54 = vld [vmem:[%s11750_s26 + $0x890] ss:$8 sps:$4 sm:$0xff]   ;;  %v10981_v56 = vld [vmem:[%s11750_s26 + $0x8a4] ss:$8 sps:$4 sm:$0xff]  }
  0x1e   : > { %v10983_v57 = vld [vmem:[%s11750_s26 + $0xa0] ss:$8 sps:$4 sm:$0xff]   ;;  %v10985_v59 = vld [vmem:[%s11750_s26 + $0xb4] ss:$8 sps:$4 sm:$0xff]   ;;  %v10989_v61 = vld [vmem:[%s11750_s26 + $0xb0] ss:$8 sps:$4 sm:$0xff]  }
  0x1f   : > { %3866 = vmatpush1.bf16.msra.mxu0 %v10915_v9  ;;  %10895 = vmatpush1.bf16.msra.mxu1 %v10915_v9  ;;  %v10984_v58 = vld [vmem:[%s11750_s26 + $0x8a0] ss:$8 sps:$4 sm:$0xff]   ;;  %v10987_v60 = vld [vmem:[%s11750_s26 + $0x8b4] ss:$8 sps:$4 sm:$0xff]   ;;  %v10990_v62 = vld [vmem:[%s11750_s26 + $0x8b0] ss:$8 sps:$4 sm:$0xff]  }
  0x20   : > { %3867 = vmatprep.subr.bf16.mxu0 %v11702_v1  ;;  %10886 = vmatprep.subr.bf16.mxu1 %v11702_v1  ;;  %v10991_v63 = vld [vmem:[%s11750_s26 + $0xc4] ss:$8 sps:$4 sm:$0xff]   ;;  %v10996_v2 = vld [vmem:[%s11750_s26 + $0x8c0] ss:$8 sps:$4 sm:$0xff]   ;;  %v10997_v3 = vld [vmem:[%s11750_s26 + $0xd4] ss:$8 sps:$4 sm:$0xff]  }
  0x21   : > { %v10993_v0 = vld [vmem:[%s11750_s26 + $0x8c4] ss:$8 sps:$4 sm:$0xff]   ;;  %v10999_v4 = vld [vmem:[%s11750_s26 + $0x8d4] ss:$8 sps:$4 sm:$0xff]   ;;  %v11001_v5 = vld [vmem:[%s11750_s26 + $0xd0] ss:$8 sps:$4 sm:$0xff]  }
  0x22   : > { %v11002_v6 = vld [vmem:[%s11750_s26 + $0x8d0] ss:$8 sps:$4 sm:$0xff]   ;;  %v11003_v7 = vld [vmem:[%s11750_s26 + $0xe4] ss:$8 sps:$4 sm:$0xff]   ;;  %v11007_v9 = vld [vmem:[%s11750_s26 + $0xe0] ss:$8 sps:$4 sm:$0xff]  }
  0x23   : > { %3868 = vmatpush1.bf16.msra.mxu0 %v10916_v10  ;;  %10896 = vmatpush1.bf16.msra.mxu1 %v10916_v10  ;;  %v11005_v8 = vld [vmem:[%s11750_s26 + $0x8e4] ss:$8 sps:$4 sm:$0xff]   ;;  %v11008_v10 = vld [vmem:[%s11750_s26 + $0x8e0] ss:$8 sps:$4 sm:$0xff]   ;;  %v11009_v11 = vld [vmem:[%s11750_s26 + $0xf4] ss:$8 sps:$4 sm:$0xff]  }
  0x24   : > { %3869 = vmatprep.subr.bf16.mxu0 %v11702_v1  ;;  %10887 = vmatprep.subr.bf16.mxu1 %v11702_v1  ;;  %v11011_v12 = vld [vmem:[%s11750_s26 + $0x8f4] ss:$8 sps:$4 sm:$0xff]   ;;  %v11014_v14 = vld [vmem:[%s11750_s26 + $0x8f0] ss:$8 sps:$4 sm:$0xff]   ;;  %v11015_v15 = vld [vmem:[%s11750_s26 + $0x104] ss:$8 sps:$4 sm:$0xff]  }
  0x27   : > { %3870 = vmatpush1.bf16.msra.mxu0 %v10917_v13  ;;  %10897 = vmatpush1.bf16.msra.mxu1 %v10917_v13  ;;  %v11013_v13 = vld [vmem:[%s11750_s26 + $0xf0] ss:$8 sps:$4 sm:$0xff]  }
  0x28   : > { %3871 = vmatprep.subr.bf16.mxu0 %v11702_v1  ;;  %10888 = vmatprep.subr.bf16.mxu1 %v11702_v1  ;;  %v10995_v1 = vld [vmem:[%s11750_s26 + $0xc0] ss:$8 sps:$4 sm:$0xff]  }
  0x2b   : > { %3872 = vmatpush1.bf16.msra.mxu0 %v3851_v16  ;;  %10898 = vmatpush1.bf16.msra.mxu1 %v3851_v16  ;;  %v11017_v16 = vld [vmem:[%s11750_s26 + $0x904] ss:$8 sps:$4 sm:$0xff]  }
  0x2e   : > { %3886 = vmatmul.mubr.bf16.vlgmr.msra.gmra.mrb[0].mxu0 %v10919_v17  ;;  %4910 = vmatmul.mubr.bf16.vlgmr.msra.gmra.mrb[0].mxu1 %v10922_v18  ;;  %v11019_v17 = vld [vmem:[%s11750_s26 + $0x100] ss:$8 sps:$4 sm:$0xff]  }
  0x2f   : > { %9597 = vmatprep.mubr.msk.bf16.mxu0 %vm3077_vm0, %v10925_v19  ;;  %9725 = vmatprep.mubr.msk.bf16.mxu1 %vm3077_vm0, %v10927_v20  ;;  %v11020_v18 = vld [vmem:[%s11750_s26 + $0x900] ss:$8 sps:$4 sm:$0xff]   ;;  %v11021_v19 = vld [vmem:[%s11750_s26 + $0x114] ss:$8 sps:$4 sm:$0xff]  }
  0x30   : > { %v11023_v20 = vld [vmem:[%s11750_s26 + $0x914] ss:$8 sps:$4 sm:$0xff]  }
  0x36   : > { %3894 = vmatmul.mubr.bf16.gmra.mrb[4].mxu0 %v10929_v21  ;;  %4918 = vmatmul.mubr.bf16.gmra.mrb[4].mxu1 %v10930_v22  ;;  %v11025_v21 = vld [vmem:[%s11750_s26 + $0x110] ss:$8 sps:$4 sm:$0xff]  }
  0x37   : > { %9598 = vmatprep.mubr.msk.bf16.mxu0 %vm3077_vm0, %v10931_v23  ;;  %9726 = vmatprep.mubr.msk.bf16.mxu1 %vm3077_vm0, %v10933_v24  ;;  %v11026_v22 = vld [vmem:[%s11750_s26 + $0x910] ss:$8 sps:$4 sm:$0xff]   ;;  %v11027_v23 = vld [vmem:[%s11750_s26 + $0x124] ss:$8 sps:$4 sm:$0xff]  }
  0x38   : > { %v11029_v24 = vld [vmem:[%s11750_s26 + $0x924] ss:$8 sps:$4 sm:$0xff]  }
  0x3e   : > { %3902 = vmatmul.mubr.bf16.gmra.mrb[8].mxu0 %v10935_v25  ;;  %4926 = vmatmul.mubr.bf16.gmra.mrb[8].mxu1 %v10936_v26  ;;  %v11031_v25 = vld [vmem:[%s11750_s26 + $0x120] ss:$8 sps:$4 sm:$0xff]  }
  0x3f   : > { %9599 = vmatprep.mubr.msk.bf16.mxu0 %vm3077_vm0, %v10937_v27  ;;  %9727 = vmatprep.mubr.msk.bf16.mxu1 %vm3077_vm0, %v10939_v28  ;;  %v11032_v26 = vld [vmem:[%s11750_s26 + $0x920] ss:$8 sps:$4 sm:$0xff]   ;;  %v11033_v27 = vld [vmem:[%s11750_s26 + $0x134] ss:$8 sps:$4 sm:$0xff]  }
  0x40   : > { %v11035_v28 = vld [vmem:[%s11750_s26 + $0x934] ss:$8 sps:$4 sm:$0xff]  }
  0x46   : > { %3910 = vmatmul.mubr.bf16.gmra.mrb[12].mxu0 %v10941_v29  ;;  %4934 = vmatmul.mubr.bf16.gmra.mrb[12].mxu1 %v10942_v30  ;;  %v11037_v29 = vld [vmem:[%s11750_s26 + $0x130] ss:$8 sps:$4 sm:$0xff]  }
  0x47   : > { %9600 = vmatprep.mubr.msk.bf16.mxu0 %vm3077_vm0, %v10943_v31  ;;  %9728 = vmatprep.mubr.msk.bf16.mxu1 %vm3077_vm0, %v10945_v32  ;;  %v11038_v30 = vld [vmem:[%s11750_s26 + $0x930] ss:$8 sps:$4 sm:$0xff]   ;;  %v11039_v31 = vld [vmem:[%s11750_s26 + $0x144] ss:$8 sps:$4 sm:$0xff]  }
  0x48   : > { %v11041_v32 = vld [vmem:[%s11750_s26 + $0x944] ss:$8 sps:$4 sm:$0xff]  }
  0x4e   : > { %3918 = vmatmul.mubr.bf16.gmra.mrb[16].mxu0 %v10947_v33  ;;  %4942 = vmatmul.mubr.bf16.gmra.mrb[16].mxu1 %v10948_v34  ;;  %v11043_v33 = vld [vmem:[%s11750_s26 + $0x140] ss:$8 sps:$4 sm:$0xff]  }
  0x4f   : > { %9601 = vmatprep.mubr.msk.bf16.mxu0 %vm3077_vm0, %v10949_v35  ;;  %9729 = vmatprep.mubr.msk.bf16.mxu1 %vm3077_vm0, %v10951_v36  ;;  %v11044_v34 = vld [vmem:[%s11750_s26 + $0x940] ss:$8 sps:$4 sm:$0xff]   ;;  %v11045_v35 = vld [vmem:[%s11750_s26 + $0x154] ss:$8 sps:$4 sm:$0xff]  }
  0x50   : > { %v11047_v36 = vld [vmem:[%s11750_s26 + $0x954] ss:$8 sps:$4 sm:$0xff]  }
  0x56   : > { %3926 = vmatmul.mubr.bf16.gmra.mrb[20].mxu0 %v10953_v37  ;;  %4950 = vmatmul.mubr.bf16.gmra.mrb[20].mxu1 %v10954_v38  ;;  %v11049_v37 = vld [vmem:[%s11750_s26 + $0x150] ss:$8 sps:$4 sm:$0xff]  }
  0x57   : > { %9602 = vmatprep.mubr.msk.bf16.mxu0 %vm3077_vm0, %v10955_v39  ;;  %9730 = vmatprep.mubr.msk.bf16.mxu1 %vm3077_vm0, %v10957_v40  ;;  %v11050_v38 = vld [vmem:[%s11750_s26 + $0x950] ss:$8 sps:$4 sm:$0xff]   ;;  %v11051_v39 = vld [vmem:[%s11750_s26 + $0x164] ss:$8 sps:$4 sm:$0xff]  }
  0x58   : > { %v11053_v40 = vld [vmem:[%s11750_s26 + $0x964] ss:$8 sps:$4 sm:$0xff]  }
  0x5e   : > { %3934 = vmatmul.mubr.bf16.gmra.mrb[24].mxu0 %v10959_v41  ;;  %4958 = vmatmul.mubr.bf16.gmra.mrb[24].mxu1 %v10960_v42  ;;  %v11055_v41 = vld [vmem:[%s11750_s26 + $0x160] ss:$8 sps:$4 sm:$0xff]  }
  0x5f   : > { %9603 = vmatprep.mubr.msk.bf16.mxu0 %vm3077_vm0, %v10961_v43  ;;  %9731 = vmatprep.mubr.msk.bf16.mxu1 %vm3077_vm0, %v10963_v44  ;;  %v11056_v42 = vld [vmem:[%s11750_s26 + $0x960] ss:$8 sps:$4 sm:$0xff]   ;;  %v11057_v43 = vld [vmem:[%s11750_s26 + $0x174] ss:$8 sps:$4 sm:$0xff]  }
  0x60   : > { %v11059_v44 = vld [vmem:[%s11750_s26 + $0x974] ss:$8 sps:$4 sm:$0xff]  }
  0x66   : > { %3942 = vmatmul.mubr.bf16.gmra.mrb[28].mxu0 %v10965_v45  ;;  %4966 = vmatmul.mubr.bf16.gmra.mrb[28].mxu1 %v10966_v46  ;;  %v11061_v45 = vld [vmem:[%s11750_s26 + $0x170] ss:$8 sps:$4 sm:$0xff]  }
  0x67   : > { %9604 = vmatprep.mubr.msk.bf16.mxu0 %vm3077_vm0, %v10967_v47  ;;  %9732 = vmatprep.mubr.msk.bf16.mxu1 %vm3077_vm0, %v10969_v48  ;;  %v11062_v46 = vld [vmem:[%s11750_s26 + $0x970] ss:$8 sps:$4 sm:$0xff]   ;;  %v11063_v47 = vld [vmem:[%s11750_s26 + $0x184] ss:$8 sps:$4 sm:$0xff]  }
  0x68   : > { %v11065_v48 = vld [vmem:[%s11750_s26 + $0x984] ss:$8 sps:$4 sm:$0xff]  }
  0x6e   : > { %3950 = vmatmul.mubr.bf16.gmra.mrb[32].mxu0 %v10971_v49  ;;  %4974 = vmatmul.mubr.bf16.gmra.mrb[32].mxu1 %v10972_v50  ;;  %v11067_v49 = vld [vmem:[%s11750_s26 + $0x180] ss:$8 sps:$4 sm:$0xff]  }
  0x6f   : > { %9605 = vmatprep.mubr.msk.bf16.mxu0 %vm3077_vm0, %v10973_v51  ;;  %9733 = vmatprep.mubr.msk.bf16.mxu1 %vm3077_vm0, %v10975_v52  ;;  %v11068_v50 = vld [vmem:[%s11750_s26 + $0x980] ss:$8 sps:$4 sm:$0xff]   ;;  %v11069_v51 = vld [vmem:[%s11750_s26 + $0x194] ss:$8 sps:$4 sm:$0xff]  }
  0x70   : > { %v11071_v52 = vld [vmem:[%s11750_s26 + $0x994] ss:$8 sps:$4 sm:$0xff]  }
  0x76   : > { %3958 = vmatmul.mubr.bf16.gmra.mrb[36].mxu0 %v10977_v53  ;;  %4982 = vmatmul.mubr.bf16.gmra.mrb[36].mxu1 %v10978_v54  ;;  %v11073_v53 = vld [vmem:[%s11750_s26 + $0x190] ss:$8 sps:$4 sm:$0xff]  }
  0x77   : > { %9606 = vmatprep.mubr.msk.bf16.mxu0 %vm3077_vm0, %v10979_v55  ;;  %9734 = vmatprep.mubr.msk.bf16.mxu1 %vm3077_vm0, %v10981_v56  ;;  %v11074_v54 = vld [vmem:[%s11750_s26 + $0x990] ss:$8 sps:$4 sm:$0xff]   ;;  %v11075_v55 = vld [vmem:[%s11750_s26 + $0x1a4] ss:$8 sps:$4 sm:$0xff]  }
  0x78   : > { %v11077_v56 = vld [vmem:[%s11750_s26 + $0x9a4] ss:$8 sps:$4 sm:$0xff]  }
  0x7e   : > { %3966 = vmatmul.mubr.bf16.gmra.mrb[40].mxu0 %v10983_v57  ;;  %4990 = vmatmul.mubr.bf16.gmra.mrb[40].mxu1 %v10984_v58  ;;  %v11079_v57 = vld [vmem:[%s11750_s26 + $0x1a0] ss:$8 sps:$4 sm:$0xff]  }
  0x7f   : > { %9607 = vmatprep.mubr.msk.bf16.mxu0 %vm3077_vm0, %v10985_v59  ;;  %9735 = vmatprep.mubr.msk.bf16.mxu1 %vm3077_vm0, %v10987_v60  ;;  %v11080_v58 = vld [vmem:[%s11750_s26 + $0x9a0] ss:$8 sps:$4 sm:$0xff]   ;;  %v11081_v59 = vld [vmem:[%s11750_s26 + $0x1b4] ss:$8 sps:$4 sm:$0xff]  }
  0x80   : > { %v11083_v60 = vld [vmem:[%s11750_s26 + $0x9b4] ss:$8 sps:$4 sm:$0xff]  }
  0x86   : > { %3974 = vmatmul.mubr.bf16.gmra.mrb[44].mxu0 %v10989_v61  ;;  %4998 = vmatmul.mubr.bf16.gmra.mrb[44].mxu1 %v10990_v62  ;;  %v11937_v61 = vld [vmem:[%s14125_s2] ss:$0 sm:$0xff] }
  0x87   : > { %9608 = vmatprep.mubr.msk.bf16.mxu0 %vm3077_vm0, %v10991_v63  ;;  %9736 = vmatprep.mubr.msk.bf16.mxu1 %vm3077_vm0, %v10993_v0 }
  0x8e   : > { %3982 = vmatmul.mubr.bf16.gmra.mrb[48].mxu0 %v10995_v1  ;;  %5006 = vmatmul.mubr.bf16.gmra.mrb[48].mxu1 %v10996_v2 }
  0x8f   : > { %9609 = vmatprep.mubr.msk.bf16.mxu0 %vm3077_vm0, %v10997_v3  ;;  %9737 = vmatprep.mubr.msk.bf16.mxu1 %vm3077_vm0, %v10999_v4  ;;  %v11085_v4 = vld [vmem:[%s11750_s26 + $0x1b0] ss:$8 sps:$4 sm:$0xff]  }
  0x96   : > { %3990 = vmatmul.mubr.bf16.gmra.mrb[52].mxu0 %v11001_v5  ;;  %5014 = vmatmul.mubr.bf16.gmra.mrb[52].mxu1 %v11002_v6  ;;  %v11086_v5 = vld [vmem:[%s11750_s26 + $0x9b0] ss:$8 sps:$4 sm:$0xff]  }
  0x97   : > { %9610 = vmatprep.mubr.msk.bf16.mxu0 %vm3077_vm0, %v11003_v7  ;;  %9738 = vmatprep.mubr.msk.bf16.mxu1 %vm3077_vm0, %v11005_v8  ;;  %v11087_v8 = vld [vmem:[%s11750_s26 + $0x1c4] ss:$8 sps:$4 sm:$0xff]  }
  0x9e   : > { %3998 = vmatmul.mubr.bf16.gmra.mrb[56].mxu0 %v11007_v9  ;;  %5022 = vmatmul.mubr.bf16.gmra.mrb[56].mxu1 %v11008_v10  ;;  %v11089_v9 = vld [vmem:[%s11750_s26 + $0x9c4] ss:$8 sps:$4 sm:$0xff]  }
  0x9f   : > { %9611 = vmatprep.mubr.msk.bf16.mxu0 %vm3077_vm0, %v11009_v11  ;;  %9739 = vmatprep.mubr.msk.bf16.mxu1 %vm3077_vm0, %v11011_v12 }
  0xa6   : > { %4006 = vmatmul.mubr.bf16.gmra.mrb[60].mxu0 %v11013_v13  ;;  %5030 = vmatmul.mubr.bf16.gmra.mrb[60].mxu1 %v11014_v14 }
  0xa7   : > { %9612 = vmatprep.mubr.msk.bf16.mxu0 %vm3077_vm0, %v11015_v15  ;;  %9740 = vmatprep.mubr.msk.bf16.mxu1 %vm3077_vm0, %v11017_v16 }
  0xae   : > { %4014 = vmatmul.mubr.bf16.gmra.mrb[64].mxu0 %v11019_v17  ;;  %5038 = vmatmul.mubr.bf16.gmra.mrb[64].mxu1 %v11020_v18 }
  0xaf   : > { %9613 = vmatprep.mubr.msk.bf16.mxu0 %vm3077_vm0, %v11021_v19  ;;  %9741 = vmatprep.mubr.msk.bf16.mxu1 %vm3077_vm0, %v11023_v20 }
  0xb6   : > { %4022 = vmatmul.mubr.bf16.gmra.mrb[68].mxu0 %v11025_v21  ;;  %5046 = vmatmul.mubr.bf16.gmra.mrb[68].mxu1 %v11026_v22 }
  0xb7   : > { %9614 = vmatprep.mubr.msk.bf16.mxu0 %vm3077_vm0, %v11027_v23  ;;  %9742 = vmatprep.mubr.msk.bf16.mxu1 %vm3077_vm0, %v11029_v24 }
  0xbe   : > { %4030 = vmatmul.mubr.bf16.gmra.mrb[72].mxu0 %v11031_v25  ;;  %5054 = vmatmul.mubr.bf16.gmra.mrb[72].mxu1 %v11032_v26 }
  0xbf   : > { %9615 = vmatprep.mubr.msk.bf16.mxu0 %vm3077_vm0, %v11033_v27  ;;  %9743 = vmatprep.mubr.msk.bf16.mxu1 %vm3077_vm0, %v11035_v28  ;;  %v11091_v28 = vld [vmem:[%s11750_s26 + $0x1c0] ss:$8 sps:$4 sm:$0xff]  }
  0xc6   : > { %4038 = vmatmul.mubr.bf16.gmra.mrb[76].mxu0 %v11037_v29  ;;  %5062 = vmatmul.mubr.bf16.gmra.mrb[76].mxu1 %v11038_v30  ;;  %v11092_v29 = vld [vmem:[%s11750_s26 + $0x9c0] ss:$8 sps:$4 sm:$0xff]  }
  0xc7   : > { %9616 = vmatprep.mubr.msk.bf16.mxu0 %vm3077_vm0, %v11039_v31  ;;  %9744 = vmatprep.mubr.msk.bf16.mxu1 %vm3077_vm0, %v11041_v32  ;;  %v11093_v32 = vld [vmem:[%s11750_s26 + $0x1d4] ss:$8 sps:$4 sm:$0xff]  }
  0xce   : > { %4046 = vmatmul.mubr.bf16.gmra.mrb[80].mxu0 %v11043_v33  ;;  %5070 = vmatmul.mubr.bf16.gmra.mrb[80].mxu1 %v11044_v34  ;;  %v11095_v33 = vld [vmem:[%s11750_s26 + $0x9d4] ss:$8 sps:$4 sm:$0xff]  }
  0xcf   : > { %9617 = vmatprep.mubr.msk.bf16.mxu0 %vm3077_vm0, %v11045_v35  ;;  %9745 = vmatprep.mubr.msk.bf16.mxu1 %vm3077_vm0, %v11047_v36 }
  0xd6   : > { %4054 = vmatmul.mubr.bf16.gmra.mrb[84].mxu0 %v11049_v37  ;;  %5078 = vmatmul.mubr.bf16.gmra.mrb[84].mxu1 %v11050_v38 }
  0xd7   : > { %9618 = vmatprep.mubr.msk.bf16.mxu0 %vm3077_vm0, %v11051_v39  ;;  %9746 = vmatprep.mubr.msk.bf16.mxu1 %vm3077_vm0, %v11053_v40 }
  0xde   : > { %4062 = vmatmul.mubr.bf16.gmra.mrb[88].mxu0 %v11055_v41  ;;  %5086 = vmatmul.mubr.bf16.gmra.mrb[88].mxu1 %v11056_v42 }
  0xdf   : > { %9619 = vmatprep.mubr.msk.bf16.mxu0 %vm3077_vm0, %v11057_v43  ;;  %9747 = vmatprep.mubr.msk.bf16.mxu1 %vm3077_vm0, %v11059_v44 }
  0xe6   : > { %4070 = vmatmul.mubr.bf16.gmra.mrb[92].mxu0 %v11061_v45  ;;  %5094 = vmatmul.mubr.bf16.gmra.mrb[92].mxu1 %v11062_v46 }
  0xe7   : > { %9620 = vmatprep.mubr.msk.bf16.mxu0 %vm3077_vm0, %v11063_v47  ;;  %9748 = vmatprep.mubr.msk.bf16.mxu1 %vm3077_vm0, %v11065_v48 }
  0xee   : > { %4078 = vmatmul.mubr.bf16.gmra.mrb[96].mxu0 %v11067_v49  ;;  %5102 = vmatmul.mubr.bf16.gmra.mrb[96].mxu1 %v11068_v50 }
  0xef   : > { %9621 = vmatprep.mubr.msk.bf16.mxu0 %vm3077_vm0, %v11069_v51  ;;  %9749 = vmatprep.mubr.msk.bf16.mxu1 %vm3077_vm0, %v11071_v52  ;;  %v11097_v52 = vld [vmem:[%s11750_s26 + $0x1d0] ss:$8 sps:$4 sm:$0xff]  }
  0xf6   : > { %4086 = vmatmul.mubr.bf16.gmra.mrb[100].mxu0 %v11073_v53  ;;  %5110 = vmatmul.mubr.bf16.gmra.mrb[100].mxu1 %v11074_v54  ;;  %v11098_v53 = vld [vmem:[%s11750_s26 + $0x9d0] ss:$8 sps:$4 sm:$0xff]  }
  0xf7   : > { %9622 = vmatprep.mubr.msk.bf16.mxu0 %vm3077_vm0, %v11075_v55  ;;  %9750 = vmatprep.mubr.msk.bf16.mxu1 %vm3077_vm0, %v11077_v56  ;;  %v11099_v56 = vld [vmem:[%s11750_s26 + $0x1e4] ss:$8 sps:$4 sm:$0xff]  }
  0xfe   : > { %4094 = vmatmul.mubr.bf16.gmra.mrb[104].mxu0 %v11079_v57  ;;  %5118 = vmatmul.mubr.bf16.gmra.mrb[104].mxu1 %v11080_v58  ;;  %v11101_v57 = vld [vmem:[%s11750_s26 + $0x9e4] ss:$8 sps:$4 sm:$0xff]  }
  0xff   : > { %9623 = vmatprep.mubr.msk.bf16.mxu0 %vm3077_vm0, %v11081_v59  ;;  %9751 = vmatprep.mubr.msk.bf16.mxu1 %vm3077_vm0, %v11083_v60 }
 0x101   : > { %v3887_v62 = vpop.f32.mrb[0].mxu0  ;;  %v4911_v63 = vpop.f32.mrb[0].mxu1 }
 0x102   : > { %v3888_v0 = vadd.f32 %v11937_v61, %v3887_v62  ;;  %v4912_v1 = vadd.f32 %v11937_v61, %v4911_v63  ;;  %v3889_v2 = vpop.f32.mrb[1].mxu0  ;;  %v4913_v3 = vpop.f32.mrb[1].mxu1 }
 0x103   : > { %v3890_v6 = vpop.f32.mrb[2].mxu0  ;;  %v4914_v7 = vpop.f32.mrb[2].mxu1 }
 0x104   : > { %v5934_v10 = vmax.f32 %v3888_v0, 0.0  ;;  %v6190_v11 = vmax.f32 %v4912_v1, 0.0  ;;  %v3891_v12 = vadd.f32 %v11937_v61, %v3890_v6  ;;  %v4915_v13 = vadd.f32 %v11937_v61, %v4914_v7  ;;  %v3892_v14 = vpop.f32.mrb[3].mxu0  ;;  %v4916_v15 = vpop.f32.mrb[3].mxu1 }
 0x105   : > { %v11104_v14 = vld [vmem:[%s11750_s26 + $0x9e0] ss:$8 sps:$4 sm:$0xff]  }
 0x106   : > { %v10367_v16 = vpack.c.bf16 %v5934_v10, %v5934_v10  ;;  %v10623_v17 = vpack.c.bf16 %v6190_v11, %v6190_v11  ;;  %v5935_v18 = vmax.f32 %v3891_v12, 0.0  ;;  %v6191_v19 = vmax.f32 %v4915_v13, 0.0  ;;  %4102 = vmatmul.mubr.bf16.gmra.mrb[108].mxu0 %v11085_v4  ;;  %5126 = vmatmul.mubr.bf16.gmra.mrb[108].mxu1 %v11086_v5  ;;  %v11103_v13 = vld [vmem:[%s11750_s26 + $0x1e0] ss:$8 sps:$4 sm:$0xff]  }
 0x107   : > { %9624 = vmatprep.mubr.msk.bf16.mxu0 %vm3077_vm0, %v11087_v8  ;;  %9752 = vmatprep.mubr.msk.bf16.mxu1 %vm3077_vm0, %v11089_v9 }
 0x108   : > { %8495 = vst.msk [vmem:[%s11953_s18] sm:$0xf] %vm8494_vm3, %v10367_v16  ;;  %8751 = vst.msk [vmem:[%s11953_s18 + $0x400] sm:$0xf] %vm8494_vm3, %v10623_v17  ;;  %v10368_v20 = vpack.c.bf16 %v5935_v18, %v5935_v18  ;;  %v10624_v21 = vpack.c.bf16 %v6191_v19, %v6191_v19  ;;  %v11105_v17 = vld [vmem:[%s11750_s26 + $0x1f4] ss:$8 sps:$4 sm:$0xff]  }
 0x109   : > { %v3895_v22 = vpop.f32.mrb[4].mxu0  ;;  %v4919_v23 = vpop.f32.mrb[4].mxu1  ;;  %v11107_v18 = vld [vmem:[%s11750_s26 + $0x9f4] ss:$8 sps:$4 sm:$0xff]  }
 0x10a   : > { %8496 = vst.msk [vmem:[%s11953_s18 + $0x4] sm:$0xf] %vm8494_vm3, %v10368_v20  ;;  %8752 = vst.msk [vmem:[%s11953_s18 + $0x404] sm:$0xf] %vm8494_vm3, %v10624_v21  ;;  %v3896_v24 = vadd.f32 %v11937_v61, %v3895_v22  ;;  %v4920_v25 = vadd.f32 %v11937_v61, %v4919_v23  ;;  %v3897_v26 = vpop.f32.mrb[5].mxu0  ;;  %v4921_v27 = vpop.f32.mrb[5].mxu1 }
 0x10b   : > { %v3898_v30 = vpop.f32.mrb[6].mxu0  ;;  %v4922_v31 = vpop.f32.mrb[6].mxu1 }
 0x10c   : > { %v5936_v34 = vmax.f32 %v3896_v24, 0.0  ;;  %v6192_v35 = vmax.f32 %v4920_v25, 0.0  ;;  %v3899_v36 = vadd.f32 %v11937_v61, %v3898_v30  ;;  %v4923_v37 = vadd.f32 %v11937_v61, %v4922_v31  ;;  %v3900_v38 = vpop.f32.mrb[7].mxu0  ;;  %v4924_v39 = vpop.f32.mrb[7].mxu1 }
 0x10d   : > { %v11110_v38 = vld [vmem:[%s11750_s26 + $0x9f0] ss:$8 sps:$4 sm:$0xff]  }
 0x10e   : > { %v10369_v40 = vpack.c.bf16 %v5936_v34, %v5936_v34  ;;  %v10625_v41 = vpack.c.bf16 %v6192_v35, %v6192_v35  ;;  %v5937_v42 = vmax.f32 %v3899_v36, 0.0  ;;  %v6193_v43 = vmax.f32 %v4923_v37, 0.0  ;;  %4110 = vmatmul.mubr.bf16.gmra.mrb[112].mxu0 %v11091_v28  ;;  %5134 = vmatmul.mubr.bf16.gmra.mrb[112].mxu1 %v11092_v29  ;;  %v11109_v37 = vld [vmem:[%s11750_s26 + $0x1f0] ss:$8 sps:$4 sm:$0xff]  }
 0x10f   : > { %9625 = vmatprep.mubr.msk.bf16.mxu0 %vm3077_vm0, %v11093_v32  ;;  %9753 = vmatprep.mubr.msk.bf16.mxu1 %vm3077_vm0, %v11095_v33 }
 0x110   : > { %8497 = vst.msk [vmem:[%s11953_s18 + $0x8] sm:$0xf] %vm8494_vm3, %v10369_v40  ;;  %8753 = vst.msk [vmem:[%s11953_s18 + $0x408] sm:$0xf] %vm8494_vm3, %v10625_v41  ;;  %v10370_v44 = vpack.c.bf16 %v5937_v42, %v5937_v42  ;;  %v10626_v45 = vpack.c.bf16 %v6193_v43, %v6193_v43  ;;  %v11111_v41 = vld [vmem:[%s11750_s26 + $0x204] ss:$8 sps:$4 sm:$0xff]  }
 0x111   : > { %v3903_v46 = vpop.f32.mrb[8].mxu0  ;;  %v4927_v47 = vpop.f32.mrb[8].mxu1  ;;  %v11113_v42 = vld [vmem:[%s11750_s26 + $0xa04] ss:$8 sps:$4 sm:$0xff]  }
 0x112   : > { %8498 = vst.msk [vmem:[%s11953_s18 + $0xc] sm:$0xf] %vm8494_vm3, %v10370_v44  ;;  %8754 = vst.msk [vmem:[%s11953_s18 + $0x40c] sm:$0xf] %vm8494_vm3, %v10626_v45  ;;  %v3904_v48 = vadd.f32 %v11937_v61, %v3903_v46  ;;  %v4928_v49 = vadd.f32 %v11937_v61, %v4927_v47  ;;  %v3905_v50 = vpop.f32.mrb[9].mxu0  ;;  %v4929_v51 = vpop.f32.mrb[9].mxu1 }
 0x113   : > { %v3906_v54 = vpop.f32.mrb[10].mxu0  ;;  %v4930_v55 = vpop.f32.mrb[10].mxu1 }
 0x114   : > { %v5938_v58 = vmax.f32 %v3904_v48, 0.0  ;;  %v6194_v59 = vmax.f32 %v4928_v49, 0.0  ;;  %v3907_v60 = vadd.f32 %v11937_v61, %v3906_v54  ;;  %v4931_v62 = vadd.f32 %v11937_v61, %v4930_v55  ;;  %v3908_v63 = vpop.f32.mrb[11].mxu0  ;;  %v4932_v0 = vpop.f32.mrb[11].mxu1 }
 0x115   : > { %v11116_v63 = vld [vmem:[%s11750_s26 + $0xa00] ss:$8 sps:$4 sm:$0xff]  }
 0x116   : > { %v10371_v1 = vpack.c.bf16 %v5938_v58, %v5938_v58  ;;  %v10627_v2 = vpack.c.bf16 %v6194_v59, %v6194_v59  ;;  %v5939_v3 = vmax.f32 %v3907_v60, 0.0  ;;  %v6195_v4 = vmax.f32 %v4931_v62, 0.0  ;;  %4118 = vmatmul.mubr.bf16.gmra.mrb[116].mxu0 %v11097_v52  ;;  %5142 = vmatmul.mubr.bf16.gmra.mrb[116].mxu1 %v11098_v53  ;;  %v11115_v62 = vld [vmem:[%s11750_s26 + $0x200] ss:$8 sps:$4 sm:$0xff]  }
 0x117   : > { %9626 = vmatprep.mubr.msk.bf16.mxu0 %vm3077_vm0, %v11099_v56  ;;  %9754 = vmatprep.mubr.msk.bf16.mxu1 %vm3077_vm0, %v11101_v57 }
 0x118   : > { %8499 = vst.msk [vmem:[%s11953_s18 + $0x10] sm:$0xf] %vm8494_vm3, %v10371_v1  ;;  %8755 = vst.msk [vmem:[%s11953_s18 + $0x410] sm:$0xf] %vm8494_vm3, %v10627_v2  ;;  %v10372_v5 = vpack.c.bf16 %v5939_v3, %v5939_v3  ;;  %v10628_v6 = vpack.c.bf16 %v6195_v4, %v6195_v4  ;;  %v11117_v2 = vld [vmem:[%s11750_s26 + $0x214] ss:$8 sps:$4 sm:$0xff]  }
 0x119   : > { %v3911_v7 = vpop.f32.mrb[12].mxu0  ;;  %v4935_v8 = vpop.f32.mrb[12].mxu1  ;;  %v11119_v3 = vld [vmem:[%s11750_s26 + $0xa14] ss:$8 sps:$4 sm:$0xff]  }
 0x11a   : > { %8500 = vst.msk [vmem:[%s11953_s18 + $0x14] sm:$0xf] %vm8494_vm3, %v10372_v5  ;;  %8756 = vst.msk [vmem:[%s11953_s18 + $0x414] sm:$0xf] %vm8494_vm3, %v10628_v6  ;;  %v3912_v9 = vadd.f32 %v11937_v61, %v3911_v7  ;;  %v4936_v10 = vadd.f32 %v11937_v61, %v4935_v8  ;;  %v3913_v11 = vpop.f32.mrb[13].mxu0  ;;  %v4937_v12 = vpop.f32.mrb[13].mxu1 }
 0x11b   : > { %v3914_v15 = vpop.f32.mrb[14].mxu0  ;;  %v4938_v16 = vpop.f32.mrb[14].mxu1 }
 0x11c   : > { %v5940_v19 = vmax.f32 %v3912_v9, 0.0  ;;  %v6196_v20 = vmax.f32 %v4936_v10, 0.0  ;;  %v3915_v21 = vadd.f32 %v11937_v61, %v3914_v15  ;;  %v4939_v22 = vadd.f32 %v11937_v61, %v4938_v16  ;;  %v3916_v23 = vpop.f32.mrb[15].mxu0  ;;  %v4940_v24 = vpop.f32.mrb[15].mxu1 }
 0x11d   : > { %v11122_v23 = vld [vmem:[%s11750_s26 + $0xa10] ss:$8 sps:$4 sm:$0xff]  }
 0x11e   : > { %v10373_v25 = vpack.c.bf16 %v5940_v19, %v5940_v19  ;;  %v10629_v26 = vpack.c.bf16 %v6196_v20, %v6196_v20  ;;  %v5941_v27 = vmax.f32 %v3915_v21, 0.0  ;;  %v6197_v28 = vmax.f32 %v4939_v22, 0.0  ;;  %4126 = vmatmul.mubr.bf16.gmra.mrb[120].mxu0 %v11103_v13  ;;  %5150 = vmatmul.mubr.bf16.gmra.mrb[120].mxu1 %v11104_v14  ;;  %v11121_v22 = vld [vmem:[%s11750_s26 + $0x210] ss:$8 sps:$4 sm:$0xff]  }
 0x11f   : > { %9627 = vmatprep.mubr.msk.bf16.mxu0 %vm3077_vm0, %v11105_v17  ;;  %9755 = vmatprep.mubr.msk.bf16.mxu1 %vm3077_vm0, %v11107_v18 }
 0x120   : > { %8501 = vst.msk [vmem:[%s11953_s18 + $0x18] sm:$0xf] %vm8494_vm3, %v10373_v25  ;;  %8757 = vst.msk [vmem:[%s11953_s18 + $0x418] sm:$0xf] %vm8494_vm3, %v10629_v26  ;;  %v10374_v29 = vpack.c.bf16 %v5941_v27, %v5941_v27  ;;  %v10630_v30 = vpack.c.bf16 %v6197_v28, %v6197_v28  ;;  %v11123_v26 = vld [vmem:[%s11750_s26 + $0x224] ss:$8 sps:$4 sm:$0xff]  }
 0x121   : > { %v3919_v31 = vpop.f32.mrb[16].mxu0  ;;  %v4943_v32 = vpop.f32.mrb[16].mxu1  ;;  %v11125_v27 = vld [vmem:[%s11750_s26 + $0xa24] ss:$8 sps:$4 sm:$0xff]  }
 0x122   : > { %8502 = vst.msk [vmem:[%s11953_s18 + $0x1c] sm:$0xf] %vm8494_vm3, %v10374_v29  ;;  %8758 = vst.msk [vmem:[%s11953_s18 + $0x41c] sm:$0xf] %vm8494_vm3, %v10630_v30  ;;  %v3920_v33 = vadd.f32 %v11937_v61, %v3919_v31  ;;  %v4944_v34 = vadd.f32 %v11937_v61, %v4943_v32  ;;  %v3921_v35 = vpop.f32.mrb[17].mxu0  ;;  %v4945_v36 = vpop.f32.mrb[17].mxu1 }
 0x123   : > { %v3922_v39 = vpop.f32.mrb[18].mxu0  ;;  %v4946_v40 = vpop.f32.mrb[18].mxu1 }
 0x124   : > { %v5942_v43 = vmax.f32 %v3920_v33, 0.0  ;;  %v6198_v44 = vmax.f32 %v4944_v34, 0.0  ;;  %v3923_v45 = vadd.f32 %v11937_v61, %v3922_v39  ;;  %v4947_v46 = vadd.f32 %v11937_v61, %v4946_v40  ;;  %v3924_v47 = vpop.f32.mrb[19].mxu0  ;;  %v4948_v48 = vpop.f32.mrb[19].mxu1 }
 0x125   : > { %v11128_v47 = vld [vmem:[%s11750_s26 + $0xa20] ss:$8 sps:$4 sm:$0xff]  }
 0x126   : > { %v10375_v49 = vpack.c.bf16 %v5942_v43, %v5942_v43  ;;  %v10631_v50 = vpack.c.bf16 %v6198_v44, %v6198_v44  ;;  %v5943_v51 = vmax.f32 %v3923_v45, 0.0  ;;  %v6199_v52 = vmax.f32 %v4947_v46, 0.0  ;;  %4134 = vmatmul.mubr.bf16.gmra.mrb[124].mxu0 %v11109_v37  ;;  %5158 = vmatmul.mubr.bf16.gmra.mrb[124].mxu1 %v11110_v38  ;;  %v11127_v46 = vld [vmem:[%s11750_s26 + $0x220] ss:$8 sps:$4 sm:$0xff]  }
 0x127   : > { %9628 = vmatprep.mubr.msk.bf16.mxu0 %vm3077_vm0, %v11111_v41  ;;  %9756 = vmatprep.mubr.msk.bf16.mxu1 %vm3077_vm0, %v11113_v42 }
 0x128   : > { %8503 = vst.msk [vmem:[%s11953_s18 + $0x20] sm:$0xf] %vm8494_vm3, %v10375_v49  ;;  %8759 = vst.msk [vmem:[%s11953_s18 + $0x420] sm:$0xf] %vm8494_vm3, %v10631_v50  ;;  %v10376_v53 = vpack.c.bf16 %v5943_v51, %v5943_v51  ;;  %v10632_v54 = vpack.c.bf16 %v6199_v52, %v6199_v52  ;;  %v11129_v50 = vld [vmem:[%s11750_s26 + $0x234] ss:$8 sps:$4 sm:$0xff]  }
 0x129   : > { %v3927_v55 = vpop.f32.mrb[20].mxu0  ;;  %v4951_v56 = vpop.f32.mrb[20].mxu1  ;;  %v11131_v51 = vld [vmem:[%s11750_s26 + $0xa34] ss:$8 sps:$4 sm:$0xff]  }
 0x12a   : > { %8504 = vst.msk [vmem:[%s11953_s18 + $0x24] sm:$0xf] %vm8494_vm3, %v10376_v53  ;;  %8760 = vst.msk [vmem:[%s11953_s18 + $0x424] sm:$0xf] %vm8494_vm3, %v10632_v54  ;;  %v3928_v57 = vadd.f32 %v11937_v61, %v3927_v55  ;;  %v4952_v58 = vadd.f32 %v11937_v61, %v4951_v56  ;;  %v3929_v59 = vpop.f32.mrb[21].mxu0  ;;  %v4953_v60 = vpop.f32.mrb[21].mxu1 }
 0x12b   : > { %v3930_v0 = vpop.f32.mrb[22].mxu0  ;;  %v4954_v1 = vpop.f32.mrb[22].mxu1 }
 0x12c   : > { %v5944_v4 = vmax.f32 %v3928_v57, 0.0  ;;  %v6200_v5 = vmax.f32 %v4952_v58, 0.0  ;;  %v3931_v6 = vadd.f32 %v11937_v61, %v3930_v0  ;;  %v4955_v7 = vadd.f32 %v11937_v61, %v4954_v1  ;;  %v3932_v8 = vpop.f32.mrb[23].mxu0  ;;  %v4956_v9 = vpop.f32.mrb[23].mxu1 }
 0x12d   : > { %v11134_v8 = vld [vmem:[%s11750_s26 + $0xa30] ss:$8 sps:$4 sm:$0xff]  }
 0x12e   : > { %v10377_v10 = vpack.c.bf16 %v5944_v4, %v5944_v4  ;;  %v10633_v11 = vpack.c.bf16 %v6200_v5, %v6200_v5  ;;  %v5945_v12 = vmax.f32 %v3931_v6, 0.0  ;;  %v6201_v13 = vmax.f32 %v4955_v7, 0.0  ;;  %4142 = vmatmul.mubr.bf16.gmra.mrb[128].mxu0 %v11115_v62  ;;  %5166 = vmatmul.mubr.bf16.gmra.mrb[128].mxu1 %v11116_v63  ;;  %v11133_v7 = vld [vmem:[%s11750_s26 + $0x230] ss:$8 sps:$4 sm:$0xff]  }
 0x12f   : > { %9629 = vmatprep.mubr.msk.bf16.mxu0 %vm3077_vm0, %v11117_v2  ;;  %9757 = vmatprep.mubr.msk.bf16.mxu1 %vm3077_vm0, %v11119_v3 }
 0x130   : > { %8505 = vst.msk [vmem:[%s11953_s18 + $0x28] sm:$0xf] %vm8494_vm3, %v10377_v10  ;;  %8761 = vst.msk [vmem:[%s11953_s18 + $0x428] sm:$0xf] %vm8494_vm3, %v10633_v11  ;;  %v10378_v14 = vpack.c.bf16 %v5945_v12, %v5945_v12  ;;  %v10634_v15 = vpack.c.bf16 %v6201_v13, %v6201_v13  ;;  %v11135_v11 = vld [vmem:[%s11750_s26 + $0x244] ss:$8 sps:$4 sm:$0xff]  }
 0x131   : > { %v3935_v16 = vpop.f32.mrb[24].mxu0  ;;  %v4959_v17 = vpop.f32.mrb[24].mxu1  ;;  %v11137_v12 = vld [vmem:[%s11750_s26 + $0xa44] ss:$8 sps:$4 sm:$0xff]  }
 0x132   : > { %8506 = vst.msk [vmem:[%s11953_s18 + $0x2c] sm:$0xf] %vm8494_vm3, %v10378_v14  ;;  %8762 = vst.msk [vmem:[%s11953_s18 + $0x42c] sm:$0xf] %vm8494_vm3, %v10634_v15  ;;  %v3936_v18 = vadd.f32 %v11937_v61, %v3935_v16  ;;  %v4960_v19 = vadd.f32 %v11937_v61, %v4959_v17  ;;  %v3937_v20 = vpop.f32.mrb[25].mxu0  ;;  %v4961_v21 = vpop.f32.mrb[25].mxu1 }
 0x133   : > { %v3938_v24 = vpop.f32.mrb[26].mxu0  ;;  %v4962_v25 = vpop.f32.mrb[26].mxu1 }
 0x134   : > { %v5946_v28 = vmax.f32 %v3936_v18, 0.0  ;;  %v6202_v29 = vmax.f32 %v4960_v19, 0.0  ;;  %v3939_v30 = vadd.f32 %v11937_v61, %v3938_v24  ;;  %v4963_v31 = vadd.f32 %v11937_v61, %v4962_v25  ;;  %v3940_v32 = vpop.f32.mrb[27].mxu0  ;;  %v4964_v33 = vpop.f32.mrb[27].mxu1 }
 0x135   : > { %v11140_v32 = vld [vmem:[%s11750_s26 + $0xa40] ss:$8 sps:$4 sm:$0xff]  }
 0x136   : > { %v10379_v34 = vpack.c.bf16 %v5946_v28, %v5946_v28  ;;  %v10635_v35 = vpack.c.bf16 %v6202_v29, %v6202_v29  ;;  %v5947_v36 = vmax.f32 %v3939_v30, 0.0  ;;  %v6203_v37 = vmax.f32 %v4963_v31, 0.0  ;;  %4150 = vmatmul.mubr.bf16.gmra.mrb[132].mxu0 %v11121_v22  ;;  %5174 = vmatmul.mubr.bf16.gmra.mrb[132].mxu1 %v11122_v23  ;;  %v11139_v31 = vld [vmem:[%s11750_s26 + $0x240] ss:$8 sps:$4 sm:$0xff]  }
 0x137   : > { %9630 = vmatprep.mubr.msk.bf16.mxu0 %vm3077_vm0, %v11123_v26  ;;  %9758 = vmatprep.mubr.msk.bf16.mxu1 %vm3077_vm0, %v11125_v27 }
 0x138   : > { %8507 = vst.msk [vmem:[%s11953_s18 + $0x30] sm:$0xf] %vm8494_vm3, %v10379_v34  ;;  %8763 = vst.msk [vmem:[%s11953_s18 + $0x430] sm:$0xf] %vm8494_vm3, %v10635_v35  ;;  %v10380_v38 = vpack.c.bf16 %v5947_v36, %v5947_v36  ;;  %v10636_v39 = vpack.c.bf16 %v6203_v37, %v6203_v37  ;;  %v11141_v35 = vld [vmem:[%s11750_s26 + $0x254] ss:$8 sps:$4 sm:$0xff]  }
 0x139   : > { %v3943_v40 = vpop.f32.mrb[28].mxu0  ;;  %v4967_v41 = vpop.f32.mrb[28].mxu1  ;;  %v11143_v36 = vld [vmem:[%s11750_s26 + $0xa54] ss:$8 sps:$4 sm:$0xff]  }
 0x13a   : > { %8508 = vst.msk [vmem:[%s11953_s18 + $0x34] sm:$0xf] %vm8494_vm3, %v10380_v38  ;;  %8764 = vst.msk [vmem:[%s11953_s18 + $0x434] sm:$0xf] %vm8494_vm3, %v10636_v39  ;;  %v3944_v42 = vadd.f32 %v11937_v61, %v3943_v40  ;;  %v4968_v43 = vadd.f32 %v11937_v61, %v4967_v41  ;;  %v3945_v44 = vpop.f32.mrb[29].mxu0  ;;  %v4969_v45 = vpop.f32.mrb[29].mxu1 }
 0x13b   : > { %v3946_v48 = vpop.f32.mrb[30].mxu0  ;;  %v4970_v49 = vpop.f32.mrb[30].mxu1 }
 0x13c   : > { %v5948_v52 = vmax.f32 %v3944_v42, 0.0  ;;  %v6204_v53 = vmax.f32 %v4968_v43, 0.0  ;;  %v3947_v54 = vadd.f32 %v11937_v61, %v3946_v48  ;;  %v4971_v55 = vadd.f32 %v11937_v61, %v4970_v49  ;;  %v3948_v56 = vpop.f32.mrb[31].mxu0  ;;  %v4972_v57 = vpop.f32.mrb[31].mxu1 }
 0x13d   : > { %v11146_v56 = vld [vmem:[%s11750_s26 + $0xa50] ss:$8 sps:$4 sm:$0xff]  }
 0x13e   : > { %v10381_v58 = vpack.c.bf16 %v5948_v52, %v5948_v52  ;;  %v10637_v59 = vpack.c.bf16 %v6204_v53, %v6204_v53  ;;  %v5949_v60 = vmax.f32 %v3947_v54, 0.0  ;;  %v6205_v62 = vmax.f32 %v4971_v55, 0.0  ;;  %4158 = vmatmul.mubr.bf16.gmra.mrb[136].mxu0 %v11127_v46  ;;  %5182 = vmatmul.mubr.bf16.gmra.mrb[136].mxu1 %v11128_v47  ;;  %v11145_v55 = vld [vmem:[%s11750_s26 + $0x250] ss:$8 sps:$4 sm:$0xff]  }
 0x13f   : > { %9631 = vmatprep.mubr.msk.bf16.mxu0 %vm3077_vm0, %v11129_v50  ;;  %9759 = vmatprep.mubr.msk.bf16.mxu1 %vm3077_vm0, %v11131_v51 }
 0x140   : > { %8509 = vst.msk [vmem:[%s11953_s18 + $0x38] sm:$0xf] %vm8494_vm3, %v10381_v58  ;;  %8765 = vst.msk [vmem:[%s11953_s18 + $0x438] sm:$0xf] %vm8494_vm3, %v10637_v59  ;;  %v10382_v63 = vpack.c.bf16 %v5949_v60, %v5949_v60  ;;  %v10638_v0 = vpack.c.bf16 %v6205_v62, %v6205_v62  ;;  %v11147_v59 = vld [vmem:[%s11750_s26 + $0x264] ss:$8 sps:$4 sm:$0xff]  }
 0x141   : > { %v3951_v1 = vpop.f32.mrb[32].mxu0  ;;  %v4975_v2 = vpop.f32.mrb[32].mxu1  ;;  %v11149_v60 = vld [vmem:[%s11750_s26 + $0xa64] ss:$8 sps:$4 sm:$0xff]  }
 0x142   : > { %8510 = vst.msk [vmem:[%s11953_s18 + $0x3c] sm:$0xf] %vm8494_vm3, %v10382_v63  ;;  %8766 = vst.msk [vmem:[%s11953_s18 + $0x43c] sm:$0xf] %vm8494_vm3, %v10638_v0  ;;  %v3952_v3 = vadd.f32 %v11937_v61, %v3951_v1  ;;  %v4976_v4 = vadd.f32 %v11937_v61, %v4975_v2  ;;  %v3953_v5 = vpop.f32.mrb[33].mxu0  ;;  %v4977_v6 = vpop.f32.mrb[33].mxu1 }
 0x143   : > { %v3954_v9 = vpop.f32.mrb[34].mxu0  ;;  %v4978_v10 = vpop.f32.mrb[34].mxu1 }
 0x144   : > { %v5950_v13 = vmax.f32 %v3952_v3, 0.0  ;;  %v6206_v14 = vmax.f32 %v4976_v4, 0.0  ;;  %v3955_v15 = vadd.f32 %v11937_v61, %v3954_v9  ;;  %v4979_v16 = vadd.f32 %v11937_v61, %v4978_v10  ;;  %v3956_v17 = vpop.f32.mrb[35].mxu0  ;;  %v4980_v18 = vpop.f32.mrb[35].mxu1 }
 0x145   : > { %v11152_v17 = vld [vmem:[%s11750_s26 + $0xa60] ss:$8 sps:$4 sm:$0xff]  }
 0x146   : > { %v10383_v19 = vpack.c.bf16 %v5950_v13, %v5950_v13  ;;  %v10639_v20 = vpack.c.bf16 %v6206_v14, %v6206_v14  ;;  %v5951_v21 = vmax.f32 %v3955_v15, 0.0  ;;  %v6207_v22 = vmax.f32 %v4979_v16, 0.0  ;;  %4166 = vmatmul.mubr.bf16.gmra.mrb[140].mxu0 %v11133_v7  ;;  %5190 = vmatmul.mubr.bf16.gmra.mrb[140].mxu1 %v11134_v8  ;;  %v11151_v16 = vld [vmem:[%s11750_s26 + $0x260] ss:$8 sps:$4 sm:$0xff]  }
 0x147   : > { %9632 = vmatprep.mubr.msk.bf16.mxu0 %vm3077_vm0, %v11135_v11  ;;  %9760 = vmatprep.mubr.msk.bf16.mxu1 %vm3077_vm0, %v11137_v12 }
 0x148   : > { %8511 = vst.msk [vmem:[%s11953_s18 + $0x40] sm:$0xf] %vm8494_vm3, %v10383_v19  ;;  %8767 = vst.msk [vmem:[%s11953_s18 + $0x440] sm:$0xf] %vm8494_vm3, %v10639_v20  ;;  %v10384_v23 = vpack.c.bf16 %v5951_v21, %v5951_v21  ;;  %v10640_v24 = vpack.c.bf16 %v6207_v22, %v6207_v22  ;;  %v11153_v20 = vld [vmem:[%s11750_s26 + $0x274] ss:$8 sps:$4 sm:$0xff]  }
 0x149   : > { %v3959_v25 = vpop.f32.mrb[36].mxu0  ;;  %v4983_v26 = vpop.f32.mrb[36].mxu1  ;;  %v11155_v21 = vld [vmem:[%s11750_s26 + $0xa74] ss:$8 sps:$4 sm:$0xff]  }
 0x14a   : > { %8512 = vst.msk [vmem:[%s11953_s18 + $0x44] sm:$0xf] %vm8494_vm3, %v10384_v23  ;;  %8768 = vst.msk [vmem:[%s11953_s18 + $0x444] sm:$0xf] %vm8494_vm3, %v10640_v24  ;;  %v3960_v27 = vadd.f32 %v11937_v61, %v3959_v25  ;;  %v4984_v28 = vadd.f32 %v11937_v61, %v4983_v26  ;;  %v3961_v29 = vpop.f32.mrb[37].mxu0  ;;  %v4985_v30 = vpop.f32.mrb[37].mxu1 }
 0x14b   : > { %v3962_v33 = vpop.f32.mrb[38].mxu0  ;;  %v4986_v34 = vpop.f32.mrb[38].mxu1 }
 0x14c   : > { %v5952_v37 = vmax.f32 %v3960_v27, 0.0  ;;  %v6208_v38 = vmax.f32 %v4984_v28, 0.0  ;;  %v3963_v39 = vadd.f32 %v11937_v61, %v3962_v33  ;;  %v4987_v40 = vadd.f32 %v11937_v61, %v4986_v34  ;;  %v3964_v41 = vpop.f32.mrb[39].mxu0  ;;  %v4988_v42 = vpop.f32.mrb[39].mxu1 }
 0x14d   : > { %v11158_v41 = vld [vmem:[%s11750_s26 + $0xa70] ss:$8 sps:$4 sm:$0xff]  }
 0x14e   : > { %v10385_v43 = vpack.c.bf16 %v5952_v37, %v5952_v37  ;;  %v10641_v44 = vpack.c.bf16 %v6208_v38, %v6208_v38  ;;  %v5953_v45 = vmax.f32 %v3963_v39, 0.0  ;;  %v6209_v46 = vmax.f32 %v4987_v40, 0.0  ;;  %4174 = vmatmul.mubr.bf16.gmra.mrb[144].mxu0 %v11139_v31  ;;  %5198 = vmatmul.mubr.bf16.gmra.mrb[144].mxu1 %v11140_v32  ;;  %v11157_v40 = vld [vmem:[%s11750_s26 + $0x270] ss:$8 sps:$4 sm:$0xff]  }
 0x14f   : > { %9633 = vmatprep.mubr.msk.bf16.mxu0 %vm3077_vm0, %v11141_v35  ;;  %9761 = vmatprep.mubr.msk.bf16.mxu1 %vm3077_vm0, %v11143_v36 }
 0x150   : > { %8513 = vst.msk [vmem:[%s11953_s18 + $0x48] sm:$0xf] %vm8494_vm3, %v10385_v43  ;;  %8769 = vst.msk [vmem:[%s11953_s18 + $0x448] sm:$0xf] %vm8494_vm3, %v10641_v44  ;;  %v10386_v47 = vpack.c.bf16 %v5953_v45, %v5953_v45  ;;  %v10642_v48 = vpack.c.bf16 %v6209_v46, %v6209_v46  ;;  %v11159_v44 = vld [vmem:[%s11750_s26 + $0x284] ss:$8 sps:$4 sm:$0xff]  }
 0x151   : > { %v3967_v49 = vpop.f32.mrb[40].mxu0  ;;  %v4991_v50 = vpop.f32.mrb[40].mxu1  ;;  %v11161_v45 = vld [vmem:[%s11750_s26 + $0xa84] ss:$8 sps:$4 sm:$0xff]  }
 0x152   : > { %8514 = vst.msk [vmem:[%s11953_s18 + $0x4c] sm:$0xf] %vm8494_vm3, %v10386_v47  ;;  %8770 = vst.msk [vmem:[%s11953_s18 + $0x44c] sm:$0xf] %vm8494_vm3, %v10642_v48  ;;  %v3968_v51 = vadd.f32 %v11937_v61, %v3967_v49  ;;  %v4992_v52 = vadd.f32 %v11937_v61, %v4991_v50  ;;  %v3969_v53 = vpop.f32.mrb[41].mxu0  ;;  %v4993_v54 = vpop.f32.mrb[41].mxu1 }
 0x153   : > { %v3970_v57 = vpop.f32.mrb[42].mxu0  ;;  %v4994_v58 = vpop.f32.mrb[42].mxu1 }
 0x154   : > { %v5954_v62 = vmax.f32 %v3968_v51, 0.0  ;;  %v6210_v63 = vmax.f32 %v4992_v52, 0.0  ;;  %v3971_v0 = vadd.f32 %v11937_v61, %v3970_v57  ;;  %v4995_v1 = vadd.f32 %v11937_v61, %v4994_v58  ;;  %v3972_v2 = vpop.f32.mrb[43].mxu0  ;;  %v4996_v3 = vpop.f32.mrb[43].mxu1 }
 0x155   : > { %v11164_v2 = vld [vmem:[%s11750_s26 + $0xa80] ss:$8 sps:$4 sm:$0xff]  }
 0x156   : > { %v10387_v4 = vpack.c.bf16 %v5954_v62, %v5954_v62  ;;  %v10643_v5 = vpack.c.bf16 %v6210_v63, %v6210_v63  ;;  %v5955_v6 = vmax.f32 %v3971_v0, 0.0  ;;  %v6211_v7 = vmax.f32 %v4995_v1, 0.0  ;;  %4182 = vmatmul.mubr.bf16.gmra.mrb[148].mxu0 %v11145_v55  ;;  %5206 = vmatmul.mubr.bf16.gmra.mrb[148].mxu1 %v11146_v56  ;;  %v11163_v1 = vld [vmem:[%s11750_s26 + $0x280] ss:$8 sps:$4 sm:$0xff]  }
 0x157   : > { %9634 = vmatprep.mubr.msk.bf16.mxu0 %vm3077_vm0, %v11147_v59  ;;  %9762 = vmatprep.mubr.msk.bf16.mxu1 %vm3077_vm0, %v11149_v60 }
 0x158   : > { %8515 = vst.msk [vmem:[%s11953_s18 + $0x50] sm:$0xf] %vm8494_vm3, %v10387_v4  ;;  %8771 = vst.msk [vmem:[%s11953_s18 + $0x450] sm:$0xf] %vm8494_vm3, %v10643_v5  ;;  %v10388_v8 = vpack.c.bf16 %v5955_v6, %v5955_v6  ;;  %v10644_v9 = vpack.c.bf16 %v6211_v7, %v6211_v7  ;;  %v11165_v5 = vld [vmem:[%s11750_s26 + $0x294] ss:$8 sps:$4 sm:$0xff]  }
 0x159   : > { %v3975_v10 = vpop.f32.mrb[44].mxu0  ;;  %v4999_v11 = vpop.f32.mrb[44].mxu1  ;;  %v11167_v6 = vld [vmem:[%s11750_s26 + $0xa94] ss:$8 sps:$4 sm:$0xff]  }
 0x15a   : > { %8516 = vst.msk [vmem:[%s11953_s18 + $0x54] sm:$0xf] %vm8494_vm3, %v10388_v8  ;;  %8772 = vst.msk [vmem:[%s11953_s18 + $0x454] sm:$0xf] %vm8494_vm3, %v10644_v9  ;;  %v3976_v12 = vadd.f32 %v11937_v61, %v3975_v10  ;;  %v5000_v13 = vadd.f32 %v11937_v61, %v4999_v11  ;;  %v3977_v14 = vpop.f32.mrb[45].mxu0  ;;  %v5001_v15 = vpop.f32.mrb[45].mxu1 }
 0x15b   : > { %v3978_v18 = vpop.f32.mrb[46].mxu0  ;;  %v5002_v19 = vpop.f32.mrb[46].mxu1 }
 0x15c   : > { %v5956_v22 = vmax.f32 %v3976_v12, 0.0  ;;  %v6212_v23 = vmax.f32 %v5000_v13, 0.0  ;;  %v3979_v24 = vadd.f32 %v11937_v61, %v3978_v18  ;;  %v5003_v25 = vadd.f32 %v11937_v61, %v5002_v19  ;;  %v3980_v26 = vpop.f32.mrb[47].mxu0  ;;  %v5004_v27 = vpop.f32.mrb[47].mxu1 }
 0x15d   : > { %v11170_v26 = vld [vmem:[%s11750_s26 + $0xa90] ss:$8 sps:$4 sm:$0xff]  }
 0x15e   : > { %v10389_v28 = vpack.c.bf16 %v5956_v22, %v5956_v22  ;;  %v10645_v29 = vpack.c.bf16 %v6212_v23, %v6212_v23  ;;  %v5957_v30 = vmax.f32 %v3979_v24, 0.0  ;;  %v6213_v31 = vmax.f32 %v5003_v25, 0.0  ;;  %4190 = vmatmul.mubr.bf16.gmra.mrb[152].mxu0 %v11151_v16  ;;  %5214 = vmatmul.mubr.bf16.gmra.mrb[152].mxu1 %v11152_v17  ;;  %v11169_v25 = vld [vmem:[%s11750_s26 + $0x290] ss:$8 sps:$4 sm:$0xff]  }
 0x15f   : > { %9635 = vmatprep.mubr.msk.bf16.mxu0 %vm3077_vm0, %v11153_v20  ;;  %9763 = vmatprep.mubr.msk.bf16.mxu1 %vm3077_vm0, %v11155_v21 }
 0x160   : > { %8517 = vst.msk [vmem:[%s11953_s18 + $0x58] sm:$0xf] %vm8494_vm3, %v10389_v28  ;;  %8773 = vst.msk [vmem:[%s11953_s18 + $0x458] sm:$0xf] %vm8494_vm3, %v10645_v29  ;;  %v10390_v32 = vpack.c.bf16 %v5957_v30, %v5957_v30  ;;  %v10646_v33 = vpack.c.bf16 %v6213_v31, %v6213_v31  ;;  %v11171_v29 = vld [vmem:[%s11750_s26 + $0x2a4] ss:$8 sps:$4 sm:$0xff]  }
 0x161   : > { %v3983_v34 = vpop.f32.mrb[48].mxu0  ;;  %v5007_v35 = vpop.f32.mrb[48].mxu1  ;;  %v11173_v30 = vld [vmem:[%s11750_s26 + $0xaa4] ss:$8 sps:$4 sm:$0xff]  }
 0x162   : > { %8518 = vst.msk [vmem:[%s11953_s18 + $0x5c] sm:$0xf] %vm8494_vm3, %v10390_v32  ;;  %8774 = vst.msk [vmem:[%s11953_s18 + $0x45c] sm:$0xf] %vm8494_vm3, %v10646_v33  ;;  %v3984_v36 = vadd.f32 %v11937_v61, %v3983_v34  ;;  %v5008_v37 = vadd.f32 %v11937_v61, %v5007_v35  ;;  %v3985_v38 = vpop.f32.mrb[49].mxu0  ;;  %v5009_v39 = vpop.f32.mrb[49].mxu1 }
 0x163   : > { %v3986_v42 = vpop.f32.mrb[50].mxu0  ;;  %v5010_v43 = vpop.f32.mrb[50].mxu1 }
 0x164   : > { %v5958_v46 = vmax.f32 %v3984_v36, 0.0  ;;  %v6214_v47 = vmax.f32 %v5008_v37, 0.0  ;;  %v3987_v48 = vadd.f32 %v11937_v61, %v3986_v42  ;;  %v5011_v49 = vadd.f32 %v11937_v61, %v5010_v43  ;;  %v3988_v50 = vpop.f32.mrb[51].mxu0  ;;  %v5012_v51 = vpop.f32.mrb[51].mxu1 }
 0x165   : > { %v11176_v50 = vld [vmem:[%s11750_s26 + $0xaa0] ss:$8 sps:$4 sm:$0xff]  }
 0x166   : > { %v10391_v52 = vpack.c.bf16 %v5958_v46, %v5958_v46  ;;  %v10647_v53 = vpack.c.bf16 %v6214_v47, %v6214_v47  ;;  %v5959_v54 = vmax.f32 %v3987_v48, 0.0  ;;  %v6215_v55 = vmax.f32 %v5011_v49, 0.0  ;;  %4198 = vmatmul.mubr.bf16.gmra.mrb[156].mxu0 %v11157_v40  ;;  %5222 = vmatmul.mubr.bf16.gmra.mrb[156].mxu1 %v11158_v41  ;;  %v11175_v49 = vld [vmem:[%s11750_s26 + $0x2a0] ss:$8 sps:$4 sm:$0xff]  }
 0x167   : > { %9636 = vmatprep.mubr.msk.bf16.mxu0 %vm3077_vm0, %v11159_v44  ;;  %9764 = vmatprep.mubr.msk.bf16.mxu1 %vm3077_vm0, %v11161_v45 }
 0x168   : > { %8519 = vst.msk [vmem:[%s11953_s18 + $0x60] sm:$0xf] %vm8494_vm3, %v10391_v52  ;;  %8775 = vst.msk [vmem:[%s11953_s18 + $0x460] sm:$0xf] %vm8494_vm3, %v10647_v53  ;;  %v10392_v56 = vpack.c.bf16 %v5959_v54, %v5959_v54  ;;  %v10648_v57 = vpack.c.bf16 %v6215_v55, %v6215_v55  ;;  %v11177_v53 = vld [vmem:[%s11750_s26 + $0x2b4] ss:$8 sps:$4 sm:$0xff]  }
 0x169   : > { %v3991_v58 = vpop.f32.mrb[52].mxu0  ;;  %v5015_v59 = vpop.f32.mrb[52].mxu1  ;;  %v11179_v54 = vld [vmem:[%s11750_s26 + $0xab4] ss:$8 sps:$4 sm:$0xff]  }
 0x16a   : > { %8520 = vst.msk [vmem:[%s11953_s18 + $0x64] sm:$0xf] %vm8494_vm3, %v10392_v56  ;;  %8776 = vst.msk [vmem:[%s11953_s18 + $0x464] sm:$0xf] %vm8494_vm3, %v10648_v57  ;;  %v3992_v60 = vadd.f32 %v11937_v61, %v3991_v58  ;;  %v5016_v62 = vadd.f32 %v11937_v61, %v5015_v59  ;;  %v3993_v63 = vpop.f32.mrb[53].mxu0  ;;  %v5017_v0 = vpop.f32.mrb[53].mxu1 }
 0x16b   : > { %v3994_v3 = vpop.f32.mrb[54].mxu0  ;;  %v5018_v4 = vpop.f32.mrb[54].mxu1 }
 0x16c   : > { %v5960_v7 = vmax.f32 %v3992_v60, 0.0  ;;  %v6216_v8 = vmax.f32 %v5016_v62, 0.0  ;;  %v3995_v9 = vadd.f32 %v11937_v61, %v3994_v3  ;;  %v5019_v10 = vadd.f32 %v11937_v61, %v5018_v4  ;;  %v3996_v11 = vpop.f32.mrb[55].mxu0  ;;  %v5020_v12 = vpop.f32.mrb[55].mxu1 }
 0x16d   : > { %v11182_v11 = vld [vmem:[%s11750_s26 + $0xab0] ss:$8 sps:$4 sm:$0xff]  }
 0x16e   : > { %v10393_v13 = vpack.c.bf16 %v5960_v7, %v5960_v7  ;;  %v10649_v14 = vpack.c.bf16 %v6216_v8, %v6216_v8  ;;  %v5961_v15 = vmax.f32 %v3995_v9, 0.0  ;;  %v6217_v16 = vmax.f32 %v5019_v10, 0.0  ;;  %4206 = vmatmul.mubr.bf16.gmra.mrb[160].mxu0 %v11163_v1  ;;  %5230 = vmatmul.mubr.bf16.gmra.mrb[160].mxu1 %v11164_v2  ;;  %v11181_v10 = vld [vmem:[%s11750_s26 + $0x2b0] ss:$8 sps:$4 sm:$0xff]  }
 0x16f   : > { %9637 = vmatprep.mubr.msk.bf16.mxu0 %vm3077_vm0, %v11165_v5  ;;  %9765 = vmatprep.mubr.msk.bf16.mxu1 %vm3077_vm0, %v11167_v6  ;;  %v12238_v5 = vld [vmem:[%s14125_s2] ss:$0 sm:$0xff] }
 0x170   : > { %8521 = vst.msk [vmem:[%s11953_s18 + $0x68] sm:$0xf] %vm8494_vm3, %v10393_v13  ;;  %8777 = vst.msk [vmem:[%s11953_s18 + $0x468] sm:$0xf] %vm8494_vm3, %v10649_v14  ;;  %v10394_v17 = vpack.c.bf16 %v5961_v15, %v5961_v15  ;;  %v10650_v18 = vpack.c.bf16 %v6217_v16, %v6217_v16  ;;  %v11183_v14 = vld [vmem:[%s11750_s26 + $0x2c4] ss:$8 sps:$4 sm:$0xff]  }
 0x171   : > { %v3999_v19 = vpop.f32.mrb[56].mxu0  ;;  %v5023_v20 = vpop.f32.mrb[56].mxu1  ;;  %v11185_v15 = vld [vmem:[%s11750_s26 + $0xac4] ss:$8 sps:$4 sm:$0xff]  }
 0x172   : > { %8522 = vst.msk [vmem:[%s11953_s18 + $0x6c] sm:$0xf] %vm8494_vm3, %v10394_v17  ;;  %8778 = vst.msk [vmem:[%s11953_s18 + $0x46c] sm:$0xf] %vm8494_vm3, %v10650_v18  ;;  %v4000_v21 = vadd.f32 %v11937_v61, %v3999_v19  ;;  %v5024_v22 = vadd.f32 %v11937_v61, %v5023_v20  ;;  %v4001_v23 = vpop.f32.mrb[57].mxu0  ;;  %v5025_v24 = vpop.f32.mrb[57].mxu1 }
 0x173   : > { %v4002_v27 = vpop.f32.mrb[58].mxu0  ;;  %v5026_v28 = vpop.f32.mrb[58].mxu1 }
 0x174   : > { %v5962_v31 = vmax.f32 %v4000_v21, 0.0  ;;  %v6218_v32 = vmax.f32 %v5024_v22, 0.0  ;;  %v4003_v33 = vadd.f32 %v11937_v61, %v4002_v27  ;;  %v5027_v34 = vadd.f32 %v11937_v61, %v5026_v28  ;;  %v4004_v35 = vpop.f32.mrb[59].mxu0  ;;  %v5028_v36 = vpop.f32.mrb[59].mxu1 }
 0x175   : > { %v11188_v35 = vld [vmem:[%s11750_s26 + $0xac0] ss:$8 sps:$4 sm:$0xff]  }
 0x176   : > { %v10395_v37 = vpack.c.bf16 %v5962_v31, %v5962_v31  ;;  %v10651_v38 = vpack.c.bf16 %v6218_v32, %v6218_v32  ;;  %v5963_v39 = vmax.f32 %v4003_v33, 0.0  ;;  %v6219_v40 = vmax.f32 %v5027_v34, 0.0  ;;  %4214 = vmatmul.mubr.bf16.gmra.mrb[164].mxu0 %v11169_v25  ;;  %5238 = vmatmul.mubr.bf16.gmra.mrb[164].mxu1 %v11170_v26  ;;  %v11187_v34 = vld [vmem:[%s11750_s26 + $0x2c0] ss:$8 sps:$4 sm:$0xff]  }
 0x177   : > { %9638 = vmatprep.mubr.msk.bf16.mxu0 %vm3077_vm0, %v11171_v29  ;;  %9766 = vmatprep.mubr.msk.bf16.mxu1 %vm3077_vm0, %v11173_v30 }
 0x178   : > { %8523 = vst.msk [vmem:[%s11953_s18 + $0x70] sm:$0xf] %vm8494_vm3, %v10395_v37  ;;  %8779 = vst.msk [vmem:[%s11953_s18 + $0x470] sm:$0xf] %vm8494_vm3, %v10651_v38  ;;  %v10396_v41 = vpack.c.bf16 %v5963_v39, %v5963_v39  ;;  %v10652_v42 = vpack.c.bf16 %v6219_v40, %v6219_v40  ;;  %v11189_v38 = vld [vmem:[%s11750_s26 + $0x2d4] ss:$8 sps:$4 sm:$0xff]  }
 0x179   : > { %v4007_v43 = vpop.f32.mrb[60].mxu0  ;;  %v5031_v44 = vpop.f32.mrb[60].mxu1  ;;  %v11191_v39 = vld [vmem:[%s11750_s26 + $0xad4] ss:$8 sps:$4 sm:$0xff]  }
 0x17a   : > { %8524 = vst.msk [vmem:[%s11953_s18 + $0x74] sm:$0xf] %vm8494_vm3, %v10396_v41  ;;  %8780 = vst.msk [vmem:[%s11953_s18 + $0x474] sm:$0xf] %vm8494_vm3, %v10652_v42  ;;  %v4008_v45 = vadd.f32 %v11937_v61, %v4007_v43  ;;  %v5032_v46 = vadd.f32 %v11937_v61, %v5031_v44  ;;  %v4009_v47 = vpop.f32.mrb[61].mxu0  ;;  %v5033_v48 = vpop.f32.mrb[61].mxu1 }
 0x17b   : > { %v4010_v51 = vpop.f32.mrb[62].mxu0  ;;  %v5034_v52 = vpop.f32.mrb[62].mxu1 }
 0x17c   : > { %v5964_v55 = vmax.f32 %v4008_v45, 0.0  ;;  %v6220_v56 = vmax.f32 %v5032_v46, 0.0  ;;  %v4011_v57 = vadd.f32 %v11937_v61, %v4010_v51  ;;  %v5035_v58 = vadd.f32 %v11937_v61, %v5034_v52  ;;  %v4012_v59 = vpop.f32.mrb[63].mxu0  ;;  %v5036_v60 = vpop.f32.mrb[63].mxu1 }
 0x17d   : > { %v11194_v59 = vld [vmem:[%s11750_s26 + $0xad0] ss:$8 sps:$4 sm:$0xff]  }
 0x17e   : > { %v10397_v62 = vpack.c.bf16 %v5964_v55, %v5964_v55  ;;  %v10653_v63 = vpack.c.bf16 %v6220_v56, %v6220_v56  ;;  %v5965_v0 = vmax.f32 %v4011_v57, 0.0  ;;  %v6221_v1 = vmax.f32 %v5035_v58, 0.0  ;;  %4222 = vmatmul.mubr.bf16.gmra.mrb[168].mxu0 %v11175_v49  ;;  %5246 = vmatmul.mubr.bf16.gmra.mrb[168].mxu1 %v11176_v50  ;;  %v11193_v58 = vld [vmem:[%s11750_s26 + $0x2d0] ss:$8 sps:$4 sm:$0xff]  }
 0x17f   : > { %9639 = vmatprep.mubr.msk.bf16.mxu0 %vm3077_vm0, %v11177_v53  ;;  %9767 = vmatprep.mubr.msk.bf16.mxu1 %vm3077_vm0, %v11179_v54 }
 0x180   : > { %8525 = vst.msk [vmem:[%s11953_s18 + $0x78] sm:$0xf] %vm8494_vm3, %v10397_v62  ;;  %8781 = vst.msk [vmem:[%s11953_s18 + $0x478] sm:$0xf] %vm8494_vm3, %v10653_v63  ;;  %v10398_v61 = vpack.c.bf16 %v5965_v0, %v5965_v0  ;;  %v10654_v2 = vpack.c.bf16 %v6221_v1, %v6221_v1  ;;  %v11195_v63 = vld [vmem:[%s11750_s26 + $0x2e4] ss:$8 sps:$4 sm:$0xff]  }
 0x181   : > { %v4015_v3 = vpop.f32.mrb[64].mxu0  ;;  %v5039_v4 = vpop.f32.mrb[64].mxu1  ;;  %v11197_v0 = vld [vmem:[%s11750_s26 + $0xae4] ss:$8 sps:$4 sm:$0xff]  }
 0x182   : > { %8526 = vst.msk [vmem:[%s11953_s18 + $0x7c] sm:$0xf] %vm8494_vm3, %v10398_v61  ;;  %8782 = vst.msk [vmem:[%s11953_s18 + $0x47c] sm:$0xf] %vm8494_vm3, %v10654_v2  ;;  %v4016_v6 = vadd.f32 %v12238_v5, %v4015_v3  ;;  %v5040_v7 = vadd.f32 %v12238_v5, %v5039_v4  ;;  %v4017_v8 = vpop.f32.mrb[65].mxu0  ;;  %v5041_v9 = vpop.f32.mrb[65].mxu1 }
 0x183   : > { %v4018_v12 = vpop.f32.mrb[66].mxu0  ;;  %v5042_v13 = vpop.f32.mrb[66].mxu1 }
 0x184   : > { %v5966_v16 = vmax.f32 %v4016_v6, 0.0  ;;  %v6222_v17 = vmax.f32 %v5040_v7, 0.0  ;;  %v4019_v18 = vadd.f32 %v12238_v5, %v4018_v12  ;;  %v5043_v19 = vadd.f32 %v12238_v5, %v5042_v13  ;;  %v4020_v20 = vpop.f32.mrb[67].mxu0  ;;  %v5044_v21 = vpop.f32.mrb[67].mxu1 }
 0x185   : > { %v11200_v20 = vld [vmem:[%s11750_s26 + $0xae0] ss:$8 sps:$4 sm:$0xff]  }
 0x186   : > { %v10399_v22 = vpack.c.bf16 %v5966_v16, %v5966_v16  ;;  %v10655_v23 = vpack.c.bf16 %v6222_v17, %v6222_v17  ;;  %v5967_v24 = vmax.f32 %v4019_v18, 0.0  ;;  %v6223_v25 = vmax.f32 %v5043_v19, 0.0  ;;  %4230 = vmatmul.mubr.bf16.gmra.mrb[172].mxu0 %v11181_v10  ;;  %5254 = vmatmul.mubr.bf16.gmra.mrb[172].mxu1 %v11182_v11  ;;  %v11199_v19 = vld [vmem:[%s11750_s26 + $0x2e0] ss:$8 sps:$4 sm:$0xff]  }
 0x187   : > { %9640 = vmatprep.mubr.msk.bf16.mxu0 %vm3077_vm0, %v11183_v14  ;;  %9768 = vmatprep.mubr.msk.bf16.mxu1 %vm3077_vm0, %v11185_v15 }
 0x188   : > { %8527 = vst.msk [vmem:[%s11953_s18 + $0x80] sm:$0xf] %vm8494_vm3, %v10399_v22  ;;  %8783 = vst.msk [vmem:[%s11953_s18 + $0x480] sm:$0xf] %vm8494_vm3, %v10655_v23  ;;  %v10400_v26 = vpack.c.bf16 %v5967_v24, %v5967_v24  ;;  %v10656_v27 = vpack.c.bf16 %v6223_v25, %v6223_v25  ;;  %v11201_v23 = vld [vmem:[%s11750_s26 + $0x2f4] ss:$8 sps:$4 sm:$0xff]  }
 0x189   : > { %v4023_v28 = vpop.f32.mrb[68].mxu0  ;;  %v5047_v29 = vpop.f32.mrb[68].mxu1  ;;  %v11203_v24 = vld [vmem:[%s11750_s26 + $0xaf4] ss:$8 sps:$4 sm:$0xff]  }
 0x18a   : > { %8528 = vst.msk [vmem:[%s11953_s18 + $0x84] sm:$0xf] %vm8494_vm3, %v10400_v26  ;;  %8784 = vst.msk [vmem:[%s11953_s18 + $0x484] sm:$0xf] %vm8494_vm3, %v10656_v27  ;;  %v4024_v30 = vadd.f32 %v12238_v5, %v4023_v28  ;;  %v5048_v31 = vadd.f32 %v12238_v5, %v5047_v29  ;;  %v4025_v32 = vpop.f32.mrb[69].mxu0  ;;  %v5049_v33 = vpop.f32.mrb[69].mxu1 }
 0x18b   : > { %v4026_v36 = vpop.f32.mrb[70].mxu0  ;;  %v5050_v37 = vpop.f32.mrb[70].mxu1 }
 0x18c   : > { %v5968_v40 = vmax.f32 %v4024_v30, 0.0  ;;  %v6224_v41 = vmax.f32 %v5048_v31, 0.0  ;;  %v4027_v42 = vadd.f32 %v12238_v5, %v4026_v36  ;;  %v5051_v43 = vadd.f32 %v12238_v5, %v5050_v37  ;;  %v4028_v44 = vpop.f32.mrb[71].mxu0  ;;  %v5052_v45 = vpop.f32.mrb[71].mxu1 }
 0x18d   : > { %v11206_v44 = vld [vmem:[%s11750_s26 + $0xaf0] ss:$8 sps:$4 sm:$0xff]  }
 0x18e   : > { %v10401_v46 = vpack.c.bf16 %v5968_v40, %v5968_v40  ;;  %v10657_v47 = vpack.c.bf16 %v6224_v41, %v6224_v41  ;;  %v5969_v48 = vmax.f32 %v4027_v42, 0.0  ;;  %v6225_v49 = vmax.f32 %v5051_v43, 0.0  ;;  %4238 = vmatmul.mubr.bf16.gmra.mrb[176].mxu0 %v11187_v34  ;;  %5262 = vmatmul.mubr.bf16.gmra.mrb[176].mxu1 %v11188_v35  ;;  %v11205_v43 = vld [vmem:[%s11750_s26 + $0x2f0] ss:$8 sps:$4 sm:$0xff]  }
 0x18f   : > { %9641 = vmatprep.mubr.msk.bf16.mxu0 %vm3077_vm0, %v11189_v38  ;;  %9769 = vmatprep.mubr.msk.bf16.mxu1 %vm3077_vm0, %v11191_v39 }
 0x190   : > { %8529 = vst.msk [vmem:[%s11953_s18 + $0x88] sm:$0xf] %vm8494_vm3, %v10401_v46  ;;  %8785 = vst.msk [vmem:[%s11953_s18 + $0x488] sm:$0xf] %vm8494_vm3, %v10657_v47  ;;  %v10402_v50 = vpack.c.bf16 %v5969_v48, %v5969_v48  ;;  %v10658_v51 = vpack.c.bf16 %v6225_v49, %v6225_v49  ;;  %v11207_v47 = vld [vmem:[%s11750_s26 + $0x304] ss:$8 sps:$4 sm:$0xff]  }
 0x191   : > { %v4031_v52 = vpop.f32.mrb[72].mxu0  ;;  %v5055_v53 = vpop.f32.mrb[72].mxu1  ;;  %v11209_v48 = vld [vmem:[%s11750_s26 + $0xb04] ss:$8 sps:$4 sm:$0xff]  }
 0x192   : > { %8530 = vst.msk [vmem:[%s11953_s18 + $0x8c] sm:$0xf] %vm8494_vm3, %v10402_v50  ;;  %8786 = vst.msk [vmem:[%s11953_s18 + $0x48c] sm:$0xf] %vm8494_vm3, %v10658_v51  ;;  %v4032_v54 = vadd.f32 %v12238_v5, %v4031_v52  ;;  %v5056_v55 = vadd.f32 %v12238_v5, %v5055_v53  ;;  %v4033_v56 = vpop.f32.mrb[73].mxu0  ;;  %v5057_v57 = vpop.f32.mrb[73].mxu1 }
 0x193   : > { %v4034_v60 = vpop.f32.mrb[74].mxu0  ;;  %v5058_v62 = vpop.f32.mrb[74].mxu1 }
 0x194   : > { %v5970_v1 = vmax.f32 %v4032_v54, 0.0  ;;  %v6226_v61 = vmax.f32 %v5056_v55, 0.0  ;;  %v4035_v2 = vadd.f32 %v12238_v5, %v4034_v60  ;;  %v5059_v3 = vadd.f32 %v12238_v5, %v5058_v62  ;;  %v4036_v4 = vpop.f32.mrb[75].mxu0  ;;  %v5060_v6 = vpop.f32.mrb[75].mxu1 }
 0x195   : > { %v11212_v4 = vld [vmem:[%s11750_s26 + $0xb00] ss:$8 sps:$4 sm:$0xff]  }
 0x196   : > { %v10403_v7 = vpack.c.bf16 %v5970_v1, %v5970_v1  ;;  %v10659_v8 = vpack.c.bf16 %v6226_v61, %v6226_v61  ;;  %v5971_v9 = vmax.f32 %v4035_v2, 0.0  ;;  %v6227_v10 = vmax.f32 %v5059_v3, 0.0  ;;  %4246 = vmatmul.mubr.bf16.gmra.mrb[180].mxu0 %v11193_v58  ;;  %5270 = vmatmul.mubr.bf16.gmra.mrb[180].mxu1 %v11194_v59  ;;  %v11211_v3 = vld [vmem:[%s11750_s26 + $0x300] ss:$8 sps:$4 sm:$0xff]  }
 0x197   : > { %9642 = vmatprep.mubr.msk.bf16.mxu0 %vm3077_vm0, %v11195_v63  ;;  %9770 = vmatprep.mubr.msk.bf16.mxu1 %vm3077_vm0, %v11197_v0 }
 0x198   : > { %8531 = vst.msk [vmem:[%s11953_s18 + $0x90] sm:$0xf] %vm8494_vm3, %v10403_v7  ;;  %8787 = vst.msk [vmem:[%s11953_s18 + $0x490] sm:$0xf] %vm8494_vm3, %v10659_v8  ;;  %v10404_v11 = vpack.c.bf16 %v5971_v9, %v5971_v9  ;;  %v10660_v12 = vpack.c.bf16 %v6227_v10, %v6227_v10  ;;  %v11213_v8 = vld [vmem:[%s11750_s26 + $0x314] ss:$8 sps:$4 sm:$0xff]  }
 0x199   : > { %v4039_v13 = vpop.f32.mrb[76].mxu0  ;;  %v5063_v14 = vpop.f32.mrb[76].mxu1  ;;  %v11215_v9 = vld [vmem:[%s11750_s26 + $0xb14] ss:$8 sps:$4 sm:$0xff]  }
 0x19a   : > { %8532 = vst.msk [vmem:[%s11953_s18 + $0x94] sm:$0xf] %vm8494_vm3, %v10404_v11  ;;  %8788 = vst.msk [vmem:[%s11953_s18 + $0x494] sm:$0xf] %vm8494_vm3, %v10660_v12  ;;  %v4040_v15 = vadd.f32 %v12238_v5, %v4039_v13  ;;  %v5064_v16 = vadd.f32 %v12238_v5, %v5063_v14  ;;  %v4041_v17 = vpop.f32.mrb[77].mxu0  ;;  %v5065_v18 = vpop.f32.mrb[77].mxu1 }
 0x19b   : > { %v4042_v21 = vpop.f32.mrb[78].mxu0  ;;  %v5066_v22 = vpop.f32.mrb[78].mxu1 }
 0x19c   : > { %v5972_v25 = vmax.f32 %v4040_v15, 0.0  ;;  %v6228_v26 = vmax.f32 %v5064_v16, 0.0  ;;  %v4043_v27 = vadd.f32 %v12238_v5, %v4042_v21  ;;  %v5067_v28 = vadd.f32 %v12238_v5, %v5066_v22  ;;  %v4044_v29 = vpop.f32.mrb[79].mxu0  ;;  %v5068_v30 = vpop.f32.mrb[79].mxu1 }
 0x19d   : > { %v11218_v29 = vld [vmem:[%s11750_s26 + $0xb10] ss:$8 sps:$4 sm:$0xff]  }
 0x19e   : > { %v10405_v31 = vpack.c.bf16 %v5972_v25, %v5972_v25  ;;  %v10661_v32 = vpack.c.bf16 %v6228_v26, %v6228_v26  ;;  %v5973_v33 = vmax.f32 %v4043_v27, 0.0  ;;  %v6229_v34 = vmax.f32 %v5067_v28, 0.0  ;;  %4254 = vmatmul.mubr.bf16.gmra.mrb[184].mxu0 %v11199_v19  ;;  %5278 = vmatmul.mubr.bf16.gmra.mrb[184].mxu1 %v11200_v20  ;;  %v11217_v28 = vld [vmem:[%s11750_s26 + $0x310] ss:$8 sps:$4 sm:$0xff]  }
 0x19f   : > { %9643 = vmatprep.mubr.msk.bf16.mxu0 %vm3077_vm0, %v11201_v23  ;;  %9771 = vmatprep.mubr.msk.bf16.mxu1 %vm3077_vm0, %v11203_v24 }
 0x1a0   : > { %8533 = vst.msk [vmem:[%s11953_s18 + $0x98] sm:$0xf] %vm8494_vm3, %v10405_v31  ;;  %8789 = vst.msk [vmem:[%s11953_s18 + $0x498] sm:$0xf] %vm8494_vm3, %v10661_v32  ;;  %v10406_v35 = vpack.c.bf16 %v5973_v33, %v5973_v33  ;;  %v10662_v36 = vpack.c.bf16 %v6229_v34, %v6229_v34  ;;  %v11219_v32 = vld [vmem:[%s11750_s26 + $0x324] ss:$8 sps:$4 sm:$0xff]  }
 0x1a1   : > { %v4047_v37 = vpop.f32.mrb[80].mxu0  ;;  %v5071_v38 = vpop.f32.mrb[80].mxu1  ;;  %v11221_v33 = vld [vmem:[%s11750_s26 + $0xb24] ss:$8 sps:$4 sm:$0xff]  }
 0x1a2   : > { %8534 = vst.msk [vmem:[%s11953_s18 + $0x9c] sm:$0xf] %vm8494_vm3, %v10406_v35  ;;  %8790 = vst.msk [vmem:[%s11953_s18 + $0x49c] sm:$0xf] %vm8494_vm3, %v10662_v36  ;;  %v4048_v39 = vadd.f32 %v12238_v5, %v4047_v37  ;;  %v5072_v40 = vadd.f32 %v12238_v5, %v5071_v38  ;;  %v4049_v41 = vpop.f32.mrb[81].mxu0  ;;  %v5073_v42 = vpop.f32.mrb[81].mxu1 }
 0x1a3   : > { %v4050_v45 = vpop.f32.mrb[82].mxu0  ;;  %v5074_v46 = vpop.f32.mrb[82].mxu1 }
 0x1a4   : > { %v5974_v49 = vmax.f32 %v4048_v39, 0.0  ;;  %v6230_v50 = vmax.f32 %v5072_v40, 0.0  ;;  %v4051_v51 = vadd.f32 %v12238_v5, %v4050_v45  ;;  %v5075_v52 = vadd.f32 %v12238_v5, %v5074_v46  ;;  %v4052_v53 = vpop.f32.mrb[83].mxu0  ;;  %v5076_v54 = vpop.f32.mrb[83].mxu1 }
 0x1a5   : > { %v11224_v53 = vld [vmem:[%s11750_s26 + $0xb20] ss:$8 sps:$4 sm:$0xff]  }
 0x1a6   : > { %v10407_v55 = vpack.c.bf16 %v5974_v49, %v5974_v49  ;;  %v10663_v56 = vpack.c.bf16 %v6230_v50, %v6230_v50  ;;  %v5975_v57 = vmax.f32 %v4051_v51, 0.0  ;;  %v6231_v58 = vmax.f32 %v5075_v52, 0.0  ;;  %4262 = vmatmul.mubr.bf16.gmra.mrb[188].mxu0 %v11205_v43  ;;  %5286 = vmatmul.mubr.bf16.gmra.mrb[188].mxu1 %v11206_v44  ;;  %v11223_v52 = vld [vmem:[%s11750_s26 + $0x320] ss:$8 sps:$4 sm:$0xff]  }
 0x1a7   : > { %9644 = vmatprep.mubr.msk.bf16.mxu0 %vm3077_vm0, %v11207_v47  ;;  %9772 = vmatprep.mubr.msk.bf16.mxu1 %vm3077_vm0, %v11209_v48 }
 0x1a8   : > { %8535 = vst.msk [vmem:[%s11953_s18 + $0xa0] sm:$0xf] %vm8494_vm3, %v10407_v55  ;;  %8791 = vst.msk [vmem:[%s11953_s18 + $0x4a0] sm:$0xf] %vm8494_vm3, %v10663_v56  ;;  %v10408_v59 = vpack.c.bf16 %v5975_v57, %v5975_v57  ;;  %v10664_v60 = vpack.c.bf16 %v6231_v58, %v6231_v58  ;;  %v11225_v56 = vld [vmem:[%s11750_s26 + $0x334] ss:$8 sps:$4 sm:$0xff]  }
 0x1a9   : > { %v4055_v62 = vpop.f32.mrb[84].mxu0  ;;  %v5079_v63 = vpop.f32.mrb[84].mxu1  ;;  %v11227_v57 = vld [vmem:[%s11750_s26 + $0xb34] ss:$8 sps:$4 sm:$0xff]  }
 0x1aa   : > { %8536 = vst.msk [vmem:[%s11953_s18 + $0xa4] sm:$0xf] %vm8494_vm3, %v10408_v59  ;;  %8792 = vst.msk [vmem:[%s11953_s18 + $0x4a4] sm:$0xf] %vm8494_vm3, %v10664_v60  ;;  %v4056_v0 = vadd.f32 %v12238_v5, %v4055_v62  ;;  %v5080_v1 = vadd.f32 %v12238_v5, %v5079_v63  ;;  %v4057_v61 = vpop.f32.mrb[85].mxu0  ;;  %v5081_v2 = vpop.f32.mrb[85].mxu1 }
 0x1ab   : > { %v4058_v6 = vpop.f32.mrb[86].mxu0  ;;  %v5082_v7 = vpop.f32.mrb[86].mxu1 }
 0x1ac   : > { %v5976_v10 = vmax.f32 %v4056_v0, 0.0  ;;  %v6232_v11 = vmax.f32 %v5080_v1, 0.0  ;;  %v4059_v12 = vadd.f32 %v12238_v5, %v4058_v6  ;;  %v5083_v13 = vadd.f32 %v12238_v5, %v5082_v7  ;;  %v4060_v14 = vpop.f32.mrb[87].mxu0  ;;  %v5084_v15 = vpop.f32.mrb[87].mxu1 }
 0x1ad   : > { %v11230_v14 = vld [vmem:[%s11750_s26 + $0xb30] ss:$8 sps:$4 sm:$0xff]  }
 0x1ae   : > { %v10409_v16 = vpack.c.bf16 %v5976_v10, %v5976_v10  ;;  %v10665_v17 = vpack.c.bf16 %v6232_v11, %v6232_v11  ;;  %v5977_v18 = vmax.f32 %v4059_v12, 0.0  ;;  %v6233_v19 = vmax.f32 %v5083_v13, 0.0  ;;  %4270 = vmatmul.mubr.bf16.gmra.mrb[192].mxu0 %v11211_v3  ;;  %5294 = vmatmul.mubr.bf16.gmra.mrb[192].mxu1 %v11212_v4  ;;  %v11229_v13 = vld [vmem:[%s11750_s26 + $0x330] ss:$8 sps:$4 sm:$0xff]  }
 0x1af   : > { %9645 = vmatprep.mubr.msk.bf16.mxu0 %vm3077_vm0, %v11213_v8  ;;  %9773 = vmatprep.mubr.msk.bf16.mxu1 %vm3077_vm0, %v11215_v9 }
 0x1b0   : > { %8537 = vst.msk [vmem:[%s11953_s18 + $0xa8] sm:$0xf] %vm8494_vm3, %v10409_v16  ;;  %8793 = vst.msk [vmem:[%s11953_s18 + $0x4a8] sm:$0xf] %vm8494_vm3, %v10665_v17  ;;  %v10410_v20 = vpack.c.bf16 %v5977_v18, %v5977_v18  ;;  %v10666_v21 = vpack.c.bf16 %v6233_v19, %v6233_v19  ;;  %v11231_v17 = vld [vmem:[%s11750_s26 + $0x344] ss:$8 sps:$4 sm:$0xff]  }
 0x1b1   : > { %v4063_v22 = vpop.f32.mrb[88].mxu0  ;;  %v5087_v23 = vpop.f32.mrb[88].mxu1  ;;  %v11233_v18 = vld [vmem:[%s11750_s26 + $0xb44] ss:$8 sps:$4 sm:$0xff]  }
 0x1b2   : > { %8538 = vst.msk [vmem:[%s11953_s18 + $0xac] sm:$0xf] %vm8494_vm3, %v10410_v20  ;;  %8794 = vst.msk [vmem:[%s11953_s18 + $0x4ac] sm:$0xf] %vm8494_vm3, %v10666_v21  ;;  %v4064_v24 = vadd.f32 %v12238_v5, %v4063_v22  ;;  %v5088_v25 = vadd.f32 %v12238_v5, %v5087_v23  ;;  %v4065_v26 = vpop.f32.mrb[89].mxu0  ;;  %v5089_v27 = vpop.f32.mrb[89].mxu1 }
 0x1b3   : > { %v4066_v30 = vpop.f32.mrb[90].mxu0  ;;  %v5090_v31 = vpop.f32.mrb[90].mxu1 }
 0x1b4   : > { %v5978_v34 = vmax.f32 %v4064_v24, 0.0  ;;  %v6234_v35 = vmax.f32 %v5088_v25, 0.0  ;;  %v4067_v36 = vadd.f32 %v12238_v5, %v4066_v30  ;;  %v5091_v37 = vadd.f32 %v12238_v5, %v5090_v31  ;;  %v4068_v38 = vpop.f32.mrb[91].mxu0  ;;  %v5092_v39 = vpop.f32.mrb[91].mxu1 }
 0x1b5   : > { %v11236_v38 = vld [vmem:[%s11750_s26 + $0xb40] ss:$8 sps:$4 sm:$0xff]  }
 0x1b6   : > { %v10411_v40 = vpack.c.bf16 %v5978_v34, %v5978_v34  ;;  %v10667_v41 = vpack.c.bf16 %v6234_v35, %v6234_v35  ;;  %v5979_v42 = vmax.f32 %v4067_v36, 0.0  ;;  %v6235_v43 = vmax.f32 %v5091_v37, 0.0  ;;  %4278 = vmatmul.mubr.bf16.gmra.mrb[196].mxu0 %v11217_v28  ;;  %5302 = vmatmul.mubr.bf16.gmra.mrb[196].mxu1 %v11218_v29  ;;  %v11235_v37 = vld [vmem:[%s11750_s26 + $0x340] ss:$8 sps:$4 sm:$0xff]  }
 0x1b7   : > { %9646 = vmatprep.mubr.msk.bf16.mxu0 %vm3077_vm0, %v11219_v32  ;;  %9774 = vmatprep.mubr.msk.bf16.mxu1 %vm3077_vm0, %v11221_v33 }
 0x1b8   : > { %8539 = vst.msk [vmem:[%s11953_s18 + $0xb0] sm:$0xf] %vm8494_vm3, %v10411_v40  ;;  %8795 = vst.msk [vmem:[%s11953_s18 + $0x4b0] sm:$0xf] %vm8494_vm3, %v10667_v41  ;;  %v10412_v44 = vpack.c.bf16 %v5979_v42, %v5979_v42  ;;  %v10668_v45 = vpack.c.bf16 %v6235_v43, %v6235_v43  ;;  %v11237_v41 = vld [vmem:[%s11750_s26 + $0x354] ss:$8 sps:$4 sm:$0xff]  }
 0x1b9   : > { %v4071_v46 = vpop.f32.mrb[92].mxu0  ;;  %v5095_v47 = vpop.f32.mrb[92].mxu1  ;;  %v11239_v42 = vld [vmem:[%s11750_s26 + $0xb54] ss:$8 sps:$4 sm:$0xff]  }
 0x1ba   : > { %8540 = vst.msk [vmem:[%s11953_s18 + $0xb4] sm:$0xf] %vm8494_vm3, %v10412_v44  ;;  %8796 = vst.msk [vmem:[%s11953_s18 + $0x4b4] sm:$0xf] %vm8494_vm3, %v10668_v45  ;;  %v4072_v48 = vadd.f32 %v12238_v5, %v4071_v46  ;;  %v5096_v49 = vadd.f32 %v12238_v5, %v5095_v47  ;;  %v4073_v50 = vpop.f32.mrb[93].mxu0  ;;  %v5097_v51 = vpop.f32.mrb[93].mxu1 }
 0x1bb   : > { %v4074_v54 = vpop.f32.mrb[94].mxu0  ;;  %v5098_v55 = vpop.f32.mrb[94].mxu1 }
 0x1bc   : > { %v5980_v58 = vmax.f32 %v4072_v48, 0.0  ;;  %v6236_v59 = vmax.f32 %v5096_v49, 0.0  ;;  %v4075_v60 = vadd.f32 %v12238_v5, %v4074_v54  ;;  %v5099_v62 = vadd.f32 %v12238_v5, %v5098_v55  ;;  %v4076_v63 = vpop.f32.mrb[95].mxu0  ;;  %v5100_v0 = vpop.f32.mrb[95].mxu1 }
 0x1bd   : > { %v11242_v63 = vld [vmem:[%s11750_s26 + $0xb50] ss:$8 sps:$4 sm:$0xff]  }
 0x1be   : > { %v10413_v1 = vpack.c.bf16 %v5980_v58, %v5980_v58  ;;  %v10669_v61 = vpack.c.bf16 %v6236_v59, %v6236_v59  ;;  %v5981_v2 = vmax.f32 %v4075_v60, 0.0  ;;  %v6237_v3 = vmax.f32 %v5099_v62, 0.0  ;;  %4286 = vmatmul.mubr.bf16.gmra.mrb[200].mxu0 %v11223_v52  ;;  %5310 = vmatmul.mubr.bf16.gmra.mrb[200].mxu1 %v11224_v53  ;;  %v11241_v62 = vld [vmem:[%s11750_s26 + $0x350] ss:$8 sps:$4 sm:$0xff]  }
 0x1bf   : > { %9647 = vmatprep.mubr.msk.bf16.mxu0 %vm3077_vm0, %v11225_v56  ;;  %9775 = vmatprep.mubr.msk.bf16.mxu1 %vm3077_vm0, %v11227_v57 }
 0x1c0   : > { %8541 = vst.msk [vmem:[%s11953_s18 + $0xb8] sm:$0xf] %vm8494_vm3, %v10413_v1  ;;  %8797 = vst.msk [vmem:[%s11953_s18 + $0x4b8] sm:$0xf] %vm8494_vm3, %v10669_v61  ;;  %v10414_v4 = vpack.c.bf16 %v5981_v2, %v5981_v2  ;;  %v10670_v6 = vpack.c.bf16 %v6237_v3, %v6237_v3  ;;  %v11243_v61 = vld [vmem:[%s11750_s26 + $0x364] ss:$8 sps:$4 sm:$0xff]  }
 0x1c1   : > { %v4079_v7 = vpop.f32.mrb[96].mxu0  ;;  %v5103_v8 = vpop.f32.mrb[96].mxu1  ;;  %v11245_v2 = vld [vmem:[%s11750_s26 + $0xb64] ss:$8 sps:$4 sm:$0xff]  }
 0x1c2   : > { %8542 = vst.msk [vmem:[%s11953_s18 + $0xbc] sm:$0xf] %vm8494_vm3, %v10414_v4  ;;  %8798 = vst.msk [vmem:[%s11953_s18 + $0x4bc] sm:$0xf] %vm8494_vm3, %v10670_v6  ;;  %v4080_v9 = vadd.f32 %v12238_v5, %v4079_v7  ;;  %v5104_v10 = vadd.f32 %v12238_v5, %v5103_v8  ;;  %v4081_v11 = vpop.f32.mrb[97].mxu0  ;;  %v5105_v12 = vpop.f32.mrb[97].mxu1 }
 0x1c3   : > { %v4082_v15 = vpop.f32.mrb[98].mxu0  ;;  %v5106_v16 = vpop.f32.mrb[98].mxu1 }
 0x1c4   : > { %v5982_v19 = vmax.f32 %v4080_v9, 0.0  ;;  %v6238_v20 = vmax.f32 %v5104_v10, 0.0  ;;  %v4083_v21 = vadd.f32 %v12238_v5, %v4082_v15  ;;  %v5107_v22 = vadd.f32 %v12238_v5, %v5106_v16  ;;  %v4084_v23 = vpop.f32.mrb[99].mxu0  ;;  %v5108_v24 = vpop.f32.mrb[99].mxu1 }
 0x1c5   : > { %v11248_v23 = vld [vmem:[%s11750_s26 + $0xb60] ss:$8 sps:$4 sm:$0xff]  }
 0x1c6   : > { %v10415_v25 = vpack.c.bf16 %v5982_v19, %v5982_v19  ;;  %v10671_v26 = vpack.c.bf16 %v6238_v20, %v6238_v20  ;;  %v5983_v27 = vmax.f32 %v4083_v21, 0.0  ;;  %v6239_v28 = vmax.f32 %v5107_v22, 0.0  ;;  %4294 = vmatmul.mubr.bf16.gmra.mrb[204].mxu0 %v11229_v13  ;;  %5318 = vmatmul.mubr.bf16.gmra.mrb[204].mxu1 %v11230_v14  ;;  %v11247_v22 = vld [vmem:[%s11750_s26 + $0x360] ss:$8 sps:$4 sm:$0xff]  }
 0x1c7   : > { %9648 = vmatprep.mubr.msk.bf16.mxu0 %vm3077_vm0, %v11231_v17  ;;  %9776 = vmatprep.mubr.msk.bf16.mxu1 %vm3077_vm0, %v11233_v18 }
 0x1c8   : > { %8543 = vst.msk [vmem:[%s11953_s18 + $0xc0] sm:$0xf] %vm8494_vm3, %v10415_v25  ;;  %8799 = vst.msk [vmem:[%s11953_s18 + $0x4c0] sm:$0xf] %vm8494_vm3, %v10671_v26  ;;  %v10416_v29 = vpack.c.bf16 %v5983_v27, %v5983_v27  ;;  %v10672_v30 = vpack.c.bf16 %v6239_v28, %v6239_v28  ;;  %v11249_v26 = vld [vmem:[%s11750_s26 + $0x374] ss:$8 sps:$4 sm:$0xff]  }
 0x1c9   : > { %v4087_v31 = vpop.f32.mrb[100].mxu0  ;;  %v5111_v32 = vpop.f32.mrb[100].mxu1  ;;  %v11251_v27 = vld [vmem:[%s11750_s26 + $0xb74] ss:$8 sps:$4 sm:$0xff]  }
 0x1ca   : > { %8544 = vst.msk [vmem:[%s11953_s18 + $0xc4] sm:$0xf] %vm8494_vm3, %v10416_v29  ;;  %8800 = vst.msk [vmem:[%s11953_s18 + $0x4c4] sm:$0xf] %vm8494_vm3, %v10672_v30  ;;  %v4088_v33 = vadd.f32 %v12238_v5, %v4087_v31  ;;  %v5112_v34 = vadd.f32 %v12238_v5, %v5111_v32  ;;  %v4089_v35 = vpop.f32.mrb[101].mxu0  ;;  %v5113_v36 = vpop.f32.mrb[101].mxu1 }
 0x1cb   : > { %v4090_v39 = vpop.f32.mrb[102].mxu0  ;;  %v5114_v40 = vpop.f32.mrb[102].mxu1 }
 0x1cc   : > { %v5984_v43 = vmax.f32 %v4088_v33, 0.0  ;;  %v6240_v44 = vmax.f32 %v5112_v34, 0.0  ;;  %v4091_v45 = vadd.f32 %v12238_v5, %v4090_v39  ;;  %v5115_v46 = vadd.f32 %v12238_v5, %v5114_v40  ;;  %v4092_v47 = vpop.f32.mrb[103].mxu0  ;;  %v5116_v48 = vpop.f32.mrb[103].mxu1 }
 0x1cd   : > { %v11254_v47 = vld [vmem:[%s11750_s26 + $0xb70] ss:$8 sps:$4 sm:$0xff]  }
 0x1ce   : > { %v10417_v49 = vpack.c.bf16 %v5984_v43, %v5984_v43  ;;  %v10673_v50 = vpack.c.bf16 %v6240_v44, %v6240_v44  ;;  %v5985_v51 = vmax.f32 %v4091_v45, 0.0  ;;  %v6241_v52 = vmax.f32 %v5115_v46, 0.0  ;;  %4302 = vmatmul.mubr.bf16.gmra.mrb[208].mxu0 %v11235_v37  ;;  %5326 = vmatmul.mubr.bf16.gmra.mrb[208].mxu1 %v11236_v38  ;;  %v11253_v46 = vld [vmem:[%s11750_s26 + $0x370] ss:$8 sps:$4 sm:$0xff]  }
 0x1cf   : > { %9649 = vmatprep.mubr.msk.bf16.mxu0 %vm3077_vm0, %v11237_v41  ;;  %9777 = vmatprep.mubr.msk.bf16.mxu1 %vm3077_vm0, %v11239_v42 }
 0x1d0   : > { %8545 = vst.msk [vmem:[%s11953_s18 + $0xc8] sm:$0xf] %vm8494_vm3, %v10417_v49  ;;  %8801 = vst.msk [vmem:[%s11953_s18 + $0x4c8] sm:$0xf] %vm8494_vm3, %v10673_v50  ;;  %v10418_v53 = vpack.c.bf16 %v5985_v51, %v5985_v51  ;;  %v10674_v54 = vpack.c.bf16 %v6241_v52, %v6241_v52  ;;  %v11255_v50 = vld [vmem:[%s11750_s26 + $0x384] ss:$8 sps:$4 sm:$0xff]  }
 0x1d1   : > { %v4095_v55 = vpop.f32.mrb[104].mxu0  ;;  %v5119_v56 = vpop.f32.mrb[104].mxu1  ;;  %v11257_v51 = vld [vmem:[%s11750_s26 + $0xb84] ss:$8 sps:$4 sm:$0xff]  }
 0x1d2   : > { %8546 = vst.msk [vmem:[%s11953_s18 + $0xcc] sm:$0xf] %vm8494_vm3, %v10418_v53  ;;  %8802 = vst.msk [vmem:[%s11953_s18 + $0x4cc] sm:$0xf] %vm8494_vm3, %v10674_v54  ;;  %v4096_v57 = vadd.f32 %v12238_v5, %v4095_v55  ;;  %v5120_v58 = vadd.f32 %v12238_v5, %v5119_v56  ;;  %v4097_v59 = vpop.f32.mrb[105].mxu0  ;;  %v5121_v60 = vpop.f32.mrb[105].mxu1 }
 0x1d3   : > { %v4098_v0 = vpop.f32.mrb[106].mxu0  ;;  %v5122_v1 = vpop.f32.mrb[106].mxu1 }
 0x1d4   : > { %v5986_v3 = vmax.f32 %v4096_v57, 0.0  ;;  %v6242_v4 = vmax.f32 %v5120_v58, 0.0  ;;  %v4099_v6 = vadd.f32 %v12238_v5, %v4098_v0  ;;  %v5123_v7 = vadd.f32 %v12238_v5, %v5122_v1  ;;  %v4100_v8 = vpop.f32.mrb[107].mxu0  ;;  %v5124_v9 = vpop.f32.mrb[107].mxu1 }
 0x1d5   : > { %v11260_v8 = vld [vmem:[%s11750_s26 + $0xb80] ss:$8 sps:$4 sm:$0xff]  }
 0x1d6   : > { %v10419_v10 = vpack.c.bf16 %v5986_v3, %v5986_v3  ;;  %v10675_v11 = vpack.c.bf16 %v6242_v4, %v6242_v4  ;;  %v5987_v12 = vmax.f32 %v4099_v6, 0.0  ;;  %v6243_v13 = vmax.f32 %v5123_v7, 0.0  ;;  %4310 = vmatmul.mubr.bf16.gmra.mrb[212].mxu0 %v11241_v62  ;;  %5334 = vmatmul.mubr.bf16.gmra.mrb[212].mxu1 %v11242_v63  ;;  %v11259_v7 = vld [vmem:[%s11750_s26 + $0x380] ss:$8 sps:$4 sm:$0xff]  }
 0x1d7   : > { %9650 = vmatprep.mubr.msk.bf16.mxu0 %vm3077_vm0, %v11243_v61  ;;  %9778 = vmatprep.mubr.msk.bf16.mxu1 %vm3077_vm0, %v11245_v2 }
 0x1d8   : > { %8547 = vst.msk [vmem:[%s11953_s18 + $0xd0] sm:$0xf] %vm8494_vm3, %v10419_v10  ;;  %8803 = vst.msk [vmem:[%s11953_s18 + $0x4d0] sm:$0xf] %vm8494_vm3, %v10675_v11  ;;  %v10420_v14 = vpack.c.bf16 %v5987_v12, %v5987_v12  ;;  %v10676_v15 = vpack.c.bf16 %v6243_v13, %v6243_v13  ;;  %v11261_v11 = vld [vmem:[%s11750_s26 + $0x394] ss:$8 sps:$4 sm:$0xff]  }
 0x1d9   : > { %v4103_v16 = vpop.f32.mrb[108].mxu0  ;;  %v5127_v17 = vpop.f32.mrb[108].mxu1  ;;  %v11263_v12 = vld [vmem:[%s11750_s26 + $0xb94] ss:$8 sps:$4 sm:$0xff]  }
 0x1da   : > { %8548 = vst.msk [vmem:[%s11953_s18 + $0xd4] sm:$0xf] %vm8494_vm3, %v10420_v14  ;;  %8804 = vst.msk [vmem:[%s11953_s18 + $0x4d4] sm:$0xf] %vm8494_vm3, %v10676_v15  ;;  %v4104_v18 = vadd.f32 %v12238_v5, %v4103_v16  ;;  %v5128_v19 = vadd.f32 %v12238_v5, %v5127_v17  ;;  %v4105_v20 = vpop.f32.mrb[109].mxu0  ;;  %v5129_v21 = vpop.f32.mrb[109].mxu1 }
 0x1db   : > { %v4106_v24 = vpop.f32.mrb[110].mxu0  ;;  %v5130_v25 = vpop.f32.mrb[110].mxu1 }
 0x1dc   : > { %v5988_v28 = vmax.f32 %v4104_v18, 0.0  ;;  %v6244_v29 = vmax.f32 %v5128_v19, 0.0  ;;  %v4107_v30 = vadd.f32 %v12238_v5, %v4106_v24  ;;  %v5131_v31 = vadd.f32 %v12238_v5, %v5130_v25  ;;  %v4108_v32 = vpop.f32.mrb[111].mxu0  ;;  %v5132_v33 = vpop.f32.mrb[111].mxu1 }
 0x1dd   : > { %v11266_v32 = vld [vmem:[%s11750_s26 + $0xb90] ss:$8 sps:$4 sm:$0xff]  }
 0x1de   : > { %v10421_v34 = vpack.c.bf16 %v5988_v28, %v5988_v28  ;;  %v10677_v35 = vpack.c.bf16 %v6244_v29, %v6244_v29  ;;  %v5989_v36 = vmax.f32 %v4107_v30, 0.0  ;;  %v6245_v37 = vmax.f32 %v5131_v31, 0.0  ;;  %4318 = vmatmul.mubr.bf16.gmra.mrb[216].mxu0 %v11247_v22  ;;  %5342 = vmatmul.mubr.bf16.gmra.mrb[216].mxu1 %v11248_v23  ;;  %v11265_v31 = vld [vmem:[%s11750_s26 + $0x390] ss:$8 sps:$4 sm:$0xff]  }
 0x1df   : > { %9651 = vmatprep.mubr.msk.bf16.mxu0 %vm3077_vm0, %v11249_v26  ;;  %9779 = vmatprep.mubr.msk.bf16.mxu1 %vm3077_vm0, %v11251_v27 }
 0x1e0   : > { %8549 = vst.msk [vmem:[%s11953_s18 + $0xd8] sm:$0xf] %vm8494_vm3, %v10421_v34  ;;  %8805 = vst.msk [vmem:[%s11953_s18 + $0x4d8] sm:$0xf] %vm8494_vm3, %v10677_v35  ;;  %v10422_v38 = vpack.c.bf16 %v5989_v36, %v5989_v36  ;;  %v10678_v39 = vpack.c.bf16 %v6245_v37, %v6245_v37  ;;  %v11267_v35 = vld [vmem:[%s11750_s26 + $0x3a4] ss:$8 sps:$4 sm:$0xff]  }
 0x1e1   : > { %v4111_v40 = vpop.f32.mrb[112].mxu0  ;;  %v5135_v41 = vpop.f32.mrb[112].mxu1  ;;  %v11269_v36 = vld [vmem:[%s11750_s26 + $0xba4] ss:$8 sps:$4 sm:$0xff]  }
 0x1e2   : > { %8550 = vst.msk [vmem:[%s11953_s18 + $0xdc] sm:$0xf] %vm8494_vm3, %v10422_v38  ;;  %8806 = vst.msk [vmem:[%s11953_s18 + $0x4dc] sm:$0xf] %vm8494_vm3, %v10678_v39  ;;  %v4112_v42 = vadd.f32 %v12238_v5, %v4111_v40  ;;  %v5136_v43 = vadd.f32 %v12238_v5, %v5135_v41  ;;  %v4113_v44 = vpop.f32.mrb[113].mxu0  ;;  %v5137_v45 = vpop.f32.mrb[113].mxu1 }
 0x1e3   : > { %v4114_v48 = vpop.f32.mrb[114].mxu0  ;;  %v5138_v49 = vpop.f32.mrb[114].mxu1 }
 0x1e4   : > { %v5990_v52 = vmax.f32 %v4112_v42, 0.0  ;;  %v6246_v53 = vmax.f32 %v5136_v43, 0.0  ;;  %v4115_v54 = vadd.f32 %v12238_v5, %v4114_v48  ;;  %v5139_v55 = vadd.f32 %v12238_v5, %v5138_v49  ;;  %v4116_v56 = vpop.f32.mrb[115].mxu0  ;;  %v5140_v57 = vpop.f32.mrb[115].mxu1 }
 0x1e5   : > { %v11272_v56 = vld [vmem:[%s11750_s26 + $0xba0] ss:$8 sps:$4 sm:$0xff]  }
 0x1e6   : > { %v10423_v58 = vpack.c.bf16 %v5990_v52, %v5990_v52  ;;  %v10679_v59 = vpack.c.bf16 %v6246_v53, %v6246_v53  ;;  %v5991_v60 = vmax.f32 %v4115_v54, 0.0  ;;  %v6247_v62 = vmax.f32 %v5139_v55, 0.0  ;;  %4326 = vmatmul.mubr.bf16.gmra.mrb[220].mxu0 %v11253_v46  ;;  %5350 = vmatmul.mubr.bf16.gmra.mrb[220].mxu1 %v11254_v47  ;;  %v11271_v55 = vld [vmem:[%s11750_s26 + $0x3a0] ss:$8 sps:$4 sm:$0xff]  }
 0x1e7   : > { %9652 = vmatprep.mubr.msk.bf16.mxu0 %vm3077_vm0, %v11255_v50  ;;  %9780 = vmatprep.mubr.msk.bf16.mxu1 %vm3077_vm0, %v11257_v51 }
 0x1e8   : > { %8551 = vst.msk [vmem:[%s11953_s18 + $0xe0] sm:$0xf] %vm8494_vm3, %v10423_v58  ;;  %8807 = vst.msk [vmem:[%s11953_s18 + $0x4e0] sm:$0xf] %vm8494_vm3, %v10679_v59  ;;  %v10424_v63 = vpack.c.bf16 %v5991_v60, %v5991_v60  ;;  %v10680_v0 = vpack.c.bf16 %v6247_v62, %v6247_v62  ;;  %v11273_v59 = vld [vmem:[%s11750_s26 + $0x3b4] ss:$8 sps:$4 sm:$0xff]  }
 0x1e9   : > { %v4119_v1 = vpop.f32.mrb[116].mxu0  ;;  %v5143_v61 = vpop.f32.mrb[116].mxu1  ;;  %v11275_v60 = vld [vmem:[%s11750_s26 + $0xbb4] ss:$8 sps:$4 sm:$0xff]  }
 0x1ea   : > { %8552 = vst.msk [vmem:[%s11953_s18 + $0xe4] sm:$0xf] %vm8494_vm3, %v10424_v63  ;;  %8808 = vst.msk [vmem:[%s11953_s18 + $0x4e4] sm:$0xf] %vm8494_vm3, %v10680_v0  ;;  %v4120_v2 = vadd.f32 %v12238_v5, %v4119_v1  ;;  %v5144_v3 = vadd.f32 %v12238_v5, %v5143_v61  ;;  %v4121_v4 = vpop.f32.mrb[117].mxu0  ;;  %v5145_v6 = vpop.f32.mrb[117].mxu1 }
 0x1eb   : > { %v4122_v9 = vpop.f32.mrb[118].mxu0  ;;  %v5146_v10 = vpop.f32.mrb[118].mxu1 }
 0x1ec   : > { %v5992_v13 = vmax.f32 %v4120_v2, 0.0  ;;  %v6248_v14 = vmax.f32 %v5144_v3, 0.0  ;;  %v4123_v15 = vadd.f32 %v12238_v5, %v4122_v9  ;;  %v5147_v16 = vadd.f32 %v12238_v5, %v5146_v10  ;;  %v4124_v17 = vpop.f32.mrb[119].mxu0  ;;  %v5148_v18 = vpop.f32.mrb[119].mxu1 }
 0x1ed   : > { %v11278_v17 = vld [vmem:[%s11750_s26 + $0xbb0] ss:$8 sps:$4 sm:$0xff]  }
 0x1ee   : > { %v10425_v19 = vpack.c.bf16 %v5992_v13, %v5992_v13  ;;  %v10681_v20 = vpack.c.bf16 %v6248_v14, %v6248_v14  ;;  %v5993_v21 = vmax.f32 %v4123_v15, 0.0  ;;  %v6249_v22 = vmax.f32 %v5147_v16, 0.0  ;;  %4334 = vmatmul.mubr.bf16.gmra.mrb[224].mxu0 %v11259_v7  ;;  %5358 = vmatmul.mubr.bf16.gmra.mrb[224].mxu1 %v11260_v8  ;;  %v11277_v16 = vld [vmem:[%s11750_s26 + $0x3b0] ss:$8 sps:$4 sm:$0xff]  }
 0x1ef   : > { %9653 = vmatprep.mubr.msk.bf16.mxu0 %vm3077_vm0, %v11261_v11  ;;  %9781 = vmatprep.mubr.msk.bf16.mxu1 %vm3077_vm0, %v11263_v12  ;;  %v12531_v11 = vld [vmem:[%s14125_s2] ss:$0 sm:$0xff] }
 0x1f0   : > { %8553 = vst.msk [vmem:[%s11953_s18 + $0xe8] sm:$0xf] %vm8494_vm3, %v10425_v19  ;;  %8809 = vst.msk [vmem:[%s11953_s18 + $0x4e8] sm:$0xf] %vm8494_vm3, %v10681_v20  ;;  %v10426_v23 = vpack.c.bf16 %v5993_v21, %v5993_v21  ;;  %v10682_v24 = vpack.c.bf16 %v6249_v22, %v6249_v22  ;;  %v11279_v20 = vld [vmem:[%s11750_s26 + $0x3c4] ss:$8 sps:$4 sm:$0xff]  }
 0x1f1   : > { %v4127_v25 = vpop.f32.mrb[120].mxu0  ;;  %v5151_v26 = vpop.f32.mrb[120].mxu1  ;;  %v11281_v21 = vld [vmem:[%s11750_s26 + $0xbc4] ss:$8 sps:$4 sm:$0xff]  }
 0x1f2   : > { %8554 = vst.msk [vmem:[%s11953_s18 + $0xec] sm:$0xf] %vm8494_vm3, %v10426_v23  ;;  %8810 = vst.msk [vmem:[%s11953_s18 + $0x4ec] sm:$0xf] %vm8494_vm3, %v10682_v24  ;;  %v4128_v27 = vadd.f32 %v12238_v5, %v4127_v25  ;;  %v5152_v28 = vadd.f32 %v12238_v5, %v5151_v26  ;;  %v4129_v29 = vpop.f32.mrb[121].mxu0  ;;  %v5153_v30 = vpop.f32.mrb[121].mxu1 }
 0x1f3   : > { %v4130_v33 = vpop.f32.mrb[122].mxu0  ;;  %v5154_v34 = vpop.f32.mrb[122].mxu1 }
 0x1f4   : > { %v5994_v37 = vmax.f32 %v4128_v27, 0.0  ;;  %v6250_v38 = vmax.f32 %v5152_v28, 0.0  ;;  %v4131_v39 = vadd.f32 %v12238_v5, %v4130_v33  ;;  %v5155_v40 = vadd.f32 %v12238_v5, %v5154_v34  ;;  %v4132_v41 = vpop.f32.mrb[123].mxu0  ;;  %v5156_v42 = vpop.f32.mrb[123].mxu1 }
 0x1f5   : > { %v11284_v41 = vld [vmem:[%s11750_s26 + $0xbc0] ss:$8 sps:$4 sm:$0xff]  }
 0x1f6   : > { %v10427_v43 = vpack.c.bf16 %v5994_v37, %v5994_v37  ;;  %v10683_v44 = vpack.c.bf16 %v6250_v38, %v6250_v38  ;;  %v5995_v45 = vmax.f32 %v4131_v39, 0.0  ;;  %v6251_v46 = vmax.f32 %v5155_v40, 0.0  ;;  %4342 = vmatmul.mubr.bf16.gmra.mrb[228].mxu0 %v11265_v31  ;;  %5366 = vmatmul.mubr.bf16.gmra.mrb[228].mxu1 %v11266_v32  ;;  %v11283_v40 = vld [vmem:[%s11750_s26 + $0x3c0] ss:$8 sps:$4 sm:$0xff]  }
 0x1f7   : > { %9654 = vmatprep.mubr.msk.bf16.mxu0 %vm3077_vm0, %v11267_v35  ;;  %9782 = vmatprep.mubr.msk.bf16.mxu1 %vm3077_vm0, %v11269_v36 }
 0x1f8   : > { %8555 = vst.msk [vmem:[%s11953_s18 + $0xf0] sm:$0xf] %vm8494_vm3, %v10427_v43  ;;  %8811 = vst.msk [vmem:[%s11953_s18 + $0x4f0] sm:$0xf] %vm8494_vm3, %v10683_v44  ;;  %v10428_v47 = vpack.c.bf16 %v5995_v45, %v5995_v45  ;;  %v10684_v48 = vpack.c.bf16 %v6251_v46, %v6251_v46  ;;  %v11285_v44 = vld [vmem:[%s11750_s26 + $0x3d4] ss:$8 sps:$4 sm:$0xff]  }
 0x1f9   : > { %v4135_v49 = vpop.f32.mrb[124].mxu0  ;;  %v5159_v50 = vpop.f32.mrb[124].mxu1  ;;  %v11287_v45 = vld [vmem:[%s11750_s26 + $0xbd4] ss:$8 sps:$4 sm:$0xff]  }
 0x1fa   : > { %8556 = vst.msk [vmem:[%s11953_s18 + $0xf4] sm:$0xf] %vm8494_vm3, %v10428_v47  ;;  %8812 = vst.msk [vmem:[%s11953_s18 + $0x4f4] sm:$0xf] %vm8494_vm3, %v10684_v48  ;;  %v4136_v51 = vadd.f32 %v12238_v5, %v4135_v49  ;;  %v5160_v52 = vadd.f32 %v12238_v5, %v5159_v50  ;;  %v4137_v53 = vpop.f32.mrb[125].mxu0  ;;  %v5161_v54 = vpop.f32.mrb[125].mxu1 }
 0x1fb   : > { %v4138_v57 = vpop.f32.mrb[126].mxu0  ;;  %v5162_v58 = vpop.f32.mrb[126].mxu1 }
 0x1fc   : > { %v5996_v62 = vmax.f32 %v4136_v51, 0.0  ;;  %v6252_v63 = vmax.f32 %v5160_v52, 0.0  ;;  %v4139_v0 = vadd.f32 %v12238_v5, %v4138_v57  ;;  %v5163_v1 = vadd.f32 %v12238_v5, %v5162_v58  ;;  %v4140_v61 = vpop.f32.mrb[127].mxu0  ;;  %v5164_v2 = vpop.f32.mrb[127].mxu1 }
 0x1fd   : > { %v11290_v61 = vld [vmem:[%s11750_s26 + $0xbd0] ss:$8 sps:$4 sm:$0xff]  }
 0x1fe   : > { %v10429_v3 = vpack.c.bf16 %v5996_v62, %v5996_v62  ;;  %v10685_v4 = vpack.c.bf16 %v6252_v63, %v6252_v63  ;;  %v5997_v6 = vmax.f32 %v4139_v0, 0.0  ;;  %v6253_v7 = vmax.f32 %v5163_v1, 0.0  ;;  %4350 = vmatmul.mubr.bf16.gmra.mrb[232].mxu0 %v11271_v55  ;;  %5374 = vmatmul.mubr.bf16.gmra.mrb[232].mxu1 %v11272_v56  ;;  %v11289_v1 = vld [vmem:[%s11750_s26 + $0x3d0] ss:$8 sps:$4 sm:$0xff]  }
 0x1ff   : > { %9655 = vmatprep.mubr.msk.bf16.mxu0 %vm3077_vm0, %v11273_v59  ;;  %9783 = vmatprep.mubr.msk.bf16.mxu1 %vm3077_vm0, %v11275_v60 }
 0x200   : > { %8557 = vst.msk [vmem:[%s11953_s18 + $0xf8] sm:$0xf] %vm8494_vm3, %v10429_v3  ;;  %8813 = vst.msk [vmem:[%s11953_s18 + $0x4f8] sm:$0xf] %vm8494_vm3, %v10685_v4  ;;  %v10430_v5 = vpack.c.bf16 %v5997_v6, %v5997_v6  ;;  %v10686_v8 = vpack.c.bf16 %v6253_v7, %v6253_v7  ;;  %v11291_v4 = vld [vmem:[%s11750_s26 + $0x3e4] ss:$8 sps:$4 sm:$0xff]  }
 0x201   : > { %v4143_v9 = vpop.f32.mrb[128].mxu0  ;;  %v5167_v10 = vpop.f32.mrb[128].mxu1  ;;  %v11293_v6 = vld [vmem:[%s11750_s26 + $0xbe4] ss:$8 sps:$4 sm:$0xff]  }
 0x202   : > { %8558 = vst.msk [vmem:[%s11953_s18 + $0xfc] sm:$0xf] %vm8494_vm3, %v10430_v5  ;;  %8814 = vst.msk [vmem:[%s11953_s18 + $0x4fc] sm:$0xf] %vm8494_vm3, %v10686_v8  ;;  %v4144_v12 = vadd.f32 %v12531_v11, %v4143_v9  ;;  %v5168_v13 = vadd.f32 %v12531_v11, %v5167_v10  ;;  %v4145_v14 = vpop.f32.mrb[129].mxu0  ;;  %v5169_v15 = vpop.f32.mrb[129].mxu1 }
 0x203   : > { %v4146_v18 = vpop.f32.mrb[130].mxu0  ;;  %v5170_v19 = vpop.f32.mrb[130].mxu1 }
 0x204   : > { %v5998_v22 = vmax.f32 %v4144_v12, 0.0  ;;  %v6254_v23 = vmax.f32 %v5168_v13, 0.0  ;;  %v4147_v24 = vadd.f32 %v12531_v11, %v4146_v18  ;;  %v5171_v25 = vadd.f32 %v12531_v11, %v5170_v19  ;;  %v4148_v26 = vpop.f32.mrb[131].mxu0  ;;  %v5172_v27 = vpop.f32.mrb[131].mxu1 }
 0x205   : > { %v11296_v26 = vld [vmem:[%s11750_s26 + $0xbe0] ss:$8 sps:$4 sm:$0xff]  }
 0x206   : > { %v10431_v28 = vpack.c.bf16 %v5998_v22, %v5998_v22  ;;  %v10687_v29 = vpack.c.bf16 %v6254_v23, %v6254_v23  ;;  %v5999_v30 = vmax.f32 %v4147_v24, 0.0  ;;  %v6255_v31 = vmax.f32 %v5171_v25, 0.0  ;;  %4358 = vmatmul.mubr.bf16.gmra.mrb[236].mxu0 %v11277_v16  ;;  %5382 = vmatmul.mubr.bf16.gmra.mrb[236].mxu1 %v11278_v17  ;;  %v11295_v25 = vld [vmem:[%s11750_s26 + $0x3e0] ss:$8 sps:$4 sm:$0xff]  }
 0x207   : > { %9656 = vmatprep.mubr.msk.bf16.mxu0 %vm3077_vm0, %v11279_v20  ;;  %9784 = vmatprep.mubr.msk.bf16.mxu1 %vm3077_vm0, %v11281_v21 }
 0x208   : > { %8559 = vst.msk [vmem:[%s11953_s18 + $0x100] sm:$0xf] %vm8494_vm3, %v10431_v28  ;;  %8815 = vst.msk [vmem:[%s11953_s18 + $0x500] sm:$0xf] %vm8494_vm3, %v10687_v29  ;;  %v10432_v32 = vpack.c.bf16 %v5999_v30, %v5999_v30  ;;  %v10688_v33 = vpack.c.bf16 %v6255_v31, %v6255_v31  ;;  %v11297_v29 = vld [vmem:[%s11750_s26 + $0x3f4] ss:$8 sps:$4 sm:$0xff]  }
 0x209   : > { %v4151_v34 = vpop.f32.mrb[132].mxu0  ;;  %v5175_v35 = vpop.f32.mrb[132].mxu1  ;;  %v11299_v30 = vld [vmem:[%s11750_s26 + $0xbf4] ss:$8 sps:$4 sm:$0xff]  }
 0x20a   : > { %8560 = vst.msk [vmem:[%s11953_s18 + $0x104] sm:$0xf] %vm8494_vm3, %v10432_v32  ;;  %8816 = vst.msk [vmem:[%s11953_s18 + $0x504] sm:$0xf] %vm8494_vm3, %v10688_v33  ;;  %v4152_v36 = vadd.f32 %v12531_v11, %v4151_v34  ;;  %v5176_v37 = vadd.f32 %v12531_v11, %v5175_v35  ;;  %v4153_v38 = vpop.f32.mrb[133].mxu0  ;;  %v5177_v39 = vpop.f32.mrb[133].mxu1 }
 0x20b   : > { %v4154_v42 = vpop.f32.mrb[134].mxu0  ;;  %v5178_v43 = vpop.f32.mrb[134].mxu1 }
 0x20c   : > { %v6000_v46 = vmax.f32 %v4152_v36, 0.0  ;;  %v6256_v47 = vmax.f32 %v5176_v37, 0.0  ;;  %v4155_v48 = vadd.f32 %v12531_v11, %v4154_v42  ;;  %v5179_v49 = vadd.f32 %v12531_v11, %v5178_v43  ;;  %v4156_v50 = vpop.f32.mrb[135].mxu0  ;;  %v5180_v51 = vpop.f32.mrb[135].mxu1 }
 0x20d   : > { %v11302_v50 = vld [vmem:[%s11750_s26 + $0xbf0] ss:$8 sps:$4 sm:$0xff]  }
 0x20e   : > { %v10433_v52 = vpack.c.bf16 %v6000_v46, %v6000_v46  ;;  %v10689_v53 = vpack.c.bf16 %v6256_v47, %v6256_v47  ;;  %v6001_v54 = vmax.f32 %v4155_v48, 0.0  ;;  %v6257_v55 = vmax.f32 %v5179_v49, 0.0  ;;  %4366 = vmatmul.mubr.bf16.gmra.mrb[240].mxu0 %v11283_v40  ;;  %5390 = vmatmul.mubr.bf16.gmra.mrb[240].mxu1 %v11284_v41  ;;  %v11301_v49 = vld [vmem:[%s11750_s26 + $0x3f0] ss:$8 sps:$4 sm:$0xff]  }
 0x20f   : > { %9657 = vmatprep.mubr.msk.bf16.mxu0 %vm3077_vm0, %v11285_v44  ;;  %9785 = vmatprep.mubr.msk.bf16.mxu1 %vm3077_vm0, %v11287_v45 }
 0x210   : > { %8561 = vst.msk [vmem:[%s11953_s18 + $0x108] sm:$0xf] %vm8494_vm3, %v10433_v52  ;;  %8817 = vst.msk [vmem:[%s11953_s18 + $0x508] sm:$0xf] %vm8494_vm3, %v10689_v53  ;;  %v10434_v56 = vpack.c.bf16 %v6001_v54, %v6001_v54  ;;  %v10690_v57 = vpack.c.bf16 %v6257_v55, %v6257_v55  ;;  %v11305_v53 = vld [vmem:[%s11750_s26 + $0x404] ss:$8 sps:$4 sm:$0xff]  }
 0x211   : > { %v4159_v58 = vpop.f32.mrb[136].mxu0  ;;  %v5183_v59 = vpop.f32.mrb[136].mxu1  ;;  %v11308_v54 = vld [vmem:[%s11750_s26 + $0xc04] ss:$8 sps:$4 sm:$0xff]  }
 0x212   : > { %8562 = vst.msk [vmem:[%s11953_s18 + $0x10c] sm:$0xf] %vm8494_vm3, %v10434_v56  ;;  %8818 = vst.msk [vmem:[%s11953_s18 + $0x50c] sm:$0xf] %vm8494_vm3, %v10690_v57  ;;  %v4160_v60 = vadd.f32 %v12531_v11, %v4159_v58  ;;  %v5184_v62 = vadd.f32 %v12531_v11, %v5183_v59  ;;  %v4161_v63 = vpop.f32.mrb[137].mxu0  ;;  %v5185_v0 = vpop.f32.mrb[137].mxu1 }
 0x213   : > { %v4162_v2 = vpop.f32.mrb[138].mxu0  ;;  %v5186_v3 = vpop.f32.mrb[138].mxu1 }
 0x214   : > { %v6002_v7 = vmax.f32 %v4160_v60, 0.0  ;;  %v6258_v5 = vmax.f32 %v5184_v62, 0.0  ;;  %v4163_v8 = vadd.f32 %v12531_v11, %v4162_v2  ;;  %v5187_v9 = vadd.f32 %v12531_v11, %v5186_v3  ;;  %v4164_v10 = vpop.f32.mrb[139].mxu0  ;;  %v5188_v12 = vpop.f32.mrb[139].mxu1 }
 0x215   : > { %v11306_v10 = vld [vmem:[%s11750_s26 + $0xc00] ss:$8 sps:$4 sm:$0xff]  }
 0x216   : > { %v10435_v13 = vpack.c.bf16 %v6002_v7, %v6002_v7  ;;  %v10691_v14 = vpack.c.bf16 %v6258_v5, %v6258_v5  ;;  %v6003_v15 = vmax.f32 %v4163_v8, 0.0  ;;  %v6259_v16 = vmax.f32 %v5187_v9, 0.0  ;;  %4374 = vmatmul.mubr.bf16.gmra.mrb[244].mxu0 %v11289_v1  ;;  %5398 = vmatmul.mubr.bf16.gmra.mrb[244].mxu1 %v11290_v61  ;;  %v11303_v9 = vld [vmem:[%s11750_s26 + $0x400] ss:$8 sps:$4 sm:$0xff]  }
 0x217   : > { %9658 = vmatprep.mubr.msk.bf16.mxu0 %vm3077_vm0, %v11291_v4  ;;  %9786 = vmatprep.mubr.msk.bf16.mxu1 %vm3077_vm0, %v11293_v6 }
 0x218   : > { %8563 = vst.msk [vmem:[%s11953_s18 + $0x110] sm:$0xf] %vm8494_vm3, %v10435_v13  ;;  %8819 = vst.msk [vmem:[%s11953_s18 + $0x510] sm:$0xf] %vm8494_vm3, %v10691_v14  ;;  %v10436_v17 = vpack.c.bf16 %v6003_v15, %v6003_v15  ;;  %v10692_v18 = vpack.c.bf16 %v6259_v16, %v6259_v16  ;;  %v11311_v14 = vld [vmem:[%s11750_s26 + $0x414] ss:$8 sps:$4 sm:$0xff]  }
 0x219   : > { %v4167_v19 = vpop.f32.mrb[140].mxu0  ;;  %v5191_v20 = vpop.f32.mrb[140].mxu1  ;;  %v11314_v15 = vld [vmem:[%s11750_s26 + $0xc14] ss:$8 sps:$4 sm:$0xff]  }
 0x21a   : > { %8564 = vst.msk [vmem:[%s11953_s18 + $0x114] sm:$0xf] %vm8494_vm3, %v10436_v17  ;;  %8820 = vst.msk [vmem:[%s11953_s18 + $0x514] sm:$0xf] %vm8494_vm3, %v10692_v18  ;;  %v4168_v21 = vadd.f32 %v12531_v11, %v4167_v19  ;;  %v5192_v22 = vadd.f32 %v12531_v11, %v5191_v20  ;;  %v4169_v23 = vpop.f32.mrb[141].mxu0  ;;  %v5193_v24 = vpop.f32.mrb[141].mxu1 }
 0x21b   : > { %v4170_v27 = vpop.f32.mrb[142].mxu0  ;;  %v5194_v28 = vpop.f32.mrb[142].mxu1 }
 0x21c   : > { %v6004_v31 = vmax.f32 %v4168_v21, 0.0  ;;  %v6260_v32 = vmax.f32 %v5192_v22, 0.0  ;;  %v4171_v33 = vadd.f32 %v12531_v11, %v4170_v27  ;;  %v5195_v34 = vadd.f32 %v12531_v11, %v5194_v28  ;;  %v4172_v35 = vpop.f32.mrb[143].mxu0  ;;  %v5196_v36 = vpop.f32.mrb[143].mxu1 }
 0x21d   : > { %v11312_v35 = vld [vmem:[%s11750_s26 + $0xc10] ss:$8 sps:$4 sm:$0xff]  }
 0x21e   : > { %v10437_v37 = vpack.c.bf16 %v6004_v31, %v6004_v31  ;;  %v10693_v38 = vpack.c.bf16 %v6260_v32, %v6260_v32  ;;  %v6005_v39 = vmax.f32 %v4171_v33, 0.0  ;;  %v6261_v40 = vmax.f32 %v5195_v34, 0.0  ;;  %4382 = vmatmul.mubr.bf16.gmra.mrb[248].mxu0 %v11295_v25  ;;  %5406 = vmatmul.mubr.bf16.gmra.mrb[248].mxu1 %v11296_v26  ;;  %v11309_v34 = vld [vmem:[%s11750_s26 + $0x410] ss:$8 sps:$4 sm:$0xff]  }
 0x21f   : > { %9659 = vmatprep.mubr.msk.bf16.mxu0 %vm3077_vm0, %v11297_v29  ;;  %9787 = vmatprep.mubr.msk.bf16.mxu1 %vm3077_vm0, %v11299_v30 }
 0x220   : > { %8565 = vst.msk [vmem:[%s11953_s18 + $0x118] sm:$0xf] %vm8494_vm3, %v10437_v37  ;;  %8821 = vst.msk [vmem:[%s11953_s18 + $0x518] sm:$0xf] %vm8494_vm3, %v10693_v38  ;;  %v10438_v41 = vpack.c.bf16 %v6005_v39, %v6005_v39  ;;  %v10694_v42 = vpack.c.bf16 %v6261_v40, %v6261_v40  ;;  %v11317_v38 = vld [vmem:[%s11750_s26 + $0x424] ss:$8 sps:$4 sm:$0xff]  }
 0x221   : > { %v4175_v43 = vpop.f32.mrb[144].mxu0  ;;  %v5199_v44 = vpop.f32.mrb[144].mxu1  ;;  %v11320_v39 = vld [vmem:[%s11750_s26 + $0xc24] ss:$8 sps:$4 sm:$0xff]  }
 0x222   : > { %8566 = vst.msk [vmem:[%s11953_s18 + $0x11c] sm:$0xf] %vm8494_vm3, %v10438_v41  ;;  %8822 = vst.msk [vmem:[%s11953_s18 + $0x51c] sm:$0xf] %vm8494_vm3, %v10694_v42  ;;  %v4176_v45 = vadd.f32 %v12531_v11, %v4175_v43  ;;  %v5200_v46 = vadd.f32 %v12531_v11, %v5199_v44  ;;  %v4177_v47 = vpop.f32.mrb[145].mxu0  ;;  %v5201_v48 = vpop.f32.mrb[145].mxu1 }
 0x223   : > { %v4178_v51 = vpop.f32.mrb[146].mxu0  ;;  %v5202_v52 = vpop.f32.mrb[146].mxu1 }
 0x224   : > { %v6006_v55 = vmax.f32 %v4176_v45, 0.0  ;;  %v6262_v56 = vmax.f32 %v5200_v46, 0.0  ;;  %v4179_v57 = vadd.f32 %v12531_v11, %v4178_v51  ;;  %v5203_v58 = vadd.f32 %v12531_v11, %v5202_v52  ;;  %v4180_v59 = vpop.f32.mrb[147].mxu0  ;;  %v5204_v60 = vpop.f32.mrb[147].mxu1 }
 0x225   : > { %v11318_v59 = vld [vmem:[%s11750_s26 + $0xc20] ss:$8 sps:$4 sm:$0xff]  }
 0x226   : > { %v10439_v62 = vpack.c.bf16 %v6006_v55, %v6006_v55  ;;  %v10695_v63 = vpack.c.bf16 %v6262_v56, %v6262_v56  ;;  %v6007_v0 = vmax.f32 %v4179_v57, 0.0  ;;  %v6263_v1 = vmax.f32 %v5203_v58, 0.0  ;;  %4390 = vmatmul.mubr.bf16.gmra.mrb[252].mxu0 %v11301_v49  ;;  %5414 = vmatmul.mubr.bf16.gmra.mrb[252].mxu1 %v11302_v50  ;;  %v11315_v58 = vld [vmem:[%s11750_s26 + $0x420] ss:$8 sps:$4 sm:$0xff]  }
 0x227   : > { %9660 = vmatprep.mubr.msk.bf16.mxu0 %vm3077_vm0, %v11305_v53  ;;  %9788 = vmatprep.mubr.msk.bf16.mxu1 %vm3077_vm0, %v11308_v54 }
 0x228   : > { %8567 = vst.msk [vmem:[%s11953_s18 + $0x120] sm:$0xf] %vm8494_vm3, %v10439_v62  ;;  %8823 = vst.msk [vmem:[%s11953_s18 + $0x520] sm:$0xf] %vm8494_vm3, %v10695_v63  ;;  %v10440_v61 = vpack.c.bf16 %v6007_v0, %v6007_v0  ;;  %v10696_v2 = vpack.c.bf16 %v6263_v1, %v6263_v1  ;;  %v11323_v63 = vld [vmem:[%s11750_s26 + $0x434] ss:$8 sps:$4 sm:$0xff]  }
 0x229   : > { %v4183_v3 = vpop.f32.mrb[148].mxu0  ;;  %v5207_v4 = vpop.f32.mrb[148].mxu1  ;;  %v11326_v0 = vld [vmem:[%s11750_s26 + $0xc34] ss:$8 sps:$4 sm:$0xff]  }
 0x22a   : > { %8568 = vst.msk [vmem:[%s11953_s18 + $0x124] sm:$0xf] %vm8494_vm3, %v10440_v61  ;;  %8824 = vst.msk [vmem:[%s11953_s18 + $0x524] sm:$0xf] %vm8494_vm3, %v10696_v2  ;;  %v4184_v6 = vadd.f32 %v12531_v11, %v4183_v3  ;;  %v5208_v7 = vadd.f32 %v12531_v11, %v5207_v4  ;;  %v4185_v5 = vpop.f32.mrb[149].mxu0  ;;  %v5209_v8 = vpop.f32.mrb[149].mxu1 }
 0x22b   : > { %v4186_v12 = vpop.f32.mrb[150].mxu0  ;;  %v5210_v13 = vpop.f32.mrb[150].mxu1 }
 0x22c   : > { %v6008_v16 = vmax.f32 %v4184_v6, 0.0  ;;  %v6264_v17 = vmax.f32 %v5208_v7, 0.0  ;;  %v4187_v18 = vadd.f32 %v12531_v11, %v4186_v12  ;;  %v5211_v19 = vadd.f32 %v12531_v11, %v5210_v13  ;;  %v4188_v20 = vpop.f32.mrb[151].mxu0  ;;  %v5212_v21 = vpop.f32.mrb[151].mxu1 }
 0x22d   : > { %v11324_v20 = vld [vmem:[%s11750_s26 + $0xc30] ss:$8 sps:$4 sm:$0xff]  }
 0x22e   : > { %v10441_v22 = vpack.c.bf16 %v6008_v16, %v6008_v16  ;;  %v10697_v23 = vpack.c.bf16 %v6264_v17, %v6264_v17  ;;  %v6009_v24 = vmax.f32 %v4187_v18, 0.0  ;;  %v6265_v25 = vmax.f32 %v5211_v19, 0.0  ;;  %4398 = vmatmul.mubr.bf16.gmra.mrb[0].mxu0 %v11303_v9  ;;  %5422 = vmatmul.mubr.bf16.gmra.mrb[0].mxu1 %v11306_v10  ;;  %v11321_v19 = vld [vmem:[%s11750_s26 + $0x430] ss:$8 sps:$4 sm:$0xff]  }
 0x22f   : > { %9661 = vmatprep.mubr.msk.bf16.mxu0 %vm3077_vm0, %v11311_v14  ;;  %9789 = vmatprep.mubr.msk.bf16.mxu1 %vm3077_vm0, %v11314_v15 }
 0x230   : > { %8569 = vst.msk [vmem:[%s11953_s18 + $0x128] sm:$0xf] %vm8494_vm3, %v10441_v22  ;;  %8825 = vst.msk [vmem:[%s11953_s18 + $0x528] sm:$0xf] %vm8494_vm3, %v10697_v23  ;;  %v10442_v26 = vpack.c.bf16 %v6009_v24, %v6009_v24  ;;  %v10698_v27 = vpack.c.bf16 %v6265_v25, %v6265_v25  ;;  %v11329_v23 = vld [vmem:[%s11750_s26 + $0x444] ss:$8 sps:$4 sm:$0xff]  }
 0x231   : > { %v4191_v28 = vpop.f32.mrb[152].mxu0  ;;  %v5215_v29 = vpop.f32.mrb[152].mxu1  ;;  %v11332_v24 = vld [vmem:[%s11750_s26 + $0xc44] ss:$8 sps:$4 sm:$0xff]  }
 0x232   : > { %8570 = vst.msk [vmem:[%s11953_s18 + $0x12c] sm:$0xf] %vm8494_vm3, %v10442_v26  ;;  %8826 = vst.msk [vmem:[%s11953_s18 + $0x52c] sm:$0xf] %vm8494_vm3, %v10698_v27  ;;  %v4192_v30 = vadd.f32 %v12531_v11, %v4191_v28  ;;  %v5216_v31 = vadd.f32 %v12531_v11, %v5215_v29  ;;  %v4193_v32 = vpop.f32.mrb[153].mxu0  ;;  %v5217_v33 = vpop.f32.mrb[153].mxu1 }
 0x233   : > { %v4194_v36 = vpop.f32.mrb[154].mxu0  ;;  %v5218_v37 = vpop.f32.mrb[154].mxu1 }
 0x234   : > { %v6010_v40 = vmax.f32 %v4192_v30, 0.0  ;;  %v6266_v41 = vmax.f32 %v5216_v31, 0.0  ;;  %v4195_v42 = vadd.f32 %v12531_v11, %v4194_v36  ;;  %v5219_v43 = vadd.f32 %v12531_v11, %v5218_v37  ;;  %v4196_v44 = vpop.f32.mrb[155].mxu0  ;;  %v5220_v45 = vpop.f32.mrb[155].mxu1 }
 0x235   : > { %v11330_v44 = vld [vmem:[%s11750_s26 + $0xc40] ss:$8 sps:$4 sm:$0xff]  }
 0x236   : > { %v10443_v46 = vpack.c.bf16 %v6010_v40, %v6010_v40  ;;  %v10699_v47 = vpack.c.bf16 %v6266_v41, %v6266_v41  ;;  %v6011_v48 = vmax.f32 %v4195_v42, 0.0  ;;  %v6267_v49 = vmax.f32 %v5219_v43, 0.0  ;;  %4406 = vmatmul.mubr.bf16.gmra.mrb[4].mxu0 %v11309_v34  ;;  %5430 = vmatmul.mubr.bf16.gmra.mrb[4].mxu1 %v11312_v35  ;;  %v11327_v43 = vld [vmem:[%s11750_s26 + $0x440] ss:$8 sps:$4 sm:$0xff]  }
 0x237   : > { %9662 = vmatprep.mubr.msk.bf16.mxu0 %vm3077_vm0, %v11317_v38  ;;  %9790 = vmatprep.mubr.msk.bf16.mxu1 %vm3077_vm0, %v11320_v39 }
 0x238   : > { %8571 = vst.msk [vmem:[%s11953_s18 + $0x130] sm:$0xf] %vm8494_vm3, %v10443_v46  ;;  %8827 = vst.msk [vmem:[%s11953_s18 + $0x530] sm:$0xf] %vm8494_vm3, %v10699_v47  ;;  %v10444_v50 = vpack.c.bf16 %v6011_v48, %v6011_v48  ;;  %v10700_v51 = vpack.c.bf16 %v6267_v49, %v6267_v49  ;;  %v11335_v47 = vld [vmem:[%s11750_s26 + $0x454] ss:$8 sps:$4 sm:$0xff]  }
 0x239   : > { %v4199_v52 = vpop.f32.mrb[156].mxu0  ;;  %v5223_v53 = vpop.f32.mrb[156].mxu1  ;;  %v11338_v48 = vld [vmem:[%s11750_s26 + $0xc54] ss:$8 sps:$4 sm:$0xff]  }
 0x23a   : > { %8572 = vst.msk [vmem:[%s11953_s18 + $0x134] sm:$0xf] %vm8494_vm3, %v10444_v50  ;;  %8828 = vst.msk [vmem:[%s11953_s18 + $0x534] sm:$0xf] %vm8494_vm3, %v10700_v51  ;;  %v4200_v54 = vadd.f32 %v12531_v11, %v4199_v52  ;;  %v5224_v55 = vadd.f32 %v12531_v11, %v5223_v53  ;;  %v4201_v56 = vpop.f32.mrb[157].mxu0  ;;  %v5225_v57 = vpop.f32.mrb[157].mxu1 }
 0x23b   : > { %v4202_v60 = vpop.f32.mrb[158].mxu0  ;;  %v5226_v62 = vpop.f32.mrb[158].mxu1 }
 0x23c   : > { %v6012_v1 = vmax.f32 %v4200_v54, 0.0  ;;  %v6268_v61 = vmax.f32 %v5224_v55, 0.0  ;;  %v4203_v2 = vadd.f32 %v12531_v11, %v4202_v60  ;;  %v5227_v3 = vadd.f32 %v12531_v11, %v5226_v62  ;;  %v4204_v4 = vpop.f32.mrb[159].mxu0  ;;  %v5228_v6 = vpop.f32.mrb[159].mxu1 }
 0x23d   : > { %v11336_v4 = vld [vmem:[%s11750_s26 + $0xc50] ss:$8 sps:$4 sm:$0xff]  }
 0x23e   : > { %v10445_v7 = vpack.c.bf16 %v6012_v1, %v6012_v1  ;;  %v10701_v5 = vpack.c.bf16 %v6268_v61, %v6268_v61  ;;  %v6013_v8 = vmax.f32 %v4203_v2, 0.0  ;;  %v6269_v9 = vmax.f32 %v5227_v3, 0.0  ;;  %4414 = vmatmul.mubr.bf16.gmra.mrb[8].mxu0 %v11315_v58  ;;  %5438 = vmatmul.mubr.bf16.gmra.mrb[8].mxu1 %v11318_v59  ;;  %v11333_v3 = vld [vmem:[%s11750_s26 + $0x450] ss:$8 sps:$4 sm:$0xff]  }
 0x23f   : > { %9663 = vmatprep.mubr.msk.bf16.mxu0 %vm3077_vm0, %v11323_v63  ;;  %9791 = vmatprep.mubr.msk.bf16.mxu1 %vm3077_vm0, %v11326_v0 }
 0x240   : > { %8573 = vst.msk [vmem:[%s11953_s18 + $0x138] sm:$0xf] %vm8494_vm3, %v10445_v7  ;;  %8829 = vst.msk [vmem:[%s11953_s18 + $0x538] sm:$0xf] %vm8494_vm3, %v10701_v5  ;;  %v10446_v10 = vpack.c.bf16 %v6013_v8, %v6013_v8  ;;  %v10702_v12 = vpack.c.bf16 %v6269_v9, %v6269_v9  ;;  %v11341_v5 = vld [vmem:[%s11750_s26 + $0x464] ss:$8 sps:$4 sm:$0xff]  }
 0x241   : > { %v4207_v13 = vpop.f32.mrb[160].mxu0  ;;  %v5231_v14 = vpop.f32.mrb[160].mxu1  ;;  %v11344_v8 = vld [vmem:[%s11750_s26 + $0xc64] ss:$8 sps:$4 sm:$0xff]  }
 0x242   : > { %8574 = vst.msk [vmem:[%s11953_s18 + $0x13c] sm:$0xf] %vm8494_vm3, %v10446_v10  ;;  %8830 = vst.msk [vmem:[%s11953_s18 + $0x53c] sm:$0xf] %vm8494_vm3, %v10702_v12  ;;  %v4208_v15 = vadd.f32 %v12531_v11, %v4207_v13  ;;  %v5232_v16 = vadd.f32 %v12531_v11, %v5231_v14  ;;  %v4209_v17 = vpop.f32.mrb[161].mxu0  ;;  %v5233_v18 = vpop.f32.mrb[161].mxu1 }
 0x243   : > { %v4210_v21 = vpop.f32.mrb[162].mxu0  ;;  %v5234_v22 = vpop.f32.mrb[162].mxu1 }
 0x244   : > { %v6014_v25 = vmax.f32 %v4208_v15, 0.0  ;;  %v6270_v26 = vmax.f32 %v5232_v16, 0.0  ;;  %v4211_v27 = vadd.f32 %v12531_v11, %v4210_v21  ;;  %v5235_v28 = vadd.f32 %v12531_v11, %v5234_v22  ;;  %v4212_v29 = vpop.f32.mrb[163].mxu0  ;;  %v5236_v30 = vpop.f32.mrb[163].mxu1 }
 0x245   : > { %v11342_v29 = vld [vmem:[%s11750_s26 + $0xc60] ss:$8 sps:$4 sm:$0xff]  }
 0x246   : > { %v10447_v31 = vpack.c.bf16 %v6014_v25, %v6014_v25  ;;  %v10703_v32 = vpack.c.bf16 %v6270_v26, %v6270_v26  ;;  %v6015_v33 = vmax.f32 %v4211_v27, 0.0  ;;  %v6271_v34 = vmax.f32 %v5235_v28, 0.0  ;;  %4422 = vmatmul.mubr.bf16.gmra.mrb[12].mxu0 %v11321_v19  ;;  %5446 = vmatmul.mubr.bf16.gmra.mrb[12].mxu1 %v11324_v20  ;;  %v11339_v28 = vld [vmem:[%s11750_s26 + $0x460] ss:$8 sps:$4 sm:$0xff]  }
 0x247   : > { %9664 = vmatprep.mubr.msk.bf16.mxu0 %vm3077_vm0, %v11329_v23  ;;  %9792 = vmatprep.mubr.msk.bf16.mxu1 %vm3077_vm0, %v11332_v24 }
 0x248   : > { %8575 = vst.msk [vmem:[%s11953_s18 + $0x140] sm:$0xf] %vm8494_vm3, %v10447_v31  ;;  %8831 = vst.msk [vmem:[%s11953_s18 + $0x540] sm:$0xf] %vm8494_vm3, %v10703_v32  ;;  %v10448_v35 = vpack.c.bf16 %v6015_v33, %v6015_v33  ;;  %v10704_v36 = vpack.c.bf16 %v6271_v34, %v6271_v34  ;;  %v11347_v32 = vld [vmem:[%s11750_s26 + $0x474] ss:$8 sps:$4 sm:$0xff]  }
 0x249   : > { %v4215_v37 = vpop.f32.mrb[164].mxu0  ;;  %v5239_v38 = vpop.f32.mrb[164].mxu1  ;;  %v11350_v33 = vld [vmem:[%s11750_s26 + $0xc74] ss:$8 sps:$4 sm:$0xff]  }
 0x24a   : > { %8576 = vst.msk [vmem:[%s11953_s18 + $0x144] sm:$0xf] %vm8494_vm3, %v10448_v35  ;;  %8832 = vst.msk [vmem:[%s11953_s18 + $0x544] sm:$0xf] %vm8494_vm3, %v10704_v36  ;;  %v4216_v39 = vadd.f32 %v12531_v11, %v4215_v37  ;;  %v5240_v40 = vadd.f32 %v12531_v11, %v5239_v38  ;;  %v4217_v41 = vpop.f32.mrb[165].mxu0  ;;  %v5241_v42 = vpop.f32.mrb[165].mxu1 }
 0x24b   : > { %v4218_v45 = vpop.f32.mrb[166].mxu0  ;;  %v5242_v46 = vpop.f32.mrb[166].mxu1 }
 0x24c   : > { %v6016_v49 = vmax.f32 %v4216_v39, 0.0  ;;  %v6272_v50 = vmax.f32 %v5240_v40, 0.0  ;;  %v4219_v51 = vadd.f32 %v12531_v11, %v4218_v45  ;;  %v5243_v52 = vadd.f32 %v12531_v11, %v5242_v46  ;;  %v4220_v53 = vpop.f32.mrb[167].mxu0  ;;  %v5244_v54 = vpop.f32.mrb[167].mxu1 }
 0x24d   : > { %v11348_v53 = vld [vmem:[%s11750_s26 + $0xc70] ss:$8 sps:$4 sm:$0xff]  }
 0x24e   : > { %v10449_v55 = vpack.c.bf16 %v6016_v49, %v6016_v49  ;;  %v10705_v56 = vpack.c.bf16 %v6272_v50, %v6272_v50  ;;  %v6017_v57 = vmax.f32 %v4219_v51, 0.0  ;;  %v6273_v58 = vmax.f32 %v5243_v52, 0.0  ;;  %4430 = vmatmul.mubr.bf16.gmra.mrb[16].mxu0 %v11327_v43  ;;  %5454 = vmatmul.mubr.bf16.gmra.mrb[16].mxu1 %v11330_v44  ;;  %v11345_v52 = vld [vmem:[%s11750_s26 + $0x470] ss:$8 sps:$4 sm:$0xff]  }
 0x24f   : > { %9665 = vmatprep.mubr.msk.bf16.mxu0 %vm3077_vm0, %v11335_v47  ;;  %9793 = vmatprep.mubr.msk.bf16.mxu1 %vm3077_vm0, %v11338_v48 }
 0x250   : > { %8577 = vst.msk [vmem:[%s11953_s18 + $0x148] sm:$0xf] %vm8494_vm3, %v10449_v55  ;;  %8833 = vst.msk [vmem:[%s11953_s18 + $0x548] sm:$0xf] %vm8494_vm3, %v10705_v56  ;;  %v10450_v59 = vpack.c.bf16 %v6017_v57, %v6017_v57  ;;  %v10706_v60 = vpack.c.bf16 %v6273_v58, %v6273_v58  ;;  %v11353_v56 = vld [vmem:[%s11750_s26 + $0x484] ss:$8 sps:$4 sm:$0xff]  }
 0x251   : > { %v4223_v62 = vpop.f32.mrb[168].mxu0  ;;  %v5247_v63 = vpop.f32.mrb[168].mxu1  ;;  %v11356_v57 = vld [vmem:[%s11750_s26 + $0xc84] ss:$8 sps:$4 sm:$0xff]  }
 0x252   : > { %8578 = vst.msk [vmem:[%s11953_s18 + $0x14c] sm:$0xf] %vm8494_vm3, %v10450_v59  ;;  %8834 = vst.msk [vmem:[%s11953_s18 + $0x54c] sm:$0xf] %vm8494_vm3, %v10706_v60  ;;  %v4224_v0 = vadd.f32 %v12531_v11, %v4223_v62  ;;  %v5248_v1 = vadd.f32 %v12531_v11, %v5247_v63  ;;  %v4225_v61 = vpop.f32.mrb[169].mxu0  ;;  %v5249_v2 = vpop.f32.mrb[169].mxu1 }
 0x253   : > { %v4226_v6 = vpop.f32.mrb[170].mxu0  ;;  %v5250_v7 = vpop.f32.mrb[170].mxu1 }
 0x254   : > { %v6018_v9 = vmax.f32 %v4224_v0, 0.0  ;;  %v6274_v10 = vmax.f32 %v5248_v1, 0.0  ;;  %v4227_v12 = vadd.f32 %v12531_v11, %v4226_v6  ;;  %v5251_v13 = vadd.f32 %v12531_v11, %v5250_v7  ;;  %v4228_v14 = vpop.f32.mrb[171].mxu0  ;;  %v5252_v15 = vpop.f32.mrb[171].mxu1 }
 0x255   : > { %v11354_v14 = vld [vmem:[%s11750_s26 + $0xc80] ss:$8 sps:$4 sm:$0xff]  }
 0x256   : > { %v10451_v16 = vpack.c.bf16 %v6018_v9, %v6018_v9  ;;  %v10707_v17 = vpack.c.bf16 %v6274_v10, %v6274_v10  ;;  %v6019_v18 = vmax.f32 %v4227_v12, 0.0  ;;  %v6275_v19 = vmax.f32 %v5251_v13, 0.0  ;;  %4438 = vmatmul.mubr.bf16.gmra.mrb[20].mxu0 %v11333_v3  ;;  %5462 = vmatmul.mubr.bf16.gmra.mrb[20].mxu1 %v11336_v4  ;;  %v11351_v13 = vld [vmem:[%s11750_s26 + $0x480] ss:$8 sps:$4 sm:$0xff]  }
 0x257   : > { %9666 = vmatprep.mubr.msk.bf16.mxu0 %vm3077_vm0, %v11341_v5  ;;  %9794 = vmatprep.mubr.msk.bf16.mxu1 %vm3077_vm0, %v11344_v8 }
 0x258   : > { %8579 = vst.msk [vmem:[%s11953_s18 + $0x150] sm:$0xf] %vm8494_vm3, %v10451_v16  ;;  %8835 = vst.msk [vmem:[%s11953_s18 + $0x550] sm:$0xf] %vm8494_vm3, %v10707_v17  ;;  %v10452_v20 = vpack.c.bf16 %v6019_v18, %v6019_v18  ;;  %v10708_v21 = vpack.c.bf16 %v6275_v19, %v6275_v19  ;;  %v11359_v17 = vld [vmem:[%s11750_s26 + $0x494] ss:$8 sps:$4 sm:$0xff]  }
 0x259   : > { %v4231_v22 = vpop.f32.mrb[172].mxu0  ;;  %v5255_v23 = vpop.f32.mrb[172].mxu1  ;;  %v11362_v18 = vld [vmem:[%s11750_s26 + $0xc94] ss:$8 sps:$4 sm:$0xff]  }
 0x25a   : > { %8580 = vst.msk [vmem:[%s11953_s18 + $0x154] sm:$0xf] %vm8494_vm3, %v10452_v20  ;;  %8836 = vst.msk [vmem:[%s11953_s18 + $0x554] sm:$0xf] %vm8494_vm3, %v10708_v21  ;;  %v4232_v24 = vadd.f32 %v12531_v11, %v4231_v22  ;;  %v5256_v25 = vadd.f32 %v12531_v11, %v5255_v23  ;;  %v4233_v26 = vpop.f32.mrb[173].mxu0  ;;  %v5257_v27 = vpop.f32.mrb[173].mxu1 }
 0x25b   : > { %v4234_v30 = vpop.f32.mrb[174].mxu0  ;;  %v5258_v31 = vpop.f32.mrb[174].mxu1 }
 0x25c   : > { %v6020_v34 = vmax.f32 %v4232_v24, 0.0  ;;  %v6276_v35 = vmax.f32 %v5256_v25, 0.0  ;;  %v4235_v36 = vadd.f32 %v12531_v11, %v4234_v30  ;;  %v5259_v37 = vadd.f32 %v12531_v11, %v5258_v31  ;;  %v4236_v38 = vpop.f32.mrb[175].mxu0  ;;  %v5260_v39 = vpop.f32.mrb[175].mxu1 }
 0x25d   : > { %v11360_v38 = vld [vmem:[%s11750_s26 + $0xc90] ss:$8 sps:$4 sm:$0xff]  }
 0x25e   : > { %v10453_v40 = vpack.c.bf16 %v6020_v34, %v6020_v34  ;;  %v10709_v41 = vpack.c.bf16 %v6276_v35, %v6276_v35  ;;  %v6021_v42 = vmax.f32 %v4235_v36, 0.0  ;;  %v6277_v43 = vmax.f32 %v5259_v37, 0.0  ;;  %4446 = vmatmul.mubr.bf16.gmra.mrb[24].mxu0 %v11339_v28  ;;  %5470 = vmatmul.mubr.bf16.gmra.mrb[24].mxu1 %v11342_v29  ;;  %v11357_v37 = vld [vmem:[%s11750_s26 + $0x490] ss:$8 sps:$4 sm:$0xff]  }
 0x25f   : > { %9667 = vmatprep.mubr.msk.bf16.mxu0 %vm3077_vm0, %v11347_v32  ;;  %9795 = vmatprep.mubr.msk.bf16.mxu1 %vm3077_vm0, %v11350_v33 }
 0x260   : > { %8581 = vst.msk [vmem:[%s11953_s18 + $0x158] sm:$0xf] %vm8494_vm3, %v10453_v40  ;;  %8837 = vst.msk [vmem:[%s11953_s18 + $0x558] sm:$0xf] %vm8494_vm3, %v10709_v41  ;;  %v10454_v44 = vpack.c.bf16 %v6021_v42, %v6021_v42  ;;  %v10710_v45 = vpack.c.bf16 %v6277_v43, %v6277_v43  ;;  %v11365_v41 = vld [vmem:[%s11750_s26 + $0x4a4] ss:$8 sps:$4 sm:$0xff]  }
 0x261   : > { %v4239_v46 = vpop.f32.mrb[176].mxu0  ;;  %v5263_v47 = vpop.f32.mrb[176].mxu1  ;;  %v11368_v42 = vld [vmem:[%s11750_s26 + $0xca4] ss:$8 sps:$4 sm:$0xff]  }
 0x262   : > { %8582 = vst.msk [vmem:[%s11953_s18 + $0x15c] sm:$0xf] %vm8494_vm3, %v10454_v44  ;;  %8838 = vst.msk [vmem:[%s11953_s18 + $0x55c] sm:$0xf] %vm8494_vm3, %v10710_v45  ;;  %v4240_v48 = vadd.f32 %v12531_v11, %v4239_v46  ;;  %v5264_v49 = vadd.f32 %v12531_v11, %v5263_v47  ;;  %v4241_v50 = vpop.f32.mrb[177].mxu0  ;;  %v5265_v51 = vpop.f32.mrb[177].mxu1 }
 0x263   : > { %v4242_v54 = vpop.f32.mrb[178].mxu0  ;;  %v5266_v55 = vpop.f32.mrb[178].mxu1 }
 0x264   : > { %v6022_v58 = vmax.f32 %v4240_v48, 0.0  ;;  %v6278_v59 = vmax.f32 %v5264_v49, 0.0  ;;  %v4243_v60 = vadd.f32 %v12531_v11, %v4242_v54  ;;  %v5267_v62 = vadd.f32 %v12531_v11, %v5266_v55  ;;  %v4244_v63 = vpop.f32.mrb[179].mxu0  ;;  %v5268_v0 = vpop.f32.mrb[179].mxu1 }
 0x265   : > { %v11366_v63 = vld [vmem:[%s11750_s26 + $0xca0] ss:$8 sps:$4 sm:$0xff]  }
 0x266   : > { %v10455_v1 = vpack.c.bf16 %v6022_v58, %v6022_v58  ;;  %v10711_v61 = vpack.c.bf16 %v6278_v59, %v6278_v59  ;;  %v6023_v2 = vmax.f32 %v4243_v60, 0.0  ;;  %v6279_v3 = vmax.f32 %v5267_v62, 0.0  ;;  %4454 = vmatmul.mubr.bf16.gmra.mrb[28].mxu0 %v11345_v52  ;;  %5478 = vmatmul.mubr.bf16.gmra.mrb[28].mxu1 %v11348_v53  ;;  %v11363_v62 = vld [vmem:[%s11750_s26 + $0x4a0] ss:$8 sps:$4 sm:$0xff]  }
 0x267   : > { %9668 = vmatprep.mubr.msk.bf16.mxu0 %vm3077_vm0, %v11353_v56  ;;  %9796 = vmatprep.mubr.msk.bf16.mxu1 %vm3077_vm0, %v11356_v57 }
 0x268   : > { %8583 = vst.msk [vmem:[%s11953_s18 + $0x160] sm:$0xf] %vm8494_vm3, %v10455_v1  ;;  %8839 = vst.msk [vmem:[%s11953_s18 + $0x560] sm:$0xf] %vm8494_vm3, %v10711_v61  ;;  %v10456_v4 = vpack.c.bf16 %v6023_v2, %v6023_v2  ;;  %v10712_v6 = vpack.c.bf16 %v6279_v3, %v6279_v3  ;;  %v11371_v61 = vld [vmem:[%s11750_s26 + $0x4b4] ss:$8 sps:$4 sm:$0xff]  }
 0x269   : > { %v4247_v7 = vpop.f32.mrb[180].mxu0  ;;  %v5271_v5 = vpop.f32.mrb[180].mxu1  ;;  %v11374_v2 = vld [vmem:[%s11750_s26 + $0xcb4] ss:$8 sps:$4 sm:$0xff]  }
 0x26a   : > { %8584 = vst.msk [vmem:[%s11953_s18 + $0x164] sm:$0xf] %vm8494_vm3, %v10456_v4  ;;  %8840 = vst.msk [vmem:[%s11953_s18 + $0x564] sm:$0xf] %vm8494_vm3, %v10712_v6  ;;  %v4248_v8 = vadd.f32 %v12531_v11, %v4247_v7  ;;  %v5272_v9 = vadd.f32 %v12531_v11, %v5271_v5  ;;  %v4249_v10 = vpop.f32.mrb[181].mxu0  ;;  %v5273_v12 = vpop.f32.mrb[181].mxu1 }
 0x26b   : > { %v4250_v15 = vpop.f32.mrb[182].mxu0  ;;  %v5274_v16 = vpop.f32.mrb[182].mxu1 }
 0x26c   : > { %v6024_v19 = vmax.f32 %v4248_v8, 0.0  ;;  %v6280_v20 = vmax.f32 %v5272_v9, 0.0  ;;  %v4251_v21 = vadd.f32 %v12531_v11, %v4250_v15  ;;  %v5275_v22 = vadd.f32 %v12531_v11, %v5274_v16  ;;  %v4252_v23 = vpop.f32.mrb[183].mxu0  ;;  %v5276_v24 = vpop.f32.mrb[183].mxu1 }
 0x26d   : > { %v11372_v23 = vld [vmem:[%s11750_s26 + $0xcb0] ss:$8 sps:$4 sm:$0xff]  }
 0x26e   : > { %v10457_v25 = vpack.c.bf16 %v6024_v19, %v6024_v19  ;;  %v10713_v26 = vpack.c.bf16 %v6280_v20, %v6280_v20  ;;  %v6025_v27 = vmax.f32 %v4251_v21, 0.0  ;;  %v6281_v28 = vmax.f32 %v5275_v22, 0.0  ;;  %4462 = vmatmul.mubr.bf16.gmra.mrb[32].mxu0 %v11351_v13  ;;  %5486 = vmatmul.mubr.bf16.gmra.mrb[32].mxu1 %v11354_v14  ;;  %v11369_v22 = vld [vmem:[%s11750_s26 + $0x4b0] ss:$8 sps:$4 sm:$0xff]  }
 0x26f   : > { %9669 = vmatprep.mubr.msk.bf16.mxu0 %vm3077_vm0, %v11359_v17  ;;  %9797 = vmatprep.mubr.msk.bf16.mxu1 %vm3077_vm0, %v11362_v18  ;;  %v12824_v17 = vld [vmem:[%s14125_s2] ss:$0 sm:$0xff] }
 0x270   : > { %8585 = vst.msk [vmem:[%s11953_s18 + $0x168] sm:$0xf] %vm8494_vm3, %v10457_v25  ;;  %8841 = vst.msk [vmem:[%s11953_s18 + $0x568] sm:$0xf] %vm8494_vm3, %v10713_v26  ;;  %v10458_v29 = vpack.c.bf16 %v6025_v27, %v6025_v27  ;;  %v10714_v30 = vpack.c.bf16 %v6281_v28, %v6281_v28  ;;  %v11377_v26 = vld [vmem:[%s11750_s26 + $0x4c4] ss:$8 sps:$4 sm:$0xff]  }
 0x271   : > { %v4255_v31 = vpop.f32.mrb[184].mxu0  ;;  %v5279_v32 = vpop.f32.mrb[184].mxu1  ;;  %v11380_v27 = vld [vmem:[%s11750_s26 + $0xcc4] ss:$8 sps:$4 sm:$0xff]  }
 0x272   : > { %8586 = vst.msk [vmem:[%s11953_s18 + $0x16c] sm:$0xf] %vm8494_vm3, %v10458_v29  ;;  %8842 = vst.msk [vmem:[%s11953_s18 + $0x56c] sm:$0xf] %vm8494_vm3, %v10714_v30  ;;  %v4256_v33 = vadd.f32 %v12531_v11, %v4255_v31  ;;  %v5280_v34 = vadd.f32 %v12531_v11, %v5279_v32  ;;  %v4257_v35 = vpop.f32.mrb[185].mxu0  ;;  %v5281_v36 = vpop.f32.mrb[185].mxu1 }
 0x273   : > { %v4258_v39 = vpop.f32.mrb[186].mxu0  ;;  %v5282_v40 = vpop.f32.mrb[186].mxu1 }
 0x274   : > { %v6026_v43 = vmax.f32 %v4256_v33, 0.0  ;;  %v6282_v44 = vmax.f32 %v5280_v34, 0.0  ;;  %v4259_v45 = vadd.f32 %v12531_v11, %v4258_v39  ;;  %v5283_v46 = vadd.f32 %v12531_v11, %v5282_v40  ;;  %v4260_v47 = vpop.f32.mrb[187].mxu0  ;;  %v5284_v48 = vpop.f32.mrb[187].mxu1 }
 0x275   : > { %v11378_v47 = vld [vmem:[%s11750_s26 + $0xcc0] ss:$8 sps:$4 sm:$0xff]  }
 0x276   : > { %v10459_v49 = vpack.c.bf16 %v6026_v43, %v6026_v43  ;;  %v10715_v50 = vpack.c.bf16 %v6282_v44, %v6282_v44  ;;  %v6027_v51 = vmax.f32 %v4259_v45, 0.0  ;;  %v6283_v52 = vmax.f32 %v5283_v46, 0.0  ;;  %4470 = vmatmul.mubr.bf16.gmra.mrb[36].mxu0 %v11357_v37  ;;  %5494 = vmatmul.mubr.bf16.gmra.mrb[36].mxu1 %v11360_v38  ;;  %v11375_v46 = vld [vmem:[%s11750_s26 + $0x4c0] ss:$8 sps:$4 sm:$0xff]  }
 0x277   : > { %9670 = vmatprep.mubr.msk.bf16.mxu0 %vm3077_vm0, %v11365_v41  ;;  %9798 = vmatprep.mubr.msk.bf16.mxu1 %vm3077_vm0, %v11368_v42 }
 0x278   : > { %8587 = vst.msk [vmem:[%s11953_s18 + $0x170] sm:$0xf] %vm8494_vm3, %v10459_v49  ;;  %8843 = vst.msk [vmem:[%s11953_s18 + $0x570] sm:$0xf] %vm8494_vm3, %v10715_v50  ;;  %v10460_v53 = vpack.c.bf16 %v6027_v51, %v6027_v51  ;;  %v10716_v54 = vpack.c.bf16 %v6283_v52, %v6283_v52  ;;  %v11383_v50 = vld [vmem:[%s11750_s26 + $0x4d4] ss:$8 sps:$4 sm:$0xff]  }
 0x279   : > { %v4263_v55 = vpop.f32.mrb[188].mxu0  ;;  %v5287_v56 = vpop.f32.mrb[188].mxu1  ;;  %v11386_v51 = vld [vmem:[%s11750_s26 + $0xcd4] ss:$8 sps:$4 sm:$0xff]  }
 0x27a   : > { %8588 = vst.msk [vmem:[%s11953_s18 + $0x174] sm:$0xf] %vm8494_vm3, %v10460_v53  ;;  %8844 = vst.msk [vmem:[%s11953_s18 + $0x574] sm:$0xf] %vm8494_vm3, %v10716_v54  ;;  %v4264_v57 = vadd.f32 %v12531_v11, %v4263_v55  ;;  %v5288_v58 = vadd.f32 %v12531_v11, %v5287_v56  ;;  %v4265_v59 = vpop.f32.mrb[189].mxu0  ;;  %v5289_v60 = vpop.f32.mrb[189].mxu1 }
 0x27b   : > { %v4266_v0 = vpop.f32.mrb[190].mxu0  ;;  %v5290_v1 = vpop.f32.mrb[190].mxu1 }
 0x27c   : > { %v6028_v3 = vmax.f32 %v4264_v57, 0.0  ;;  %v6284_v4 = vmax.f32 %v5288_v58, 0.0  ;;  %v4267_v6 = vadd.f32 %v12531_v11, %v4266_v0  ;;  %v5291_v7 = vadd.f32 %v12531_v11, %v5290_v1  ;;  %v4268_v5 = vpop.f32.mrb[191].mxu0  ;;  %v5292_v8 = vpop.f32.mrb[191].mxu1 }
 0x27d   : > { %v11384_v5 = vld [vmem:[%s11750_s26 + $0xcd0] ss:$8 sps:$4 sm:$0xff]  }
 0x27e   : > { %v10461_v9 = vpack.c.bf16 %v6028_v3, %v6028_v3  ;;  %v10717_v10 = vpack.c.bf16 %v6284_v4, %v6284_v4  ;;  %v6029_v12 = vmax.f32 %v4267_v6, 0.0  ;;  %v6285_v13 = vmax.f32 %v5291_v7, 0.0  ;;  %4478 = vmatmul.mubr.bf16.gmra.mrb[40].mxu0 %v11363_v62  ;;  %5502 = vmatmul.mubr.bf16.gmra.mrb[40].mxu1 %v11366_v63  ;;  %v11381_v7 = vld [vmem:[%s11750_s26 + $0x4d0] ss:$8 sps:$4 sm:$0xff]  }
 0x27f   : > { %9671 = vmatprep.mubr.msk.bf16.mxu0 %vm3077_vm0, %v11371_v61  ;;  %9799 = vmatprep.mubr.msk.bf16.mxu1 %vm3077_vm0, %v11374_v2 }
 0x280   : > { %8589 = vst.msk [vmem:[%s11953_s18 + $0x178] sm:$0xf] %vm8494_vm3, %v10461_v9  ;;  %8845 = vst.msk [vmem:[%s11953_s18 + $0x578] sm:$0xf] %vm8494_vm3, %v10717_v10  ;;  %v10462_v11 = vpack.c.bf16 %v6029_v12, %v6029_v12  ;;  %v10718_v14 = vpack.c.bf16 %v6285_v13, %v6285_v13  ;;  %v11389_v10 = vld [vmem:[%s11750_s26 + $0x4e4] ss:$8 sps:$4 sm:$0xff]  }
 0x281   : > { %v4271_v15 = vpop.f32.mrb[192].mxu0  ;;  %v5295_v16 = vpop.f32.mrb[192].mxu1  ;;  %v11392_v12 = vld [vmem:[%s11750_s26 + $0xce4] ss:$8 sps:$4 sm:$0xff]  }
 0x282   : > { %8590 = vst.msk [vmem:[%s11953_s18 + $0x17c] sm:$0xf] %vm8494_vm3, %v10462_v11  ;;  %8846 = vst.msk [vmem:[%s11953_s18 + $0x57c] sm:$0xf] %vm8494_vm3, %v10718_v14  ;;  %v4272_v18 = vadd.f32 %v12824_v17, %v4271_v15  ;;  %v5296_v19 = vadd.f32 %v12824_v17, %v5295_v16  ;;  %v4273_v20 = vpop.f32.mrb[193].mxu0  ;;  %v5297_v21 = vpop.f32.mrb[193].mxu1 }
 0x283   : > { %v4274_v24 = vpop.f32.mrb[194].mxu0  ;;  %v5298_v25 = vpop.f32.mrb[194].mxu1 }
 0x284   : > { %v6030_v28 = vmax.f32 %v4272_v18, 0.0  ;;  %v6286_v29 = vmax.f32 %v5296_v19, 0.0  ;;  %v4275_v30 = vadd.f32 %v12824_v17, %v4274_v24  ;;  %v5299_v31 = vadd.f32 %v12824_v17, %v5298_v25  ;;  %v4276_v32 = vpop.f32.mrb[195].mxu0  ;;  %v5300_v33 = vpop.f32.mrb[195].mxu1 }
 0x285   : > { %v11390_v32 = vld [vmem:[%s11750_s26 + $0xce0] ss:$8 sps:$4 sm:$0xff]  }
 0x286   : > { %v10463_v34 = vpack.c.bf16 %v6030_v28, %v6030_v28  ;;  %v10719_v35 = vpack.c.bf16 %v6286_v29, %v6286_v29  ;;  %v6031_v36 = vmax.f32 %v4275_v30, 0.0  ;;  %v6287_v37 = vmax.f32 %v5299_v31, 0.0  ;;  %4486 = vmatmul.mubr.bf16.gmra.mrb[44].mxu0 %v11369_v22  ;;  %5510 = vmatmul.mubr.bf16.gmra.mrb[44].mxu1 %v11372_v23  ;;  %v11387_v31 = vld [vmem:[%s11750_s26 + $0x4e0] ss:$8 sps:$4 sm:$0xff]  }
 0x287   : > { %9672 = vmatprep.mubr.msk.bf16.mxu0 %vm3077_vm0, %v11377_v26  ;;  %9800 = vmatprep.mubr.msk.bf16.mxu1 %vm3077_vm0, %v11380_v27 }
 0x288   : > { %8591 = vst.msk [vmem:[%s11953_s18 + $0x180] sm:$0xf] %vm8494_vm3, %v10463_v34  ;;  %8847 = vst.msk [vmem:[%s11953_s18 + $0x580] sm:$0xf] %vm8494_vm3, %v10719_v35  ;;  %v10464_v38 = vpack.c.bf16 %v6031_v36, %v6031_v36  ;;  %v10720_v39 = vpack.c.bf16 %v6287_v37, %v6287_v37  ;;  %v11395_v35 = vld [vmem:[%s11750_s26 + $0x4f4] ss:$8 sps:$4 sm:$0xff]  }
 0x289   : > { %v4279_v40 = vpop.f32.mrb[196].mxu0  ;;  %v5303_v41 = vpop.f32.mrb[196].mxu1  ;;  %v11398_v36 = vld [vmem:[%s11750_s26 + $0xcf4] ss:$8 sps:$4 sm:$0xff]  }
 0x28a   : > { %8592 = vst.msk [vmem:[%s11953_s18 + $0x184] sm:$0xf] %vm8494_vm3, %v10464_v38  ;;  %8848 = vst.msk [vmem:[%s11953_s18 + $0x584] sm:$0xf] %vm8494_vm3, %v10720_v39  ;;  %v4280_v42 = vadd.f32 %v12824_v17, %v4279_v40  ;;  %v5304_v43 = vadd.f32 %v12824_v17, %v5303_v41  ;;  %v4281_v44 = vpop.f32.mrb[197].mxu0  ;;  %v5305_v45 = vpop.f32.mrb[197].mxu1 }
 0x28b   : > { %v4282_v48 = vpop.f32.mrb[198].mxu0  ;;  %v5306_v49 = vpop.f32.mrb[198].mxu1 }
 0x28c   : > { %v6032_v52 = vmax.f32 %v4280_v42, 0.0  ;;  %v6288_v53 = vmax.f32 %v5304_v43, 0.0  ;;  %v4283_v54 = vadd.f32 %v12824_v17, %v4282_v48  ;;  %v5307_v55 = vadd.f32 %v12824_v17, %v5306_v49  ;;  %v4284_v56 = vpop.f32.mrb[199].mxu0  ;;  %v5308_v57 = vpop.f32.mrb[199].mxu1 }
 0x28d   : > { %v11396_v56 = vld [vmem:[%s11750_s26 + $0xcf0] ss:$8 sps:$4 sm:$0xff]  }
 0x28e   : > { %v10465_v58 = vpack.c.bf16 %v6032_v52, %v6032_v52  ;;  %v10721_v59 = vpack.c.bf16 %v6288_v53, %v6288_v53  ;;  %v6033_v60 = vmax.f32 %v4283_v54, 0.0  ;;  %v6289_v62 = vmax.f32 %v5307_v55, 0.0  ;;  %4494 = vmatmul.mubr.bf16.gmra.mrb[48].mxu0 %v11375_v46  ;;  %5518 = vmatmul.mubr.bf16.gmra.mrb[48].mxu1 %v11378_v47  ;;  %v11393_v55 = vld [vmem:[%s11750_s26 + $0x4f0] ss:$8 sps:$4 sm:$0xff]  }
 0x28f   : > { %9673 = vmatprep.mubr.msk.bf16.mxu0 %vm3077_vm0, %v11383_v50  ;;  %9801 = vmatprep.mubr.msk.bf16.mxu1 %vm3077_vm0, %v11386_v51 }
 0x290   : > { %8593 = vst.msk [vmem:[%s11953_s18 + $0x188] sm:$0xf] %vm8494_vm3, %v10465_v58  ;;  %8849 = vst.msk [vmem:[%s11953_s18 + $0x588] sm:$0xf] %vm8494_vm3, %v10721_v59  ;;  %v10466_v63 = vpack.c.bf16 %v6033_v60, %v6033_v60  ;;  %v10722_v0 = vpack.c.bf16 %v6289_v62, %v6289_v62  ;;  %v11401_v59 = vld [vmem:[%s11750_s26 + $0x504] ss:$8 sps:$4 sm:$0xff]  }
 0x291   : > { %v4287_v1 = vpop.f32.mrb[200].mxu0  ;;  %v5311_v61 = vpop.f32.mrb[200].mxu1  ;;  %v11404_v60 = vld [vmem:[%s11750_s26 + $0xd04] ss:$8 sps:$4 sm:$0xff]  }
 0x292   : > { %8594 = vst.msk [vmem:[%s11953_s18 + $0x18c] sm:$0xf] %vm8494_vm3, %v10466_v63  ;;  %8850 = vst.msk [vmem:[%s11953_s18 + $0x58c] sm:$0xf] %vm8494_vm3, %v10722_v0  ;;  %v4288_v2 = vadd.f32 %v12824_v17, %v4287_v1  ;;  %v5312_v3 = vadd.f32 %v12824_v17, %v5311_v61  ;;  %v4289_v4 = vpop.f32.mrb[201].mxu0  ;;  %v5313_v6 = vpop.f32.mrb[201].mxu1 }
 0x293   : > { %v4290_v8 = vpop.f32.mrb[202].mxu0  ;;  %v5314_v9 = vpop.f32.mrb[202].mxu1 }
 0x294   : > { %v6034_v13 = vmax.f32 %v4288_v2, 0.0  ;;  %v6290_v11 = vmax.f32 %v5312_v3, 0.0  ;;  %v4291_v14 = vadd.f32 %v12824_v17, %v4290_v8  ;;  %v5315_v15 = vadd.f32 %v12824_v17, %v5314_v9  ;;  %v4292_v16 = vpop.f32.mrb[203].mxu0  ;;  %v5316_v18 = vpop.f32.mrb[203].mxu1 }
 0x295   : > { %v11402_v16 = vld [vmem:[%s11750_s26 + $0xd00] ss:$8 sps:$4 sm:$0xff]  }
 0x296   : > { %v10467_v19 = vpack.c.bf16 %v6034_v13, %v6034_v13  ;;  %v10723_v20 = vpack.c.bf16 %v6290_v11, %v6290_v11  ;;  %v6035_v21 = vmax.f32 %v4291_v14, 0.0  ;;  %v6291_v22 = vmax.f32 %v5315_v15, 0.0  ;;  %4502 = vmatmul.mubr.bf16.gmra.mrb[52].mxu0 %v11381_v7  ;;  %5526 = vmatmul.mubr.bf16.gmra.mrb[52].mxu1 %v11384_v5  ;;  %v11399_v15 = vld [vmem:[%s11750_s26 + $0x500] ss:$8 sps:$4 sm:$0xff]  }
 0x297   : > { %9674 = vmatprep.mubr.msk.bf16.mxu0 %vm3077_vm0, %v11389_v10  ;;  %9802 = vmatprep.mubr.msk.bf16.mxu1 %vm3077_vm0, %v11392_v12 }
 0x298   : > { %8595 = vst.msk [vmem:[%s11953_s18 + $0x190] sm:$0xf] %vm8494_vm3, %v10467_v19  ;;  %8851 = vst.msk [vmem:[%s11953_s18 + $0x590] sm:$0xf] %vm8494_vm3, %v10723_v20  ;;  %v10468_v23 = vpack.c.bf16 %v6035_v21, %v6035_v21  ;;  %v10724_v24 = vpack.c.bf16 %v6291_v22, %v6291_v22  ;;  %v11407_v20 = vld [vmem:[%s11750_s26 + $0x514] ss:$8 sps:$4 sm:$0xff]  }
 0x299   : > { %v4295_v25 = vpop.f32.mrb[204].mxu0  ;;  %v5319_v26 = vpop.f32.mrb[204].mxu1  ;;  %v11410_v21 = vld [vmem:[%s11750_s26 + $0xd14] ss:$8 sps:$4 sm:$0xff]  }
 0x29a   : > { %8596 = vst.msk [vmem:[%s11953_s18 + $0x194] sm:$0xf] %vm8494_vm3, %v10468_v23  ;;  %8852 = vst.msk [vmem:[%s11953_s18 + $0x594] sm:$0xf] %vm8494_vm3, %v10724_v24  ;;  %v4296_v27 = vadd.f32 %v12824_v17, %v4295_v25  ;;  %v5320_v28 = vadd.f32 %v12824_v17, %v5319_v26  ;;  %v4297_v29 = vpop.f32.mrb[205].mxu0  ;;  %v5321_v30 = vpop.f32.mrb[205].mxu1 }
 0x29b   : > { %v4298_v33 = vpop.f32.mrb[206].mxu0  ;;  %v5322_v34 = vpop.f32.mrb[206].mxu1 }
 0x29c   : > { %v6036_v37 = vmax.f32 %v4296_v27, 0.0  ;;  %v6292_v38 = vmax.f32 %v5320_v28, 0.0  ;;  %v4299_v39 = vadd.f32 %v12824_v17, %v4298_v33  ;;  %v5323_v40 = vadd.f32 %v12824_v17, %v5322_v34  ;;  %v4300_v41 = vpop.f32.mrb[207].mxu0  ;;  %v5324_v42 = vpop.f32.mrb[207].mxu1 }
 0x29d   : > { %v11408_v41 = vld [vmem:[%s11750_s26 + $0xd10] ss:$8 sps:$4 sm:$0xff]  }
 0x29e   : > { %v10469_v43 = vpack.c.bf16 %v6036_v37, %v6036_v37  ;;  %v10725_v44 = vpack.c.bf16 %v6292_v38, %v6292_v38  ;;  %v6037_v45 = vmax.f32 %v4299_v39, 0.0  ;;  %v6293_v46 = vmax.f32 %v5323_v40, 0.0  ;;  %4510 = vmatmul.mubr.bf16.gmra.mrb[56].mxu0 %v11387_v31  ;;  %5534 = vmatmul.mubr.bf16.gmra.mrb[56].mxu1 %v11390_v32  ;;  %v11405_v40 = vld [vmem:[%s11750_s26 + $0x510] ss:$8 sps:$4 sm:$0xff]  }
 0x29f   : > { %9675 = vmatprep.mubr.msk.bf16.mxu0 %vm3077_vm0, %v11395_v35  ;;  %9803 = vmatprep.mubr.msk.bf16.mxu1 %vm3077_vm0, %v11398_v36 }
 0x2a0   : > { %8597 = vst.msk [vmem:[%s11953_s18 + $0x198] sm:$0xf] %vm8494_vm3, %v10469_v43  ;;  %8853 = vst.msk [vmem:[%s11953_s18 + $0x598] sm:$0xf] %vm8494_vm3, %v10725_v44  ;;  %v10470_v47 = vpack.c.bf16 %v6037_v45, %v6037_v45  ;;  %v10726_v48 = vpack.c.bf16 %v6293_v46, %v6293_v46  ;;  %v11413_v44 = vld [vmem:[%s11750_s26 + $0x524] ss:$8 sps:$4 sm:$0xff]  }
 0x2a1   : > { %v4303_v49 = vpop.f32.mrb[208].mxu0  ;;  %v5327_v50 = vpop.f32.mrb[208].mxu1  ;;  %v11416_v45 = vld [vmem:[%s11750_s26 + $0xd24] ss:$8 sps:$4 sm:$0xff]  }
 0x2a2   : > { %8598 = vst.msk [vmem:[%s11953_s18 + $0x19c] sm:$0xf] %vm8494_vm3, %v10470_v47  ;;  %8854 = vst.msk [vmem:[%s11953_s18 + $0x59c] sm:$0xf] %vm8494_vm3, %v10726_v48  ;;  %v4304_v51 = vadd.f32 %v12824_v17, %v4303_v49  ;;  %v5328_v52 = vadd.f32 %v12824_v17, %v5327_v50  ;;  %v4305_v53 = vpop.f32.mrb[209].mxu0  ;;  %v5329_v54 = vpop.f32.mrb[209].mxu1 }
 0x2a3   : > { %v4306_v57 = vpop.f32.mrb[210].mxu0  ;;  %v5330_v58 = vpop.f32.mrb[210].mxu1 }
 0x2a4   : > { %v6038_v62 = vmax.f32 %v4304_v51, 0.0  ;;  %v6294_v63 = vmax.f32 %v5328_v52, 0.0  ;;  %v4307_v0 = vadd.f32 %v12824_v17, %v4306_v57  ;;  %v5331_v1 = vadd.f32 %v12824_v17, %v5330_v58  ;;  %v4308_v61 = vpop.f32.mrb[211].mxu0  ;;  %v5332_v2 = vpop.f32.mrb[211].mxu1 }
 0x2a5   : > { %v11414_v61 = vld [vmem:[%s11750_s26 + $0xd20] ss:$8 sps:$4 sm:$0xff]  }
 0x2a6   : > { %v10471_v3 = vpack.c.bf16 %v6038_v62, %v6038_v62  ;;  %v10727_v4 = vpack.c.bf16 %v6294_v63, %v6294_v63  ;;  %v6039_v6 = vmax.f32 %v4307_v0, 0.0  ;;  %v6295_v7 = vmax.f32 %v5331_v1, 0.0  ;;  %4518 = vmatmul.mubr.bf16.gmra.mrb[60].mxu0 %v11393_v55  ;;  %5542 = vmatmul.mubr.bf16.gmra.mrb[60].mxu1 %v11396_v56  ;;  %v11411_v1 = vld [vmem:[%s11750_s26 + $0x520] ss:$8 sps:$4 sm:$0xff]  }
 0x2a7   : > { %9676 = vmatprep.mubr.msk.bf16.mxu0 %vm3077_vm0, %v11401_v59  ;;  %9804 = vmatprep.mubr.msk.bf16.mxu1 %vm3077_vm0, %v11404_v60 }
 0x2a8   : > { %8599 = vst.msk [vmem:[%s11953_s18 + $0x1a0] sm:$0xf] %vm8494_vm3, %v10471_v3  ;;  %8855 = vst.msk [vmem:[%s11953_s18 + $0x5a0] sm:$0xf] %vm8494_vm3, %v10727_v4  ;;  %v10472_v5 = vpack.c.bf16 %v6039_v6, %v6039_v6  ;;  %v10728_v8 = vpack.c.bf16 %v6295_v7, %v6295_v7  ;;  %v11419_v4 = vld [vmem:[%s11750_s26 + $0x534] ss:$8 sps:$4 sm:$0xff]  }
 0x2a9   : > { %v4311_v9 = vpop.f32.mrb[212].mxu0  ;;  %v5335_v10 = vpop.f32.mrb[212].mxu1  ;;  %v11422_v6 = vld [vmem:[%s11750_s26 + $0xd34] ss:$8 sps:$4 sm:$0xff]  }
 0x2aa   : > { %8600 = vst.msk [vmem:[%s11953_s18 + $0x1a4] sm:$0xf] %vm8494_vm3, %v10472_v5  ;;  %8856 = vst.msk [vmem:[%s11953_s18 + $0x5a4] sm:$0xf] %vm8494_vm3, %v10728_v8  ;;  %v4312_v12 = vadd.f32 %v12824_v17, %v4311_v9  ;;  %v5336_v13 = vadd.f32 %v12824_v17, %v5335_v10  ;;  %v4313_v11 = vpop.f32.mrb[213].mxu0  ;;  %v5337_v14 = vpop.f32.mrb[213].mxu1 }
 0x2ab   : > { %v4314_v18 = vpop.f32.mrb[214].mxu0  ;;  %v5338_v19 = vpop.f32.mrb[214].mxu1 }
 0x2ac   : > { %v6040_v22 = vmax.f32 %v4312_v12, 0.0  ;;  %v6296_v23 = vmax.f32 %v5336_v13, 0.0  ;;  %v4315_v24 = vadd.f32 %v12824_v17, %v4314_v18  ;;  %v5339_v25 = vadd.f32 %v12824_v17, %v5338_v19  ;;  %v4316_v26 = vpop.f32.mrb[215].mxu0  ;;  %v5340_v27 = vpop.f32.mrb[215].mxu1 }
 0x2ad   : > { %v11420_v26 = vld [vmem:[%s11750_s26 + $0xd30] ss:$8 sps:$4 sm:$0xff]  }
 0x2ae   : > { %v10473_v28 = vpack.c.bf16 %v6040_v22, %v6040_v22  ;;  %v10729_v29 = vpack.c.bf16 %v6296_v23, %v6296_v23  ;;  %v6041_v30 = vmax.f32 %v4315_v24, 0.0  ;;  %v6297_v31 = vmax.f32 %v5339_v25, 0.0  ;;  %4526 = vmatmul.mubr.bf16.gmra.mrb[64].mxu0 %v11399_v15  ;;  %5550 = vmatmul.mubr.bf16.gmra.mrb[64].mxu1 %v11402_v16  ;;  %v11417_v25 = vld [vmem:[%s11750_s26 + $0x530] ss:$8 sps:$4 sm:$0xff]  }
 0x2af   : > { %9677 = vmatprep.mubr.msk.bf16.mxu0 %vm3077_vm0, %v11407_v20  ;;  %9805 = vmatprep.mubr.msk.bf16.mxu1 %vm3077_vm0, %v11410_v21 }
 0x2b0   : > { %8601 = vst.msk [vmem:[%s11953_s18 + $0x1a8] sm:$0xf] %vm8494_vm3, %v10473_v28  ;;  %8857 = vst.msk [vmem:[%s11953_s18 + $0x5a8] sm:$0xf] %vm8494_vm3, %v10729_v29  ;;  %v10474_v32 = vpack.c.bf16 %v6041_v30, %v6041_v30  ;;  %v10730_v33 = vpack.c.bf16 %v6297_v31, %v6297_v31  ;;  %v11425_v29 = vld [vmem:[%s11750_s26 + $0x544] ss:$8 sps:$4 sm:$0xff]  }
 0x2b1   : > { %v4319_v34 = vpop.f32.mrb[216].mxu0  ;;  %v5343_v35 = vpop.f32.mrb[216].mxu1  ;;  %v11428_v30 = vld [vmem:[%s11750_s26 + $0xd44] ss:$8 sps:$4 sm:$0xff]  }
 0x2b2   : > { %8602 = vst.msk [vmem:[%s11953_s18 + $0x1ac] sm:$0xf] %vm8494_vm3, %v10474_v32  ;;  %8858 = vst.msk [vmem:[%s11953_s18 + $0x5ac] sm:$0xf] %vm8494_vm3, %v10730_v33  ;;  %v4320_v36 = vadd.f32 %v12824_v17, %v4319_v34  ;;  %v5344_v37 = vadd.f32 %v12824_v17, %v5343_v35  ;;  %v4321_v38 = vpop.f32.mrb[217].mxu0  ;;  %v5345_v39 = vpop.f32.mrb[217].mxu1 }
 0x2b3   : > { %v4322_v42 = vpop.f32.mrb[218].mxu0  ;;  %v5346_v43 = vpop.f32.mrb[218].mxu1 }
 0x2b4   : > { %v6042_v46 = vmax.f32 %v4320_v36, 0.0  ;;  %v6298_v47 = vmax.f32 %v5344_v37, 0.0  ;;  %v4323_v48 = vadd.f32 %v12824_v17, %v4322_v42  ;;  %v5347_v49 = vadd.f32 %v12824_v17, %v5346_v43  ;;  %v4324_v50 = vpop.f32.mrb[219].mxu0  ;;  %v5348_v51 = vpop.f32.mrb[219].mxu1 }
 0x2b5   : > { %v11426_v50 = vld [vmem:[%s11750_s26 + $0xd40] ss:$8 sps:$4 sm:$0xff]  }
 0x2b6   : > { %v10475_v52 = vpack.c.bf16 %v6042_v46, %v6042_v46  ;;  %v10731_v53 = vpack.c.bf16 %v6298_v47, %v6298_v47  ;;  %v6043_v54 = vmax.f32 %v4323_v48, 0.0  ;;  %v6299_v55 = vmax.f32 %v5347_v49, 0.0  ;;  %4534 = vmatmul.mubr.bf16.gmra.mrb[68].mxu0 %v11405_v40  ;;  %5558 = vmatmul.mubr.bf16.gmra.mrb[68].mxu1 %v11408_v41  ;;  %v11423_v49 = vld [vmem:[%s11750_s26 + $0x540] ss:$8 sps:$4 sm:$0xff]  }
 0x2b7   : > { %9678 = vmatprep.mubr.msk.bf16.mxu0 %vm3077_vm0, %v11413_v44  ;;  %9806 = vmatprep.mubr.msk.bf16.mxu1 %vm3077_vm0, %v11416_v45 }
 0x2b8   : > { %8603 = vst.msk [vmem:[%s11953_s18 + $0x1b0] sm:$0xf] %vm8494_vm3, %v10475_v52  ;;  %8859 = vst.msk [vmem:[%s11953_s18 + $0x5b0] sm:$0xf] %vm8494_vm3, %v10731_v53  ;;  %v10476_v56 = vpack.c.bf16 %v6043_v54, %v6043_v54  ;;  %v10732_v57 = vpack.c.bf16 %v6299_v55, %v6299_v55  ;;  %v11431_v53 = vld [vmem:[%s11750_s26 + $0x554] ss:$8 sps:$4 sm:$0xff]  }
 0x2b9   : > { %v4327_v58 = vpop.f32.mrb[220].mxu0  ;;  %v5351_v59 = vpop.f32.mrb[220].mxu1  ;;  %v11434_v54 = vld [vmem:[%s11750_s26 + $0xd54] ss:$8 sps:$4 sm:$0xff]  }
 0x2ba   : > { %8604 = vst.msk [vmem:[%s11953_s18 + $0x1b4] sm:$0xf] %vm8494_vm3, %v10476_v56  ;;  %8860 = vst.msk [vmem:[%s11953_s18 + $0x5b4] sm:$0xf] %vm8494_vm3, %v10732_v57  ;;  %v4328_v60 = vadd.f32 %v12824_v17, %v4327_v58  ;;  %v5352_v62 = vadd.f32 %v12824_v17, %v5351_v59  ;;  %v4329_v63 = vpop.f32.mrb[221].mxu0  ;;  %v5353_v0 = vpop.f32.mrb[221].mxu1 }
 0x2bb   : > { %v4330_v2 = vpop.f32.mrb[222].mxu0  ;;  %v5354_v3 = vpop.f32.mrb[222].mxu1 }
 0x2bc   : > { %v6044_v7 = vmax.f32 %v4328_v60, 0.0  ;;  %v6300_v5 = vmax.f32 %v5352_v62, 0.0  ;;  %v4331_v8 = vadd.f32 %v12824_v17, %v4330_v2  ;;  %v5355_v9 = vadd.f32 %v12824_v17, %v5354_v3  ;;  %v4332_v10 = vpop.f32.mrb[223].mxu0  ;;  %v5356_v12 = vpop.f32.mrb[223].mxu1 }
 0x2bd   : > { %v11432_v10 = vld [vmem:[%s11750_s26 + $0xd50] ss:$8 sps:$4 sm:$0xff]  }
 0x2be   : > { %v10477_v13 = vpack.c.bf16 %v6044_v7, %v6044_v7  ;;  %v10733_v11 = vpack.c.bf16 %v6300_v5, %v6300_v5  ;;  %v6045_v14 = vmax.f32 %v4331_v8, 0.0  ;;  %v6301_v15 = vmax.f32 %v5355_v9, 0.0  ;;  %4542 = vmatmul.mubr.bf16.gmra.mrb[72].mxu0 %v11411_v1  ;;  %5566 = vmatmul.mubr.bf16.gmra.mrb[72].mxu1 %v11414_v61  ;;  %v11429_v9 = vld [vmem:[%s11750_s26 + $0x550] ss:$8 sps:$4 sm:$0xff]  }
 0x2bf   : > { %9679 = vmatprep.mubr.msk.bf16.mxu0 %vm3077_vm0, %v11419_v4  ;;  %9807 = vmatprep.mubr.msk.bf16.mxu1 %vm3077_vm0, %v11422_v6 }
 0x2c0   : > { %8605 = vst.msk [vmem:[%s11953_s18 + $0x1b8] sm:$0xf] %vm8494_vm3, %v10477_v13  ;;  %8861 = vst.msk [vmem:[%s11953_s18 + $0x5b8] sm:$0xf] %vm8494_vm3, %v10733_v11  ;;  %v10478_v16 = vpack.c.bf16 %v6045_v14, %v6045_v14  ;;  %v10734_v18 = vpack.c.bf16 %v6301_v15, %v6301_v15  ;;  %v11437_v11 = vld [vmem:[%s11750_s26 + $0x564] ss:$8 sps:$4 sm:$0xff]  }
 0x2c1   : > { %v4335_v19 = vpop.f32.mrb[224].mxu0  ;;  %v5359_v20 = vpop.f32.mrb[224].mxu1  ;;  %v11440_v14 = vld [vmem:[%s11750_s26 + $0xd64] ss:$8 sps:$4 sm:$0xff]  }
 0x2c2   : > { %8606 = vst.msk [vmem:[%s11953_s18 + $0x1bc] sm:$0xf] %vm8494_vm3, %v10478_v16  ;;  %8862 = vst.msk [vmem:[%s11953_s18 + $0x5bc] sm:$0xf] %vm8494_vm3, %v10734_v18  ;;  %v4336_v21 = vadd.f32 %v12824_v17, %v4335_v19  ;;  %v5360_v22 = vadd.f32 %v12824_v17, %v5359_v20  ;;  %v4337_v23 = vpop.f32.mrb[225].mxu0  ;;  %v5361_v24 = vpop.f32.mrb[225].mxu1 }
 0x2c3   : > { %v4338_v27 = vpop.f32.mrb[226].mxu0  ;;  %v5362_v28 = vpop.f32.mrb[226].mxu1 }
 0x2c4   : > { %v6046_v31 = vmax.f32 %v4336_v21, 0.0  ;;  %v6302_v32 = vmax.f32 %v5360_v22, 0.0  ;;  %v4339_v33 = vadd.f32 %v12824_v17, %v4338_v27  ;;  %v5363_v34 = vadd.f32 %v12824_v17, %v5362_v28  ;;  %v4340_v35 = vpop.f32.mrb[227].mxu0  ;;  %v5364_v36 = vpop.f32.mrb[227].mxu1 }
 0x2c5   : > { %v11438_v35 = vld [vmem:[%s11750_s26 + $0xd60] ss:$8 sps:$4 sm:$0xff]  }
 0x2c6   : > { %v10479_v37 = vpack.c.bf16 %v6046_v31, %v6046_v31  ;;  %v10735_v38 = vpack.c.bf16 %v6302_v32, %v6302_v32  ;;  %v6047_v39 = vmax.f32 %v4339_v33, 0.0  ;;  %v6303_v40 = vmax.f32 %v5363_v34, 0.0  ;;  %4550 = vmatmul.mubr.bf16.gmra.mrb[76].mxu0 %v11417_v25  ;;  %5574 = vmatmul.mubr.bf16.gmra.mrb[76].mxu1 %v11420_v26  ;;  %v11435_v34 = vld [vmem:[%s11750_s26 + $0x560] ss:$8 sps:$4 sm:$0xff]  }
 0x2c7   : > { %9680 = vmatprep.mubr.msk.bf16.mxu0 %vm3077_vm0, %v11425_v29  ;;  %9808 = vmatprep.mubr.msk.bf16.mxu1 %vm3077_vm0, %v11428_v30 }
 0x2c8   : > { %8607 = vst.msk [vmem:[%s11953_s18 + $0x1c0] sm:$0xf] %vm8494_vm3, %v10479_v37  ;;  %8863 = vst.msk [vmem:[%s11953_s18 + $0x5c0] sm:$0xf] %vm8494_vm3, %v10735_v38  ;;  %v10480_v41 = vpack.c.bf16 %v6047_v39, %v6047_v39  ;;  %v10736_v42 = vpack.c.bf16 %v6303_v40, %v6303_v40  ;;  %v11443_v38 = vld [vmem:[%s11750_s26 + $0x574] ss:$8 sps:$4 sm:$0xff]  }
 0x2c9   : > { %v4343_v43 = vpop.f32.mrb[228].mxu0  ;;  %v5367_v44 = vpop.f32.mrb[228].mxu1  ;;  %v11446_v39 = vld [vmem:[%s11750_s26 + $0xd74] ss:$8 sps:$4 sm:$0xff]  }
 0x2ca   : > { %8608 = vst.msk [vmem:[%s11953_s18 + $0x1c4] sm:$0xf] %vm8494_vm3, %v10480_v41  ;;  %8864 = vst.msk [vmem:[%s11953_s18 + $0x5c4] sm:$0xf] %vm8494_vm3, %v10736_v42  ;;  %v4344_v45 = vadd.f32 %v12824_v17, %v4343_v43  ;;  %v5368_v46 = vadd.f32 %v12824_v17, %v5367_v44  ;;  %v4345_v47 = vpop.f32.mrb[229].mxu0  ;;  %v5369_v48 = vpop.f32.mrb[229].mxu1 }
 0x2cb   : > { %v4346_v51 = vpop.f32.mrb[230].mxu0  ;;  %v5370_v52 = vpop.f32.mrb[230].mxu1 }
 0x2cc   : > { %v6048_v55 = vmax.f32 %v4344_v45, 0.0  ;;  %v6304_v56 = vmax.f32 %v5368_v46, 0.0  ;;  %v4347_v57 = vadd.f32 %v12824_v17, %v4346_v51  ;;  %v5371_v58 = vadd.f32 %v12824_v17, %v5370_v52  ;;  %v4348_v59 = vpop.f32.mrb[231].mxu0  ;;  %v5372_v60 = vpop.f32.mrb[231].mxu1 }
 0x2cd   : > { %v11444_v59 = vld [vmem:[%s11750_s26 + $0xd70] ss:$8 sps:$4 sm:$0xff]  }
 0x2ce   : > { %v10481_v62 = vpack.c.bf16 %v6048_v55, %v6048_v55  ;;  %v10737_v63 = vpack.c.bf16 %v6304_v56, %v6304_v56  ;;  %v6049_v0 = vmax.f32 %v4347_v57, 0.0  ;;  %v6305_v1 = vmax.f32 %v5371_v58, 0.0  ;;  %4558 = vmatmul.mubr.bf16.gmra.mrb[80].mxu0 %v11423_v49  ;;  %5582 = vmatmul.mubr.bf16.gmra.mrb[80].mxu1 %v11426_v50  ;;  %v11441_v58 = vld [vmem:[%s11750_s26 + $0x570] ss:$8 sps:$4 sm:$0xff]  }
 0x2cf   : > { %9681 = vmatprep.mubr.msk.bf16.mxu0 %vm3077_vm0, %v11431_v53  ;;  %9809 = vmatprep.mubr.msk.bf16.mxu1 %vm3077_vm0, %v11434_v54 }
 0x2d0   : > { %8609 = vst.msk [vmem:[%s11953_s18 + $0x1c8] sm:$0xf] %vm8494_vm3, %v10481_v62  ;;  %8865 = vst.msk [vmem:[%s11953_s18 + $0x5c8] sm:$0xf] %vm8494_vm3, %v10737_v63  ;;  %v10482_v61 = vpack.c.bf16 %v6049_v0, %v6049_v0  ;;  %v10738_v2 = vpack.c.bf16 %v6305_v1, %v6305_v1  ;;  %v11449_v63 = vld [vmem:[%s11750_s26 + $0x584] ss:$8 sps:$4 sm:$0xff]  }
 0x2d1   : > { %v4351_v3 = vpop.f32.mrb[232].mxu0  ;;  %v5375_v4 = vpop.f32.mrb[232].mxu1  ;;  %v11452_v0 = vld [vmem:[%s11750_s26 + $0xd84] ss:$8 sps:$4 sm:$0xff]  }
 0x2d2   : > { %8610 = vst.msk [vmem:[%s11953_s18 + $0x1cc] sm:$0xf] %vm8494_vm3, %v10482_v61  ;;  %8866 = vst.msk [vmem:[%s11953_s18 + $0x5cc] sm:$0xf] %vm8494_vm3, %v10738_v2  ;;  %v4352_v6 = vadd.f32 %v12824_v17, %v4351_v3  ;;  %v5376_v7 = vadd.f32 %v12824_v17, %v5375_v4  ;;  %v4353_v5 = vpop.f32.mrb[233].mxu0  ;;  %v5377_v8 = vpop.f32.mrb[233].mxu1 }
 0x2d3   : > { %v4354_v12 = vpop.f32.mrb[234].mxu0  ;;  %v5378_v13 = vpop.f32.mrb[234].mxu1 }
 0x2d4   : > { %v6050_v15 = vmax.f32 %v4352_v6, 0.0  ;;  %v6306_v16 = vmax.f32 %v5376_v7, 0.0  ;;  %v4355_v18 = vadd.f32 %v12824_v17, %v4354_v12  ;;  %v5379_v19 = vadd.f32 %v12824_v17, %v5378_v13  ;;  %v4356_v20 = vpop.f32.mrb[235].mxu0  ;;  %v5380_v21 = vpop.f32.mrb[235].mxu1 }
 0x2d5   : > { %v11450_v20 = vld [vmem:[%s11750_s26 + $0xd80] ss:$8 sps:$4 sm:$0xff]  }
 0x2d6   : > { %v10483_v22 = vpack.c.bf16 %v6050_v15, %v6050_v15  ;;  %v10739_v23 = vpack.c.bf16 %v6306_v16, %v6306_v16  ;;  %v6051_v24 = vmax.f32 %v4355_v18, 0.0  ;;  %v6307_v25 = vmax.f32 %v5379_v19, 0.0  ;;  %4566 = vmatmul.mubr.bf16.gmra.mrb[84].mxu0 %v11429_v9  ;;  %5590 = vmatmul.mubr.bf16.gmra.mrb[84].mxu1 %v11432_v10  ;;  %v11447_v19 = vld [vmem:[%s11750_s26 + $0x580] ss:$8 sps:$4 sm:$0xff]  }
 0x2d7   : > { %9682 = vmatprep.mubr.msk.bf16.mxu0 %vm3077_vm0, %v11437_v11  ;;  %9810 = vmatprep.mubr.msk.bf16.mxu1 %vm3077_vm0, %v11440_v14 }
 0x2d8   : > { %8611 = vst.msk [vmem:[%s11953_s18 + $0x1d0] sm:$0xf] %vm8494_vm3, %v10483_v22  ;;  %8867 = vst.msk [vmem:[%s11953_s18 + $0x5d0] sm:$0xf] %vm8494_vm3, %v10739_v23  ;;  %v10484_v26 = vpack.c.bf16 %v6051_v24, %v6051_v24  ;;  %v10740_v27 = vpack.c.bf16 %v6307_v25, %v6307_v25  ;;  %v11455_v23 = vld [vmem:[%s11750_s26 + $0x594] ss:$8 sps:$4 sm:$0xff]  }
 0x2d9   : > { %v4359_v28 = vpop.f32.mrb[236].mxu0  ;;  %v5383_v29 = vpop.f32.mrb[236].mxu1  ;;  %v11458_v24 = vld [vmem:[%s11750_s26 + $0xd94] ss:$8 sps:$4 sm:$0xff]  }
 0x2da   : > { %8612 = vst.msk [vmem:[%s11953_s18 + $0x1d4] sm:$0xf] %vm8494_vm3, %v10484_v26  ;;  %8868 = vst.msk [vmem:[%s11953_s18 + $0x5d4] sm:$0xf] %vm8494_vm3, %v10740_v27  ;;  %v4360_v30 = vadd.f32 %v12824_v17, %v4359_v28  ;;  %v5384_v31 = vadd.f32 %v12824_v17, %v5383_v29  ;;  %v4361_v32 = vpop.f32.mrb[237].mxu0  ;;  %v5385_v33 = vpop.f32.mrb[237].mxu1 }
 0x2db   : > { %v4362_v36 = vpop.f32.mrb[238].mxu0  ;;  %v5386_v37 = vpop.f32.mrb[238].mxu1 }
 0x2dc   : > { %v6052_v40 = vmax.f32 %v4360_v30, 0.0  ;;  %v6308_v41 = vmax.f32 %v5384_v31, 0.0  ;;  %v4363_v42 = vadd.f32 %v12824_v17, %v4362_v36  ;;  %v5387_v43 = vadd.f32 %v12824_v17, %v5386_v37  ;;  %v4364_v44 = vpop.f32.mrb[239].mxu0  ;;  %v5388_v45 = vpop.f32.mrb[239].mxu1 }
 0x2dd   : > { %v11456_v44 = vld [vmem:[%s11750_s26 + $0xd90] ss:$8 sps:$4 sm:$0xff]  }
 0x2de   : > { %v10485_v46 = vpack.c.bf16 %v6052_v40, %v6052_v40  ;;  %v10741_v47 = vpack.c.bf16 %v6308_v41, %v6308_v41  ;;  %v6053_v48 = vmax.f32 %v4363_v42, 0.0  ;;  %v6309_v49 = vmax.f32 %v5387_v43, 0.0  ;;  %4574 = vmatmul.mubr.bf16.gmra.mrb[88].mxu0 %v11435_v34  ;;  %5598 = vmatmul.mubr.bf16.gmra.mrb[88].mxu1 %v11438_v35  ;;  %v11453_v43 = vld [vmem:[%s11750_s26 + $0x590] ss:$8 sps:$4 sm:$0xff]  }
 0x2df   : > { %9683 = vmatprep.mubr.msk.bf16.mxu0 %vm3077_vm0, %v11443_v38  ;;  %9811 = vmatprep.mubr.msk.bf16.mxu1 %vm3077_vm0, %v11446_v39 }
 0x2e0   : > { %8613 = vst.msk [vmem:[%s11953_s18 + $0x1d8] sm:$0xf] %vm8494_vm3, %v10485_v46  ;;  %8869 = vst.msk [vmem:[%s11953_s18 + $0x5d8] sm:$0xf] %vm8494_vm3, %v10741_v47  ;;  %v10486_v50 = vpack.c.bf16 %v6053_v48, %v6053_v48  ;;  %v10742_v51 = vpack.c.bf16 %v6309_v49, %v6309_v49  ;;  %v11461_v47 = vld [vmem:[%s11750_s26 + $0x5a4] ss:$8 sps:$4 sm:$0xff]  }
 0x2e1   : > { %v4367_v52 = vpop.f32.mrb[240].mxu0  ;;  %v5391_v53 = vpop.f32.mrb[240].mxu1  ;;  %v11464_v48 = vld [vmem:[%s11750_s26 + $0xda4] ss:$8 sps:$4 sm:$0xff]  }
 0x2e2   : > { %8614 = vst.msk [vmem:[%s11953_s18 + $0x1dc] sm:$0xf] %vm8494_vm3, %v10486_v50  ;;  %8870 = vst.msk [vmem:[%s11953_s18 + $0x5dc] sm:$0xf] %vm8494_vm3, %v10742_v51  ;;  %v4368_v54 = vadd.f32 %v12824_v17, %v4367_v52  ;;  %v5392_v55 = vadd.f32 %v12824_v17, %v5391_v53  ;;  %v4369_v56 = vpop.f32.mrb[241].mxu0  ;;  %v5393_v57 = vpop.f32.mrb[241].mxu1 }
 0x2e3   : > { %v4370_v60 = vpop.f32.mrb[242].mxu0  ;;  %v5394_v62 = vpop.f32.mrb[242].mxu1 }
 0x2e4   : > { %v6054_v1 = vmax.f32 %v4368_v54, 0.0  ;;  %v6310_v61 = vmax.f32 %v5392_v55, 0.0  ;;  %v4371_v2 = vadd.f32 %v12824_v17, %v4370_v60  ;;  %v5395_v3 = vadd.f32 %v12824_v17, %v5394_v62  ;;  %v4372_v4 = vpop.f32.mrb[243].mxu0  ;;  %v5396_v6 = vpop.f32.mrb[243].mxu1 }
 0x2e5   : > { %v11462_v4 = vld [vmem:[%s11750_s26 + $0xda0] ss:$8 sps:$4 sm:$0xff]  }
 0x2e6   : > { %v10487_v7 = vpack.c.bf16 %v6054_v1, %v6054_v1  ;;  %v10743_v5 = vpack.c.bf16 %v6310_v61, %v6310_v61  ;;  %v6055_v8 = vmax.f32 %v4371_v2, 0.0  ;;  %v6311_v9 = vmax.f32 %v5395_v3, 0.0  ;;  %4582 = vmatmul.mubr.bf16.gmra.mrb[92].mxu0 %v11441_v58  ;;  %5606 = vmatmul.mubr.bf16.gmra.mrb[92].mxu1 %v11444_v59  ;;  %v11459_v3 = vld [vmem:[%s11750_s26 + $0x5a0] ss:$8 sps:$4 sm:$0xff]  }
 0x2e7   : > { %9684 = vmatprep.mubr.msk.bf16.mxu0 %vm3077_vm0, %v11449_v63  ;;  %9812 = vmatprep.mubr.msk.bf16.mxu1 %vm3077_vm0, %v11452_v0 }
 0x2e8   : > { %8615 = vst.msk [vmem:[%s11953_s18 + $0x1e0] sm:$0xf] %vm8494_vm3, %v10487_v7  ;;  %8871 = vst.msk [vmem:[%s11953_s18 + $0x5e0] sm:$0xf] %vm8494_vm3, %v10743_v5  ;;  %v10488_v10 = vpack.c.bf16 %v6055_v8, %v6055_v8  ;;  %v10744_v12 = vpack.c.bf16 %v6311_v9, %v6311_v9  ;;  %v11467_v5 = vld [vmem:[%s11750_s26 + $0x5b4] ss:$8 sps:$4 sm:$0xff]  }
 0x2e9   : > { %v4375_v13 = vpop.f32.mrb[244].mxu0  ;;  %v5399_v11 = vpop.f32.mrb[244].mxu1  ;;  %v11470_v8 = vld [vmem:[%s11750_s26 + $0xdb4] ss:$8 sps:$4 sm:$0xff]  }
 0x2ea   : > { %8616 = vst.msk [vmem:[%s11953_s18 + $0x1e4] sm:$0xf] %vm8494_vm3, %v10488_v10  ;;  %8872 = vst.msk [vmem:[%s11953_s18 + $0x5e4] sm:$0xf] %vm8494_vm3, %v10744_v12  ;;  %v4376_v14 = vadd.f32 %v12824_v17, %v4375_v13  ;;  %v5400_v15 = vadd.f32 %v12824_v17, %v5399_v11  ;;  %v4377_v16 = vpop.f32.mrb[245].mxu0  ;;  %v5401_v18 = vpop.f32.mrb[245].mxu1 }
 0x2eb   : > { %v4378_v21 = vpop.f32.mrb[246].mxu0  ;;  %v5402_v22 = vpop.f32.mrb[246].mxu1 }
 0x2ec   : > { %v6056_v25 = vmax.f32 %v4376_v14, 0.0  ;;  %v6312_v26 = vmax.f32 %v5400_v15, 0.0  ;;  %v4379_v27 = vadd.f32 %v12824_v17, %v4378_v21  ;;  %v5403_v28 = vadd.f32 %v12824_v17, %v5402_v22  ;;  %v4380_v29 = vpop.f32.mrb[247].mxu0  ;;  %v5404_v30 = vpop.f32.mrb[247].mxu1 }
 0x2ed   : > { %v11468_v29 = vld [vmem:[%s11750_s26 + $0xdb0] ss:$8 sps:$4 sm:$0xff]  }
 0x2ee   : > { %v10489_v31 = vpack.c.bf16 %v6056_v25, %v6056_v25  ;;  %v10745_v32 = vpack.c.bf16 %v6312_v26, %v6312_v26  ;;  %v6057_v33 = vmax.f32 %v4379_v27, 0.0  ;;  %v6313_v34 = vmax.f32 %v5403_v28, 0.0  ;;  %4590 = vmatmul.mubr.bf16.gmra.mrb[96].mxu0 %v11447_v19  ;;  %5614 = vmatmul.mubr.bf16.gmra.mrb[96].mxu1 %v11450_v20  ;;  %v11465_v28 = vld [vmem:[%s11750_s26 + $0x5b0] ss:$8 sps:$4 sm:$0xff]  }
 0x2ef   : > { %9685 = vmatprep.mubr.msk.bf16.mxu0 %vm3077_vm0, %v11455_v23  ;;  %9813 = vmatprep.mubr.msk.bf16.mxu1 %vm3077_vm0, %v11458_v24  ;;  %v13117_v23 = vld [vmem:[%s14125_s2] ss:$0 sm:$0xff] }
 0x2f0   : > { %8617 = vst.msk [vmem:[%s11953_s18 + $0x1e8] sm:$0xf] %vm8494_vm3, %v10489_v31  ;;  %8873 = vst.msk [vmem:[%s11953_s18 + $0x5e8] sm:$0xf] %vm8494_vm3, %v10745_v32  ;;  %v10490_v35 = vpack.c.bf16 %v6057_v33, %v6057_v33  ;;  %v10746_v36 = vpack.c.bf16 %v6313_v34, %v6313_v34  ;;  %v11473_v32 = vld [vmem:[%s11750_s26 + $0x5c4] ss:$8 sps:$4 sm:$0xff]  }
 0x2f1   : > { %v4383_v37 = vpop.f32.mrb[248].mxu0  ;;  %v5407_v38 = vpop.f32.mrb[248].mxu1  ;;  %v11476_v33 = vld [vmem:[%s11750_s26 + $0xdc4] ss:$8 sps:$4 sm:$0xff]  }
 0x2f2   : > { %8618 = vst.msk [vmem:[%s11953_s18 + $0x1ec] sm:$0xf] %vm8494_vm3, %v10490_v35  ;;  %8874 = vst.msk [vmem:[%s11953_s18 + $0x5ec] sm:$0xf] %vm8494_vm3, %v10746_v36  ;;  %v4384_v39 = vadd.f32 %v12824_v17, %v4383_v37  ;;  %v5408_v40 = vadd.f32 %v12824_v17, %v5407_v38  ;;  %v4385_v41 = vpop.f32.mrb[249].mxu0  ;;  %v5409_v42 = vpop.f32.mrb[249].mxu1 }
 0x2f3   : > { %v4386_v45 = vpop.f32.mrb[250].mxu0  ;;  %v5410_v46 = vpop.f32.mrb[250].mxu1 }
 0x2f4   : > { %v6058_v49 = vmax.f32 %v4384_v39, 0.0  ;;  %v6314_v50 = vmax.f32 %v5408_v40, 0.0  ;;  %v4387_v51 = vadd.f32 %v12824_v17, %v4386_v45  ;;  %v5411_v52 = vadd.f32 %v12824_v17, %v5410_v46  ;;  %v4388_v53 = vpop.f32.mrb[251].mxu0  ;;  %v5412_v54 = vpop.f32.mrb[251].mxu1 }
 0x2f5   : > { %v11474_v53 = vld [vmem:[%s11750_s26 + $0xdc0] ss:$8 sps:$4 sm:$0xff]  }
 0x2f6   : > { %v10491_v55 = vpack.c.bf16 %v6058_v49, %v6058_v49  ;;  %v10747_v56 = vpack.c.bf16 %v6314_v50, %v6314_v50  ;;  %v6059_v57 = vmax.f32 %v4387_v51, 0.0  ;;  %v6315_v58 = vmax.f32 %v5411_v52, 0.0  ;;  %4598 = vmatmul.mubr.bf16.gmra.mrb[100].mxu0 %v11453_v43  ;;  %5622 = vmatmul.mubr.bf16.gmra.mrb[100].mxu1 %v11456_v44  ;;  %v11471_v52 = vld [vmem:[%s11750_s26 + $0x5c0] ss:$8 sps:$4 sm:$0xff]  }
 0x2f7   : > { %9686 = vmatprep.mubr.msk.bf16.mxu0 %vm3077_vm0, %v11461_v47  ;;  %9814 = vmatprep.mubr.msk.bf16.mxu1 %vm3077_vm0, %v11464_v48 }
 0x2f8   : > { %8619 = vst.msk [vmem:[%s11953_s18 + $0x1f0] sm:$0xf] %vm8494_vm3, %v10491_v55  ;;  %8875 = vst.msk [vmem:[%s11953_s18 + $0x5f0] sm:$0xf] %vm8494_vm3, %v10747_v56  ;;  %v10492_v59 = vpack.c.bf16 %v6059_v57, %v6059_v57  ;;  %v10748_v60 = vpack.c.bf16 %v6315_v58, %v6315_v58  ;;  %v11479_v56 = vld [vmem:[%s11750_s26 + $0x5d4] ss:$8 sps:$4 sm:$0xff]  }
 0x2f9   : > { %v4391_v62 = vpop.f32.mrb[252].mxu0  ;;  %v5415_v63 = vpop.f32.mrb[252].mxu1  ;;  %v11482_v57 = vld [vmem:[%s11750_s26 + $0xdd4] ss:$8 sps:$4 sm:$0xff]  }
 0x2fa   : > { %8620 = vst.msk [vmem:[%s11953_s18 + $0x1f4] sm:$0xf] %vm8494_vm3, %v10492_v59  ;;  %8876 = vst.msk [vmem:[%s11953_s18 + $0x5f4] sm:$0xf] %vm8494_vm3, %v10748_v60  ;;  %v4392_v0 = vadd.f32 %v12824_v17, %v4391_v62  ;;  %v5416_v1 = vadd.f32 %v12824_v17, %v5415_v63  ;;  %v4393_v61 = vpop.f32.mrb[253].mxu0  ;;  %v5417_v2 = vpop.f32.mrb[253].mxu1 }
 0x2fb   : > { %v4394_v6 = vpop.f32.mrb[254].mxu0  ;;  %v5418_v7 = vpop.f32.mrb[254].mxu1 }
 0x2fc   : > { %v6060_v9 = vmax.f32 %v4392_v0, 0.0  ;;  %v6316_v10 = vmax.f32 %v5416_v1, 0.0  ;;  %v4395_v12 = vadd.f32 %v12824_v17, %v4394_v6  ;;  %v5419_v13 = vadd.f32 %v12824_v17, %v5418_v7  ;;  %v4396_v11 = vpop.f32.mrb[255].mxu0  ;;  %v5420_v14 = vpop.f32.mrb[255].mxu1 }
 0x2fd   : > { %v11480_v11 = vld [vmem:[%s11750_s26 + $0xdd0] ss:$8 sps:$4 sm:$0xff]  }
 0x2fe   : > { %v10493_v15 = vpack.c.bf16 %v6060_v9, %v6060_v9  ;;  %v10749_v16 = vpack.c.bf16 %v6316_v10, %v6316_v10  ;;  %v6061_v18 = vmax.f32 %v4395_v12, 0.0  ;;  %v6317_v19 = vmax.f32 %v5419_v13, 0.0  ;;  %4606 = vmatmul.mubr.bf16.gmra.mrb[104].mxu0 %v11459_v3  ;;  %5630 = vmatmul.mubr.bf16.gmra.mrb[104].mxu1 %v11462_v4  ;;  %v11477_v13 = vld [vmem:[%s11750_s26 + $0x5d0] ss:$8 sps:$4 sm:$0xff]  }
 0x2ff   : > { %9687 = vmatprep.mubr.msk.bf16.mxu0 %vm3077_vm0, %v11467_v5  ;;  %9815 = vmatprep.mubr.msk.bf16.mxu1 %vm3077_vm0, %v11470_v8 }
 0x300   : > { %8621 = vst.msk [vmem:[%s11953_s18 + $0x1f8] sm:$0xf] %vm8494_vm3, %v10493_v15  ;;  %8877 = vst.msk [vmem:[%s11953_s18 + $0x5f8] sm:$0xf] %vm8494_vm3, %v10749_v16  ;;  %v10494_v17 = vpack.c.bf16 %v6061_v18, %v6061_v18  ;;  %v10750_v20 = vpack.c.bf16 %v6317_v19, %v6317_v19  ;;  %v11485_v16 = vld [vmem:[%s11750_s26 + $0x5e4] ss:$8 sps:$4 sm:$0xff]  }
 0x301   : > { %v4399_v21 = vpop.f32.mrb[0].mxu0  ;;  %v5423_v22 = vpop.f32.mrb[0].mxu1  ;;  %v11488_v18 = vld [vmem:[%s11750_s26 + $0xde4] ss:$8 sps:$4 sm:$0xff]  }
 0x302   : > { %8622 = vst.msk [vmem:[%s11953_s18 + $0x1fc] sm:$0xf] %vm8494_vm3, %v10494_v17  ;;  %8878 = vst.msk [vmem:[%s11953_s18 + $0x5fc] sm:$0xf] %vm8494_vm3, %v10750_v20  ;;  %v4400_v24 = vadd.f32 %v13117_v23, %v4399_v21  ;;  %v5424_v25 = vadd.f32 %v13117_v23, %v5423_v22  ;;  %v4401_v26 = vpop.f32.mrb[1].mxu0  ;;  %v5425_v27 = vpop.f32.mrb[1].mxu1 }
 0x303   : > { %v4402_v30 = vpop.f32.mrb[2].mxu0  ;;  %v5426_v31 = vpop.f32.mrb[2].mxu1 }
 0x304   : > { %v6062_v34 = vmax.f32 %v4400_v24, 0.0  ;;  %v6318_v35 = vmax.f32 %v5424_v25, 0.0  ;;  %v4403_v36 = vadd.f32 %v13117_v23, %v4402_v30  ;;  %v5427_v37 = vadd.f32 %v13117_v23, %v5426_v31  ;;  %v4404_v38 = vpop.f32.mrb[3].mxu0  ;;  %v5428_v39 = vpop.f32.mrb[3].mxu1 }
 0x305   : > { %v11486_v38 = vld [vmem:[%s11750_s26 + $0xde0] ss:$8 sps:$4 sm:$0xff]  }
 0x306   : > { %v10495_v40 = vpack.c.bf16 %v6062_v34, %v6062_v34  ;;  %v10751_v41 = vpack.c.bf16 %v6318_v35, %v6318_v35  ;;  %v6063_v42 = vmax.f32 %v4403_v36, 0.0  ;;  %v6319_v43 = vmax.f32 %v5427_v37, 0.0  ;;  %4614 = vmatmul.mubr.bf16.gmra.mrb[108].mxu0 %v11465_v28  ;;  %5638 = vmatmul.mubr.bf16.gmra.mrb[108].mxu1 %v11468_v29  ;;  %v11483_v37 = vld [vmem:[%s11750_s26 + $0x5e0] ss:$8 sps:$4 sm:$0xff]  }
 0x307   : > { %9688 = vmatprep.mubr.msk.bf16.mxu0 %vm3077_vm0, %v11473_v32  ;;  %9816 = vmatprep.mubr.msk.bf16.mxu1 %vm3077_vm0, %v11476_v33 }
 0x308   : > { %8623 = vst.msk [vmem:[%s11953_s18 + $0x200] sm:$0xf] %vm8494_vm3, %v10495_v40  ;;  %8879 = vst.msk [vmem:[%s11953_s18 + $0x600] sm:$0xf] %vm8494_vm3, %v10751_v41  ;;  %v10496_v44 = vpack.c.bf16 %v6063_v42, %v6063_v42  ;;  %v10752_v45 = vpack.c.bf16 %v6319_v43, %v6319_v43  ;;  %v11491_v41 = vld [vmem:[%s11750_s26 + $0x5f4] ss:$8 sps:$4 sm:$0xff]  }
 0x309   : > { %v4407_v46 = vpop.f32.mrb[4].mxu0  ;;  %v5431_v47 = vpop.f32.mrb[4].mxu1  ;;  %v11494_v42 = vld [vmem:[%s11750_s26 + $0xdf4] ss:$8 sps:$4 sm:$0xff]  }
 0x30a   : > { %8624 = vst.msk [vmem:[%s11953_s18 + $0x204] sm:$0xf] %vm8494_vm3, %v10496_v44  ;;  %8880 = vst.msk [vmem:[%s11953_s18 + $0x604] sm:$0xf] %vm8494_vm3, %v10752_v45  ;;  %v4408_v48 = vadd.f32 %v13117_v23, %v4407_v46  ;;  %v5432_v49 = vadd.f32 %v13117_v23, %v5431_v47  ;;  %v4409_v50 = vpop.f32.mrb[5].mxu0  ;;  %v5433_v51 = vpop.f32.mrb[5].mxu1 }
 0x30b   : > { %v4410_v54 = vpop.f32.mrb[6].mxu0  ;;  %v5434_v55 = vpop.f32.mrb[6].mxu1 }
 0x30c   : > { %v6064_v58 = vmax.f32 %v4408_v48, 0.0  ;;  %v6320_v59 = vmax.f32 %v5432_v49, 0.0  ;;  %v4411_v60 = vadd.f32 %v13117_v23, %v4410_v54  ;;  %v5435_v62 = vadd.f32 %v13117_v23, %v5434_v55  ;;  %v4412_v63 = vpop.f32.mrb[7].mxu0  ;;  %v5436_v0 = vpop.f32.mrb[7].mxu1 }
 0x30d   : > { %v11492_v63 = vld [vmem:[%s11750_s26 + $0xdf0] ss:$8 sps:$4 sm:$0xff]  }
 0x30e   : > { %v10497_v1 = vpack.c.bf16 %v6064_v58, %v6064_v58  ;;  %v10753_v61 = vpack.c.bf16 %v6320_v59, %v6320_v59  ;;  %v6065_v2 = vmax.f32 %v4411_v60, 0.0  ;;  %v6321_v3 = vmax.f32 %v5435_v62, 0.0  ;;  %4622 = vmatmul.mubr.bf16.gmra.mrb[112].mxu0 %v11471_v52  ;;  %5646 = vmatmul.mubr.bf16.gmra.mrb[112].mxu1 %v11474_v53  ;;  %v11489_v62 = vld [vmem:[%s11750_s26 + $0x5f0] ss:$8 sps:$4 sm:$0xff]  }
 0x30f   : > { %9689 = vmatprep.mubr.msk.bf16.mxu0 %vm3077_vm0, %v11479_v56  ;;  %9817 = vmatprep.mubr.msk.bf16.mxu1 %vm3077_vm0, %v11482_v57 }
 0x310   : > { %8625 = vst.msk [vmem:[%s11953_s18 + $0x208] sm:$0xf] %vm8494_vm3, %v10497_v1  ;;  %8881 = vst.msk [vmem:[%s11953_s18 + $0x608] sm:$0xf] %vm8494_vm3, %v10753_v61  ;;  %v10498_v4 = vpack.c.bf16 %v6065_v2, %v6065_v2  ;;  %v10754_v6 = vpack.c.bf16 %v6321_v3, %v6321_v3  ;;  %v11497_v61 = vld [vmem:[%s11750_s26 + $0x604] ss:$8 sps:$4 sm:$0xff]  }
 0x311   : > { %v4415_v7 = vpop.f32.mrb[8].mxu0  ;;  %v5439_v5 = vpop.f32.mrb[8].mxu1  ;;  %v11500_v2 = vld [vmem:[%s11750_s26 + $0xe04] ss:$8 sps:$4 sm:$0xff]  }
 0x312   : > { %8626 = vst.msk [vmem:[%s11953_s18 + $0x20c] sm:$0xf] %vm8494_vm3, %v10498_v4  ;;  %8882 = vst.msk [vmem:[%s11953_s18 + $0x60c] sm:$0xf] %vm8494_vm3, %v10754_v6  ;;  %v4416_v8 = vadd.f32 %v13117_v23, %v4415_v7  ;;  %v5440_v9 = vadd.f32 %v13117_v23, %v5439_v5  ;;  %v4417_v10 = vpop.f32.mrb[9].mxu0  ;;  %v5441_v12 = vpop.f32.mrb[9].mxu1 }
 0x313   : > { %v4418_v14 = vpop.f32.mrb[10].mxu0  ;;  %v5442_v15 = vpop.f32.mrb[10].mxu1 }
 0x314   : > { %v6066_v19 = vmax.f32 %v4416_v8, 0.0  ;;  %v6322_v17 = vmax.f32 %v5440_v9, 0.0  ;;  %v4419_v20 = vadd.f32 %v13117_v23, %v4418_v14  ;;  %v5443_v21 = vadd.f32 %v13117_v23, %v5442_v15  ;;  %v4420_v22 = vpop.f32.mrb[11].mxu0  ;;  %v5444_v24 = vpop.f32.mrb[11].mxu1 }
 0x315   : > { %v11498_v22 = vld [vmem:[%s11750_s26 + $0xe00] ss:$8 sps:$4 sm:$0xff]  }
 0x316   : > { %v10499_v25 = vpack.c.bf16 %v6066_v19, %v6066_v19  ;;  %v10755_v26 = vpack.c.bf16 %v6322_v17, %v6322_v17  ;;  %v6067_v27 = vmax.f32 %v4419_v20, 0.0  ;;  %v6323_v28 = vmax.f32 %v5443_v21, 0.0  ;;  %4630 = vmatmul.mubr.bf16.gmra.mrb[116].mxu0 %v11477_v13  ;;  %5654 = vmatmul.mubr.bf16.gmra.mrb[116].mxu1 %v11480_v11  ;;  %v11495_v21 = vld [vmem:[%s11750_s26 + $0x600] ss:$8 sps:$4 sm:$0xff]  }
 0x317   : > { %9690 = vmatprep.mubr.msk.bf16.mxu0 %vm3077_vm0, %v11485_v16  ;;  %9818 = vmatprep.mubr.msk.bf16.mxu1 %vm3077_vm0, %v11488_v18 }
 0x318   : > { %8627 = vst.msk [vmem:[%s11953_s18 + $0x210] sm:$0xf] %vm8494_vm3, %v10499_v25  ;;  %8883 = vst.msk [vmem:[%s11953_s18 + $0x610] sm:$0xf] %vm8494_vm3, %v10755_v26  ;;  %v10500_v29 = vpack.c.bf16 %v6067_v27, %v6067_v27  ;;  %v10756_v30 = vpack.c.bf16 %v6323_v28, %v6323_v28  ;;  %v11503_v26 = vld [vmem:[%s11750_s26 + $0x614] ss:$8 sps:$4 sm:$0xff]  }
 0x319   : > { %v4423_v31 = vpop.f32.mrb[12].mxu0  ;;  %v5447_v32 = vpop.f32.mrb[12].mxu1  ;;  %v11506_v27 = vld [vmem:[%s11750_s26 + $0xe14] ss:$8 sps:$4 sm:$0xff]  }
 0x31a   : > { %8628 = vst.msk [vmem:[%s11953_s18 + $0x214] sm:$0xf] %vm8494_vm3, %v10500_v29  ;;  %8884 = vst.msk [vmem:[%s11953_s18 + $0x614] sm:$0xf] %vm8494_vm3, %v10756_v30  ;;  %v4424_v33 = vadd.f32 %v13117_v23, %v4423_v31  ;;  %v5448_v34 = vadd.f32 %v13117_v23, %v5447_v32  ;;  %v4425_v35 = vpop.f32.mrb[13].mxu0  ;;  %v5449_v36 = vpop.f32.mrb[13].mxu1 }
 0x31b   : > { %v4426_v39 = vpop.f32.mrb[14].mxu0  ;;  %v5450_v40 = vpop.f32.mrb[14].mxu1 }
 0x31c   : > { %v6068_v43 = vmax.f32 %v4424_v33, 0.0  ;;  %v6324_v44 = vmax.f32 %v5448_v34, 0.0  ;;  %v4427_v45 = vadd.f32 %v13117_v23, %v4426_v39  ;;  %v5451_v46 = vadd.f32 %v13117_v23, %v5450_v40  ;;  %v4428_v47 = vpop.f32.mrb[15].mxu0  ;;  %v5452_v48 = vpop.f32.mrb[15].mxu1 }
 0x31d   : > { %v11504_v47 = vld [vmem:[%s11750_s26 + $0xe10] ss:$8 sps:$4 sm:$0xff]  }
 0x31e   : > { %v10501_v49 = vpack.c.bf16 %v6068_v43, %v6068_v43  ;;  %v10757_v50 = vpack.c.bf16 %v6324_v44, %v6324_v44  ;;  %v6069_v51 = vmax.f32 %v4427_v45, 0.0  ;;  %v6325_v52 = vmax.f32 %v5451_v46, 0.0  ;;  %4638 = vmatmul.mubr.bf16.gmra.mrb[120].mxu0 %v11483_v37  ;;  %5662 = vmatmul.mubr.bf16.gmra.mrb[120].mxu1 %v11486_v38  ;;  %v11501_v46 = vld [vmem:[%s11750_s26 + $0x610] ss:$8 sps:$4 sm:$0xff]  }
 0x31f   : > { %9691 = vmatprep.mubr.msk.bf16.mxu0 %vm3077_vm0, %v11491_v41  ;;  %9819 = vmatprep.mubr.msk.bf16.mxu1 %vm3077_vm0, %v11494_v42 }
 0x320   : > { %8629 = vst.msk [vmem:[%s11953_s18 + $0x218] sm:$0xf] %vm8494_vm3, %v10501_v49  ;;  %8885 = vst.msk [vmem:[%s11953_s18 + $0x618] sm:$0xf] %vm8494_vm3, %v10757_v50  ;;  %v10502_v53 = vpack.c.bf16 %v6069_v51, %v6069_v51  ;;  %v10758_v54 = vpack.c.bf16 %v6325_v52, %v6325_v52  ;;  %v11509_v50 = vld [vmem:[%s11750_s26 + $0x624] ss:$8 sps:$4 sm:$0xff]  }
 0x321   : > { %v4431_v55 = vpop.f32.mrb[16].mxu0  ;;  %v5455_v56 = vpop.f32.mrb[16].mxu1  ;;  %v11512_v51 = vld [vmem:[%s11750_s26 + $0xe24] ss:$8 sps:$4 sm:$0xff]  }
 0x322   : > { %8630 = vst.msk [vmem:[%s11953_s18 + $0x21c] sm:$0xf] %vm8494_vm3, %v10502_v53  ;;  %8886 = vst.msk [vmem:[%s11953_s18 + $0x61c] sm:$0xf] %vm8494_vm3, %v10758_v54  ;;  %v4432_v57 = vadd.f32 %v13117_v23, %v4431_v55  ;;  %v5456_v58 = vadd.f32 %v13117_v23, %v5455_v56  ;;  %v4433_v59 = vpop.f32.mrb[17].mxu0  ;;  %v5457_v60 = vpop.f32.mrb[17].mxu1 }
 0x323   : > { %v4434_v0 = vpop.f32.mrb[18].mxu0  ;;  %v5458_v1 = vpop.f32.mrb[18].mxu1 }
 0x324   : > { %v6070_v3 = vmax.f32 %v4432_v57, 0.0  ;;  %v6326_v4 = vmax.f32 %v5456_v58, 0.0  ;;  %v4435_v6 = vadd.f32 %v13117_v23, %v4434_v0  ;;  %v5459_v7 = vadd.f32 %v13117_v23, %v5458_v1  ;;  %v4436_v5 = vpop.f32.mrb[19].mxu0  ;;  %v5460_v8 = vpop.f32.mrb[19].mxu1 }
 0x325   : > { %v11510_v5 = vld [vmem:[%s11750_s26 + $0xe20] ss:$8 sps:$4 sm:$0xff]  }
 0x326   : > { %v10503_v9 = vpack.c.bf16 %v6070_v3, %v6070_v3  ;;  %v10759_v10 = vpack.c.bf16 %v6326_v4, %v6326_v4  ;;  %v6071_v12 = vmax.f32 %v4435_v6, 0.0  ;;  %v6327_v13 = vmax.f32 %v5459_v7, 0.0  ;;  %4646 = vmatmul.mubr.bf16.gmra.mrb[124].mxu0 %v11489_v62  ;;  %5670 = vmatmul.mubr.bf16.gmra.mrb[124].mxu1 %v11492_v63  ;;  %v11507_v7 = vld [vmem:[%s11750_s26 + $0x620] ss:$8 sps:$4 sm:$0xff]  }
 0x327   : > { %9692 = vmatprep.mubr.msk.bf16.mxu0 %vm3077_vm0, %v11497_v61  ;;  %9820 = vmatprep.mubr.msk.bf16.mxu1 %vm3077_vm0, %v11500_v2 }
 0x328   : > { %8631 = vst.msk [vmem:[%s11953_s18 + $0x220] sm:$0xf] %vm8494_vm3, %v10503_v9  ;;  %8887 = vst.msk [vmem:[%s11953_s18 + $0x620] sm:$0xf] %vm8494_vm3, %v10759_v10  ;;  %v10504_v11 = vpack.c.bf16 %v6071_v12, %v6071_v12  ;;  %v10760_v14 = vpack.c.bf16 %v6327_v13, %v6327_v13  ;;  %v11515_v10 = vld [vmem:[%s11750_s26 + $0x634] ss:$8 sps:$4 sm:$0xff]  }
 0x329   : > { %v4439_v15 = vpop.f32.mrb[20].mxu0  ;;  %v5463_v16 = vpop.f32.mrb[20].mxu1  ;;  %v11518_v12 = vld [vmem:[%s11750_s26 + $0xe34] ss:$8 sps:$4 sm:$0xff]  }
 0x32a   : > { %8632 = vst.msk [vmem:[%s11953_s18 + $0x224] sm:$0xf] %vm8494_vm3, %v10504_v11  ;;  %8888 = vst.msk [vmem:[%s11953_s18 + $0x624] sm:$0xf] %vm8494_vm3, %v10760_v14  ;;  %v4440_v18 = vadd.f32 %v13117_v23, %v4439_v15  ;;  %v5464_v19 = vadd.f32 %v13117_v23, %v5463_v16  ;;  %v4441_v17 = vpop.f32.mrb[21].mxu0  ;;  %v5465_v20 = vpop.f32.mrb[21].mxu1 }
 0x32b   : > { %v4442_v24 = vpop.f32.mrb[22].mxu0  ;;  %v5466_v25 = vpop.f32.mrb[22].mxu1 }
 0x32c   : > { %v6072_v28 = vmax.f32 %v4440_v18, 0.0  ;;  %v6328_v29 = vmax.f32 %v5464_v19, 0.0  ;;  %v4443_v30 = vadd.f32 %v13117_v23, %v4442_v24  ;;  %v5467_v31 = vadd.f32 %v13117_v23, %v5466_v25  ;;  %v4444_v32 = vpop.f32.mrb[23].mxu0  ;;  %v5468_v33 = vpop.f32.mrb[23].mxu1 }
 0x32d   : > { %v11516_v32 = vld [vmem:[%s11750_s26 + $0xe30] ss:$8 sps:$4 sm:$0xff]  }
 0x32e   : > { %v10505_v34 = vpack.c.bf16 %v6072_v28, %v6072_v28  ;;  %v10761_v35 = vpack.c.bf16 %v6328_v29, %v6328_v29  ;;  %v6073_v36 = vmax.f32 %v4443_v30, 0.0  ;;  %v6329_v37 = vmax.f32 %v5467_v31, 0.0  ;;  %4654 = vmatmul.mubr.bf16.gmra.mrb[128].mxu0 %v11495_v21  ;;  %5678 = vmatmul.mubr.bf16.gmra.mrb[128].mxu1 %v11498_v22  ;;  %v11513_v31 = vld [vmem:[%s11750_s26 + $0x630] ss:$8 sps:$4 sm:$0xff]  }
 0x32f   : > { %9693 = vmatprep.mubr.msk.bf16.mxu0 %vm3077_vm0, %v11503_v26  ;;  %9821 = vmatprep.mubr.msk.bf16.mxu1 %vm3077_vm0, %v11506_v27 }
 0x330   : > { %8633 = vst.msk [vmem:[%s11953_s18 + $0x228] sm:$0xf] %vm8494_vm3, %v10505_v34  ;;  %8889 = vst.msk [vmem:[%s11953_s18 + $0x628] sm:$0xf] %vm8494_vm3, %v10761_v35  ;;  %v10506_v38 = vpack.c.bf16 %v6073_v36, %v6073_v36  ;;  %v10762_v39 = vpack.c.bf16 %v6329_v37, %v6329_v37  ;;  %v11521_v35 = vld [vmem:[%s11750_s26 + $0x644] ss:$8 sps:$4 sm:$0xff]  }
 0x331   : > { %v4447_v40 = vpop.f32.mrb[24].mxu0  ;;  %v5471_v41 = vpop.f32.mrb[24].mxu1  ;;  %v11524_v36 = vld [vmem:[%s11750_s26 + $0xe44] ss:$8 sps:$4 sm:$0xff]  }
 0x332   : > { %8634 = vst.msk [vmem:[%s11953_s18 + $0x22c] sm:$0xf] %vm8494_vm3, %v10506_v38  ;;  %8890 = vst.msk [vmem:[%s11953_s18 + $0x62c] sm:$0xf] %vm8494_vm3, %v10762_v39  ;;  %v4448_v42 = vadd.f32 %v13117_v23, %v4447_v40  ;;  %v5472_v43 = vadd.f32 %v13117_v23, %v5471_v41  ;;  %v4449_v44 = vpop.f32.mrb[25].mxu0  ;;  %v5473_v45 = vpop.f32.mrb[25].mxu1 }
 0x333   : > { %v4450_v48 = vpop.f32.mrb[26].mxu0  ;;  %v5474_v49 = vpop.f32.mrb[26].mxu1 }
 0x334   : > { %v6074_v52 = vmax.f32 %v4448_v42, 0.0  ;;  %v6330_v53 = vmax.f32 %v5472_v43, 0.0  ;;  %v4451_v54 = vadd.f32 %v13117_v23, %v4450_v48  ;;  %v5475_v55 = vadd.f32 %v13117_v23, %v5474_v49  ;;  %v4452_v56 = vpop.f32.mrb[27].mxu0  ;;  %v5476_v57 = vpop.f32.mrb[27].mxu1 }
 0x335   : > { %v11522_v56 = vld [vmem:[%s11750_s26 + $0xe40] ss:$8 sps:$4 sm:$0xff]  }
 0x336   : > { %v10507_v58 = vpack.c.bf16 %v6074_v52, %v6074_v52  ;;  %v10763_v59 = vpack.c.bf16 %v6330_v53, %v6330_v53  ;;  %v6075_v60 = vmax.f32 %v4451_v54, 0.0  ;;  %v6331_v62 = vmax.f32 %v5475_v55, 0.0  ;;  %4662 = vmatmul.mubr.bf16.gmra.mrb[132].mxu0 %v11501_v46  ;;  %5686 = vmatmul.mubr.bf16.gmra.mrb[132].mxu1 %v11504_v47  ;;  %v11519_v55 = vld [vmem:[%s11750_s26 + $0x640] ss:$8 sps:$4 sm:$0xff]  }
 0x337   : > { %9694 = vmatprep.mubr.msk.bf16.mxu0 %vm3077_vm0, %v11509_v50  ;;  %9822 = vmatprep.mubr.msk.bf16.mxu1 %vm3077_vm0, %v11512_v51 }
 0x338   : > { %8635 = vst.msk [vmem:[%s11953_s18 + $0x230] sm:$0xf] %vm8494_vm3, %v10507_v58  ;;  %8891 = vst.msk [vmem:[%s11953_s18 + $0x630] sm:$0xf] %vm8494_vm3, %v10763_v59  ;;  %v10508_v63 = vpack.c.bf16 %v6075_v60, %v6075_v60  ;;  %v10764_v0 = vpack.c.bf16 %v6331_v62, %v6331_v62  ;;  %v11527_v59 = vld [vmem:[%s11750_s26 + $0x654] ss:$8 sps:$4 sm:$0xff]  }
 0x339   : > { %v4455_v1 = vpop.f32.mrb[28].mxu0  ;;  %v5479_v61 = vpop.f32.mrb[28].mxu1  ;;  %v11530_v60 = vld [vmem:[%s11750_s26 + $0xe54] ss:$8 sps:$4 sm:$0xff]  }
 0x33a   : > { %8636 = vst.msk [vmem:[%s11953_s18 + $0x234] sm:$0xf] %vm8494_vm3, %v10508_v63  ;;  %8892 = vst.msk [vmem:[%s11953_s18 + $0x634] sm:$0xf] %vm8494_vm3, %v10764_v0  ;;  %v4456_v2 = vadd.f32 %v13117_v23, %v4455_v1  ;;  %v5480_v3 = vadd.f32 %v13117_v23, %v5479_v61  ;;  %v4457_v4 = vpop.f32.mrb[29].mxu0  ;;  %v5481_v6 = vpop.f32.mrb[29].mxu1 }
 0x33b   : > { %v4458_v8 = vpop.f32.mrb[30].mxu0  ;;  %v5482_v9 = vpop.f32.mrb[30].mxu1 }
 0x33c   : > { %v6076_v13 = vmax.f32 %v4456_v2, 0.0  ;;  %v6332_v11 = vmax.f32 %v5480_v3, 0.0  ;;  %v4459_v14 = vadd.f32 %v13117_v23, %v4458_v8  ;;  %v5483_v15 = vadd.f32 %v13117_v23, %v5482_v9  ;;  %v4460_v16 = vpop.f32.mrb[31].mxu0  ;;  %v5484_v18 = vpop.f32.mrb[31].mxu1 }
 0x33d   : > { %v11528_v16 = vld [vmem:[%s11750_s26 + $0xe50] ss:$8 sps:$4 sm:$0xff]  }
 0x33e   : > { %v10509_v19 = vpack.c.bf16 %v6076_v13, %v6076_v13  ;;  %v10765_v17 = vpack.c.bf16 %v6332_v11, %v6332_v11  ;;  %v6077_v20 = vmax.f32 %v4459_v14, 0.0  ;;  %v6333_v21 = vmax.f32 %v5483_v15, 0.0  ;;  %4670 = vmatmul.mubr.bf16.gmra.mrb[136].mxu0 %v11507_v7  ;;  %5694 = vmatmul.mubr.bf16.gmra.mrb[136].mxu1 %v11510_v5  ;;  %v11525_v15 = vld [vmem:[%s11750_s26 + $0x650] ss:$8 sps:$4 sm:$0xff]  }
 0x33f   : > { %9695 = vmatprep.mubr.msk.bf16.mxu0 %vm3077_vm0, %v11515_v10  ;;  %9823 = vmatprep.mubr.msk.bf16.mxu1 %vm3077_vm0, %v11518_v12 }
 0x340   : > { %8637 = vst.msk [vmem:[%s11953_s18 + $0x238] sm:$0xf] %vm8494_vm3, %v10509_v19  ;;  %8893 = vst.msk [vmem:[%s11953_s18 + $0x638] sm:$0xf] %vm8494_vm3, %v10765_v17  ;;  %v10510_v22 = vpack.c.bf16 %v6077_v20, %v6077_v20  ;;  %v10766_v24 = vpack.c.bf16 %v6333_v21, %v6333_v21  ;;  %v11533_v17 = vld [vmem:[%s11750_s26 + $0x664] ss:$8 sps:$4 sm:$0xff]  }
 0x341   : > { %v4463_v25 = vpop.f32.mrb[32].mxu0  ;;  %v5487_v26 = vpop.f32.mrb[32].mxu1  ;;  %v11536_v20 = vld [vmem:[%s11750_s26 + $0xe64] ss:$8 sps:$4 sm:$0xff]  }
 0x342   : > { %8638 = vst.msk [vmem:[%s11953_s18 + $0x23c] sm:$0xf] %vm8494_vm3, %v10510_v22  ;;  %8894 = vst.msk [vmem:[%s11953_s18 + $0x63c] sm:$0xf] %vm8494_vm3, %v10766_v24  ;;  %v4464_v27 = vadd.f32 %v13117_v23, %v4463_v25  ;;  %v5488_v28 = vadd.f32 %v13117_v23, %v5487_v26  ;;  %v4465_v29 = vpop.f32.mrb[33].mxu0  ;;  %v5489_v30 = vpop.f32.mrb[33].mxu1 }
 0x343   : > { %v4466_v33 = vpop.f32.mrb[34].mxu0  ;;  %v5490_v34 = vpop.f32.mrb[34].mxu1 }
 0x344   : > { %v6078_v37 = vmax.f32 %v4464_v27, 0.0  ;;  %v6334_v38 = vmax.f32 %v5488_v28, 0.0  ;;  %v4467_v39 = vadd.f32 %v13117_v23, %v4466_v33  ;;  %v5491_v40 = vadd.f32 %v13117_v23, %v5490_v34  ;;  %v4468_v41 = vpop.f32.mrb[35].mxu0  ;;  %v5492_v42 = vpop.f32.mrb[35].mxu1 }
 0x345   : > { %v11534_v41 = vld [vmem:[%s11750_s26 + $0xe60] ss:$8 sps:$4 sm:$0xff]  }
 0x346   : > { %v10511_v43 = vpack.c.bf16 %v6078_v37, %v6078_v37  ;;  %v10767_v44 = vpack.c.bf16 %v6334_v38, %v6334_v38  ;;  %v6079_v45 = vmax.f32 %v4467_v39, 0.0  ;;  %v6335_v46 = vmax.f32 %v5491_v40, 0.0  ;;  %4678 = vmatmul.mubr.bf16.gmra.mrb[140].mxu0 %v11513_v31  ;;  %5702 = vmatmul.mubr.bf16.gmra.mrb[140].mxu1 %v11516_v32  ;;  %v11531_v40 = vld [vmem:[%s11750_s26 + $0x660] ss:$8 sps:$4 sm:$0xff]  }
 0x347   : > { %9696 = vmatprep.mubr.msk.bf16.mxu0 %vm3077_vm0, %v11521_v35  ;;  %9824 = vmatprep.mubr.msk.bf16.mxu1 %vm3077_vm0, %v11524_v36 }
 0x348   : > { %8639 = vst.msk [vmem:[%s11953_s18 + $0x240] sm:$0xf] %vm8494_vm3, %v10511_v43  ;;  %8895 = vst.msk [vmem:[%s11953_s18 + $0x640] sm:$0xf] %vm8494_vm3, %v10767_v44  ;;  %v10512_v47 = vpack.c.bf16 %v6079_v45, %v6079_v45  ;;  %v10768_v48 = vpack.c.bf16 %v6335_v46, %v6335_v46  ;;  %v11539_v44 = vld [vmem:[%s11750_s26 + $0x674] ss:$8 sps:$4 sm:$0xff]  }
 0x349   : > { %v4471_v49 = vpop.f32.mrb[36].mxu0  ;;  %v5495_v50 = vpop.f32.mrb[36].mxu1  ;;  %v11542_v45 = vld [vmem:[%s11750_s26 + $0xe74] ss:$8 sps:$4 sm:$0xff]  }
 0x34a   : > { %8640 = vst.msk [vmem:[%s11953_s18 + $0x244] sm:$0xf] %vm8494_vm3, %v10512_v47  ;;  %8896 = vst.msk [vmem:[%s11953_s18 + $0x644] sm:$0xf] %vm8494_vm3, %v10768_v48  ;;  %v4472_v51 = vadd.f32 %v13117_v23, %v4471_v49  ;;  %v5496_v52 = vadd.f32 %v13117_v23, %v5495_v50  ;;  %v4473_v53 = vpop.f32.mrb[37].mxu0  ;;  %v5497_v54 = vpop.f32.mrb[37].mxu1 }
 0x34b   : > { %v4474_v57 = vpop.f32.mrb[38].mxu0  ;;  %v5498_v58 = vpop.f32.mrb[38].mxu1 }
 0x34c   : > { %v6080_v62 = vmax.f32 %v4472_v51, 0.0  ;;  %v6336_v63 = vmax.f32 %v5496_v52, 0.0  ;;  %v4475_v0 = vadd.f32 %v13117_v23, %v4474_v57  ;;  %v5499_v1 = vadd.f32 %v13117_v23, %v5498_v58  ;;  %v4476_v61 = vpop.f32.mrb[39].mxu0  ;;  %v5500_v2 = vpop.f32.mrb[39].mxu1 }
 0x34d   : > { %v11540_v61 = vld [vmem:[%s11750_s26 + $0xe70] ss:$8 sps:$4 sm:$0xff]  }
 0x34e   : > { %v10513_v3 = vpack.c.bf16 %v6080_v62, %v6080_v62  ;;  %v10769_v4 = vpack.c.bf16 %v6336_v63, %v6336_v63  ;;  %v6081_v6 = vmax.f32 %v4475_v0, 0.0  ;;  %v6337_v7 = vmax.f32 %v5499_v1, 0.0  ;;  %4686 = vmatmul.mubr.bf16.gmra.mrb[144].mxu0 %v11519_v55  ;;  %5710 = vmatmul.mubr.bf16.gmra.mrb[144].mxu1 %v11522_v56  ;;  %v11537_v1 = vld [vmem:[%s11750_s26 + $0x670] ss:$8 sps:$4 sm:$0xff]  }
 0x34f   : > { %9697 = vmatprep.mubr.msk.bf16.mxu0 %vm3077_vm0, %v11527_v59  ;;  %9825 = vmatprep.mubr.msk.bf16.mxu1 %vm3077_vm0, %v11530_v60 }
 0x350   : > { %8641 = vst.msk [vmem:[%s11953_s18 + $0x248] sm:$0xf] %vm8494_vm3, %v10513_v3  ;;  %8897 = vst.msk [vmem:[%s11953_s18 + $0x648] sm:$0xf] %vm8494_vm3, %v10769_v4  ;;  %v10514_v5 = vpack.c.bf16 %v6081_v6, %v6081_v6  ;;  %v10770_v8 = vpack.c.bf16 %v6337_v7, %v6337_v7  ;;  %v11545_v4 = vld [vmem:[%s11750_s26 + $0x684] ss:$8 sps:$4 sm:$0xff]  }
 0x351   : > { %v4479_v9 = vpop.f32.mrb[40].mxu0  ;;  %v5503_v10 = vpop.f32.mrb[40].mxu1  ;;  %v11548_v6 = vld [vmem:[%s11750_s26 + $0xe84] ss:$8 sps:$4 sm:$0xff]  }
 0x352   : > { %8642 = vst.msk [vmem:[%s11953_s18 + $0x24c] sm:$0xf] %vm8494_vm3, %v10514_v5  ;;  %8898 = vst.msk [vmem:[%s11953_s18 + $0x64c] sm:$0xf] %vm8494_vm3, %v10770_v8  ;;  %v4480_v12 = vadd.f32 %v13117_v23, %v4479_v9  ;;  %v5504_v13 = vadd.f32 %v13117_v23, %v5503_v10  ;;  %v4481_v11 = vpop.f32.mrb[41].mxu0  ;;  %v5505_v14 = vpop.f32.mrb[41].mxu1 }
 0x353   : > { %v4482_v18 = vpop.f32.mrb[42].mxu0  ;;  %v5506_v19 = vpop.f32.mrb[42].mxu1 }
 0x354   : > { %v6082_v21 = vmax.f32 %v4480_v12, 0.0  ;;  %v6338_v22 = vmax.f32 %v5504_v13, 0.0  ;;  %v4483_v24 = vadd.f32 %v13117_v23, %v4482_v18  ;;  %v5507_v25 = vadd.f32 %v13117_v23, %v5506_v19  ;;  %v4484_v26 = vpop.f32.mrb[43].mxu0  ;;  %v5508_v27 = vpop.f32.mrb[43].mxu1 }
 0x355   : > { %v11546_v26 = vld [vmem:[%s11750_s26 + $0xe80] ss:$8 sps:$4 sm:$0xff]  }
 0x356   : > { %v10515_v28 = vpack.c.bf16 %v6082_v21, %v6082_v21  ;;  %v10771_v29 = vpack.c.bf16 %v6338_v22, %v6338_v22  ;;  %v6083_v30 = vmax.f32 %v4483_v24, 0.0  ;;  %v6339_v31 = vmax.f32 %v5507_v25, 0.0  ;;  %4694 = vmatmul.mubr.bf16.gmra.mrb[148].mxu0 %v11525_v15  ;;  %5718 = vmatmul.mubr.bf16.gmra.mrb[148].mxu1 %v11528_v16  ;;  %v11543_v25 = vld [vmem:[%s11750_s26 + $0x680] ss:$8 sps:$4 sm:$0xff]  }
 0x357   : > { %9698 = vmatprep.mubr.msk.bf16.mxu0 %vm3077_vm0, %v11533_v17  ;;  %9826 = vmatprep.mubr.msk.bf16.mxu1 %vm3077_vm0, %v11536_v20 }
 0x358   : > { %8643 = vst.msk [vmem:[%s11953_s18 + $0x250] sm:$0xf] %vm8494_vm3, %v10515_v28  ;;  %8899 = vst.msk [vmem:[%s11953_s18 + $0x650] sm:$0xf] %vm8494_vm3, %v10771_v29  ;;  %v10516_v32 = vpack.c.bf16 %v6083_v30, %v6083_v30  ;;  %v10772_v33 = vpack.c.bf16 %v6339_v31, %v6339_v31  ;;  %v11551_v29 = vld [vmem:[%s11750_s26 + $0x694] ss:$8 sps:$4 sm:$0xff]  }
 0x359   : > { %v4487_v34 = vpop.f32.mrb[44].mxu0  ;;  %v5511_v35 = vpop.f32.mrb[44].mxu1  ;;  %v11554_v30 = vld [vmem:[%s11750_s26 + $0xe94] ss:$8 sps:$4 sm:$0xff]  }
 0x35a   : > { %8644 = vst.msk [vmem:[%s11953_s18 + $0x254] sm:$0xf] %vm8494_vm3, %v10516_v32  ;;  %8900 = vst.msk [vmem:[%s11953_s18 + $0x654] sm:$0xf] %vm8494_vm3, %v10772_v33  ;;  %v4488_v36 = vadd.f32 %v13117_v23, %v4487_v34  ;;  %v5512_v37 = vadd.f32 %v13117_v23, %v5511_v35  ;;  %v4489_v38 = vpop.f32.mrb[45].mxu0  ;;  %v5513_v39 = vpop.f32.mrb[45].mxu1 }
 0x35b   : > { %v4490_v42 = vpop.f32.mrb[46].mxu0  ;;  %v5514_v43 = vpop.f32.mrb[46].mxu1 }
 0x35c   : > { %v6084_v46 = vmax.f32 %v4488_v36, 0.0  ;;  %v6340_v47 = vmax.f32 %v5512_v37, 0.0  ;;  %v4491_v48 = vadd.f32 %v13117_v23, %v4490_v42  ;;  %v5515_v49 = vadd.f32 %v13117_v23, %v5514_v43  ;;  %v4492_v50 = vpop.f32.mrb[47].mxu0  ;;  %v5516_v51 = vpop.f32.mrb[47].mxu1 }
 0x35d   : > { %v11552_v50 = vld [vmem:[%s11750_s26 + $0xe90] ss:$8 sps:$4 sm:$0xff]  }
 0x35e   : > { %v10517_v52 = vpack.c.bf16 %v6084_v46, %v6084_v46  ;;  %v10773_v53 = vpack.c.bf16 %v6340_v47, %v6340_v47  ;;  %v6085_v54 = vmax.f32 %v4491_v48, 0.0  ;;  %v6341_v55 = vmax.f32 %v5515_v49, 0.0  ;;  %4702 = vmatmul.mubr.bf16.gmra.mrb[152].mxu0 %v11531_v40  ;;  %5726 = vmatmul.mubr.bf16.gmra.mrb[152].mxu1 %v11534_v41  ;;  %v11549_v49 = vld [vmem:[%s11750_s26 + $0x690] ss:$8 sps:$4 sm:$0xff]  }
 0x35f   : > { %9699 = vmatprep.mubr.msk.bf16.mxu0 %vm3077_vm0, %v11539_v44  ;;  %9827 = vmatprep.mubr.msk.bf16.mxu1 %vm3077_vm0, %v11542_v45 }
 0x360   : > { %8645 = vst.msk [vmem:[%s11953_s18 + $0x258] sm:$0xf] %vm8494_vm3, %v10517_v52  ;;  %8901 = vst.msk [vmem:[%s11953_s18 + $0x658] sm:$0xf] %vm8494_vm3, %v10773_v53  ;;  %v10518_v56 = vpack.c.bf16 %v6085_v54, %v6085_v54  ;;  %v10774_v57 = vpack.c.bf16 %v6341_v55, %v6341_v55  ;;  %v11557_v53 = vld [vmem:[%s11750_s26 + $0x6a4] ss:$8 sps:$4 sm:$0xff]  }
 0x361   : > { %v4495_v58 = vpop.f32.mrb[48].mxu0  ;;  %v5519_v59 = vpop.f32.mrb[48].mxu1  ;;  %v11560_v54 = vld [vmem:[%s11750_s26 + $0xea4] ss:$8 sps:$4 sm:$0xff]  }
 0x362   : > { %8646 = vst.msk [vmem:[%s11953_s18 + $0x25c] sm:$0xf] %vm8494_vm3, %v10518_v56  ;;  %8902 = vst.msk [vmem:[%s11953_s18 + $0x65c] sm:$0xf] %vm8494_vm3, %v10774_v57  ;;  %v4496_v60 = vadd.f32 %v13117_v23, %v4495_v58  ;;  %v5520_v62 = vadd.f32 %v13117_v23, %v5519_v59  ;;  %v4497_v63 = vpop.f32.mrb[49].mxu0  ;;  %v5521_v0 = vpop.f32.mrb[49].mxu1 }
 0x363   : > { %v4498_v2 = vpop.f32.mrb[50].mxu0  ;;  %v5522_v3 = vpop.f32.mrb[50].mxu1 }
 0x364   : > { %v6086_v7 = vmax.f32 %v4496_v60, 0.0  ;;  %v6342_v5 = vmax.f32 %v5520_v62, 0.0  ;;  %v4499_v8 = vadd.f32 %v13117_v23, %v4498_v2  ;;  %v5523_v9 = vadd.f32 %v13117_v23, %v5522_v3  ;;  %v4500_v10 = vpop.f32.mrb[51].mxu0  ;;  %v5524_v12 = vpop.f32.mrb[51].mxu1 }
 0x365   : > { %v11558_v10 = vld [vmem:[%s11750_s26 + $0xea0] ss:$8 sps:$4 sm:$0xff]  }
 0x366   : > { %v10519_v13 = vpack.c.bf16 %v6086_v7, %v6086_v7  ;;  %v10775_v11 = vpack.c.bf16 %v6342_v5, %v6342_v5  ;;  %v6087_v14 = vmax.f32 %v4499_v8, 0.0  ;;  %v6343_v15 = vmax.f32 %v5523_v9, 0.0  ;;  %4710 = vmatmul.mubr.bf16.gmra.mrb[156].mxu0 %v11537_v1  ;;  %5734 = vmatmul.mubr.bf16.gmra.mrb[156].mxu1 %v11540_v61  ;;  %v11555_v9 = vld [vmem:[%s11750_s26 + $0x6a0] ss:$8 sps:$4 sm:$0xff]  }
 0x367   : > { %9700 = vmatprep.mubr.msk.bf16.mxu0 %vm3077_vm0, %v11545_v4  ;;  %9828 = vmatprep.mubr.msk.bf16.mxu1 %vm3077_vm0, %v11548_v6 }
 0x368   : > { %8647 = vst.msk [vmem:[%s11953_s18 + $0x260] sm:$0xf] %vm8494_vm3, %v10519_v13  ;;  %8903 = vst.msk [vmem:[%s11953_s18 + $0x660] sm:$0xf] %vm8494_vm3, %v10775_v11  ;;  %v10520_v16 = vpack.c.bf16 %v6087_v14, %v6087_v14  ;;  %v10776_v18 = vpack.c.bf16 %v6343_v15, %v6343_v15  ;;  %v11563_v11 = vld [vmem:[%s11750_s26 + $0x6b4] ss:$8 sps:$4 sm:$0xff]  }
 0x369   : > { %v4503_v19 = vpop.f32.mrb[52].mxu0  ;;  %v5527_v17 = vpop.f32.mrb[52].mxu1  ;;  %v11566_v14 = vld [vmem:[%s11750_s26 + $0xeb4] ss:$8 sps:$4 sm:$0xff]  }
 0x36a   : > { %8648 = vst.msk [vmem:[%s11953_s18 + $0x264] sm:$0xf] %vm8494_vm3, %v10520_v16  ;;  %8904 = vst.msk [vmem:[%s11953_s18 + $0x664] sm:$0xf] %vm8494_vm3, %v10776_v18  ;;  %v4504_v20 = vadd.f32 %v13117_v23, %v4503_v19  ;;  %v5528_v21 = vadd.f32 %v13117_v23, %v5527_v17  ;;  %v4505_v22 = vpop.f32.mrb[53].mxu0  ;;  %v5529_v24 = vpop.f32.mrb[53].mxu1 }
 0x36b   : > { %v4506_v27 = vpop.f32.mrb[54].mxu0  ;;  %v5530_v28 = vpop.f32.mrb[54].mxu1 }
 0x36c   : > { %v6088_v31 = vmax.f32 %v4504_v20, 0.0  ;;  %v6344_v32 = vmax.f32 %v5528_v21, 0.0  ;;  %v4507_v33 = vadd.f32 %v13117_v23, %v4506_v27  ;;  %v5531_v34 = vadd.f32 %v13117_v23, %v5530_v28  ;;  %v4508_v35 = vpop.f32.mrb[55].mxu0  ;;  %v5532_v36 = vpop.f32.mrb[55].mxu1 }
 0x36d   : > { %v11564_v35 = vld [vmem:[%s11750_s26 + $0xeb0] ss:$8 sps:$4 sm:$0xff]  }
 0x36e   : > { %v10521_v37 = vpack.c.bf16 %v6088_v31, %v6088_v31  ;;  %v10777_v38 = vpack.c.bf16 %v6344_v32, %v6344_v32  ;;  %v6089_v39 = vmax.f32 %v4507_v33, 0.0  ;;  %v6345_v40 = vmax.f32 %v5531_v34, 0.0  ;;  %4718 = vmatmul.mubr.bf16.gmra.mrb[160].mxu0 %v11543_v25  ;;  %5742 = vmatmul.mubr.bf16.gmra.mrb[160].mxu1 %v11546_v26  ;;  %v11561_v34 = vld [vmem:[%s11750_s26 + $0x6b0] ss:$8 sps:$4 sm:$0xff]  }
 0x36f   : > { %9701 = vmatprep.mubr.msk.bf16.mxu0 %vm3077_vm0, %v11551_v29  ;;  %9829 = vmatprep.mubr.msk.bf16.mxu1 %vm3077_vm0, %v11554_v30  ;;  %v13410_v29 = vld [vmem:[%s14125_s2] ss:$0 sm:$0xff] }
 0x370   : > { %8649 = vst.msk [vmem:[%s11953_s18 + $0x268] sm:$0xf] %vm8494_vm3, %v10521_v37  ;;  %8905 = vst.msk [vmem:[%s11953_s18 + $0x668] sm:$0xf] %vm8494_vm3, %v10777_v38  ;;  %v10522_v41 = vpack.c.bf16 %v6089_v39, %v6089_v39  ;;  %v10778_v42 = vpack.c.bf16 %v6345_v40, %v6345_v40  ;;  %v11569_v38 = vld [vmem:[%s11750_s26 + $0x6c4] ss:$8 sps:$4 sm:$0xff]  }
 0x371   : > { %v4511_v43 = vpop.f32.mrb[56].mxu0  ;;  %v5535_v44 = vpop.f32.mrb[56].mxu1  ;;  %v11572_v39 = vld [vmem:[%s11750_s26 + $0xec4] ss:$8 sps:$4 sm:$0xff]  }
 0x372   : > { %8650 = vst.msk [vmem:[%s11953_s18 + $0x26c] sm:$0xf] %vm8494_vm3, %v10522_v41  ;;  %8906 = vst.msk [vmem:[%s11953_s18 + $0x66c] sm:$0xf] %vm8494_vm3, %v10778_v42  ;;  %v4512_v45 = vadd.f32 %v13117_v23, %v4511_v43  ;;  %v5536_v46 = vadd.f32 %v13117_v23, %v5535_v44  ;;  %v4513_v47 = vpop.f32.mrb[57].mxu0  ;;  %v5537_v48 = vpop.f32.mrb[57].mxu1 }
 0x373   : > { %v4514_v51 = vpop.f32.mrb[58].mxu0  ;;  %v5538_v52 = vpop.f32.mrb[58].mxu1 }
 0x374   : > { %v6090_v55 = vmax.f32 %v4512_v45, 0.0  ;;  %v6346_v56 = vmax.f32 %v5536_v46, 0.0  ;;  %v4515_v57 = vadd.f32 %v13117_v23, %v4514_v51  ;;  %v5539_v58 = vadd.f32 %v13117_v23, %v5538_v52  ;;  %v4516_v59 = vpop.f32.mrb[59].mxu0  ;;  %v5540_v60 = vpop.f32.mrb[59].mxu1 }
 0x375   : > { %v11570_v59 = vld [vmem:[%s11750_s26 + $0xec0] ss:$8 sps:$4 sm:$0xff]  }
 0x376   : > { %v10523_v62 = vpack.c.bf16 %v6090_v55, %v6090_v55  ;;  %v10779_v63 = vpack.c.bf16 %v6346_v56, %v6346_v56  ;;  %v6091_v0 = vmax.f32 %v4515_v57, 0.0  ;;  %v6347_v1 = vmax.f32 %v5539_v58, 0.0  ;;  %4726 = vmatmul.mubr.bf16.gmra.mrb[164].mxu0 %v11549_v49  ;;  %5750 = vmatmul.mubr.bf16.gmra.mrb[164].mxu1 %v11552_v50  ;;  %v11567_v58 = vld [vmem:[%s11750_s26 + $0x6c0] ss:$8 sps:$4 sm:$0xff]  }
 0x377   : > { %9702 = vmatprep.mubr.msk.bf16.mxu0 %vm3077_vm0, %v11557_v53  ;;  %9830 = vmatprep.mubr.msk.bf16.mxu1 %vm3077_vm0, %v11560_v54 }
 0x378   : > { %8651 = vst.msk [vmem:[%s11953_s18 + $0x270] sm:$0xf] %vm8494_vm3, %v10523_v62  ;;  %8907 = vst.msk [vmem:[%s11953_s18 + $0x670] sm:$0xf] %vm8494_vm3, %v10779_v63  ;;  %v10524_v61 = vpack.c.bf16 %v6091_v0, %v6091_v0  ;;  %v10780_v2 = vpack.c.bf16 %v6347_v1, %v6347_v1  ;;  %v11575_v63 = vld [vmem:[%s11750_s26 + $0x6d4] ss:$8 sps:$4 sm:$0xff]  }
 0x379   : > { %v4519_v3 = vpop.f32.mrb[60].mxu0  ;;  %v5543_v4 = vpop.f32.mrb[60].mxu1  ;;  %v11578_v0 = vld [vmem:[%s11750_s26 + $0xed4] ss:$8 sps:$4 sm:$0xff]  }
 0x37a   : > { %8652 = vst.msk [vmem:[%s11953_s18 + $0x274] sm:$0xf] %vm8494_vm3, %v10524_v61  ;;  %8908 = vst.msk [vmem:[%s11953_s18 + $0x674] sm:$0xf] %vm8494_vm3, %v10780_v2  ;;  %v4520_v6 = vadd.f32 %v13117_v23, %v4519_v3  ;;  %v5544_v7 = vadd.f32 %v13117_v23, %v5543_v4  ;;  %v4521_v5 = vpop.f32.mrb[61].mxu0  ;;  %v5545_v8 = vpop.f32.mrb[61].mxu1 }
 0x37b   : > { %v4522_v12 = vpop.f32.mrb[62].mxu0  ;;  %v5546_v13 = vpop.f32.mrb[62].mxu1 }
 0x37c   : > { %v6092_v15 = vmax.f32 %v4520_v6, 0.0  ;;  %v6348_v16 = vmax.f32 %v5544_v7, 0.0  ;;  %v4523_v18 = vadd.f32 %v13117_v23, %v4522_v12  ;;  %v5547_v19 = vadd.f32 %v13117_v23, %v5546_v13  ;;  %v4524_v17 = vpop.f32.mrb[63].mxu0  ;;  %v5548_v20 = vpop.f32.mrb[63].mxu1 }
 0x37d   : > { %v11576_v17 = vld [vmem:[%s11750_s26 + $0xed0] ss:$8 sps:$4 sm:$0xff]  }
 0x37e   : > { %v10525_v21 = vpack.c.bf16 %v6092_v15, %v6092_v15  ;;  %v10781_v22 = vpack.c.bf16 %v6348_v16, %v6348_v16  ;;  %v6093_v24 = vmax.f32 %v4523_v18, 0.0  ;;  %v6349_v25 = vmax.f32 %v5547_v19, 0.0  ;;  %4734 = vmatmul.mubr.bf16.gmra.mrb[168].mxu0 %v11555_v9  ;;  %5758 = vmatmul.mubr.bf16.gmra.mrb[168].mxu1 %v11558_v10  ;;  %v11573_v19 = vld [vmem:[%s11750_s26 + $0x6d0] ss:$8 sps:$4 sm:$0xff]  }
 0x37f   : > { %9703 = vmatprep.mubr.msk.bf16.mxu0 %vm3077_vm0, %v11563_v11  ;;  %9831 = vmatprep.mubr.msk.bf16.mxu1 %vm3077_vm0, %v11566_v14 }
 0x380   : > { %8653 = vst.msk [vmem:[%s11953_s18 + $0x278] sm:$0xf] %vm8494_vm3, %v10525_v21  ;;  %8909 = vst.msk [vmem:[%s11953_s18 + $0x678] sm:$0xf] %vm8494_vm3, %v10781_v22  ;;  %v10526_v23 = vpack.c.bf16 %v6093_v24, %v6093_v24  ;;  %v10782_v26 = vpack.c.bf16 %v6349_v25, %v6349_v25  ;;  %v11581_v22 = vld [vmem:[%s11750_s26 + $0x6e4] ss:$8 sps:$4 sm:$0xff]  }
 0x381   : > { %v4527_v27 = vpop.f32.mrb[64].mxu0  ;;  %v5551_v28 = vpop.f32.mrb[64].mxu1  ;;  %v11584_v24 = vld [vmem:[%s11750_s26 + $0xee4] ss:$8 sps:$4 sm:$0xff]  }
 0x382   : > { %8654 = vst.msk [vmem:[%s11953_s18 + $0x27c] sm:$0xf] %vm8494_vm3, %v10526_v23  ;;  %8910 = vst.msk [vmem:[%s11953_s18 + $0x67c] sm:$0xf] %vm8494_vm3, %v10782_v26  ;;  %v4528_v30 = vadd.f32 %v13410_v29, %v4527_v27  ;;  %v5552_v31 = vadd.f32 %v13410_v29, %v5551_v28  ;;  %v4529_v32 = vpop.f32.mrb[65].mxu0  ;;  %v5553_v33 = vpop.f32.mrb[65].mxu1 }
 0x383   : > { %v4530_v36 = vpop.f32.mrb[66].mxu0  ;;  %v5554_v37 = vpop.f32.mrb[66].mxu1 }
 0x384   : > { %v6094_v40 = vmax.f32 %v4528_v30, 0.0  ;;  %v6350_v41 = vmax.f32 %v5552_v31, 0.0  ;;  %v4531_v42 = vadd.f32 %v13410_v29, %v4530_v36  ;;  %v5555_v43 = vadd.f32 %v13410_v29, %v5554_v37  ;;  %v4532_v44 = vpop.f32.mrb[67].mxu0  ;;  %v5556_v45 = vpop.f32.mrb[67].mxu1 }
 0x385   : > { %v11582_v44 = vld [vmem:[%s11750_s26 + $0xee0] ss:$8 sps:$4 sm:$0xff]  }
 0x386   : > { %v10527_v46 = vpack.c.bf16 %v6094_v40, %v6094_v40  ;;  %v10783_v47 = vpack.c.bf16 %v6350_v41, %v6350_v41  ;;  %v6095_v48 = vmax.f32 %v4531_v42, 0.0  ;;  %v6351_v49 = vmax.f32 %v5555_v43, 0.0  ;;  %4742 = vmatmul.mubr.bf16.gmra.mrb[172].mxu0 %v11561_v34  ;;  %5766 = vmatmul.mubr.bf16.gmra.mrb[172].mxu1 %v11564_v35  ;;  %v11579_v43 = vld [vmem:[%s11750_s26 + $0x6e0] ss:$8 sps:$4 sm:$0xff]  }
 0x387   : > { %9704 = vmatprep.mubr.msk.bf16.mxu0 %vm3077_vm0, %v11569_v38  ;;  %9832 = vmatprep.mubr.msk.bf16.mxu1 %vm3077_vm0, %v11572_v39 }
 0x388   : > { %8655 = vst.msk [vmem:[%s11953_s18 + $0x280] sm:$0xf] %vm8494_vm3, %v10527_v46  ;;  %8911 = vst.msk [vmem:[%s11953_s18 + $0x680] sm:$0xf] %vm8494_vm3, %v10783_v47  ;;  %v10528_v50 = vpack.c.bf16 %v6095_v48, %v6095_v48  ;;  %v10784_v51 = vpack.c.bf16 %v6351_v49, %v6351_v49  ;;  %v11587_v47 = vld [vmem:[%s11750_s26 + $0x6f4] ss:$8 sps:$4 sm:$0xff]  }
 0x389   : > { %v4535_v52 = vpop.f32.mrb[68].mxu0  ;;  %v5559_v53 = vpop.f32.mrb[68].mxu1  ;;  %v11590_v48 = vld [vmem:[%s11750_s26 + $0xef4] ss:$8 sps:$4 sm:$0xff]  }
 0x38a   : > { %8656 = vst.msk [vmem:[%s11953_s18 + $0x284] sm:$0xf] %vm8494_vm3, %v10528_v50  ;;  %8912 = vst.msk [vmem:[%s11953_s18 + $0x684] sm:$0xf] %vm8494_vm3, %v10784_v51  ;;  %v4536_v54 = vadd.f32 %v13410_v29, %v4535_v52  ;;  %v5560_v55 = vadd.f32 %v13410_v29, %v5559_v53  ;;  %v4537_v56 = vpop.f32.mrb[69].mxu0  ;;  %v5561_v57 = vpop.f32.mrb[69].mxu1 }
 0x38b   : > { %v4538_v60 = vpop.f32.mrb[70].mxu0  ;;  %v5562_v62 = vpop.f32.mrb[70].mxu1 }
 0x38c   : > { %v6096_v1 = vmax.f32 %v4536_v54, 0.0  ;;  %v6352_v61 = vmax.f32 %v5560_v55, 0.0  ;;  %v4539_v2 = vadd.f32 %v13410_v29, %v4538_v60  ;;  %v5563_v3 = vadd.f32 %v13410_v29, %v5562_v62  ;;  %v4540_v4 = vpop.f32.mrb[71].mxu0  ;;  %v5564_v6 = vpop.f32.mrb[71].mxu1 }
 0x38d   : > { %v11588_v4 = vld [vmem:[%s11750_s26 + $0xef0] ss:$8 sps:$4 sm:$0xff]  }
 0x38e   : > { %v10529_v7 = vpack.c.bf16 %v6096_v1, %v6096_v1  ;;  %v10785_v5 = vpack.c.bf16 %v6352_v61, %v6352_v61  ;;  %v6097_v8 = vmax.f32 %v4539_v2, 0.0  ;;  %v6353_v9 = vmax.f32 %v5563_v3, 0.0  ;;  %4750 = vmatmul.mubr.bf16.gmra.mrb[176].mxu0 %v11567_v58  ;;  %5774 = vmatmul.mubr.bf16.gmra.mrb[176].mxu1 %v11570_v59  ;;  %v11585_v3 = vld [vmem:[%s11750_s26 + $0x6f0] ss:$8 sps:$4 sm:$0xff]  }
 0x38f   : > { %9705 = vmatprep.mubr.msk.bf16.mxu0 %vm3077_vm0, %v11575_v63  ;;  %9833 = vmatprep.mubr.msk.bf16.mxu1 %vm3077_vm0, %v11578_v0 }
 0x390   : > { %8657 = vst.msk [vmem:[%s11953_s18 + $0x288] sm:$0xf] %vm8494_vm3, %v10529_v7  ;;  %8913 = vst.msk [vmem:[%s11953_s18 + $0x688] sm:$0xf] %vm8494_vm3, %v10785_v5  ;;  %v10530_v10 = vpack.c.bf16 %v6097_v8, %v6097_v8  ;;  %v10786_v12 = vpack.c.bf16 %v6353_v9, %v6353_v9  ;;  %v11593_v5 = vld [vmem:[%s11750_s26 + $0x704] ss:$8 sps:$4 sm:$0xff]  }
 0x391   : > { %v4543_v13 = vpop.f32.mrb[72].mxu0  ;;  %v5567_v11 = vpop.f32.mrb[72].mxu1  ;;  %v11596_v8 = vld [vmem:[%s11750_s26 + $0xf04] ss:$8 sps:$4 sm:$0xff]  }
 0x392   : > { %8658 = vst.msk [vmem:[%s11953_s18 + $0x28c] sm:$0xf] %vm8494_vm3, %v10530_v10  ;;  %8914 = vst.msk [vmem:[%s11953_s18 + $0x68c] sm:$0xf] %vm8494_vm3, %v10786_v12  ;;  %v4544_v14 = vadd.f32 %v13410_v29, %v4543_v13  ;;  %v5568_v15 = vadd.f32 %v13410_v29, %v5567_v11  ;;  %v4545_v16 = vpop.f32.mrb[73].mxu0  ;;  %v5569_v18 = vpop.f32.mrb[73].mxu1 }
 0x393   : > { %v4546_v20 = vpop.f32.mrb[74].mxu0  ;;  %v5570_v21 = vpop.f32.mrb[74].mxu1 }
 0x394   : > { %v6098_v25 = vmax.f32 %v4544_v14, 0.0  ;;  %v6354_v23 = vmax.f32 %v5568_v15, 0.0  ;;  %v4547_v26 = vadd.f32 %v13410_v29, %v4546_v20  ;;  %v5571_v27 = vadd.f32 %v13410_v29, %v5570_v21  ;;  %v4548_v28 = vpop.f32.mrb[75].mxu0  ;;  %v5572_v30 = vpop.f32.mrb[75].mxu1 }
 0x395   : > { %v11594_v28 = vld [vmem:[%s11750_s26 + $0xf00] ss:$8 sps:$4 sm:$0xff]  }
 0x396   : > { %v10531_v31 = vpack.c.bf16 %v6098_v25, %v6098_v25  ;;  %v10787_v32 = vpack.c.bf16 %v6354_v23, %v6354_v23  ;;  %v6099_v33 = vmax.f32 %v4547_v26, 0.0  ;;  %v6355_v34 = vmax.f32 %v5571_v27, 0.0  ;;  %4758 = vmatmul.mubr.bf16.gmra.mrb[180].mxu0 %v11573_v19  ;;  %5782 = vmatmul.mubr.bf16.gmra.mrb[180].mxu1 %v11576_v17  ;;  %v11591_v27 = vld [vmem:[%s11750_s26 + $0x700] ss:$8 sps:$4 sm:$0xff]  }
 0x397   : > { %9706 = vmatprep.mubr.msk.bf16.mxu0 %vm3077_vm0, %v11581_v22  ;;  %9834 = vmatprep.mubr.msk.bf16.mxu1 %vm3077_vm0, %v11584_v24 }
 0x398   : > { %8659 = vst.msk [vmem:[%s11953_s18 + $0x290] sm:$0xf] %vm8494_vm3, %v10531_v31  ;;  %8915 = vst.msk [vmem:[%s11953_s18 + $0x690] sm:$0xf] %vm8494_vm3, %v10787_v32  ;;  %v10532_v35 = vpack.c.bf16 %v6099_v33, %v6099_v33  ;;  %v10788_v36 = vpack.c.bf16 %v6355_v34, %v6355_v34  ;;  %v11599_v32 = vld [vmem:[%s11750_s26 + $0x714] ss:$8 sps:$4 sm:$0xff]  }
 0x399   : > { %v4551_v37 = vpop.f32.mrb[76].mxu0  ;;  %v5575_v38 = vpop.f32.mrb[76].mxu1  ;;  %v11602_v33 = vld [vmem:[%s11750_s26 + $0xf14] ss:$8 sps:$4 sm:$0xff]  }
 0x39a   : > { %8660 = vst.msk [vmem:[%s11953_s18 + $0x294] sm:$0xf] %vm8494_vm3, %v10532_v35  ;;  %8916 = vst.msk [vmem:[%s11953_s18 + $0x694] sm:$0xf] %vm8494_vm3, %v10788_v36  ;;  %v4552_v39 = vadd.f32 %v13410_v29, %v4551_v37  ;;  %v5576_v40 = vadd.f32 %v13410_v29, %v5575_v38  ;;  %v4553_v41 = vpop.f32.mrb[77].mxu0  ;;  %v5577_v42 = vpop.f32.mrb[77].mxu1 }
 0x39b   : > { %v4554_v45 = vpop.f32.mrb[78].mxu0  ;;  %v5578_v46 = vpop.f32.mrb[78].mxu1 }
 0x39c   : > { %v6100_v49 = vmax.f32 %v4552_v39, 0.0  ;;  %v6356_v50 = vmax.f32 %v5576_v40, 0.0  ;;  %v4555_v51 = vadd.f32 %v13410_v29, %v4554_v45  ;;  %v5579_v52 = vadd.f32 %v13410_v29, %v5578_v46  ;;  %v4556_v53 = vpop.f32.mrb[79].mxu0  ;;  %v5580_v54 = vpop.f32.mrb[79].mxu1 }
 0x39d   : > { %v11600_v53 = vld [vmem:[%s11750_s26 + $0xf10] ss:$8 sps:$4 sm:$0xff]  }
 0x39e   : > { %v10533_v55 = vpack.c.bf16 %v6100_v49, %v6100_v49  ;;  %v10789_v56 = vpack.c.bf16 %v6356_v50, %v6356_v50  ;;  %v6101_v57 = vmax.f32 %v4555_v51, 0.0  ;;  %v6357_v58 = vmax.f32 %v5579_v52, 0.0  ;;  %4766 = vmatmul.mubr.bf16.gmra.mrb[184].mxu0 %v11579_v43  ;;  %5790 = vmatmul.mubr.bf16.gmra.mrb[184].mxu1 %v11582_v44  ;;  %v11597_v52 = vld [vmem:[%s11750_s26 + $0x710] ss:$8 sps:$4 sm:$0xff]  }
 0x39f   : > { %9707 = vmatprep.mubr.msk.bf16.mxu0 %vm3077_vm0, %v11587_v47  ;;  %9835 = vmatprep.mubr.msk.bf16.mxu1 %vm3077_vm0, %v11590_v48 }
 0x3a0   : > { %8661 = vst.msk [vmem:[%s11953_s18 + $0x298] sm:$0xf] %vm8494_vm3, %v10533_v55  ;;  %8917 = vst.msk [vmem:[%s11953_s18 + $0x698] sm:$0xf] %vm8494_vm3, %v10789_v56  ;;  %v10534_v59 = vpack.c.bf16 %v6101_v57, %v6101_v57  ;;  %v10790_v60 = vpack.c.bf16 %v6357_v58, %v6357_v58  ;;  %v11605_v56 = vld [vmem:[%s11750_s26 + $0x724] ss:$8 sps:$4 sm:$0xff]  }
 0x3a1   : > { %v4559_v62 = vpop.f32.mrb[80].mxu0  ;;  %v5583_v63 = vpop.f32.mrb[80].mxu1  ;;  %v11608_v57 = vld [vmem:[%s11750_s26 + $0xf24] ss:$8 sps:$4 sm:$0xff]  }
 0x3a2   : > { %8662 = vst.msk [vmem:[%s11953_s18 + $0x29c] sm:$0xf] %vm8494_vm3, %v10534_v59  ;;  %8918 = vst.msk [vmem:[%s11953_s18 + $0x69c] sm:$0xf] %vm8494_vm3, %v10790_v60  ;;  %v4560_v0 = vadd.f32 %v13410_v29, %v4559_v62  ;;  %v5584_v1 = vadd.f32 %v13410_v29, %v5583_v63  ;;  %v4561_v61 = vpop.f32.mrb[81].mxu0  ;;  %v5585_v2 = vpop.f32.mrb[81].mxu1 }
 0x3a3   : > { %v4562_v6 = vpop.f32.mrb[82].mxu0  ;;  %v5586_v7 = vpop.f32.mrb[82].mxu1 }
 0x3a4   : > { %v6102_v9 = vmax.f32 %v4560_v0, 0.0  ;;  %v6358_v10 = vmax.f32 %v5584_v1, 0.0  ;;  %v4563_v12 = vadd.f32 %v13410_v29, %v4562_v6  ;;  %v5587_v13 = vadd.f32 %v13410_v29, %v5586_v7  ;;  %v4564_v11 = vpop.f32.mrb[83].mxu0  ;;  %v5588_v14 = vpop.f32.mrb[83].mxu1 }
 0x3a5   : > { %v11606_v11 = vld [vmem:[%s11750_s26 + $0xf20] ss:$8 sps:$4 sm:$0xff]  }
 0x3a6   : > { %v10535_v15 = vpack.c.bf16 %v6102_v9, %v6102_v9  ;;  %v10791_v16 = vpack.c.bf16 %v6358_v10, %v6358_v10  ;;  %v6103_v18 = vmax.f32 %v4563_v12, 0.0  ;;  %v6359_v19 = vmax.f32 %v5587_v13, 0.0  ;;  %4774 = vmatmul.mubr.bf16.gmra.mrb[188].mxu0 %v11585_v3  ;;  %5798 = vmatmul.mubr.bf16.gmra.mrb[188].mxu1 %v11588_v4  ;;  %v11603_v13 = vld [vmem:[%s11750_s26 + $0x720] ss:$8 sps:$4 sm:$0xff]  }
 0x3a7   : > { %9708 = vmatprep.mubr.msk.bf16.mxu0 %vm3077_vm0, %v11593_v5  ;;  %9836 = vmatprep.mubr.msk.bf16.mxu1 %vm3077_vm0, %v11596_v8 }
 0x3a8   : > { %8663 = vst.msk [vmem:[%s11953_s18 + $0x2a0] sm:$0xf] %vm8494_vm3, %v10535_v15  ;;  %8919 = vst.msk [vmem:[%s11953_s18 + $0x6a0] sm:$0xf] %vm8494_vm3, %v10791_v16  ;;  %v10536_v17 = vpack.c.bf16 %v6103_v18, %v6103_v18  ;;  %v10792_v20 = vpack.c.bf16 %v6359_v19, %v6359_v19  ;;  %v11611_v16 = vld [vmem:[%s11750_s26 + $0x734] ss:$8 sps:$4 sm:$0xff]  }
 0x3a9   : > { %v4567_v21 = vpop.f32.mrb[84].mxu0  ;;  %v5591_v22 = vpop.f32.mrb[84].mxu1  ;;  %v11614_v18 = vld [vmem:[%s11750_s26 + $0xf34] ss:$8 sps:$4 sm:$0xff]  }
 0x3aa   : > { %8664 = vst.msk [vmem:[%s11953_s18 + $0x2a4] sm:$0xf] %vm8494_vm3, %v10536_v17  ;;  %8920 = vst.msk [vmem:[%s11953_s18 + $0x6a4] sm:$0xf] %vm8494_vm3, %v10792_v20  ;;  %v4568_v24 = vadd.f32 %v13410_v29, %v4567_v21  ;;  %v5592_v25 = vadd.f32 %v13410_v29, %v5591_v22  ;;  %v4569_v23 = vpop.f32.mrb[85].mxu0  ;;  %v5593_v26 = vpop.f32.mrb[85].mxu1 }
 0x3ab   : > { %v4570_v30 = vpop.f32.mrb[86].mxu0  ;;  %v5594_v31 = vpop.f32.mrb[86].mxu1 }
 0x3ac   : > { %v6104_v34 = vmax.f32 %v4568_v24, 0.0  ;;  %v6360_v35 = vmax.f32 %v5592_v25, 0.0  ;;  %v4571_v36 = vadd.f32 %v13410_v29, %v4570_v30  ;;  %v5595_v37 = vadd.f32 %v13410_v29, %v5594_v31  ;;  %v4572_v38 = vpop.f32.mrb[87].mxu0  ;;  %v5596_v39 = vpop.f32.mrb[87].mxu1 }
 0x3ad   : > { %v11612_v38 = vld [vmem:[%s11750_s26 + $0xf30] ss:$8 sps:$4 sm:$0xff]  }
 0x3ae   : > { %v10537_v40 = vpack.c.bf16 %v6104_v34, %v6104_v34  ;;  %v10793_v41 = vpack.c.bf16 %v6360_v35, %v6360_v35  ;;  %v6105_v42 = vmax.f32 %v4571_v36, 0.0  ;;  %v6361_v43 = vmax.f32 %v5595_v37, 0.0  ;;  %4782 = vmatmul.mubr.bf16.gmra.mrb[192].mxu0 %v11591_v27  ;;  %5806 = vmatmul.mubr.bf16.gmra.mrb[192].mxu1 %v11594_v28  ;;  %v11609_v37 = vld [vmem:[%s11750_s26 + $0x730] ss:$8 sps:$4 sm:$0xff]  }
 0x3af   : > { %9709 = vmatprep.mubr.msk.bf16.mxu0 %vm3077_vm0, %v11599_v32  ;;  %9837 = vmatprep.mubr.msk.bf16.mxu1 %vm3077_vm0, %v11602_v33 }
 0x3b0   : > { %8665 = vst.msk [vmem:[%s11953_s18 + $0x2a8] sm:$0xf] %vm8494_vm3, %v10537_v40  ;;  %8921 = vst.msk [vmem:[%s11953_s18 + $0x6a8] sm:$0xf] %vm8494_vm3, %v10793_v41  ;;  %v10538_v44 = vpack.c.bf16 %v6105_v42, %v6105_v42  ;;  %v10794_v45 = vpack.c.bf16 %v6361_v43, %v6361_v43  ;;  %v11617_v41 = vld [vmem:[%s11750_s26 + $0x744] ss:$8 sps:$4 sm:$0xff]  }
 0x3b1   : > { %v4575_v46 = vpop.f32.mrb[88].mxu0  ;;  %v5599_v47 = vpop.f32.mrb[88].mxu1  ;;  %v11620_v42 = vld [vmem:[%s11750_s26 + $0xf44] ss:$8 sps:$4 sm:$0xff]  }
 0x3b2   : > { %8666 = vst.msk [vmem:[%s11953_s18 + $0x2ac] sm:$0xf] %vm8494_vm3, %v10538_v44  ;;  %8922 = vst.msk [vmem:[%s11953_s18 + $0x6ac] sm:$0xf] %vm8494_vm3, %v10794_v45  ;;  %v4576_v48 = vadd.f32 %v13410_v29, %v4575_v46  ;;  %v5600_v49 = vadd.f32 %v13410_v29, %v5599_v47  ;;  %v4577_v50 = vpop.f32.mrb[89].mxu0  ;;  %v5601_v51 = vpop.f32.mrb[89].mxu1 }
 0x3b3   : > { %v4578_v54 = vpop.f32.mrb[90].mxu0  ;;  %v5602_v55 = vpop.f32.mrb[90].mxu1 }
 0x3b4   : > { %v6106_v58 = vmax.f32 %v4576_v48, 0.0  ;;  %v6362_v59 = vmax.f32 %v5600_v49, 0.0  ;;  %v4579_v60 = vadd.f32 %v13410_v29, %v4578_v54  ;;  %v5603_v62 = vadd.f32 %v13410_v29, %v5602_v55  ;;  %v4580_v63 = vpop.f32.mrb[91].mxu0  ;;  %v5604_v0 = vpop.f32.mrb[91].mxu1 }
 0x3b5   : > { %v11618_v63 = vld [vmem:[%s11750_s26 + $0xf40] ss:$8 sps:$4 sm:$0xff]  }
 0x3b6   : > { %v10539_v1 = vpack.c.bf16 %v6106_v58, %v6106_v58  ;;  %v10795_v61 = vpack.c.bf16 %v6362_v59, %v6362_v59  ;;  %v6107_v2 = vmax.f32 %v4579_v60, 0.0  ;;  %v6363_v3 = vmax.f32 %v5603_v62, 0.0  ;;  %4790 = vmatmul.mubr.bf16.gmra.mrb[196].mxu0 %v11597_v52  ;;  %5814 = vmatmul.mubr.bf16.gmra.mrb[196].mxu1 %v11600_v53  ;;  %v11615_v62 = vld [vmem:[%s11750_s26 + $0x740] ss:$8 sps:$4 sm:$0xff]  }
 0x3b7   : > { %9710 = vmatprep.mubr.msk.bf16.mxu0 %vm3077_vm0, %v11605_v56  ;;  %9838 = vmatprep.mubr.msk.bf16.mxu1 %vm3077_vm0, %v11608_v57 }
 0x3b8   : > { %8667 = vst.msk [vmem:[%s11953_s18 + $0x2b0] sm:$0xf] %vm8494_vm3, %v10539_v1  ;;  %8923 = vst.msk [vmem:[%s11953_s18 + $0x6b0] sm:$0xf] %vm8494_vm3, %v10795_v61  ;;  %v10540_v4 = vpack.c.bf16 %v6107_v2, %v6107_v2  ;;  %v10796_v6 = vpack.c.bf16 %v6363_v3, %v6363_v3  ;;  %v11623_v61 = vld [vmem:[%s11750_s26 + $0x754] ss:$8 sps:$4 sm:$0xff]  }
 0x3b9   : > { %v4583_v7 = vpop.f32.mrb[92].mxu0  ;;  %v5607_v5 = vpop.f32.mrb[92].mxu1  ;;  %v11626_v2 = vld [vmem:[%s11750_s26 + $0xf54] ss:$8 sps:$4 sm:$0xff]  }
 0x3ba   : > { %8668 = vst.msk [vmem:[%s11953_s18 + $0x2b4] sm:$0xf] %vm8494_vm3, %v10540_v4  ;;  %8924 = vst.msk [vmem:[%s11953_s18 + $0x6b4] sm:$0xf] %vm8494_vm3, %v10796_v6  ;;  %v4584_v8 = vadd.f32 %v13410_v29, %v4583_v7  ;;  %v5608_v9 = vadd.f32 %v13410_v29, %v5607_v5  ;;  %v4585_v10 = vpop.f32.mrb[93].mxu0  ;;  %v5609_v12 = vpop.f32.mrb[93].mxu1 }
 0x3bb   : > { %v4586_v14 = vpop.f32.mrb[94].mxu0  ;;  %v5610_v15 = vpop.f32.mrb[94].mxu1 }
 0x3bc   : > { %v6108_v19 = vmax.f32 %v4584_v8, 0.0  ;;  %v6364_v17 = vmax.f32 %v5608_v9, 0.0  ;;  %v4587_v20 = vadd.f32 %v13410_v29, %v4586_v14  ;;  %v5611_v21 = vadd.f32 %v13410_v29, %v5610_v15  ;;  %v4588_v22 = vpop.f32.mrb[95].mxu0  ;;  %v5612_v24 = vpop.f32.mrb[95].mxu1 }
 0x3bd   : > { %v11624_v22 = vld [vmem:[%s11750_s26 + $0xf50] ss:$8 sps:$4 sm:$0xff]  }
 0x3be   : > { %v10541_v25 = vpack.c.bf16 %v6108_v19, %v6108_v19  ;;  %v10797_v23 = vpack.c.bf16 %v6364_v17, %v6364_v17  ;;  %v6109_v26 = vmax.f32 %v4587_v20, 0.0  ;;  %v6365_v27 = vmax.f32 %v5611_v21, 0.0  ;;  %4798 = vmatmul.mubr.bf16.gmra.mrb[200].mxu0 %v11603_v13  ;;  %5822 = vmatmul.mubr.bf16.gmra.mrb[200].mxu1 %v11606_v11  ;;  %v11621_v21 = vld [vmem:[%s11750_s26 + $0x750] ss:$8 sps:$4 sm:$0xff]  }
 0x3bf   : > { %9711 = vmatprep.mubr.msk.bf16.mxu0 %vm3077_vm0, %v11611_v16  ;;  %9839 = vmatprep.mubr.msk.bf16.mxu1 %vm3077_vm0, %v11614_v18 }
 0x3c0   : > { %8669 = vst.msk [vmem:[%s11953_s18 + $0x2b8] sm:$0xf] %vm8494_vm3, %v10541_v25  ;;  %8925 = vst.msk [vmem:[%s11953_s18 + $0x6b8] sm:$0xf] %vm8494_vm3, %v10797_v23  ;;  %v10542_v28 = vpack.c.bf16 %v6109_v26, %v6109_v26  ;;  %v10798_v30 = vpack.c.bf16 %v6365_v27, %v6365_v27  ;;  %v11629_v23 = vld [vmem:[%s11750_s26 + $0x764] ss:$8 sps:$4 sm:$0xff]  }
 0x3c1   : > { %v4591_v31 = vpop.f32.mrb[96].mxu0  ;;  %v5615_v32 = vpop.f32.mrb[96].mxu1  ;;  %v11632_v26 = vld [vmem:[%s11750_s26 + $0xf64] ss:$8 sps:$4 sm:$0xff]  }
 0x3c2   : > { %8670 = vst.msk [vmem:[%s11953_s18 + $0x2bc] sm:$0xf] %vm8494_vm3, %v10542_v28  ;;  %8926 = vst.msk [vmem:[%s11953_s18 + $0x6bc] sm:$0xf] %vm8494_vm3, %v10798_v30  ;;  %v4592_v33 = vadd.f32 %v13410_v29, %v4591_v31  ;;  %v5616_v34 = vadd.f32 %v13410_v29, %v5615_v32  ;;  %v4593_v35 = vpop.f32.mrb[97].mxu0  ;;  %v5617_v36 = vpop.f32.mrb[97].mxu1 }
 0x3c3   : > { %v4594_v39 = vpop.f32.mrb[98].mxu0  ;;  %v5618_v40 = vpop.f32.mrb[98].mxu1 }
 0x3c4   : > { %v6110_v43 = vmax.f32 %v4592_v33, 0.0  ;;  %v6366_v44 = vmax.f32 %v5616_v34, 0.0  ;;  %v4595_v45 = vadd.f32 %v13410_v29, %v4594_v39  ;;  %v5619_v46 = vadd.f32 %v13410_v29, %v5618_v40  ;;  %v4596_v47 = vpop.f32.mrb[99].mxu0  ;;  %v5620_v48 = vpop.f32.mrb[99].mxu1 }
 0x3c5   : > { %v11630_v47 = vld [vmem:[%s11750_s26 + $0xf60] ss:$8 sps:$4 sm:$0xff]  }
 0x3c6   : > { %v10543_v49 = vpack.c.bf16 %v6110_v43, %v6110_v43  ;;  %v10799_v50 = vpack.c.bf16 %v6366_v44, %v6366_v44  ;;  %v6111_v51 = vmax.f32 %v4595_v45, 0.0  ;;  %v6367_v52 = vmax.f32 %v5619_v46, 0.0  ;;  %4806 = vmatmul.mubr.bf16.gmra.mrb[204].mxu0 %v11609_v37  ;;  %5830 = vmatmul.mubr.bf16.gmra.mrb[204].mxu1 %v11612_v38  ;;  %v11627_v46 = vld [vmem:[%s11750_s26 + $0x760] ss:$8 sps:$4 sm:$0xff]  }
 0x3c7   : > { %9712 = vmatprep.mubr.msk.bf16.mxu0 %vm3077_vm0, %v11617_v41  ;;  %9840 = vmatprep.mubr.msk.bf16.mxu1 %vm3077_vm0, %v11620_v42 }
 0x3c8   : > { %8671 = vst.msk [vmem:[%s11953_s18 + $0x2c0] sm:$0xf] %vm8494_vm3, %v10543_v49  ;;  %8927 = vst.msk [vmem:[%s11953_s18 + $0x6c0] sm:$0xf] %vm8494_vm3, %v10799_v50  ;;  %v10544_v53 = vpack.c.bf16 %v6111_v51, %v6111_v51  ;;  %v10800_v54 = vpack.c.bf16 %v6367_v52, %v6367_v52  ;;  %v11635_v50 = vld [vmem:[%s11750_s26 + $0x774] ss:$8 sps:$4 sm:$0xff]  }
 0x3c9   : > { %v4599_v55 = vpop.f32.mrb[100].mxu0  ;;  %v5623_v56 = vpop.f32.mrb[100].mxu1  ;;  %v11638_v51 = vld [vmem:[%s11750_s26 + $0xf74] ss:$8 sps:$4 sm:$0xff]  }
 0x3ca   : > { %8672 = vst.msk [vmem:[%s11953_s18 + $0x2c4] sm:$0xf] %vm8494_vm3, %v10544_v53  ;;  %8928 = vst.msk [vmem:[%s11953_s18 + $0x6c4] sm:$0xf] %vm8494_vm3, %v10800_v54  ;;  %v4600_v57 = vadd.f32 %v13410_v29, %v4599_v55  ;;  %v5624_v58 = vadd.f32 %v13410_v29, %v5623_v56  ;;  %v4601_v59 = vpop.f32.mrb[101].mxu0  ;;  %v5625_v60 = vpop.f32.mrb[101].mxu1 }
 0x3cb   : > { %v4602_v0 = vpop.f32.mrb[102].mxu0  ;;  %v5626_v1 = vpop.f32.mrb[102].mxu1 }
 0x3cc   : > { %v6112_v3 = vmax.f32 %v4600_v57, 0.0  ;;  %v6368_v4 = vmax.f32 %v5624_v58, 0.0  ;;  %v4603_v6 = vadd.f32 %v13410_v29, %v4602_v0  ;;  %v5627_v7 = vadd.f32 %v13410_v29, %v5626_v1  ;;  %v4604_v5 = vpop.f32.mrb[103].mxu0  ;;  %v5628_v8 = vpop.f32.mrb[103].mxu1 }
 0x3cd   : > { %v11636_v5 = vld [vmem:[%s11750_s26 + $0xf70] ss:$8 sps:$4 sm:$0xff]  }
 0x3ce   : > { %v10545_v9 = vpack.c.bf16 %v6112_v3, %v6112_v3  ;;  %v10801_v10 = vpack.c.bf16 %v6368_v4, %v6368_v4  ;;  %v6113_v12 = vmax.f32 %v4603_v6, 0.0  ;;  %v6369_v13 = vmax.f32 %v5627_v7, 0.0  ;;  %4814 = vmatmul.mubr.bf16.gmra.mrb[208].mxu0 %v11615_v62  ;;  %5838 = vmatmul.mubr.bf16.gmra.mrb[208].mxu1 %v11618_v63  ;;  %v11633_v7 = vld [vmem:[%s11750_s26 + $0x770] ss:$8 sps:$4 sm:$0xff]  }
 0x3cf   : > { %9713 = vmatprep.mubr.msk.bf16.mxu0 %vm3077_vm0, %v11623_v61  ;;  %9841 = vmatprep.mubr.msk.bf16.mxu1 %vm3077_vm0, %v11626_v2 }
 0x3d0   : > { %8673 = vst.msk [vmem:[%s11953_s18 + $0x2c8] sm:$0xf] %vm8494_vm3, %v10545_v9  ;;  %8929 = vst.msk [vmem:[%s11953_s18 + $0x6c8] sm:$0xf] %vm8494_vm3, %v10801_v10  ;;  %v10546_v11 = vpack.c.bf16 %v6113_v12, %v6113_v12  ;;  %v10802_v14 = vpack.c.bf16 %v6369_v13, %v6369_v13  ;;  %v11641_v10 = vld [vmem:[%s11750_s26 + $0x784] ss:$8 sps:$4 sm:$0xff]  }
 0x3d1   : > { %v4607_v15 = vpop.f32.mrb[104].mxu0  ;;  %v5631_v16 = vpop.f32.mrb[104].mxu1  ;;  %v11644_v12 = vld [vmem:[%s11750_s26 + $0xf84] ss:$8 sps:$4 sm:$0xff]  }
 0x3d2   : > { %8674 = vst.msk [vmem:[%s11953_s18 + $0x2cc] sm:$0xf] %vm8494_vm3, %v10546_v11  ;;  %8930 = vst.msk [vmem:[%s11953_s18 + $0x6cc] sm:$0xf] %vm8494_vm3, %v10802_v14  ;;  %v4608_v18 = vadd.f32 %v13410_v29, %v4607_v15  ;;  %v5632_v19 = vadd.f32 %v13410_v29, %v5631_v16  ;;  %v4609_v17 = vpop.f32.mrb[105].mxu0  ;;  %v5633_v20 = vpop.f32.mrb[105].mxu1 }
 0x3d3   : > { %v4610_v24 = vpop.f32.mrb[106].mxu0  ;;  %v5634_v25 = vpop.f32.mrb[106].mxu1 }
 0x3d4   : > { %v6114_v27 = vmax.f32 %v4608_v18, 0.0  ;;  %v6370_v28 = vmax.f32 %v5632_v19, 0.0  ;;  %v4611_v30 = vadd.f32 %v13410_v29, %v4610_v24  ;;  %v5635_v31 = vadd.f32 %v13410_v29, %v5634_v25  ;;  %v4612_v32 = vpop.f32.mrb[107].mxu0  ;;  %v5636_v33 = vpop.f32.mrb[107].mxu1 }
 0x3d5   : > { %v11642_v32 = vld [vmem:[%s11750_s26 + $0xf80] ss:$8 sps:$4 sm:$0xff]  }
 0x3d6   : > { %v10547_v34 = vpack.c.bf16 %v6114_v27, %v6114_v27  ;;  %v10803_v35 = vpack.c.bf16 %v6370_v28, %v6370_v28  ;;  %v6115_v36 = vmax.f32 %v4611_v30, 0.0  ;;  %v6371_v37 = vmax.f32 %v5635_v31, 0.0  ;;  %4822 = vmatmul.mubr.bf16.gmra.mrb[212].mxu0 %v11621_v21  ;;  %5846 = vmatmul.mubr.bf16.gmra.mrb[212].mxu1 %v11624_v22  ;;  %v11639_v31 = vld [vmem:[%s11750_s26 + $0x780] ss:$8 sps:$4 sm:$0xff]  }
 0x3d7   : > { %9714 = vmatprep.mubr.msk.bf16.mxu0 %vm3077_vm0, %v11629_v23  ;;  %9842 = vmatprep.mubr.msk.bf16.mxu1 %vm3077_vm0, %v11632_v26 }
 0x3d8   : > { %8675 = vst.msk [vmem:[%s11953_s18 + $0x2d0] sm:$0xf] %vm8494_vm3, %v10547_v34  ;;  %8931 = vst.msk [vmem:[%s11953_s18 + $0x6d0] sm:$0xf] %vm8494_vm3, %v10803_v35  ;;  %v10548_v38 = vpack.c.bf16 %v6115_v36, %v6115_v36  ;;  %v10804_v39 = vpack.c.bf16 %v6371_v37, %v6371_v37  ;;  %v11647_v35 = vld [vmem:[%s11750_s26 + $0x794] ss:$8 sps:$4 sm:$0xff]  }
 0x3d9   : > { %v4615_v40 = vpop.f32.mrb[108].mxu0  ;;  %v5639_v41 = vpop.f32.mrb[108].mxu1  ;;  %v11650_v36 = vld [vmem:[%s11750_s26 + $0xf94] ss:$8 sps:$4 sm:$0xff]  }
 0x3da   : > { %8676 = vst.msk [vmem:[%s11953_s18 + $0x2d4] sm:$0xf] %vm8494_vm3, %v10548_v38  ;;  %8932 = vst.msk [vmem:[%s11953_s18 + $0x6d4] sm:$0xf] %vm8494_vm3, %v10804_v39  ;;  %v4616_v42 = vadd.f32 %v13410_v29, %v4615_v40  ;;  %v5640_v43 = vadd.f32 %v13410_v29, %v5639_v41  ;;  %v4617_v44 = vpop.f32.mrb[109].mxu0  ;;  %v5641_v45 = vpop.f32.mrb[109].mxu1 }
 0x3db   : > { %v4618_v48 = vpop.f32.mrb[110].mxu0  ;;  %v5642_v49 = vpop.f32.mrb[110].mxu1 }
 0x3dc   : > { %v6116_v52 = vmax.f32 %v4616_v42, 0.0  ;;  %v6372_v53 = vmax.f32 %v5640_v43, 0.0  ;;  %v4619_v54 = vadd.f32 %v13410_v29, %v4618_v48  ;;  %v5643_v55 = vadd.f32 %v13410_v29, %v5642_v49  ;;  %v4620_v56 = vpop.f32.mrb[111].mxu0  ;;  %v5644_v57 = vpop.f32.mrb[111].mxu1 }
 0x3dd   : > { %v11648_v56 = vld [vmem:[%s11750_s26 + $0xf90] ss:$8 sps:$4 sm:$0xff]  }
 0x3de   : > { %v10549_v58 = vpack.c.bf16 %v6116_v52, %v6116_v52  ;;  %v10805_v59 = vpack.c.bf16 %v6372_v53, %v6372_v53  ;;  %v6117_v60 = vmax.f32 %v4619_v54, 0.0  ;;  %v6373_v62 = vmax.f32 %v5643_v55, 0.0  ;;  %4830 = vmatmul.mubr.bf16.gmra.mrb[216].mxu0 %v11627_v46  ;;  %5854 = vmatmul.mubr.bf16.gmra.mrb[216].mxu1 %v11630_v47  ;;  %v11645_v55 = vld [vmem:[%s11750_s26 + $0x790] ss:$8 sps:$4 sm:$0xff]  }
 0x3df   : > { %9715 = vmatprep.mubr.msk.bf16.mxu0 %vm3077_vm0, %v11635_v50  ;;  %9843 = vmatprep.mubr.msk.bf16.mxu1 %vm3077_vm0, %v11638_v51 }
 0x3e0   : > { %8677 = vst.msk [vmem:[%s11953_s18 + $0x2d8] sm:$0xf] %vm8494_vm3, %v10549_v58  ;;  %8933 = vst.msk [vmem:[%s11953_s18 + $0x6d8] sm:$0xf] %vm8494_vm3, %v10805_v59  ;;  %v10550_v63 = vpack.c.bf16 %v6117_v60, %v6117_v60  ;;  %v10806_v0 = vpack.c.bf16 %v6373_v62, %v6373_v62  ;;  %v11653_v59 = vld [vmem:[%s11750_s26 + $0x7a4] ss:$8 sps:$4 sm:$0xff]  }
 0x3e1   : > { %v4623_v1 = vpop.f32.mrb[112].mxu0  ;;  %v5647_v61 = vpop.f32.mrb[112].mxu1  ;;  %v11656_v60 = vld [vmem:[%s11750_s26 + $0xfa4] ss:$8 sps:$4 sm:$0xff]  }
 0x3e2   : > { %8678 = vst.msk [vmem:[%s11953_s18 + $0x2dc] sm:$0xf] %vm8494_vm3, %v10550_v63  ;;  %8934 = vst.msk [vmem:[%s11953_s18 + $0x6dc] sm:$0xf] %vm8494_vm3, %v10806_v0  ;;  %v4624_v2 = vadd.f32 %v13410_v29, %v4623_v1  ;;  %v5648_v3 = vadd.f32 %v13410_v29, %v5647_v61  ;;  %v4625_v4 = vpop.f32.mrb[113].mxu0  ;;  %v5649_v6 = vpop.f32.mrb[113].mxu1 }
 0x3e3   : > { %v4626_v8 = vpop.f32.mrb[114].mxu0  ;;  %v5650_v9 = vpop.f32.mrb[114].mxu1 }
 0x3e4   : > { %v6118_v13 = vmax.f32 %v4624_v2, 0.0  ;;  %v6374_v11 = vmax.f32 %v5648_v3, 0.0  ;;  %v4627_v14 = vadd.f32 %v13410_v29, %v4626_v8  ;;  %v5651_v15 = vadd.f32 %v13410_v29, %v5650_v9  ;;  %v4628_v16 = vpop.f32.mrb[115].mxu0  ;;  %v5652_v18 = vpop.f32.mrb[115].mxu1 }
 0x3e5   : > { %v11654_v16 = vld [vmem:[%s11750_s26 + $0xfa0] ss:$8 sps:$4 sm:$0xff]  }
 0x3e6   : > { %v10551_v19 = vpack.c.bf16 %v6118_v13, %v6118_v13  ;;  %v10807_v17 = vpack.c.bf16 %v6374_v11, %v6374_v11  ;;  %v6119_v20 = vmax.f32 %v4627_v14, 0.0  ;;  %v6375_v21 = vmax.f32 %v5651_v15, 0.0  ;;  %4838 = vmatmul.mubr.bf16.gmra.mrb[220].mxu0 %v11633_v7  ;;  %5862 = vmatmul.mubr.bf16.gmra.mrb[220].mxu1 %v11636_v5  ;;  %v11651_v15 = vld [vmem:[%s11750_s26 + $0x7a0] ss:$8 sps:$4 sm:$0xff]  }
 0x3e7   : > { %9716 = vmatprep.mubr.msk.bf16.mxu0 %vm3077_vm0, %v11641_v10  ;;  %9844 = vmatprep.mubr.msk.bf16.mxu1 %vm3077_vm0, %v11644_v12 }
 0x3e8   : > { %8679 = vst.msk [vmem:[%s11953_s18 + $0x2e0] sm:$0xf] %vm8494_vm3, %v10551_v19  ;;  %8935 = vst.msk [vmem:[%s11953_s18 + $0x6e0] sm:$0xf] %vm8494_vm3, %v10807_v17  ;;  %v10552_v22 = vpack.c.bf16 %v6119_v20, %v6119_v20  ;;  %v10808_v24 = vpack.c.bf16 %v6375_v21, %v6375_v21  ;;  %v11659_v17 = vld [vmem:[%s11750_s26 + $0x7b4] ss:$8 sps:$4 sm:$0xff]  }
 0x3e9   : > { %v4631_v25 = vpop.f32.mrb[116].mxu0  ;;  %v5655_v23 = vpop.f32.mrb[116].mxu1  ;;  %v11662_v20 = vld [vmem:[%s11750_s26 + $0xfb4] ss:$8 sps:$4 sm:$0xff]  }
 0x3ea   : > { %8680 = vst.msk [vmem:[%s11953_s18 + $0x2e4] sm:$0xf] %vm8494_vm3, %v10552_v22  ;;  %8936 = vst.msk [vmem:[%s11953_s18 + $0x6e4] sm:$0xf] %vm8494_vm3, %v10808_v24  ;;  %v4632_v26 = vadd.f32 %v13410_v29, %v4631_v25  ;;  %v5656_v27 = vadd.f32 %v13410_v29, %v5655_v23  ;;  %v4633_v28 = vpop.f32.mrb[117].mxu0  ;;  %v5657_v30 = vpop.f32.mrb[117].mxu1 }
 0x3eb   : > { %v4634_v33 = vpop.f32.mrb[118].mxu0  ;;  %v5658_v34 = vpop.f32.mrb[118].mxu1 }
 0x3ec   : > { %v6120_v37 = vmax.f32 %v4632_v26, 0.0  ;;  %v6376_v38 = vmax.f32 %v5656_v27, 0.0  ;;  %v4635_v39 = vadd.f32 %v13410_v29, %v4634_v33  ;;  %v5659_v40 = vadd.f32 %v13410_v29, %v5658_v34  ;;  %v4636_v41 = vpop.f32.mrb[119].mxu0  ;;  %v5660_v42 = vpop.f32.mrb[119].mxu1 }
 0x3ed   : > { %v11660_v41 = vld [vmem:[%s11750_s26 + $0xfb0] ss:$8 sps:$4 sm:$0xff]  }
 0x3ee   : > { %v10553_v43 = vpack.c.bf16 %v6120_v37, %v6120_v37  ;;  %v10809_v44 = vpack.c.bf16 %v6376_v38, %v6376_v38  ;;  %v6121_v45 = vmax.f32 %v4635_v39, 0.0  ;;  %v6377_v46 = vmax.f32 %v5659_v40, 0.0  ;;  %4846 = vmatmul.mubr.bf16.gmra.mrb[224].mxu0 %v11639_v31  ;;  %5870 = vmatmul.mubr.bf16.gmra.mrb[224].mxu1 %v11642_v32  ;;  %v11657_v40 = vld [vmem:[%s11750_s26 + $0x7b0] ss:$8 sps:$4 sm:$0xff]  }
 0x3ef   : > { %9717 = vmatprep.mubr.msk.bf16.mxu0 %vm3077_vm0, %v11647_v35  ;;  %9845 = vmatprep.mubr.msk.bf16.mxu1 %vm3077_vm0, %v11650_v36  ;;  %v13703_v35 = vld [vmem:[%s14125_s2] ss:$0 sm:$0xff] }
 0x3f0   : > { %8681 = vst.msk [vmem:[%s11953_s18 + $0x2e8] sm:$0xf] %vm8494_vm3, %v10553_v43  ;;  %8937 = vst.msk [vmem:[%s11953_s18 + $0x6e8] sm:$0xf] %vm8494_vm3, %v10809_v44  ;;  %v10554_v47 = vpack.c.bf16 %v6121_v45, %v6121_v45  ;;  %v10810_v48 = vpack.c.bf16 %v6377_v46, %v6377_v46  ;;  %v11665_v44 = vld [vmem:[%s11750_s26 + $0x7c4] ss:$8 sps:$4 sm:$0xff]  }
 0x3f1   : > { %v4639_v49 = vpop.f32.mrb[120].mxu0  ;;  %v5663_v50 = vpop.f32.mrb[120].mxu1  ;;  %v11668_v45 = vld [vmem:[%s11750_s26 + $0xfc4] ss:$8 sps:$4 sm:$0xff]  }
 0x3f2   : > { %8682 = vst.msk [vmem:[%s11953_s18 + $0x2ec] sm:$0xf] %vm8494_vm3, %v10554_v47  ;;  %8938 = vst.msk [vmem:[%s11953_s18 + $0x6ec] sm:$0xf] %vm8494_vm3, %v10810_v48  ;;  %v4640_v51 = vadd.f32 %v13410_v29, %v4639_v49  ;;  %v5664_v52 = vadd.f32 %v13410_v29, %v5663_v50  ;;  %v4641_v53 = vpop.f32.mrb[121].mxu0  ;;  %v5665_v54 = vpop.f32.mrb[121].mxu1 }
 0x3f3   : > { %v4642_v57 = vpop.f32.mrb[122].mxu0  ;;  %v5666_v58 = vpop.f32.mrb[122].mxu1 }
 0x3f4   : > { %v6122_v62 = vmax.f32 %v4640_v51, 0.0  ;;  %v6378_v63 = vmax.f32 %v5664_v52, 0.0  ;;  %v4643_v0 = vadd.f32 %v13410_v29, %v4642_v57  ;;  %v5667_v1 = vadd.f32 %v13410_v29, %v5666_v58  ;;  %v4644_v61 = vpop.f32.mrb[123].mxu0  ;;  %v5668_v2 = vpop.f32.mrb[123].mxu1 }
 0x3f5   : > { %v11666_v61 = vld [vmem:[%s11750_s26 + $0xfc0] ss:$8 sps:$4 sm:$0xff]  }
 0x3f6   : > { %v10555_v3 = vpack.c.bf16 %v6122_v62, %v6122_v62  ;;  %v10811_v4 = vpack.c.bf16 %v6378_v63, %v6378_v63  ;;  %v6123_v6 = vmax.f32 %v4643_v0, 0.0  ;;  %v6379_v7 = vmax.f32 %v5667_v1, 0.0  ;;  %4854 = vmatmul.mubr.bf16.gmra.mrb[228].mxu0 %v11645_v55  ;;  %5878 = vmatmul.mubr.bf16.gmra.mrb[228].mxu1 %v11648_v56  ;;  %v11663_v1 = vld [vmem:[%s11750_s26 + $0x7c0] ss:$8 sps:$4 sm:$0xff]  }
 0x3f7   : > { %9718 = vmatprep.mubr.msk.bf16.mxu0 %vm3077_vm0, %v11653_v59  ;;  %9846 = vmatprep.mubr.msk.bf16.mxu1 %vm3077_vm0, %v11656_v60 }
 0x3f8   : > { %8683 = vst.msk [vmem:[%s11953_s18 + $0x2f0] sm:$0xf] %vm8494_vm3, %v10555_v3  ;;  %8939 = vst.msk [vmem:[%s11953_s18 + $0x6f0] sm:$0xf] %vm8494_vm3, %v10811_v4  ;;  %v10556_v5 = vpack.c.bf16 %v6123_v6, %v6123_v6  ;;  %v10812_v8 = vpack.c.bf16 %v6379_v7, %v6379_v7  ;;  %v11671_v4 = vld [vmem:[%s11750_s26 + $0x7d4] ss:$8 sps:$4 sm:$0xff]  }
 0x3f9   : > { %v4647_v9 = vpop.f32.mrb[124].mxu0  ;;  %v5671_v10 = vpop.f32.mrb[124].mxu1  ;;  %v11674_v6 = vld [vmem:[%s11750_s26 + $0xfd4] ss:$8 sps:$4 sm:$0xff]  }
 0x3fa   : > { %8684 = vst.msk [vmem:[%s11953_s18 + $0x2f4] sm:$0xf] %vm8494_vm3, %v10556_v5  ;;  %8940 = vst.msk [vmem:[%s11953_s18 + $0x6f4] sm:$0xf] %vm8494_vm3, %v10812_v8  ;;  %v4648_v12 = vadd.f32 %v13410_v29, %v4647_v9  ;;  %v5672_v13 = vadd.f32 %v13410_v29, %v5671_v10  ;;  %v4649_v11 = vpop.f32.mrb[125].mxu0  ;;  %v5673_v14 = vpop.f32.mrb[125].mxu1 }
 0x3fb   : > { %v4650_v18 = vpop.f32.mrb[126].mxu0  ;;  %v5674_v19 = vpop.f32.mrb[126].mxu1 }
 0x3fc   : > { %v6124_v21 = vmax.f32 %v4648_v12, 0.0  ;;  %v6380_v22 = vmax.f32 %v5672_v13, 0.0  ;;  %v4651_v24 = vadd.f32 %v13410_v29, %v4650_v18  ;;  %v5675_v25 = vadd.f32 %v13410_v29, %v5674_v19  ;;  %v4652_v23 = vpop.f32.mrb[127].mxu0  ;;  %v5676_v26 = vpop.f32.mrb[127].mxu1 }
 0x3fd   : > { %v11672_v23 = vld [vmem:[%s11750_s26 + $0xfd0] ss:$8 sps:$4 sm:$0xff]  }
 0x3fe   : > { %v10557_v27 = vpack.c.bf16 %v6124_v21, %v6124_v21  ;;  %v10813_v28 = vpack.c.bf16 %v6380_v22, %v6380_v22  ;;  %v6125_v30 = vmax.f32 %v4651_v24, 0.0  ;;  %v6381_v31 = vmax.f32 %v5675_v25, 0.0  ;;  %4862 = vmatmul.mubr.bf16.gmra.mrb[232].mxu0 %v11651_v15  ;;  %5886 = vmatmul.mubr.bf16.gmra.mrb[232].mxu1 %v11654_v16  ;;  %v11669_v25 = vld [vmem:[%s11750_s26 + $0x7d0] ss:$8 sps:$4 sm:$0xff]  }
 0x3ff   : > { %9719 = vmatprep.mubr.msk.bf16.mxu0 %vm3077_vm0, %v11659_v17  ;;  %9847 = vmatprep.mubr.msk.bf16.mxu1 %vm3077_vm0, %v11662_v20 }
 0x400   : > { %8685 = vst.msk [vmem:[%s11953_s18 + $0x2f8] sm:$0xf] %vm8494_vm3, %v10557_v27  ;;  %8941 = vst.msk [vmem:[%s11953_s18 + $0x6f8] sm:$0xf] %vm8494_vm3, %v10813_v28  ;;  %v10558_v29 = vpack.c.bf16 %v6125_v30, %v6125_v30  ;;  %v10814_v32 = vpack.c.bf16 %v6381_v31, %v6381_v31  ;;  %v11677_v28 = vld [vmem:[%s11750_s26 + $0x7e4] ss:$8 sps:$4 sm:$0xff]  }
 0x401   : > { %v4655_v33 = vpop.f32.mrb[128].mxu0  ;;  %v5679_v34 = vpop.f32.mrb[128].mxu1  ;;  %v11680_v30 = vld [vmem:[%s11750_s26 + $0xfe4] ss:$8 sps:$4 sm:$0xff]  }
 0x402   : > { %8686 = vst.msk [vmem:[%s11953_s18 + $0x2fc] sm:$0xf] %vm8494_vm3, %v10558_v29  ;;  %8942 = vst.msk [vmem:[%s11953_s18 + $0x6fc] sm:$0xf] %vm8494_vm3, %v10814_v32  ;;  %v4656_v36 = vadd.f32 %v13703_v35, %v4655_v33  ;;  %v5680_v37 = vadd.f32 %v13703_v35, %v5679_v34  ;;  %v4657_v38 = vpop.f32.mrb[129].mxu0  ;;  %v5681_v39 = vpop.f32.mrb[129].mxu1 }
 0x403   : > { %v4658_v42 = vpop.f32.mrb[130].mxu0  ;;  %v5682_v43 = vpop.f32.mrb[130].mxu1 }
 0x404   : > { %v6126_v46 = vmax.f32 %v4656_v36, 0.0  ;;  %v6382_v47 = vmax.f32 %v5680_v37, 0.0  ;;  %v4659_v48 = vadd.f32 %v13703_v35, %v4658_v42  ;;  %v5683_v49 = vadd.f32 %v13703_v35, %v5682_v43  ;;  %v4660_v50 = vpop.f32.mrb[131].mxu0  ;;  %v5684_v51 = vpop.f32.mrb[131].mxu1 }
 0x405   : > { %v11678_v50 = vld [vmem:[%s11750_s26 + $0xfe0] ss:$8 sps:$4 sm:$0xff]  }
 0x406   : > { %v10559_v52 = vpack.c.bf16 %v6126_v46, %v6126_v46  ;;  %v10815_v53 = vpack.c.bf16 %v6382_v47, %v6382_v47  ;;  %v6127_v54 = vmax.f32 %v4659_v48, 0.0  ;;  %v6383_v55 = vmax.f32 %v5683_v49, 0.0  ;;  %4870 = vmatmul.mubr.bf16.gmra.mrb[236].mxu0 %v11657_v40  ;;  %5894 = vmatmul.mubr.bf16.gmra.mrb[236].mxu1 %v11660_v41  ;;  %v11675_v49 = vld [vmem:[%s11750_s26 + $0x7e0] ss:$8 sps:$4 sm:$0xff]  }
 0x407   : > { %9720 = vmatprep.mubr.msk.bf16.mxu0 %vm3077_vm0, %v11665_v44  ;;  %9848 = vmatprep.mubr.msk.bf16.mxu1 %vm3077_vm0, %v11668_v45 }
 0x408   : > { %8687 = vst.msk [vmem:[%s11953_s18 + $0x300] sm:$0xf] %vm8494_vm3, %v10559_v52  ;;  %8943 = vst.msk [vmem:[%s11953_s18 + $0x700] sm:$0xf] %vm8494_vm3, %v10815_v53  ;;  %v10560_v56 = vpack.c.bf16 %v6127_v54, %v6127_v54  ;;  %v10816_v57 = vpack.c.bf16 %v6383_v55, %v6383_v55  ;;  %v11683_v53 = vld [vmem:[%s11750_s26 + $0x7f4] ss:$8 sps:$4 sm:$0xff]  }
 0x409   : > { %v4663_v58 = vpop.f32.mrb[132].mxu0  ;;  %v5687_v59 = vpop.f32.mrb[132].mxu1  ;;  %v11686_v54 = vld [vmem:[%s11750_s26 + $0xff4] ss:$8 sps:$4 sm:$0xff]  }
 0x40a   : > { %8688 = vst.msk [vmem:[%s11953_s18 + $0x304] sm:$0xf] %vm8494_vm3, %v10560_v56  ;;  %8944 = vst.msk [vmem:[%s11953_s18 + $0x704] sm:$0xf] %vm8494_vm3, %v10816_v57  ;;  %v4664_v60 = vadd.f32 %v13703_v35, %v4663_v58  ;;  %v5688_v62 = vadd.f32 %v13703_v35, %v5687_v59  ;;  %v4665_v63 = vpop.f32.mrb[133].mxu0  ;;  %v5689_v0 = vpop.f32.mrb[133].mxu1 }
 0x40b   : > { %v4666_v2 = vpop.f32.mrb[134].mxu0  ;;  %v5690_v3 = vpop.f32.mrb[134].mxu1 }
 0x40c   : > { %v6128_v7 = vmax.f32 %v4664_v60, 0.0  ;;  %v6384_v5 = vmax.f32 %v5688_v62, 0.0  ;;  %v4667_v8 = vadd.f32 %v13703_v35, %v4666_v2  ;;  %v5691_v9 = vadd.f32 %v13703_v35, %v5690_v3  ;;  %v4668_v10 = vpop.f32.mrb[135].mxu0  ;;  %v5692_v12 = vpop.f32.mrb[135].mxu1 }
 0x40d   : > { %v11684_v10 = vld [vmem:[%s11750_s26 + $0xff0] ss:$8 sps:$4 sm:$0xff]  }
 0x40e   : > { %v10561_v13 = vpack.c.bf16 %v6128_v7, %v6128_v7  ;;  %v10817_v11 = vpack.c.bf16 %v6384_v5, %v6384_v5  ;;  %v6129_v14 = vmax.f32 %v4667_v8, 0.0  ;;  %v6385_v15 = vmax.f32 %v5691_v9, 0.0  ;;  %4878 = vmatmul.mubr.bf16.gmra.mrb[240].mxu0 %v11663_v1  ;;  %5902 = vmatmul.mubr.bf16.gmra.mrb[240].mxu1 %v11666_v61  ;;  %v11681_v9 = vld [vmem:[%s11750_s26 + $0x7f0] ss:$8 sps:$4 sm:$0xff]  }
 0x40f   : > { %9721 = vmatprep.mubr.msk.bf16.mxu0 %vm3077_vm0, %v11671_v4  ;;  %9849 = vmatprep.mubr.msk.bf16.mxu1 %vm3077_vm0, %v11674_v6 }
 0x410   : > { %8689 = vst.msk [vmem:[%s11953_s18 + $0x308] sm:$0xf] %vm8494_vm3, %v10561_v13  ;;  %8945 = vst.msk [vmem:[%s11953_s18 + $0x708] sm:$0xf] %vm8494_vm3, %v10817_v11  ;;  %v10562_v16 = vpack.c.bf16 %v6129_v14, %v6129_v14  ;;  %v10818_v18 = vpack.c.bf16 %v6385_v15, %v6385_v15 }
 0x411   : > { %v4671_v19 = vpop.f32.mrb[136].mxu0  ;;  %v5695_v17 = vpop.f32.mrb[136].mxu1 }
 0x412   : > { %8690 = vst.msk [vmem:[%s11953_s18 + $0x30c] sm:$0xf] %vm8494_vm3, %v10562_v16  ;;  %8946 = vst.msk [vmem:[%s11953_s18 + $0x70c] sm:$0xf] %vm8494_vm3, %v10818_v18  ;;  %v4672_v20 = vadd.f32 %v13703_v35, %v4671_v19  ;;  %v5696_v21 = vadd.f32 %v13703_v35, %v5695_v17  ;;  %v4673_v22 = vpop.f32.mrb[137].mxu0  ;;  %v5697_v24 = vpop.f32.mrb[137].mxu1 }
 0x413   : > { %v4674_v26 = vpop.f32.mrb[138].mxu0  ;;  %v5698_v27 = vpop.f32.mrb[138].mxu1 }
 0x414   : > { %v6130_v31 = vmax.f32 %v4672_v20, 0.0  ;;  %v6386_v29 = vmax.f32 %v5696_v21, 0.0  ;;  %v4675_v32 = vadd.f32 %v13703_v35, %v4674_v26  ;;  %v5699_v33 = vadd.f32 %v13703_v35, %v5698_v27  ;;  %v4676_v34 = vpop.f32.mrb[139].mxu0  ;;  %v5700_v36 = vpop.f32.mrb[139].mxu1 }
 0x416   : > { %v10563_v37 = vpack.c.bf16 %v6130_v31, %v6130_v31  ;;  %v10819_v38 = vpack.c.bf16 %v6386_v29, %v6386_v29  ;;  %v6131_v39 = vmax.f32 %v4675_v32, 0.0  ;;  %v6387_v40 = vmax.f32 %v5699_v33, 0.0  ;;  %4886 = vmatmul.mubr.bf16.gmra.mrb[244].mxu0 %v11669_v25  ;;  %5910 = vmatmul.mubr.bf16.gmra.mrb[244].mxu1 %v11672_v23 }
 0x417   : > { %9722 = vmatprep.mubr.msk.bf16.mxu0 %vm3077_vm0, %v11677_v28  ;;  %9850 = vmatprep.mubr.msk.bf16.mxu1 %vm3077_vm0, %v11680_v30 }
 0x418   : > { %8691 = vst.msk [vmem:[%s11953_s18 + $0x310] sm:$0xf] %vm8494_vm3, %v10563_v37  ;;  %8947 = vst.msk [vmem:[%s11953_s18 + $0x710] sm:$0xf] %vm8494_vm3, %v10819_v38  ;;  %v10564_v41 = vpack.c.bf16 %v6131_v39, %v6131_v39  ;;  %v10820_v42 = vpack.c.bf16 %v6387_v40, %v6387_v40 }
 0x419   : > { %v4679_v43 = vpop.f32.mrb[140].mxu0  ;;  %v5703_v44 = vpop.f32.mrb[140].mxu1 }
 0x41a   : > { %8692 = vst.msk [vmem:[%s11953_s18 + $0x314] sm:$0xf] %vm8494_vm3, %v10564_v41  ;;  %8948 = vst.msk [vmem:[%s11953_s18 + $0x714] sm:$0xf] %vm8494_vm3, %v10820_v42  ;;  %v4680_v45 = vadd.f32 %v13703_v35, %v4679_v43  ;;  %v5704_v46 = vadd.f32 %v13703_v35, %v5703_v44  ;;  %v4681_v47 = vpop.f32.mrb[141].mxu0  ;;  %v5705_v48 = vpop.f32.mrb[141].mxu1 }
 0x41b   : > { %v4682_v51 = vpop.f32.mrb[142].mxu0  ;;  %v5706_v52 = vpop.f32.mrb[142].mxu1 }
 0x41c   : > { %v6132_v55 = vmax.f32 %v4680_v45, 0.0  ;;  %v6388_v56 = vmax.f32 %v5704_v46, 0.0  ;;  %v4683_v57 = vadd.f32 %v13703_v35, %v4682_v51  ;;  %v5707_v58 = vadd.f32 %v13703_v35, %v5706_v52  ;;  %v4684_v59 = vpop.f32.mrb[143].mxu0  ;;  %v5708_v60 = vpop.f32.mrb[143].mxu1 }
 0x41e   : > { %v10565_v62 = vpack.c.bf16 %v6132_v55, %v6132_v55  ;;  %v10821_v63 = vpack.c.bf16 %v6388_v56, %v6388_v56  ;;  %v6133_v0 = vmax.f32 %v4683_v57, 0.0  ;;  %v6389_v1 = vmax.f32 %v5707_v58, 0.0  ;;  %4894 = vmatmul.mubr.bf16.gmra.mrb[248].mxu0 %v11675_v49  ;;  %5918 = vmatmul.mubr.bf16.gmra.mrb[248].mxu1 %v11678_v50 }
 0x41f   : > { %9723 = vmatprep.mubr.msk.bf16.mxu0 %vm3077_vm0, %v11683_v53  ;;  %9851 = vmatprep.mubr.msk.bf16.mxu1 %vm3077_vm0, %v11686_v54 }
 0x420   : > { %8693 = vst.msk [vmem:[%s11953_s18 + $0x318] sm:$0xf] %vm8494_vm3, %v10565_v62  ;;  %8949 = vst.msk [vmem:[%s11953_s18 + $0x718] sm:$0xf] %vm8494_vm3, %v10821_v63  ;;  %v10566_v61 = vpack.c.bf16 %v6133_v0, %v6133_v0  ;;  %v10822_v2 = vpack.c.bf16 %v6389_v1, %v6389_v1 }
 0x421   : > { %v4687_v3 = vpop.f32.mrb[144].mxu0  ;;  %v5711_v4 = vpop.f32.mrb[144].mxu1 }
 0x422   : > { %8694 = vst.msk [vmem:[%s11953_s18 + $0x31c] sm:$0xf] %vm8494_vm3, %v10566_v61  ;;  %8950 = vst.msk [vmem:[%s11953_s18 + $0x71c] sm:$0xf] %vm8494_vm3, %v10822_v2  ;;  %v4688_v6 = vadd.f32 %v13703_v35, %v4687_v3  ;;  %v5712_v7 = vadd.f32 %v13703_v35, %v5711_v4  ;;  %v4689_v5 = vpop.f32.mrb[145].mxu0  ;;  %v5713_v8 = vpop.f32.mrb[145].mxu1 }
 0x423   : > { %v4690_v12 = vpop.f32.mrb[146].mxu0  ;;  %v5714_v13 = vpop.f32.mrb[146].mxu1 }
 0x424   : > { %v6134_v11 = vmax.f32 %v4688_v6, 0.0  ;;  %v6390_v14 = vmax.f32 %v5712_v7, 0.0  ;;  %v4691_v15 = vadd.f32 %v13703_v35, %v4690_v12  ;;  %v5715_v16 = vadd.f32 %v13703_v35, %v5714_v13  ;;  %v4692_v18 = vpop.f32.mrb[147].mxu0  ;;  %v5716_v19 = vpop.f32.mrb[147].mxu1 }
 0x426   : > { %v10567_v17 = vpack.c.bf16 %v6134_v11, %v6134_v11  ;;  %v10823_v20 = vpack.c.bf16 %v6390_v14, %v6390_v14  ;;  %v6135_v21 = vmax.f32 %v4691_v15, 0.0  ;;  %v6391_v22 = vmax.f32 %v5715_v16, 0.0  ;;  %4902 = vmatmul.mubr.bf16.gmra.mrb[252].mxu0 %v11681_v9  ;;  %5926 = vmatmul.mubr.bf16.gmra.mrb[252].mxu1 %v11684_v10 }
 0x428   : > { %8695 = vst.msk [vmem:[%s11953_s18 + $0x320] sm:$0xf] %vm8494_vm3, %v10567_v17  ;;  %8951 = vst.msk [vmem:[%s11953_s18 + $0x720] sm:$0xf] %vm8494_vm3, %v10823_v20  ;;  %v10568_v24 = vpack.c.bf16 %v6135_v21, %v6135_v21  ;;  %v10824_v25 = vpack.c.bf16 %v6391_v22, %v6391_v22 }
 0x429   : > { %v4695_v23 = vpop.f32.mrb[148].mxu0  ;;  %v5719_v26 = vpop.f32.mrb[148].mxu1 }
 0x42a   : > { %8696 = vst.msk [vmem:[%s11953_s18 + $0x324] sm:$0xf] %vm8494_vm3, %v10568_v24  ;;  %8952 = vst.msk [vmem:[%s11953_s18 + $0x724] sm:$0xf] %vm8494_vm3, %v10824_v25  ;;  %v4696_v27 = vadd.f32 %v13703_v35, %v4695_v23  ;;  %v5720_v28 = vadd.f32 %v13703_v35, %v5719_v26  ;;  %v4697_v30 = vpop.f32.mrb[149].mxu0  ;;  %v5721_v31 = vpop.f32.mrb[149].mxu1 }
 0x42b   : > { %v4698_v29 = vpop.f32.mrb[150].mxu0  ;;  %v5722_v32 = vpop.f32.mrb[150].mxu1 }
 0x42c   : > { %v6136_v33 = vmax.f32 %v4696_v27, 0.0  ;;  %v6392_v34 = vmax.f32 %v5720_v28, 0.0  ;;  %v4699_v36 = vadd.f32 %v13703_v35, %v4698_v29  ;;  %v5723_v37 = vadd.f32 %v13703_v35, %v5722_v32  ;;  %v4700_v38 = vpop.f32.mrb[151].mxu0  ;;  %v5724_v39 = vpop.f32.mrb[151].mxu1 }
 0x42e   : > { %v10569_v40 = vpack.c.bf16 %v6136_v33, %v6136_v33  ;;  %v10825_v41 = vpack.c.bf16 %v6392_v34, %v6392_v34  ;;  %v6137_v42 = vmax.f32 %v4699_v36, 0.0  ;;  %v6393_v43 = vmax.f32 %v5723_v37, 0.0 }
 0x430   : > { %8697 = vst.msk [vmem:[%s11953_s18 + $0x328] sm:$0xf] %vm8494_vm3, %v10569_v40  ;;  %8953 = vst.msk [vmem:[%s11953_s18 + $0x728] sm:$0xf] %vm8494_vm3, %v10825_v41  ;;  %v10570_v44 = vpack.c.bf16 %v6137_v42, %v6137_v42  ;;  %v10826_v45 = vpack.c.bf16 %v6393_v43, %v6393_v43 }
 0x431   : > { %v4703_v46 = vpop.f32.mrb[152].mxu0  ;;  %v5727_v47 = vpop.f32.mrb[152].mxu1 }
 0x432   : > { %8698 = vst.msk [vmem:[%s11953_s18 + $0x32c] sm:$0xf] %vm8494_vm3, %v10570_v44  ;;  %8954 = vst.msk [vmem:[%s11953_s18 + $0x72c] sm:$0xf] %vm8494_vm3, %v10826_v45  ;;  %v4704_v48 = vadd.f32 %v13703_v35, %v4703_v46  ;;  %v5728_v49 = vadd.f32 %v13703_v35, %v5727_v47  ;;  %v4705_v50 = vpop.f32.mrb[153].mxu0  ;;  %v5729_v51 = vpop.f32.mrb[153].mxu1 }
 0x433   : > { %v4706_v52 = vpop.f32.mrb[154].mxu0  ;;  %v5730_v53 = vpop.f32.mrb[154].mxu1 }
 0x434   : > { %v6138_v54 = vmax.f32 %v4704_v48, 0.0  ;;  %v6394_v55 = vmax.f32 %v5728_v49, 0.0  ;;  %v4707_v56 = vadd.f32 %v13703_v35, %v4706_v52  ;;  %v5731_v57 = vadd.f32 %v13703_v35, %v5730_v53  ;;  %v4708_v58 = vpop.f32.mrb[155].mxu0  ;;  %v5732_v59 = vpop.f32.mrb[155].mxu1 }
 0x436   : > { %v10571_v60 = vpack.c.bf16 %v6138_v54, %v6138_v54  ;;  %v10827_v62 = vpack.c.bf16 %v6394_v55, %v6394_v55  ;;  %v6139_v63 = vmax.f32 %v4707_v56, 0.0  ;;  %v6395_v0 = vmax.f32 %v5731_v57, 0.0 }
 0x438   : > { %8699 = vst.msk [vmem:[%s11953_s18 + $0x330] sm:$0xf] %vm8494_vm3, %v10571_v60  ;;  %8955 = vst.msk [vmem:[%s11953_s18 + $0x730] sm:$0xf] %vm8494_vm3, %v10827_v62  ;;  %v10572_v1 = vpack.c.bf16 %v6139_v63, %v6139_v63  ;;  %v10828_v61 = vpack.c.bf16 %v6395_v0, %v6395_v0 }
 0x439   : > { %v4711_v2 = vpop.f32.mrb[156].mxu0  ;;  %v5735_v3 = vpop.f32.mrb[156].mxu1 }
 0x43a   : > { %8700 = vst.msk [vmem:[%s11953_s18 + $0x334] sm:$0xf] %vm8494_vm3, %v10572_v1  ;;  %8956 = vst.msk [vmem:[%s11953_s18 + $0x734] sm:$0xf] %vm8494_vm3, %v10828_v61  ;;  %v4712_v4 = vadd.f32 %v13703_v35, %v4711_v2  ;;  %v5736_v6 = vadd.f32 %v13703_v35, %v5735_v3  ;;  %v4713_v7 = vpop.f32.mrb[157].mxu0  ;;  %v5737_v5 = vpop.f32.mrb[157].mxu1 }
 0x43b   : > { %v4714_v8 = vpop.f32.mrb[158].mxu0  ;;  %v5738_v9 = vpop.f32.mrb[158].mxu1 }
 0x43c   : > { %v6140_v10 = vmax.f32 %v4712_v4, 0.0  ;;  %v6396_v12 = vmax.f32 %v5736_v6, 0.0  ;;  %v4715_v13 = vadd.f32 %v13703_v35, %v4714_v8  ;;  %v5739_v11 = vadd.f32 %v13703_v35, %v5738_v9  ;;  %v4716_v14 = vpop.f32.mrb[159].mxu0  ;;  %v5740_v15 = vpop.f32.mrb[159].mxu1 }
 0x43e   : > { %v10573_v16 = vpack.c.bf16 %v6140_v10, %v6140_v10  ;;  %v10829_v18 = vpack.c.bf16 %v6396_v12, %v6396_v12  ;;  %v6141_v19 = vmax.f32 %v4715_v13, 0.0  ;;  %v6397_v17 = vmax.f32 %v5739_v11, 0.0 }
 0x440   : > { %8701 = vst.msk [vmem:[%s11953_s18 + $0x338] sm:$0xf] %vm8494_vm3, %v10573_v16  ;;  %8957 = vst.msk [vmem:[%s11953_s18 + $0x738] sm:$0xf] %vm8494_vm3, %v10829_v18  ;;  %v10574_v20 = vpack.c.bf16 %v6141_v19, %v6141_v19  ;;  %v10830_v21 = vpack.c.bf16 %v6397_v17, %v6397_v17 }
 0x441   : > { %v4719_v22 = vpop.f32.mrb[160].mxu0  ;;  %v5743_v24 = vpop.f32.mrb[160].mxu1 }
 0x442   : > { %8702 = vst.msk [vmem:[%s11953_s18 + $0x33c] sm:$0xf] %vm8494_vm3, %v10574_v20  ;;  %8958 = vst.msk [vmem:[%s11953_s18 + $0x73c] sm:$0xf] %vm8494_vm3, %v10830_v21  ;;  %v4720_v25 = vadd.f32 %v13703_v35, %v4719_v22  ;;  %v5744_v23 = vadd.f32 %v13703_v35, %v5743_v24  ;;  %v4721_v26 = vpop.f32.mrb[161].mxu0  ;;  %v5745_v27 = vpop.f32.mrb[161].mxu1 }
 0x443   : > { %v4722_v28 = vpop.f32.mrb[162].mxu0  ;;  %v5746_v30 = vpop.f32.mrb[162].mxu1 }
 0x444   : > { %v6142_v31 = vmax.f32 %v4720_v25, 0.0  ;;  %v6398_v29 = vmax.f32 %v5744_v23, 0.0  ;;  %v4723_v32 = vadd.f32 %v13703_v35, %v4722_v28  ;;  %v5747_v33 = vadd.f32 %v13703_v35, %v5746_v30  ;;  %v4724_v34 = vpop.f32.mrb[163].mxu0  ;;  %v5748_v36 = vpop.f32.mrb[163].mxu1 }
 0x446   : > { %v10575_v37 = vpack.c.bf16 %v6142_v31, %v6142_v31  ;;  %v10831_v38 = vpack.c.bf16 %v6398_v29, %v6398_v29  ;;  %v6143_v39 = vmax.f32 %v4723_v32, 0.0  ;;  %v6399_v40 = vmax.f32 %v5747_v33, 0.0 }
 0x448   : > { %8703 = vst.msk [vmem:[%s11953_s18 + $0x340] sm:$0xf] %vm8494_vm3, %v10575_v37  ;;  %8959 = vst.msk [vmem:[%s11953_s18 + $0x740] sm:$0xf] %vm8494_vm3, %v10831_v38  ;;  %v10576_v41 = vpack.c.bf16 %v6143_v39, %v6143_v39  ;;  %v10832_v42 = vpack.c.bf16 %v6399_v40, %v6399_v40 }
 0x449   : > { %v4727_v43 = vpop.f32.mrb[164].mxu0  ;;  %v5751_v44 = vpop.f32.mrb[164].mxu1 }
 0x44a   : > { %8704 = vst.msk [vmem:[%s11953_s18 + $0x344] sm:$0xf] %vm8494_vm3, %v10576_v41  ;;  %8960 = vst.msk [vmem:[%s11953_s18 + $0x744] sm:$0xf] %vm8494_vm3, %v10832_v42  ;;  %v4728_v45 = vadd.f32 %v13703_v35, %v4727_v43  ;;  %v5752_v46 = vadd.f32 %v13703_v35, %v5751_v44  ;;  %v4729_v47 = vpop.f32.mrb[165].mxu0  ;;  %v5753_v48 = vpop.f32.mrb[165].mxu1 }
 0x44b   : > { %v4730_v49 = vpop.f32.mrb[166].mxu0  ;;  %v5754_v50 = vpop.f32.mrb[166].mxu1 }
 0x44c   : > { %v6144_v51 = vmax.f32 %v4728_v45, 0.0  ;;  %v6400_v52 = vmax.f32 %v5752_v46, 0.0  ;;  %v4731_v53 = vadd.f32 %v13703_v35, %v4730_v49  ;;  %v5755_v54 = vadd.f32 %v13703_v35, %v5754_v50  ;;  %v4732_v55 = vpop.f32.mrb[167].mxu0  ;;  %v5756_v56 = vpop.f32.mrb[167].mxu1 }
 0x44e   : > { %v10577_v57 = vpack.c.bf16 %v6144_v51, %v6144_v51  ;;  %v10833_v58 = vpack.c.bf16 %v6400_v52, %v6400_v52  ;;  %v6145_v59 = vmax.f32 %v4731_v53, 0.0  ;;  %v6401_v60 = vmax.f32 %v5755_v54, 0.0 }
 0x450   : > { %8705 = vst.msk [vmem:[%s11953_s18 + $0x348] sm:$0xf] %vm8494_vm3, %v10577_v57  ;;  %8961 = vst.msk [vmem:[%s11953_s18 + $0x748] sm:$0xf] %vm8494_vm3, %v10833_v58  ;;  %v10578_v62 = vpack.c.bf16 %v6145_v59, %v6145_v59  ;;  %v10834_v63 = vpack.c.bf16 %v6401_v60, %v6401_v60 }
 0x451   : > { %v4735_v0 = vpop.f32.mrb[168].mxu0  ;;  %v5759_v1 = vpop.f32.mrb[168].mxu1 }
 0x452   : > { %8706 = vst.msk [vmem:[%s11953_s18 + $0x34c] sm:$0xf] %vm8494_vm3, %v10578_v62  ;;  %8962 = vst.msk [vmem:[%s11953_s18 + $0x74c] sm:$0xf] %vm8494_vm3, %v10834_v63  ;;  %v4736_v61 = vadd.f32 %v13703_v35, %v4735_v0  ;;  %v5760_v2 = vadd.f32 %v13703_v35, %v5759_v1  ;;  %v4737_v3 = vpop.f32.mrb[169].mxu0  ;;  %v5761_v4 = vpop.f32.mrb[169].mxu1 }
 0x453   : > { %v4738_v6 = vpop.f32.mrb[170].mxu0  ;;  %v5762_v7 = vpop.f32.mrb[170].mxu1 }
 0x454   : > { %v6146_v5 = vmax.f32 %v4736_v61, 0.0  ;;  %v6402_v8 = vmax.f32 %v5760_v2, 0.0  ;;  %v4739_v9 = vadd.f32 %v13703_v35, %v4738_v6  ;;  %v5763_v10 = vadd.f32 %v13703_v35, %v5762_v7  ;;  %v4740_v12 = vpop.f32.mrb[171].mxu0  ;;  %v5764_v13 = vpop.f32.mrb[171].mxu1 }
 0x456   : > { %v10579_v11 = vpack.c.bf16 %v6146_v5, %v6146_v5  ;;  %v10835_v14 = vpack.c.bf16 %v6402_v8, %v6402_v8  ;;  %v6147_v15 = vmax.f32 %v4739_v9, 0.0  ;;  %v6403_v16 = vmax.f32 %v5763_v10, 0.0 }
 0x458   : > { %8707 = vst.msk [vmem:[%s11953_s18 + $0x350] sm:$0xf] %vm8494_vm3, %v10579_v11  ;;  %8963 = vst.msk [vmem:[%s11953_s18 + $0x750] sm:$0xf] %vm8494_vm3, %v10835_v14  ;;  %v10580_v18 = vpack.c.bf16 %v6147_v15, %v6147_v15  ;;  %v10836_v19 = vpack.c.bf16 %v6403_v16, %v6403_v16 }
 0x459   : > { %v4743_v17 = vpop.f32.mrb[172].mxu0  ;;  %v5767_v20 = vpop.f32.mrb[172].mxu1 }
 0x45a   : > { %8708 = vst.msk [vmem:[%s11953_s18 + $0x354] sm:$0xf] %vm8494_vm3, %v10580_v18  ;;  %8964 = vst.msk [vmem:[%s11953_s18 + $0x754] sm:$0xf] %vm8494_vm3, %v10836_v19  ;;  %v4744_v21 = vadd.f32 %v13703_v35, %v4743_v17  ;;  %v5768_v22 = vadd.f32 %v13703_v35, %v5767_v20  ;;  %v4745_v24 = vpop.f32.mrb[173].mxu0  ;;  %v5769_v25 = vpop.f32.mrb[173].mxu1 }
 0x45b   : > { %v4746_v23 = vpop.f32.mrb[174].mxu0  ;;  %v5770_v26 = vpop.f32.mrb[174].mxu1 }
 0x45c   : > { %v6148_v27 = vmax.f32 %v4744_v21, 0.0  ;;  %v6404_v28 = vmax.f32 %v5768_v22, 0.0  ;;  %v4747_v30 = vadd.f32 %v13703_v35, %v4746_v23  ;;  %v5771_v31 = vadd.f32 %v13703_v35, %v5770_v26  ;;  %v4748_v29 = vpop.f32.mrb[175].mxu0  ;;  %v5772_v32 = vpop.f32.mrb[175].mxu1 }
 0x45e   : > { %v10581_v33 = vpack.c.bf16 %v6148_v27, %v6148_v27  ;;  %v10837_v34 = vpack.c.bf16 %v6404_v28, %v6404_v28  ;;  %v6149_v36 = vmax.f32 %v4747_v30, 0.0  ;;  %v6405_v37 = vmax.f32 %v5771_v31, 0.0 }
 0x460   : > { %8709 = vst.msk [vmem:[%s11953_s18 + $0x358] sm:$0xf] %vm8494_vm3, %v10581_v33  ;;  %8965 = vst.msk [vmem:[%s11953_s18 + $0x758] sm:$0xf] %vm8494_vm3, %v10837_v34  ;;  %v10582_v38 = vpack.c.bf16 %v6149_v36, %v6149_v36  ;;  %v10838_v39 = vpack.c.bf16 %v6405_v37, %v6405_v37 }
 0x461   : > { %v4751_v40 = vpop.f32.mrb[176].mxu0  ;;  %v5775_v41 = vpop.f32.mrb[176].mxu1 }
 0x462   : > { %8710 = vst.msk [vmem:[%s11953_s18 + $0x35c] sm:$0xf] %vm8494_vm3, %v10582_v38  ;;  %8966 = vst.msk [vmem:[%s11953_s18 + $0x75c] sm:$0xf] %vm8494_vm3, %v10838_v39  ;;  %v4752_v42 = vadd.f32 %v13703_v35, %v4751_v40  ;;  %v5776_v43 = vadd.f32 %v13703_v35, %v5775_v41  ;;  %v4753_v44 = vpop.f32.mrb[177].mxu0  ;;  %v5777_v45 = vpop.f32.mrb[177].mxu1 }
 0x463   : > { %v4754_v46 = vpop.f32.mrb[178].mxu0  ;;  %v5778_v47 = vpop.f32.mrb[178].mxu1 }
 0x464   : > { %v6150_v48 = vmax.f32 %v4752_v42, 0.0  ;;  %v6406_v49 = vmax.f32 %v5776_v43, 0.0  ;;  %v4755_v50 = vadd.f32 %v13703_v35, %v4754_v46  ;;  %v5779_v51 = vadd.f32 %v13703_v35, %v5778_v47  ;;  %v4756_v52 = vpop.f32.mrb[179].mxu0  ;;  %v5780_v53 = vpop.f32.mrb[179].mxu1 }
 0x466   : > { %v10583_v54 = vpack.c.bf16 %v6150_v48, %v6150_v48  ;;  %v10839_v55 = vpack.c.bf16 %v6406_v49, %v6406_v49  ;;  %v6151_v56 = vmax.f32 %v4755_v50, 0.0  ;;  %v6407_v57 = vmax.f32 %v5779_v51, 0.0 }
 0x468   : > { %8711 = vst.msk [vmem:[%s11953_s18 + $0x360] sm:$0xf] %vm8494_vm3, %v10583_v54  ;;  %8967 = vst.msk [vmem:[%s11953_s18 + $0x760] sm:$0xf] %vm8494_vm3, %v10839_v55  ;;  %v10584_v58 = vpack.c.bf16 %v6151_v56, %v6151_v56  ;;  %v10840_v59 = vpack.c.bf16 %v6407_v57, %v6407_v57 }
 0x469   : > { %v4759_v60 = vpop.f32.mrb[180].mxu0  ;;  %v5783_v62 = vpop.f32.mrb[180].mxu1 }
 0x46a   : > { %8712 = vst.msk [vmem:[%s11953_s18 + $0x364] sm:$0xf] %vm8494_vm3, %v10584_v58  ;;  %8968 = vst.msk [vmem:[%s11953_s18 + $0x764] sm:$0xf] %vm8494_vm3, %v10840_v59  ;;  %v4760_v63 = vadd.f32 %v13703_v35, %v4759_v60  ;;  %v5784_v0 = vadd.f32 %v13703_v35, %v5783_v62  ;;  %v4761_v1 = vpop.f32.mrb[181].mxu0  ;;  %v5785_v61 = vpop.f32.mrb[181].mxu1 }
 0x46b   : > { %v4762_v2 = vpop.f32.mrb[182].mxu0  ;;  %v5786_v3 = vpop.f32.mrb[182].mxu1 }
 0x46c   : > { %v6152_v4 = vmax.f32 %v4760_v63, 0.0  ;;  %v6408_v6 = vmax.f32 %v5784_v0, 0.0  ;;  %v4763_v7 = vadd.f32 %v13703_v35, %v4762_v2  ;;  %v5787_v5 = vadd.f32 %v13703_v35, %v5786_v3  ;;  %v4764_v8 = vpop.f32.mrb[183].mxu0  ;;  %v5788_v9 = vpop.f32.mrb[183].mxu1 }
 0x46e   : > { %v10585_v10 = vpack.c.bf16 %v6152_v4, %v6152_v4  ;;  %v10841_v12 = vpack.c.bf16 %v6408_v6, %v6408_v6  ;;  %v6153_v13 = vmax.f32 %v4763_v7, 0.0  ;;  %v6409_v11 = vmax.f32 %v5787_v5, 0.0 }
 0x470   : > { %8713 = vst.msk [vmem:[%s11953_s18 + $0x368] sm:$0xf] %vm8494_vm3, %v10585_v10  ;;  %8969 = vst.msk [vmem:[%s11953_s18 + $0x768] sm:$0xf] %vm8494_vm3, %v10841_v12  ;;  %v10586_v14 = vpack.c.bf16 %v6153_v13, %v6153_v13  ;;  %v10842_v15 = vpack.c.bf16 %v6409_v11, %v6409_v11 }
 0x471   : > { %v4767_v16 = vpop.f32.mrb[184].mxu0  ;;  %v5791_v18 = vpop.f32.mrb[184].mxu1 }
 0x472   : > { %8714 = vst.msk [vmem:[%s11953_s18 + $0x36c] sm:$0xf] %vm8494_vm3, %v10586_v14  ;;  %8970 = vst.msk [vmem:[%s11953_s18 + $0x76c] sm:$0xf] %vm8494_vm3, %v10842_v15  ;;  %v4768_v19 = vadd.f32 %v13703_v35, %v4767_v16  ;;  %v5792_v17 = vadd.f32 %v13703_v35, %v5791_v18  ;;  %v4769_v20 = vpop.f32.mrb[185].mxu0  ;;  %v5793_v21 = vpop.f32.mrb[185].mxu1 }
 0x473   : > { %v4770_v22 = vpop.f32.mrb[186].mxu0  ;;  %v5794_v24 = vpop.f32.mrb[186].mxu1 }
 0x474   : > { %v6154_v25 = vmax.f32 %v4768_v19, 0.0  ;;  %v6410_v23 = vmax.f32 %v5792_v17, 0.0  ;;  %v4771_v26 = vadd.f32 %v13703_v35, %v4770_v22  ;;  %v5795_v27 = vadd.f32 %v13703_v35, %v5794_v24  ;;  %v4772_v28 = vpop.f32.mrb[187].mxu0  ;;  %v5796_v30 = vpop.f32.mrb[187].mxu1 }
 0x476   : > { %v10587_v31 = vpack.c.bf16 %v6154_v25, %v6154_v25  ;;  %v10843_v29 = vpack.c.bf16 %v6410_v23, %v6410_v23  ;;  %v6155_v32 = vmax.f32 %v4771_v26, 0.0  ;;  %v6411_v33 = vmax.f32 %v5795_v27, 0.0 }
 0x478   : > { %8715 = vst.msk [vmem:[%s11953_s18 + $0x370] sm:$0xf] %vm8494_vm3, %v10587_v31  ;;  %8971 = vst.msk [vmem:[%s11953_s18 + $0x770] sm:$0xf] %vm8494_vm3, %v10843_v29  ;;  %v10588_v34 = vpack.c.bf16 %v6155_v32, %v6155_v32  ;;  %v10844_v36 = vpack.c.bf16 %v6411_v33, %v6411_v33 }
 0x479   : > { %v4775_v37 = vpop.f32.mrb[188].mxu0  ;;  %v5799_v38 = vpop.f32.mrb[188].mxu1 }
 0x47a   : > { %8716 = vst.msk [vmem:[%s11953_s18 + $0x374] sm:$0xf] %vm8494_vm3, %v10588_v34  ;;  %8972 = vst.msk [vmem:[%s11953_s18 + $0x774] sm:$0xf] %vm8494_vm3, %v10844_v36  ;;  %v4776_v39 = vadd.f32 %v13703_v35, %v4775_v37  ;;  %v5800_v40 = vadd.f32 %v13703_v35, %v5799_v38  ;;  %v4777_v41 = vpop.f32.mrb[189].mxu0  ;;  %v5801_v42 = vpop.f32.mrb[189].mxu1 }
 0x47b   : > { %v4778_v43 = vpop.f32.mrb[190].mxu0  ;;  %v5802_v44 = vpop.f32.mrb[190].mxu1 }
 0x47c   : > { %v6156_v45 = vmax.f32 %v4776_v39, 0.0  ;;  %v6412_v46 = vmax.f32 %v5800_v40, 0.0  ;;  %v4779_v47 = vadd.f32 %v13703_v35, %v4778_v43  ;;  %v5803_v48 = vadd.f32 %v13703_v35, %v5802_v44  ;;  %v4780_v49 = vpop.f32.mrb[191].mxu0  ;;  %v5804_v50 = vpop.f32.mrb[191].mxu1 }
 0x47e   : > { %v10589_v51 = vpack.c.bf16 %v6156_v45, %v6156_v45  ;;  %v10845_v52 = vpack.c.bf16 %v6412_v46, %v6412_v46  ;;  %v6157_v53 = vmax.f32 %v4779_v47, 0.0  ;;  %v6413_v54 = vmax.f32 %v5803_v48, 0.0 }
 0x480   : > { %8717 = vst.msk [vmem:[%s11953_s18 + $0x378] sm:$0xf] %vm8494_vm3, %v10589_v51  ;;  %8973 = vst.msk [vmem:[%s11953_s18 + $0x778] sm:$0xf] %vm8494_vm3, %v10845_v52  ;;  %v10590_v55 = vpack.c.bf16 %v6157_v53, %v6157_v53  ;;  %v10846_v56 = vpack.c.bf16 %v6413_v54, %v6413_v54 }
 0x481   : > { %v4783_v57 = vpop.f32.mrb[192].mxu0  ;;  %v5807_v58 = vpop.f32.mrb[192].mxu1 }
 0x482   : > { %8718 = vst.msk [vmem:[%s11953_s18 + $0x37c] sm:$0xf] %vm8494_vm3, %v10590_v55  ;;  %8974 = vst.msk [vmem:[%s11953_s18 + $0x77c] sm:$0xf] %vm8494_vm3, %v10846_v56  ;;  %v4784_v59 = vadd.f32 %v13703_v35, %v4783_v57  ;;  %v5808_v60 = vadd.f32 %v13703_v35, %v5807_v58  ;;  %v4785_v62 = vpop.f32.mrb[193].mxu0  ;;  %v5809_v63 = vpop.f32.mrb[193].mxu1 }
 0x483   : > { %v4786_v0 = vpop.f32.mrb[194].mxu0  ;;  %v5810_v1 = vpop.f32.mrb[194].mxu1 }
 0x484   : > { %v6158_v61 = vmax.f32 %v4784_v59, 0.0  ;;  %v6414_v2 = vmax.f32 %v5808_v60, 0.0  ;;  %v4787_v3 = vadd.f32 %v13703_v35, %v4786_v0  ;;  %v5811_v4 = vadd.f32 %v13703_v35, %v5810_v1  ;;  %v4788_v6 = vpop.f32.mrb[195].mxu0  ;;  %v5812_v7 = vpop.f32.mrb[195].mxu1 }
 0x486   : > { %v10591_v5 = vpack.c.bf16 %v6158_v61, %v6158_v61  ;;  %v10847_v8 = vpack.c.bf16 %v6414_v2, %v6414_v2  ;;  %v6159_v9 = vmax.f32 %v4787_v3, 0.0  ;;  %v6415_v10 = vmax.f32 %v5811_v4, 0.0 }
 0x488   : > { %8719 = vst.msk [vmem:[%s11953_s18 + $0x380] sm:$0xf] %vm8494_vm3, %v10591_v5  ;;  %8975 = vst.msk [vmem:[%s11953_s18 + $0x780] sm:$0xf] %vm8494_vm3, %v10847_v8  ;;  %v10592_v12 = vpack.c.bf16 %v6159_v9, %v6159_v9  ;;  %v10848_v13 = vpack.c.bf16 %v6415_v10, %v6415_v10 }
 0x489   : > { %v4791_v11 = vpop.f32.mrb[196].mxu0  ;;  %v5815_v14 = vpop.f32.mrb[196].mxu1 }
 0x48a   : > { %8720 = vst.msk [vmem:[%s11953_s18 + $0x384] sm:$0xf] %vm8494_vm3, %v10592_v12  ;;  %8976 = vst.msk [vmem:[%s11953_s18 + $0x784] sm:$0xf] %vm8494_vm3, %v10848_v13  ;;  %v4792_v15 = vadd.f32 %v13703_v35, %v4791_v11  ;;  %v5816_v16 = vadd.f32 %v13703_v35, %v5815_v14  ;;  %v4793_v18 = vpop.f32.mrb[197].mxu0  ;;  %v5817_v19 = vpop.f32.mrb[197].mxu1 }
 0x48b   : > { %v4794_v17 = vpop.f32.mrb[198].mxu0  ;;  %v5818_v20 = vpop.f32.mrb[198].mxu1 }
 0x48c   : > { %v6160_v21 = vmax.f32 %v4792_v15, 0.0  ;;  %v6416_v22 = vmax.f32 %v5816_v16, 0.0  ;;  %v4795_v24 = vadd.f32 %v13703_v35, %v4794_v17  ;;  %v5819_v25 = vadd.f32 %v13703_v35, %v5818_v20  ;;  %v4796_v23 = vpop.f32.mrb[199].mxu0  ;;  %v5820_v26 = vpop.f32.mrb[199].mxu1 }
 0x48e   : > { %v10593_v27 = vpack.c.bf16 %v6160_v21, %v6160_v21  ;;  %v10849_v28 = vpack.c.bf16 %v6416_v22, %v6416_v22  ;;  %v6161_v30 = vmax.f32 %v4795_v24, 0.0  ;;  %v6417_v31 = vmax.f32 %v5819_v25, 0.0 }
 0x490   : > { %8721 = vst.msk [vmem:[%s11953_s18 + $0x388] sm:$0xf] %vm8494_vm3, %v10593_v27  ;;  %8977 = vst.msk [vmem:[%s11953_s18 + $0x788] sm:$0xf] %vm8494_vm3, %v10849_v28  ;;  %v10594_v29 = vpack.c.bf16 %v6161_v30, %v6161_v30  ;;  %v10850_v32 = vpack.c.bf16 %v6417_v31, %v6417_v31 }
 0x491   : > { %v4799_v33 = vpop.f32.mrb[200].mxu0  ;;  %v5823_v34 = vpop.f32.mrb[200].mxu1 }
 0x492   : > { %8722 = vst.msk [vmem:[%s11953_s18 + $0x38c] sm:$0xf] %vm8494_vm3, %v10594_v29  ;;  %8978 = vst.msk [vmem:[%s11953_s18 + $0x78c] sm:$0xf] %vm8494_vm3, %v10850_v32  ;;  %v4800_v36 = vadd.f32 %v13703_v35, %v4799_v33  ;;  %v5824_v37 = vadd.f32 %v13703_v35, %v5823_v34  ;;  %v4801_v38 = vpop.f32.mrb[201].mxu0  ;;  %v5825_v39 = vpop.f32.mrb[201].mxu1 }
 0x493   : > { %v4802_v40 = vpop.f32.mrb[202].mxu0  ;;  %v5826_v41 = vpop.f32.mrb[202].mxu1 }
 0x494   : > { %v6162_v42 = vmax.f32 %v4800_v36, 0.0  ;;  %v6418_v43 = vmax.f32 %v5824_v37, 0.0  ;;  %v4803_v44 = vadd.f32 %v13703_v35, %v4802_v40  ;;  %v5827_v45 = vadd.f32 %v13703_v35, %v5826_v41  ;;  %v4804_v46 = vpop.f32.mrb[203].mxu0  ;;  %v5828_v47 = vpop.f32.mrb[203].mxu1 }
 0x496   : > { %v10595_v48 = vpack.c.bf16 %v6162_v42, %v6162_v42  ;;  %v10851_v49 = vpack.c.bf16 %v6418_v43, %v6418_v43  ;;  %v6163_v50 = vmax.f32 %v4803_v44, 0.0  ;;  %v6419_v51 = vmax.f32 %v5827_v45, 0.0 }
 0x498   : > { %8723 = vst.msk [vmem:[%s11953_s18 + $0x390] sm:$0xf] %vm8494_vm3, %v10595_v48  ;;  %8979 = vst.msk [vmem:[%s11953_s18 + $0x790] sm:$0xf] %vm8494_vm3, %v10851_v49  ;;  %v10596_v52 = vpack.c.bf16 %v6163_v50, %v6163_v50  ;;  %v10852_v53 = vpack.c.bf16 %v6419_v51, %v6419_v51 }
 0x499   : > { %v4807_v54 = vpop.f32.mrb[204].mxu0  ;;  %v5831_v55 = vpop.f32.mrb[204].mxu1 }
 0x49a   : > { %8724 = vst.msk [vmem:[%s11953_s18 + $0x394] sm:$0xf] %vm8494_vm3, %v10596_v52  ;;  %8980 = vst.msk [vmem:[%s11953_s18 + $0x794] sm:$0xf] %vm8494_vm3, %v10852_v53  ;;  %v4808_v56 = vadd.f32 %v13703_v35, %v4807_v54  ;;  %v5832_v57 = vadd.f32 %v13703_v35, %v5831_v55  ;;  %v4809_v58 = vpop.f32.mrb[205].mxu0  ;;  %v5833_v59 = vpop.f32.mrb[205].mxu1 }
 0x49b   : > { %v4810_v60 = vpop.f32.mrb[206].mxu0  ;;  %v5834_v62 = vpop.f32.mrb[206].mxu1 }
 0x49c   : > { %v6164_v63 = vmax.f32 %v4808_v56, 0.0  ;;  %v6420_v0 = vmax.f32 %v5832_v57, 0.0  ;;  %v4811_v1 = vadd.f32 %v13703_v35, %v4810_v60  ;;  %v5835_v61 = vadd.f32 %v13703_v35, %v5834_v62  ;;  %v4812_v2 = vpop.f32.mrb[207].mxu0  ;;  %v5836_v3 = vpop.f32.mrb[207].mxu1  ;;  %v13974_v35 = vld [vmem:[%s14125_s2] ss:$0 sm:$0xff] }
 0x49e   : > { %v10597_v4 = vpack.c.bf16 %v6164_v63, %v6164_v63  ;;  %v10853_v6 = vpack.c.bf16 %v6420_v0, %v6420_v0  ;;  %v6165_v7 = vmax.f32 %v4811_v1, 0.0  ;;  %v6421_v5 = vmax.f32 %v5835_v61, 0.0 }
 0x4a0   : > { %8725 = vst.msk [vmem:[%s11953_s18 + $0x398] sm:$0xf] %vm8494_vm3, %v10597_v4  ;;  %8981 = vst.msk [vmem:[%s11953_s18 + $0x798] sm:$0xf] %vm8494_vm3, %v10853_v6  ;;  %v10598_v8 = vpack.c.bf16 %v6165_v7, %v6165_v7  ;;  %v10854_v9 = vpack.c.bf16 %v6421_v5, %v6421_v5 }
 0x4a1   : > { %v4815_v10 = vpop.f32.mrb[208].mxu0  ;;  %v5839_v12 = vpop.f32.mrb[208].mxu1 }
 0x4a2   : > { %8726 = vst.msk [vmem:[%s11953_s18 + $0x39c] sm:$0xf] %vm8494_vm3, %v10598_v8  ;;  %8982 = vst.msk [vmem:[%s11953_s18 + $0x79c] sm:$0xf] %vm8494_vm3, %v10854_v9  ;;  %v4816_v13 = vadd.f32 %v13974_v35, %v4815_v10  ;;  %v5840_v11 = vadd.f32 %v13974_v35, %v5839_v12  ;;  %v4817_v14 = vpop.f32.mrb[209].mxu0  ;;  %v5841_v15 = vpop.f32.mrb[209].mxu1 }
 0x4a3   : > { %v4818_v16 = vpop.f32.mrb[210].mxu0  ;;  %v5842_v18 = vpop.f32.mrb[210].mxu1 }
 0x4a4   : > { %v6166_v19 = vmax.f32 %v4816_v13, 0.0  ;;  %v6422_v17 = vmax.f32 %v5840_v11, 0.0  ;;  %v4819_v20 = vadd.f32 %v13974_v35, %v4818_v16  ;;  %v5843_v21 = vadd.f32 %v13974_v35, %v5842_v18  ;;  %v4820_v22 = vpop.f32.mrb[211].mxu0  ;;  %v5844_v24 = vpop.f32.mrb[211].mxu1 }
 0x4a6   : > { %v10599_v25 = vpack.c.bf16 %v6166_v19, %v6166_v19  ;;  %v10855_v23 = vpack.c.bf16 %v6422_v17, %v6422_v17  ;;  %v6167_v26 = vmax.f32 %v4819_v20, 0.0  ;;  %v6423_v27 = vmax.f32 %v5843_v21, 0.0 }
 0x4a8   : > { %8727 = vst.msk [vmem:[%s11953_s18 + $0x3a0] sm:$0xf] %vm8494_vm3, %v10599_v25  ;;  %8983 = vst.msk [vmem:[%s11953_s18 + $0x7a0] sm:$0xf] %vm8494_vm3, %v10855_v23  ;;  %v10600_v28 = vpack.c.bf16 %v6167_v26, %v6167_v26  ;;  %v10856_v30 = vpack.c.bf16 %v6423_v27, %v6423_v27 }
 0x4a9   : > { %v4823_v31 = vpop.f32.mrb[212].mxu0  ;;  %v5847_v29 = vpop.f32.mrb[212].mxu1 }
 0x4aa   : > { %8728 = vst.msk [vmem:[%s11953_s18 + $0x3a4] sm:$0xf] %vm8494_vm3, %v10600_v28  ;;  %8984 = vst.msk [vmem:[%s11953_s18 + $0x7a4] sm:$0xf] %vm8494_vm3, %v10856_v30  ;;  %v4824_v32 = vadd.f32 %v13974_v35, %v4823_v31  ;;  %v5848_v33 = vadd.f32 %v13974_v35, %v5847_v29  ;;  %v4825_v34 = vpop.f32.mrb[213].mxu0  ;;  %v5849_v36 = vpop.f32.mrb[213].mxu1 }
 0x4ab   : > { %v4826_v37 = vpop.f32.mrb[214].mxu0  ;;  %v5850_v38 = vpop.f32.mrb[214].mxu1 }
 0x4ac   : > { %v6168_v39 = vmax.f32 %v4824_v32, 0.0  ;;  %v6424_v40 = vmax.f32 %v5848_v33, 0.0  ;;  %v4827_v41 = vadd.f32 %v13974_v35, %v4826_v37  ;;  %v5851_v42 = vadd.f32 %v13974_v35, %v5850_v38  ;;  %v4828_v43 = vpop.f32.mrb[215].mxu0  ;;  %v5852_v44 = vpop.f32.mrb[215].mxu1 }
 0x4ae   : > { %v10601_v45 = vpack.c.bf16 %v6168_v39, %v6168_v39  ;;  %v10857_v46 = vpack.c.bf16 %v6424_v40, %v6424_v40  ;;  %v6169_v47 = vmax.f32 %v4827_v41, 0.0  ;;  %v6425_v48 = vmax.f32 %v5851_v42, 0.0 }
 0x4b0   : > { %8729 = vst.msk [vmem:[%s11953_s18 + $0x3a8] sm:$0xf] %vm8494_vm3, %v10601_v45  ;;  %8985 = vst.msk [vmem:[%s11953_s18 + $0x7a8] sm:$0xf] %vm8494_vm3, %v10857_v46  ;;  %v10602_v49 = vpack.c.bf16 %v6169_v47, %v6169_v47  ;;  %v10858_v50 = vpack.c.bf16 %v6425_v48, %v6425_v48 }
 0x4b1   : > { %v4831_v51 = vpop.f32.mrb[216].mxu0  ;;  %v5855_v52 = vpop.f32.mrb[216].mxu1 }
 0x4b2   : > { %8730 = vst.msk [vmem:[%s11953_s18 + $0x3ac] sm:$0xf] %vm8494_vm3, %v10602_v49  ;;  %8986 = vst.msk [vmem:[%s11953_s18 + $0x7ac] sm:$0xf] %vm8494_vm3, %v10858_v50  ;;  %v4832_v53 = vadd.f32 %v13974_v35, %v4831_v51  ;;  %v5856_v54 = vadd.f32 %v13974_v35, %v5855_v52  ;;  %v4833_v55 = vpop.f32.mrb[217].mxu0  ;;  %v5857_v56 = vpop.f32.mrb[217].mxu1 }
 0x4b3   : > { %v4834_v57 = vpop.f32.mrb[218].mxu0  ;;  %v5858_v58 = vpop.f32.mrb[218].mxu1 }
 0x4b4   : > { %v6170_v59 = vmax.f32 %v4832_v53, 0.0  ;;  %v6426_v60 = vmax.f32 %v5856_v54, 0.0  ;;  %v4835_v62 = vadd.f32 %v13974_v35, %v4834_v57  ;;  %v5859_v63 = vadd.f32 %v13974_v35, %v5858_v58  ;;  %v4836_v0 = vpop.f32.mrb[219].mxu0  ;;  %v5860_v1 = vpop.f32.mrb[219].mxu1 }
 0x4b6   : > { %v10603_v61 = vpack.c.bf16 %v6170_v59, %v6170_v59  ;;  %v10859_v2 = vpack.c.bf16 %v6426_v60, %v6426_v60  ;;  %v6171_v3 = vmax.f32 %v4835_v62, 0.0  ;;  %v6427_v4 = vmax.f32 %v5859_v63, 0.0 }
 0x4b8   : > { %8731 = vst.msk [vmem:[%s11953_s18 + $0x3b0] sm:$0xf] %vm8494_vm3, %v10603_v61  ;;  %8987 = vst.msk [vmem:[%s11953_s18 + $0x7b0] sm:$0xf] %vm8494_vm3, %v10859_v2  ;;  %v10604_v6 = vpack.c.bf16 %v6171_v3, %v6171_v3  ;;  %v10860_v7 = vpack.c.bf16 %v6427_v4, %v6427_v4 }
 0x4b9   : > { %v4839_v5 = vpop.f32.mrb[220].mxu0  ;;  %v5863_v8 = vpop.f32.mrb[220].mxu1 }
 0x4ba   : > { %8732 = vst.msk [vmem:[%s11953_s18 + $0x3b4] sm:$0xf] %vm8494_vm3, %v10604_v6  ;;  %8988 = vst.msk [vmem:[%s11953_s18 + $0x7b4] sm:$0xf] %vm8494_vm3, %v10860_v7  ;;  %v4840_v9 = vadd.f32 %v13974_v35, %v4839_v5  ;;  %v5864_v10 = vadd.f32 %v13974_v35, %v5863_v8  ;;  %v4841_v12 = vpop.f32.mrb[221].mxu0  ;;  %v5865_v13 = vpop.f32.mrb[221].mxu1 }
 0x4bb   : > { %v4842_v11 = vpop.f32.mrb[222].mxu0  ;;  %v5866_v14 = vpop.f32.mrb[222].mxu1 }
 0x4bc   : > { %v6172_v15 = vmax.f32 %v4840_v9, 0.0  ;;  %v6428_v16 = vmax.f32 %v5864_v10, 0.0  ;;  %v4843_v18 = vadd.f32 %v13974_v35, %v4842_v11  ;;  %v5867_v19 = vadd.f32 %v13974_v35, %v5866_v14  ;;  %v4844_v17 = vpop.f32.mrb[223].mxu0  ;;  %v5868_v20 = vpop.f32.mrb[223].mxu1 }
 0x4be   : > { %v10605_v21 = vpack.c.bf16 %v6172_v15, %v6172_v15  ;;  %v10861_v22 = vpack.c.bf16 %v6428_v16, %v6428_v16  ;;  %v6173_v24 = vmax.f32 %v4843_v18, 0.0  ;;  %v6429_v25 = vmax.f32 %v5867_v19, 0.0 }
 0x4c0   : > { %8733 = vst.msk [vmem:[%s11953_s18 + $0x3b8] sm:$0xf] %vm8494_vm3, %v10605_v21  ;;  %8989 = vst.msk [vmem:[%s11953_s18 + $0x7b8] sm:$0xf] %vm8494_vm3, %v10861_v22  ;;  %v10606_v23 = vpack.c.bf16 %v6173_v24, %v6173_v24  ;;  %v10862_v26 = vpack.c.bf16 %v6429_v25, %v6429_v25 }
 0x4c1   : > { %v4847_v27 = vpop.f32.mrb[224].mxu0  ;;  %v5871_v28 = vpop.f32.mrb[224].mxu1 }
 0x4c2   : > { %8734 = vst.msk [vmem:[%s11953_s18 + $0x3bc] sm:$0xf] %vm8494_vm3, %v10606_v23  ;;  %8990 = vst.msk [vmem:[%s11953_s18 + $0x7bc] sm:$0xf] %vm8494_vm3, %v10862_v26  ;;  %v4848_v30 = vadd.f32 %v13974_v35, %v4847_v27  ;;  %v5872_v31 = vadd.f32 %v13974_v35, %v5871_v28  ;;  %v4849_v29 = vpop.f32.mrb[225].mxu0  ;;  %v5873_v32 = vpop.f32.mrb[225].mxu1 }
 0x4c3   : > { %v4850_v33 = vpop.f32.mrb[226].mxu0  ;;  %v5874_v34 = vpop.f32.mrb[226].mxu1 }
 0x4c4   : > { %v6174_v36 = vmax.f32 %v4848_v30, 0.0  ;;  %v6430_v37 = vmax.f32 %v5872_v31, 0.0  ;;  %v4851_v38 = vadd.f32 %v13974_v35, %v4850_v33  ;;  %v5875_v39 = vadd.f32 %v13974_v35, %v5874_v34  ;;  %v4852_v40 = vpop.f32.mrb[227].mxu0  ;;  %v5876_v41 = vpop.f32.mrb[227].mxu1 }
 0x4c6   : > { %v10607_v42 = vpack.c.bf16 %v6174_v36, %v6174_v36  ;;  %v10863_v43 = vpack.c.bf16 %v6430_v37, %v6430_v37  ;;  %v6175_v44 = vmax.f32 %v4851_v38, 0.0  ;;  %v6431_v45 = vmax.f32 %v5875_v39, 0.0 }
 0x4c8   : > { %8735 = vst.msk [vmem:[%s11953_s18 + $0x3c0] sm:$0xf] %vm8494_vm3, %v10607_v42  ;;  %8991 = vst.msk [vmem:[%s11953_s18 + $0x7c0] sm:$0xf] %vm8494_vm3, %v10863_v43  ;;  %v10608_v46 = vpack.c.bf16 %v6175_v44, %v6175_v44  ;;  %v10864_v47 = vpack.c.bf16 %v6431_v45, %v6431_v45 }
 0x4c9   : > { %v4855_v48 = vpop.f32.mrb[228].mxu0  ;;  %v5879_v49 = vpop.f32.mrb[228].mxu1 }
 0x4ca   : > { %8736 = vst.msk [vmem:[%s11953_s18 + $0x3c4] sm:$0xf] %vm8494_vm3, %v10608_v46  ;;  %8992 = vst.msk [vmem:[%s11953_s18 + $0x7c4] sm:$0xf] %vm8494_vm3, %v10864_v47  ;;  %v4856_v50 = vadd.f32 %v13974_v35, %v4855_v48  ;;  %v5880_v51 = vadd.f32 %v13974_v35, %v5879_v49  ;;  %v4857_v52 = vpop.f32.mrb[229].mxu0  ;;  %v5881_v53 = vpop.f32.mrb[229].mxu1 }
 0x4cb   : > { %v4858_v54 = vpop.f32.mrb[230].mxu0  ;;  %v5882_v55 = vpop.f32.mrb[230].mxu1 }
 0x4cc   : > { %v6176_v56 = vmax.f32 %v4856_v50, 0.0  ;;  %v6432_v57 = vmax.f32 %v5880_v51, 0.0  ;;  %v4859_v58 = vadd.f32 %v13974_v35, %v4858_v54  ;;  %v5883_v59 = vadd.f32 %v13974_v35, %v5882_v55  ;;  %v4860_v60 = vpop.f32.mrb[231].mxu0  ;;  %v5884_v62 = vpop.f32.mrb[231].mxu1 }
 0x4ce   : > { %v10609_v63 = vpack.c.bf16 %v6176_v56, %v6176_v56  ;;  %v10865_v0 = vpack.c.bf16 %v6432_v57, %v6432_v57  ;;  %v6177_v1 = vmax.f32 %v4859_v58, 0.0  ;;  %v6433_v61 = vmax.f32 %v5883_v59, 0.0 }
 0x4d0   : > { %8737 = vst.msk [vmem:[%s11953_s18 + $0x3c8] sm:$0xf] %vm8494_vm3, %v10609_v63  ;;  %8993 = vst.msk [vmem:[%s11953_s18 + $0x7c8] sm:$0xf] %vm8494_vm3, %v10865_v0  ;;  %v10610_v2 = vpack.c.bf16 %v6177_v1, %v6177_v1  ;;  %v10866_v3 = vpack.c.bf16 %v6433_v61, %v6433_v61 }
 0x4d1   : > { %v4863_v4 = vpop.f32.mrb[232].mxu0  ;;  %v5887_v6 = vpop.f32.mrb[232].mxu1 }
 0x4d2   : > { %8738 = vst.msk [vmem:[%s11953_s18 + $0x3cc] sm:$0xf] %vm8494_vm3, %v10610_v2  ;;  %8994 = vst.msk [vmem:[%s11953_s18 + $0x7cc] sm:$0xf] %vm8494_vm3, %v10866_v3  ;;  %v4864_v7 = vadd.f32 %v13974_v35, %v4863_v4  ;;  %v5888_v5 = vadd.f32 %v13974_v35, %v5887_v6  ;;  %v4865_v8 = vpop.f32.mrb[233].mxu0  ;;  %v5889_v9 = vpop.f32.mrb[233].mxu1 }
 0x4d3   : > { %v4866_v10 = vpop.f32.mrb[234].mxu0  ;;  %v5890_v12 = vpop.f32.mrb[234].mxu1 }
 0x4d4   : > { %v6178_v13 = vmax.f32 %v4864_v7, 0.0  ;;  %v6434_v11 = vmax.f32 %v5888_v5, 0.0  ;;  %v4867_v14 = vadd.f32 %v13974_v35, %v4866_v10  ;;  %v5891_v15 = vadd.f32 %v13974_v35, %v5890_v12  ;;  %v4868_v16 = vpop.f32.mrb[235].mxu0  ;;  %v5892_v18 = vpop.f32.mrb[235].mxu1 }
 0x4d6   : > { %v10611_v19 = vpack.c.bf16 %v6178_v13, %v6178_v13  ;;  %v10867_v17 = vpack.c.bf16 %v6434_v11, %v6434_v11  ;;  %v6179_v20 = vmax.f32 %v4867_v14, 0.0  ;;  %v6435_v21 = vmax.f32 %v5891_v15, 0.0 }
 0x4d8   : > { %8739 = vst.msk [vmem:[%s11953_s18 + $0x3d0] sm:$0xf] %vm8494_vm3, %v10611_v19  ;;  %8995 = vst.msk [vmem:[%s11953_s18 + $0x7d0] sm:$0xf] %vm8494_vm3, %v10867_v17  ;;  %v10612_v22 = vpack.c.bf16 %v6179_v20, %v6179_v20  ;;  %v10868_v24 = vpack.c.bf16 %v6435_v21, %v6435_v21 }
 0x4d9   : > { %v4871_v25 = vpop.f32.mrb[236].mxu0  ;;  %v5895_v23 = vpop.f32.mrb[236].mxu1 }
 0x4da   : > { %8740 = vst.msk [vmem:[%s11953_s18 + $0x3d4] sm:$0xf] %vm8494_vm3, %v10612_v22  ;;  %8996 = vst.msk [vmem:[%s11953_s18 + $0x7d4] sm:$0xf] %vm8494_vm3, %v10868_v24  ;;  %v4872_v26 = vadd.f32 %v13974_v35, %v4871_v25  ;;  %v5896_v27 = vadd.f32 %v13974_v35, %v5895_v23  ;;  %v4873_v28 = vpop.f32.mrb[237].mxu0  ;;  %v5897_v30 = vpop.f32.mrb[237].mxu1 }
 0x4db   : > { %v4874_v31 = vpop.f32.mrb[238].mxu0  ;;  %v5898_v29 = vpop.f32.mrb[238].mxu1 }
 0x4dc   : > { %v6180_v32 = vmax.f32 %v4872_v26, 0.0  ;;  %v6436_v33 = vmax.f32 %v5896_v27, 0.0  ;;  %v4875_v34 = vadd.f32 %v13974_v35, %v4874_v31  ;;  %v5899_v36 = vadd.f32 %v13974_v35, %v5898_v29  ;;  %v4876_v37 = vpop.f32.mrb[239].mxu0  ;;  %v5900_v38 = vpop.f32.mrb[239].mxu1 }
 0x4de   : > { %v10613_v39 = vpack.c.bf16 %v6180_v32, %v6180_v32  ;;  %v10869_v40 = vpack.c.bf16 %v6436_v33, %v6436_v33  ;;  %v6181_v41 = vmax.f32 %v4875_v34, 0.0  ;;  %v6437_v42 = vmax.f32 %v5899_v36, 0.0 }
 0x4e0   : > { %8741 = vst.msk [vmem:[%s11953_s18 + $0x3d8] sm:$0xf] %vm8494_vm3, %v10613_v39  ;;  %8997 = vst.msk [vmem:[%s11953_s18 + $0x7d8] sm:$0xf] %vm8494_vm3, %v10869_v40  ;;  %v10614_v43 = vpack.c.bf16 %v6181_v41, %v6181_v41  ;;  %v10870_v44 = vpack.c.bf16 %v6437_v42, %v6437_v42 }
 0x4e1   : > { %v4879_v45 = vpop.f32.mrb[240].mxu0  ;;  %v5903_v46 = vpop.f32.mrb[240].mxu1 }
 0x4e2   : > { %8742 = vst.msk [vmem:[%s11953_s18 + $0x3dc] sm:$0xf] %vm8494_vm3, %v10614_v43  ;;  %8998 = vst.msk [vmem:[%s11953_s18 + $0x7dc] sm:$0xf] %vm8494_vm3, %v10870_v44  ;;  %v4880_v47 = vadd.f32 %v13974_v35, %v4879_v45  ;;  %v5904_v48 = vadd.f32 %v13974_v35, %v5903_v46  ;;  %v4881_v49 = vpop.f32.mrb[241].mxu0  ;;  %v5905_v50 = vpop.f32.mrb[241].mxu1 }
 0x4e3   : > { %v4882_v51 = vpop.f32.mrb[242].mxu0  ;;  %v5906_v52 = vpop.f32.mrb[242].mxu1 }
 0x4e4   : > { %v6182_v53 = vmax.f32 %v4880_v47, 0.0  ;;  %v6438_v54 = vmax.f32 %v5904_v48, 0.0  ;;  %v4883_v55 = vadd.f32 %v13974_v35, %v4882_v51  ;;  %v5907_v56 = vadd.f32 %v13974_v35, %v5906_v52  ;;  %v4884_v57 = vpop.f32.mrb[243].mxu0  ;;  %v5908_v58 = vpop.f32.mrb[243].mxu1 }
 0x4e6   : > { %v10615_v59 = vpack.c.bf16 %v6182_v53, %v6182_v53  ;;  %v10871_v60 = vpack.c.bf16 %v6438_v54, %v6438_v54  ;;  %v6183_v62 = vmax.f32 %v4883_v55, 0.0  ;;  %v6439_v63 = vmax.f32 %v5907_v56, 0.0 }
 0x4e8   : > { %8743 = vst.msk [vmem:[%s11953_s18 + $0x3e0] sm:$0xf] %vm8494_vm3, %v10615_v59  ;;  %8999 = vst.msk [vmem:[%s11953_s18 + $0x7e0] sm:$0xf] %vm8494_vm3, %v10871_v60  ;;  %v10616_v0 = vpack.c.bf16 %v6183_v62, %v6183_v62  ;;  %v10872_v1 = vpack.c.bf16 %v6439_v63, %v6439_v63 }
 0x4e9   : > { %v4887_v61 = vpop.f32.mrb[244].mxu0  ;;  %v5911_v2 = vpop.f32.mrb[244].mxu1 }
 0x4ea   : > { %8744 = vst.msk [vmem:[%s11953_s18 + $0x3e4] sm:$0xf] %vm8494_vm3, %v10616_v0  ;;  %9000 = vst.msk [vmem:[%s11953_s18 + $0x7e4] sm:$0xf] %vm8494_vm3, %v10872_v1  ;;  %v4888_v3 = vadd.f32 %v13974_v35, %v4887_v61  ;;  %v5912_v4 = vadd.f32 %v13974_v35, %v5911_v2  ;;  %v4889_v6 = vpop.f32.mrb[245].mxu0  ;;  %v5913_v7 = vpop.f32.mrb[245].mxu1 }
 0x4eb   : > { %v4890_v5 = vpop.f32.mrb[246].mxu0  ;;  %v5914_v8 = vpop.f32.mrb[246].mxu1 }
 0x4ec   : > { %v6184_v9 = vmax.f32 %v4888_v3, 0.0  ;;  %v6440_v10 = vmax.f32 %v5912_v4, 0.0  ;;  %v4891_v12 = vadd.f32 %v13974_v35, %v4890_v5  ;;  %v5915_v13 = vadd.f32 %v13974_v35, %v5914_v8  ;;  %v4892_v11 = vpop.f32.mrb[247].mxu0  ;;  %v5916_v14 = vpop.f32.mrb[247].mxu1 }
 0x4ee   : > { %v10617_v15 = vpack.c.bf16 %v6184_v9, %v6184_v9  ;;  %v10873_v16 = vpack.c.bf16 %v6440_v10, %v6440_v10  ;;  %v6185_v18 = vmax.f32 %v4891_v12, 0.0  ;;  %v6441_v19 = vmax.f32 %v5915_v13, 0.0 }
 0x4f0   : > { %8745 = vst.msk [vmem:[%s11953_s18 + $0x3e8] sm:$0xf] %vm8494_vm3, %v10617_v15  ;;  %9001 = vst.msk [vmem:[%s11953_s18 + $0x7e8] sm:$0xf] %vm8494_vm3, %v10873_v16  ;;  %v10618_v17 = vpack.c.bf16 %v6185_v18, %v6185_v18  ;;  %v10874_v20 = vpack.c.bf16 %v6441_v19, %v6441_v19 }
 0x4f1   : > { %v4895_v21 = vpop.f32.mrb[248].mxu0  ;;  %v5919_v22 = vpop.f32.mrb[248].mxu1 }
 0x4f2   : > { %8746 = vst.msk [vmem:[%s11953_s18 + $0x3ec] sm:$0xf] %vm8494_vm3, %v10618_v17  ;;  %9002 = vst.msk [vmem:[%s11953_s18 + $0x7ec] sm:$0xf] %vm8494_vm3, %v10874_v20  ;;  %v4896_v24 = vadd.f32 %v13974_v35, %v4895_v21  ;;  %v5920_v25 = vadd.f32 %v13974_v35, %v5919_v22  ;;  %v4897_v23 = vpop.f32.mrb[249].mxu0  ;;  %v5921_v26 = vpop.f32.mrb[249].mxu1 }
 0x4f3   : > { %v4898_v27 = vpop.f32.mrb[250].mxu0  ;;  %v5922_v28 = vpop.f32.mrb[250].mxu1 }
 0x4f4   : > { %v6186_v30 = vmax.f32 %v4896_v24, 0.0  ;;  %v6442_v31 = vmax.f32 %v5920_v25, 0.0  ;;  %v4899_v29 = vadd.f32 %v13974_v35, %v4898_v27  ;;  %v5923_v32 = vadd.f32 %v13974_v35, %v5922_v28  ;;  %v4900_v33 = vpop.f32.mrb[251].mxu0  ;;  %v5924_v34 = vpop.f32.mrb[251].mxu1 }
 0x4f6   : > { %v10619_v36 = vpack.c.bf16 %v6186_v30, %v6186_v30  ;;  %v10875_v37 = vpack.c.bf16 %v6442_v31, %v6442_v31  ;;  %v6187_v38 = vmax.f32 %v4899_v29, 0.0  ;;  %v6443_v39 = vmax.f32 %v5923_v32, 0.0 }
 0x4f8   : > { %8747 = vst.msk [vmem:[%s11953_s18 + $0x3f0] sm:$0xf] %vm8494_vm3, %v10619_v36  ;;  %9003 = vst.msk [vmem:[%s11953_s18 + $0x7f0] sm:$0xf] %vm8494_vm3, %v10875_v37  ;;  %v10620_v40 = vpack.c.bf16 %v6187_v38, %v6187_v38  ;;  %v10876_v41 = vpack.c.bf16 %v6443_v39, %v6443_v39 }
 0x4f9   : > { %v4903_v42 = vpop.f32.mrb[252].mxu0  ;;  %v5927_v43 = vpop.f32.mrb[252].mxu1 }
 0x4fa   : > { %8748 = vst.msk [vmem:[%s11953_s18 + $0x3f4] sm:$0xf] %vm8494_vm3, %v10620_v40  ;;  %9004 = vst.msk [vmem:[%s11953_s18 + $0x7f4] sm:$0xf] %vm8494_vm3, %v10876_v41  ;;  %v4904_v44 = vadd.f32 %v13974_v35, %v4903_v42  ;;  %v5928_v45 = vadd.f32 %v13974_v35, %v5927_v43  ;;  %v4905_v46 = vpop.f32.mrb[253].mxu0  ;;  %v5929_v47 = vpop.f32.mrb[253].mxu1 }
 0x4fb   : > { %v4906_v48 = vpop.f32.mrb[254].mxu0  ;;  %v5930_v49 = vpop.f32.mrb[254].mxu1 }
 0x4fc   : > { %v6188_v50 = vmax.f32 %v4904_v44, 0.0  ;;  %v6444_v51 = vmax.f32 %v5928_v45, 0.0  ;;  %v4907_v52 = vadd.f32 %v13974_v35, %v4906_v48  ;;  %v5931_v53 = vadd.f32 %v13974_v35, %v5930_v49  ;;  %v4908_v54 = vpop.f32.mrb[255].mxu0  ;;  %v5932_v55 = vpop.f32.mrb[255].mxu1 }
 0x4fe   : > { %v10621_v56 = vpack.c.bf16 %v6188_v50, %v6188_v50  ;;  %v10877_v57 = vpack.c.bf16 %v6444_v51, %v6444_v51  ;;  %v6189_v58 = vmax.f32 %v4907_v52, 0.0  ;;  %v6445_v59 = vmax.f32 %v5931_v53, 0.0 }
 0x500   : > { %8749 = vst.msk [vmem:[%s11953_s18 + $0x3f8] sm:$0xf] %vm8494_vm3, %v10621_v56  ;;  %9005 = vst.msk [vmem:[%s11953_s18 + $0x7f8] sm:$0xf] %vm8494_vm3, %v10877_v57  ;;  %v10622_v60 = vpack.c.bf16 %v6189_v58, %v6189_v58  ;;  %v10878_v62 = vpack.c.bf16 %v6445_v59, %v6445_v59 }
 0x502   : > { %8750 = vst.msk [vmem:[%s11953_s18 + $0x3fc] sm:$0xf] %vm8494_vm3, %v10622_v60  ;;  %9006 = vst.msk [vmem:[%s11953_s18 + $0x7fc] sm:$0xf] %vm8494_vm3, %v10878_v62 }
 0x503 PF: > { %s13_s12 = sadd.s32 1, %s11700_s12  }
 0x504   : > { %p10_p4 = scmp.ge.s32.totalorder %s13_s12, 4  }
 0x506   :  { %12 = sbr.rel (!%p10_p4) target bundleno = 1 (0x1), region = 62 }

</bundles_post_ra>
